<compile_context>
chip_gen: v7x
topology: tpu7x:2x2x1
jax: 0.10.0
libtpu: 0.0.40
codegen_flags: <defaults>
</compile_context>

<pallas_src>
import functools
import math
import warnings

import jax
import jax.numpy as jnp
from jax.experimental import pallas as pl
from jax.experimental.pallas import tpu as pltpu


def _gelu_exact(x):
    # nn.GELU() default = exact erf formulation (f32 VALU polynomial).
    return 0.5 * x * (1.0 + jax.lax.erf(x * (1.0 / math.sqrt(2.0))))


def _gelu_tanh(x):
    # tanh-approximate GELU: transcendental goes to the EUP slot instead of a
    # long erf polynomial on the 4-wide VALU (the saturated slot at
    # hidden~2048 on v6e/v7x).  Max deviation from exact erf GELU ~1e-3.
    return jax.nn.gelu(x, approximate=True)


def sdpn_head_kernel(x_ref, w1_ref, b1_ref, w2_ref, b2_ref, w3_ref, b3_ref,
                     o_ref, *, gelu):
    # In-kernel f32 -> bf16 cast of the activation tile (hidden under the MXU;
    # avoids an extra wrapper-side cast pass over x in HBM).
    x = x_ref[...].astype(w1_ref.dtype)

    # Layer 1: bf16 MXU matmul, f32 accumulate, f32 bias + GELU.
    h = jnp.dot(x, w1_ref[...], preferred_element_type=jnp.float32)
    h = gelu(h + b1_ref[...])

    # Layer 2.
    h = jnp.dot(h.astype(w2_ref.dtype), w2_ref[...],
                preferred_element_type=jnp.float32)
    h = gelu(h + b2_ref[...])

    # Layer 3: bottleneck projection.
    y = jnp.dot(h.astype(w3_ref.dtype), w3_ref[...],
                preferred_element_type=jnp.float32)
    y = y + b3_ref[...]

    # F.normalize(dim=-1, p=2, eps=1e-12):
    #   y / max(||y||, 1e-12)  ==  y * rsqrt(max(sum(y^2), 1e-24))
    sumsq = jnp.sum(y * y, axis=-1, keepdims=True)
    inv = jax.lax.rsqrt(jnp.maximum(sumsq, 1e-24))        # EUP rsqrt
    o_ref[...] = (y * inv).astype(o_ref.dtype)


def _vmem_budget_bytes():
    """Generation-dependent scoped-VMEM limit (per TensorCore)."""
    try:
        cap = int(pltpu.get_tpu_info().vmem_capacity_bytes)
    except Exception:
        cap = 64 * 1024 * 1024                 # conservative default
    if cap >= 100 * 1024 * 1024:               # v5e / v6e: 128 MiB physical
        return 100 * 1024 * 1024
    return 48 * 1024 * 1024                    # v7x: 64 MiB per TC


def _pick_tile_m(n, requested, in_dim, hidden, bottleneck, weight_bytes,
                 budget, x_item, out_item):
    """Largest power-of-two-shrunk tile_m that divides n and fits the budget."""
    tm = min(requested, n)

    def fits(t):
        act = 2 * t * in_dim * x_item            # x double-buffer (f32 in)
        act += 2 * t * bottleneck * out_item     # out double-buffer
        act += 4 * t * hidden * 4                # f32 matmul / GELU temporaries
        return weight_bytes + act <= int(budget * 0.9)

    while tm > 8 and (n % tm != 0 or not fits(tm)):
        tm //= 2
    assert n % tm == 0, "batch must be divisible by a power-of-two row tile"
    return tm


def sdpn_head(x, params, *, tile_m=256, compute_dtype=jnp.bfloat16,
              out_dtype=None, gelu_approximate=True,
              single_buffer_weights=True):
    """x: [N, in_dim]; params: dict of transposed weights / biases."""
    w1 = params["w1"].astype(compute_dtype)    # no-op: stored bf16 at init
    w2 = params["w2"].astype(compute_dtype)
    w3 = params["w3"].astype(compute_dtype)
    b1 = params["b1"].astype(jnp.float32)
    b2 = params["b2"].astype(jnp.float32)
    b3 = params["b3"].astype(jnp.float32)

    n, in_dim = x.shape
    hidden = w1.shape[1]
    bottleneck = w3.shape[1]
    out_dtype = x.dtype if out_dtype is None else out_dtype
    x_item = jnp.dtype(x.dtype).itemsize
    out_item = jnp.dtype(out_dtype).itemsize

    weight_bytes = sum(int(a.size) * a.dtype.itemsize
                       for a in (w1, b1, w2, b2, w3, b3))
    budget = _vmem_budget_bytes()

    # Budget assuming single-resident weights (Buffered(1)); re-budgeted
    # below if that request is rejected.
    tm = _pick_tile_m(n, tile_m, in_dim, hidden, bottleneck,
                      weight_bytes, budget, x_item, out_item)

    gelu = _gelu_tanh if gelu_approximate else _gelu_exact
    kernel = functools.partial(sdpn_head_kernel, gelu=gelu)

    # Advisory cost estimate for the XLA scheduler.
    flops = 2 * n * (in_dim * hidden + hidden * hidden + hidden * bottleneck)
    transcendentals = n * (2 * hidden + 1)      # 2x GELU tanh + rsqrt per row
    bytes_accessed = int(x.size * x_item + weight_bytes
                         + n * bottleneck * out_item)

    def build(tm, weight_pipeline_mode):
        grid = (n // tm,)

        def const_spec(shape):
            # Same block for every grid step (constant index map).
            return pl.BlockSpec(shape, lambda i: (0, 0),
                                pipeline_mode=weight_pipeline_mode)

        return pl.pallas_call(
            kernel,
            out_shape=jax.ShapeDtypeStruct((n, bottleneck), out_dtype),
            grid_spec=pltpu.PrefetchScalarGridSpec(
                num_scalar_prefetch=0,
                grid=grid,
                in_specs=[
                    pl.BlockSpec((tm, in_dim), lambda i: (i, 0)),  # x (f32)
                    const_spec((in_dim, hidden)),                  # W1
                    const_spec((1, hidden)),                       # b1
                    const_spec((hidden, hidden)),                  # W2
                    const_spec((1, hidden)),                       # b2
                    const_spec((hidden, bottleneck)),              # W3
                    const_spec((1, bottleneck)),                   # b3
                ],
                out_specs=pl.BlockSpec((tm, bottleneck), lambda i: (i, 0)),
            ),
            compiler_params=pltpu.CompilerParams(
                dimension_semantics=("parallel",),    # batch axis -> megacore
                vmem_limit_bytes=budget),
            cost_estimate=pl.CostEstimate(
                flops=flops,
                transcendentals=transcendentals,
                bytes_accessed=bytes_accessed),
        )

    args = (x, w1, b1, w2, b2, w3, b3)
    if single_buffer_weights:
        try:
            # Constant-index weights don't need double-buffering.
            return build(tm, pl.Buffered(1))(*args)
        except Exception as e:
            # Surface the fallback (it changes the VMEM footprint) and
            # re-budget tile_m assuming double-buffered weights.
            warnings.warn(
                "pl.Buffered(1) weight pipelining rejected "
                f"({type(e).__name__}: {e}); falling back to default "
                "double-buffered weights with re-budgeted tile_m.")
            tm = _pick_tile_m(n, tm, in_dim, hidden, bottleneck,
                              2 * weight_bytes, budget, x_item, out_item)
    return build(tm, None)(*args)


def init_params(key, in_dim, hidden_dim, bottleneck_dim,
                weight_dtype=jnp.bfloat16):
    """Deterministic init mirroring trunc_normal_(std=0.02), zero biases.

    Weights are stored transposed: [in_features, out_features]."""
    k1, k2, k3 = jax.random.split(key, 3)

    def trunc(k, shape):
        # truncated normal on [-2, 2] scaled by std=0.02 (matches trunc_normal_)
        return (jax.random.truncated_normal(k, -2.0, 2.0, shape, jnp.float32)
                * 0.02).astype(weight_dtype)

    return {
        "w1": trunc(k1, (in_dim, hidden_dim)),
        "b1": jnp.zeros((1, hidden_dim), jnp.float32),
        "w2": trunc(k2, (hidden_dim, hidden_dim)),
        "b2": jnp.zeros((1, hidden_dim), jnp.float32),
        "w3": trunc(k3, (hidden_dim, bottleneck_dim)),
        "b3": jnp.zeros((1, bottleneck_dim), jnp.float32),
    }


def sdpn_head_ref(x, params):
    """Pure-JAX f32 reference (exact-erf GELU, matching nn.GELU())."""
    w1 = params["w1"].astype(jnp.float32)
    w2 = params["w2"].astype(jnp.float32)
    w3 = params["w3"].astype(jnp.float32)
    x = x.astype(jnp.float32)
    h = _gelu_exact(x @ w1 + params["b1"])
    h = _gelu_exact(h @ w2 + params["b2"])
    y = h @ w3 + params["b3"]
    norm = jnp.sqrt(jnp.sum(y * y, axis=-1, keepdims=True))
    return y / jnp.maximum(norm, 1e-12)


if __name__ == "__main__":
    # Small but lane-dense shapes consistent with the module
    # (nlayers=3, use_bn=False); all feature dims are multiples of 256 so the
    # MXU contraction dim is full-width on v6e/v7x.  Real SDPN dims
    # (in_dim~768..2048, hidden=2048, bottleneck=256) already satisfy this.
    batch, in_dim, hidden_dim, bottleneck_dim = 256, 256, 256, 256

    key = jax.random.PRNGKey(0)
    kx, kp = jax.random.split(key)
    x = jax.random.normal(kx, (batch, in_dim), jnp.float32)
    params = init_params(kp, in_dim, hidden_dim, bottleneck_dim)

    out = sdpn_head(x, params)
    out = jax.block_until_ready(out)

    ref = sdpn_head_ref(x, params)
    assert out.shape == (batch, bottleneck_dim)
    out_f32 = out.astype(jnp.float32)
    max_err = float(jnp.max(jnp.abs(out_f32 - ref)))
    # bf16 MXU inputs + tanh-approx GELU vs exact-erf f32 reference.
    assert jnp.allclose(out_f32, ref, atol=2e-2, rtol=2e-2), (
        f"mismatch vs reference, max abs err = {max_err}")

    print("KERNEL_OK")
</pallas_src>

<mosaic_0001>
module attributes {stable_mosaic.version = 11 : i64} {
  func.func @sdpn_head_kernel(%arg0: i32, %arg1: memref<256x256xf32, #tpu.memory_space<vmem>>, %arg2: memref<256x256xbf16, #tpu.memory_space<vmem>>, %arg3: memref<1x256xf32, #tpu.memory_space<vmem>>, %arg4: memref<256x256xbf16, #tpu.memory_space<vmem>>, %arg5: memref<1x256xf32, #tpu.memory_space<vmem>>, %arg6: memref<256x256xbf16, #tpu.memory_space<vmem>>, %arg7: memref<1x256xf32, #tpu.memory_space<vmem>>, %arg8: memref<256x256xf32, #tpu.memory_space<vmem>>) attributes {dimension_semantics = [#tpu.dimension_semantics<parallel>], iteration_bounds = array<i64: 1>, scalar_prefetch = 0 : i64, scratch_operands = 0 : i64, tpu.core_type = #tpu.core_type<tc>, window_params = [{transform_indices = @transform_0, window_bounds = array<i64: 256, 256>}, {pipeline_mode = #tpu.pipeline_mode<synchronous>, transform_indices = @transform_1, window_bounds = array<i64: 256, 256>}, {pipeline_mode = #tpu.pipeline_mode<synchronous>, transform_indices = @transform_2, window_bounds = array<i64: 1, 256>}, {pipeline_mode = #tpu.pipeline_mode<synchronous>, transform_indices = @transform_3, window_bounds = array<i64: 256, 256>}, {pipeline_mode = #tpu.pipeline_mode<synchronous>, transform_indices = @transform_4, window_bounds = array<i64: 1, 256>}, {pipeline_mode = #tpu.pipeline_mode<synchronous>, transform_indices = @transform_5, window_bounds = array<i64: 256, 256>}, {pipeline_mode = #tpu.pipeline_mode<synchronous>, transform_indices = @transform_6, window_bounds = array<i64: 1, 256>}, {transform_indices = @transform_7, window_bounds = array<i64: 256, 256>}]} {
    %c0 = arith.constant 0 : index
    %c0_0 = arith.constant 0 : index
    %0 = vector.load %arg1[%c0, %c0_0] : memref<256x256xf32, #tpu.memory_space<vmem>>, vector<256x256xf32>
    %1 = arith.truncf %0 : vector<256x256xf32> to vector<256x256xbf16>
    %c0_1 = arith.constant 0 : index
    %c0_2 = arith.constant 0 : index
    %2 = vector.load %arg2[%c0_1, %c0_2] : memref<256x256xbf16, #tpu.memory_space<vmem>>, vector<256x256xbf16>
    %cst = arith.constant dense<0.000000e+00> : vector<256x256xf32>
    %3 = tpu.matmul %1, %2, %cst {dimension_numbers = #tpu.dot_dimension_numbers<[1], [0], [0], [1], [0, 0, 1, 1], [], []>} : vector<256x256xbf16>, vector<256x256xbf16>, vector<256x256xf32> -> vector<256x256xf32>
    %c0_3 = arith.constant 0 : index
    %c0_4 = arith.constant 0 : index
    %4 = vector.load %arg3[%c0_3, %c0_4] : memref<1x256xf32, #tpu.memory_space<vmem>>, vector<1x256xf32>
    %5 = vector.broadcast %4 : vector<1x256xf32> to vector<256x256xf32>
    %6 = arith.addf %3, %5 : vector<256x256xf32>
    %7 = arith.mulf %6, %6 : vector<256x256xf32>
    %8 = arith.mulf %6, %7 : vector<256x256xf32>
    %cst_5 = arith.constant 4.471500e-02 : f32
    %9 = vector.broadcast %cst_5 : f32 to vector<256x256xf32>
    %10 = arith.mulf %9, %8 : vector<256x256xf32>
    %11 = arith.addf %6, %10 : vector<256x256xf32>
    %cst_6 = arith.constant 0.797884583 : f32
    %12 = vector.broadcast %cst_6 : f32 to vector<256x256xf32>
    %13 = arith.mulf %12, %11 : vector<256x256xf32>
    %14 = math.tanh %13 : vector<256x256xf32>
    %cst_7 = arith.constant 1.000000e+00 : f32
    %15 = vector.broadcast %cst_7 : f32 to vector<256x256xf32>
    %16 = arith.addf %15, %14 : vector<256x256xf32>
    %cst_8 = arith.constant 5.000000e-01 : f32
    %17 = vector.broadcast %cst_8 : f32 to vector<256x256xf32>
    %18 = arith.mulf %17, %16 : vector<256x256xf32>
    %19 = arith.mulf %6, %18 : vector<256x256xf32>
    %20 = arith.truncf %19 : vector<256x256xf32> to vector<256x256xbf16>
    %c0_9 = arith.constant 0 : index
    %c0_10 = arith.constant 0 : index
    %21 = vector.load %arg4[%c0_9, %c0_10] : memref<256x256xbf16, #tpu.memory_space<vmem>>, vector<256x256xbf16>
    %cst_11 = arith.constant dense<0.000000e+00> : vector<256x256xf32>
    %22 = tpu.matmul %20, %21, %cst_11 {dimension_numbers = #tpu.dot_dimension_numbers<[1], [0], [0], [1], [0, 0, 1, 1], [], []>} : vector<256x256xbf16>, vector<256x256xbf16>, vector<256x256xf32> -> vector<256x256xf32>
    %c0_12 = arith.constant 0 : index
    %c0_13 = arith.constant 0 : index
    %23 = vector.load %arg5[%c0_12, %c0_13] : memref<1x256xf32, #tpu.memory_space<vmem>>, vector<1x256xf32>
    %24 = vector.broadcast %23 : vector<1x256xf32> to vector<256x256xf32>
    %25 = arith.addf %22, %24 : vector<256x256xf32>
    %26 = arith.mulf %25, %25 : vector<256x256xf32>
    %27 = arith.mulf %25, %26 : vector<256x256xf32>
    %cst_14 = arith.constant 4.471500e-02 : f32
    %28 = vector.broadcast %cst_14 : f32 to vector<256x256xf32>
    %29 = arith.mulf %28, %27 : vector<256x256xf32>
    %30 = arith.addf %25, %29 : vector<256x256xf32>
    %cst_15 = arith.constant 0.797884583 : f32
    %31 = vector.broadcast %cst_15 : f32 to vector<256x256xf32>
    %32 = arith.mulf %31, %30 : vector<256x256xf32>
    %33 = math.tanh %32 : vector<256x256xf32>
    %cst_16 = arith.constant 1.000000e+00 : f32
    %34 = vector.broadcast %cst_16 : f32 to vector<256x256xf32>
    %35 = arith.addf %34, %33 : vector<256x256xf32>
    %cst_17 = arith.constant 5.000000e-01 : f32
    %36 = vector.broadcast %cst_17 : f32 to vector<256x256xf32>
    %37 = arith.mulf %36, %35 : vector<256x256xf32>
    %38 = arith.mulf %25, %37 : vector<256x256xf32>
    %39 = arith.truncf %38 : vector<256x256xf32> to vector<256x256xbf16>
    %c0_18 = arith.constant 0 : index
    %c0_19 = arith.constant 0 : index
    %40 = vector.load %arg6[%c0_18, %c0_19] : memref<256x256xbf16, #tpu.memory_space<vmem>>, vector<256x256xbf16>
    %cst_20 = arith.constant dense<0.000000e+00> : vector<256x256xf32>
    %41 = tpu.matmul %39, %40, %cst_20 {dimension_numbers = #tpu.dot_dimension_numbers<[1], [0], [0], [1], [0, 0, 1, 1], [], []>} : vector<256x256xbf16>, vector<256x256xbf16>, vector<256x256xf32> -> vector<256x256xf32>
    %c0_21 = arith.constant 0 : index
    %c0_22 = arith.constant 0 : index
    %42 = vector.load %arg7[%c0_21, %c0_22] : memref<1x256xf32, #tpu.memory_space<vmem>>, vector<1x256xf32>
    %43 = vector.broadcast %42 : vector<1x256xf32> to vector<256x256xf32>
    %44 = arith.addf %41, %43 : vector<256x256xf32>
    %45 = arith.mulf %44, %44 : vector<256x256xf32>
    %cst_23 = arith.constant dense<0.000000e+00> : vector<256xf32>
    %46 = vector.multi_reduction <add>, %45, %cst_23 [1] : vector<256x256xf32> to vector<256xf32>
    %47 = vector.shape_cast %46 : vector<256xf32> to vector<256x1xf32>
    %cst_24 = arith.constant 1.000000e-24 : f32
    %48 = vector.broadcast %cst_24 : f32 to vector<256x1xf32>
    %49 = arith.maximumf %47, %48 : vector<256x1xf32>
    %50 = math.rsqrt %49 : vector<256x1xf32>
    %51 = vector.broadcast %50 : vector<256x1xf32> to vector<256x256xf32>
    %52 = arith.mulf %44, %51 : vector<256x256xf32>
    %c0_25 = arith.constant 0 : index
    %c0_26 = arith.constant 0 : index
    %53 = vector.load %arg8[%c0_25, %c0_26] : memref<256x256xf32, #tpu.memory_space<vmem>>, vector<256x256xf32>
    tpu.vector_store %arg8[%c0_25, %c0_26], %52 {strides = array<i32>} : memref<256x256xf32, #tpu.memory_space<vmem>>, vector<256x256xf32>,
    return
  }
  func.func @transform_0(%arg0: i32) -> (i32, i32) {
    %c0_i32 = arith.constant 0 : i32
    %c0_i32_0 = arith.constant 0 : i32
    return %arg0, %c0_i32 : i32, i32
  }
  func.func @transform_1(%arg0: i32) -> (i32, i32) {
    %c0_i32 = arith.constant 0 : i32
    %c0_i32_0 = arith.constant 0 : i32
    %c0_i32_1 = arith.constant 0 : i32
    return %c0_i32, %c0_i32_0 : i32, i32
  }
  func.func @transform_2(%arg0: i32) -> (i32, i32) {
    %c0_i32 = arith.constant 0 : i32
    %c0_i32_0 = arith.constant 0 : i32
    %c0_i32_1 = arith.constant 0 : i32
    return %c0_i32, %c0_i32_0 : i32, i32
  }
  func.func @transform_3(%arg0: i32) -> (i32, i32) {
    %c0_i32 = arith.constant 0 : i32
    %c0_i32_0 = arith.constant 0 : i32
    %c0_i32_1 = arith.constant 0 : i32
    return %c0_i32, %c0_i32_0 : i32, i32
  }
  func.func @transform_4(%arg0: i32) -> (i32, i32) {
    %c0_i32 = arith.constant 0 : i32
    %c0_i32_0 = arith.constant 0 : i32
    %c0_i32_1 = arith.constant 0 : i32
    return %c0_i32, %c0_i32_0 : i32, i32
  }
  func.func @transform_5(%arg0: i32) -> (i32, i32) {
    %c0_i32 = arith.constant 0 : i32
    %c0_i32_0 = arith.constant 0 : i32
    %c0_i32_1 = arith.constant 0 : i32
    return %c0_i32, %c0_i32_0 : i32, i32
  }
  func.func @transform_6(%arg0: i32) -> (i32, i32) {
    %c0_i32 = arith.constant 0 : i32
    %c0_i32_0 = arith.constant 0 : i32
    %c0_i32_1 = arith.constant 0 : i32
    return %c0_i32, %c0_i32_0 : i32, i32
  }
  func.func @transform_7(%arg0: i32) -> (i32, i32) {
    %c0_i32 = arith.constant 0 : i32
    %c0_i32_0 = arith.constant 0 : i32
    return %arg0, %c0_i32 : i32, i32
  }
}

module attributes {stable_mosaic.version = 11 : i64} {
  func.func @sdpn_head_kernel(%arg0: i32, %arg1: memref<256x256xf32, #tpu.memory_space<vmem>>, %arg2: memref<256x256xbf16, #tpu.memory_space<vmem>>, %arg3: memref<1x256xf32, #tpu.memory_space<vmem>>, %arg4: memref<256x256xbf16, #tpu.memory_space<vmem>>, %arg5: memref<1x256xf32, #tpu.memory_space<vmem>>, %arg6: memref<256x256xbf16, #tpu.memory_space<vmem>>, %arg7: memref<1x256xf32, #tpu.memory_space<vmem>>, %arg8: memref<256x256xf32, #tpu.memory_space<vmem>>) attributes {dimension_semantics = [#tpu.dimension_semantics<parallel>], iteration_bounds = array<i64: 1>, scalar_prefetch = 0 : i64, scratch_operands = 0 : i64, tpu.core_type = #tpu.core_type<tc>, window_params = [{transform_indices = @transform_0, window_bounds = array<i64: 256, 256>}, {pipeline_mode = #tpu.pipeline_mode<synchronous>, transform_indices = @transform_1, window_bounds = array<i64: 256, 256>}, {pipeline_mode = #tpu.pipeline_mode<synchronous>, transform_indices = @transform_2, window_bounds = array<i64: 1, 256>}, {pipeline_mode = #tpu.pipeline_mode<synchronous>, transform_indices = @transform_3, window_bounds = array<i64: 256, 256>}, {pipeline_mode = #tpu.pipeline_mode<synchronous>, transform_indices = @transform_4, window_bounds = array<i64: 1, 256>}, {pipeline_mode = #tpu.pipeline_mode<synchronous>, transform_indices = @transform_5, window_bounds = array<i64: 256, 256>}, {pipeline_mode = #tpu.pipeline_mode<synchronous>, transform_indices = @transform_6, window_bounds = array<i64: 1, 256>}, {transform_indices = @transform_7, window_bounds = array<i64: 256, 256>}]} {
    %c0 = arith.constant 0 : index
    %c0_0 = arith.constant 0 : index
    %0 = vector.load %arg1[%c0, %c0_0] : memref<256x256xf32, #tpu.memory_space<vmem>>, vector<256x256xf32>
    %1 = arith.truncf %0 : vector<256x256xf32> to vector<256x256xbf16>
    %c0_1 = arith.constant 0 : index
    %c0_2 = arith.constant 0 : index
    %2 = vector.load %arg2[%c0_1, %c0_2] : memref<256x256xbf16, #tpu.memory_space<vmem>>, vector<256x256xbf16>
    %cst = arith.constant dense<0.000000e+00> : vector<256x256xf32>
    %3 = tpu.matmul %1, %2, %cst {dimension_numbers = #tpu.dot_dimension_numbers<[1], [0], [0], [1], [0, 0, 1, 1], [], []>} : vector<256x256xbf16>, vector<256x256xbf16>, vector<256x256xf32> -> vector<256x256xf32>
    %c0_3 = arith.constant 0 : index
    %c0_4 = arith.constant 0 : index
    %4 = vector.load %arg3[%c0_3, %c0_4] : memref<1x256xf32, #tpu.memory_space<vmem>>, vector<1x256xf32>
    %5 = vector.broadcast %4 : vector<1x256xf32> to vector<256x256xf32>
    %6 = arith.addf %3, %5 : vector<256x256xf32>
    %7 = arith.mulf %6, %6 : vector<256x256xf32>
    %8 = arith.mulf %6, %7 : vector<256x256xf32>
    %cst_5 = arith.constant 4.471500e-02 : f32
    %9 = vector.broadcast %cst_5 : f32 to vector<256x256xf32>
    %10 = arith.mulf %9, %8 : vector<256x256xf32>
    %11 = arith.addf %6, %10 : vector<256x256xf32>
    %cst_6 = arith.constant 0.797884583 : f32
    %12 = vector.broadcast %cst_6 : f32 to vector<256x256xf32>
    %13 = arith.mulf %12, %11 : vector<256x256xf32>
    %14 = math.tanh %13 : vector<256x256xf32>
    %cst_7 = arith.constant 1.000000e+00 : f32
    %15 = vector.broadcast %cst_7 : f32 to vector<256x256xf32>
    %16 = arith.addf %15, %14 : vector<256x256xf32>
    %cst_8 = arith.constant 5.000000e-01 : f32
    %17 = vector.broadcast %cst_8 : f32 to vector<256x256xf32>
    %18 = arith.mulf %17, %16 : vector<256x256xf32>
    %19 = arith.mulf %6, %18 : vector<256x256xf32>
    %20 = arith.truncf %19 : vector<256x256xf32> to vector<256x256xbf16>
    %c0_9 = arith.constant 0 : index
    %c0_10 = arith.constant 0 : index
    %21 = vector.load %arg4[%c0_9, %c0_10] : memref<256x256xbf16, #tpu.memory_space<vmem>>, vector<256x256xbf16>
    %cst_11 = arith.constant dense<0.000000e+00> : vector<256x256xf32>
    %22 = tpu.matmul %20, %21, %cst_11 {dimension_numbers = #tpu.dot_dimension_numbers<[1], [0], [0], [1], [0, 0, 1, 1], [], []>} : vector<256x256xbf16>, vector<256x256xbf16>, vector<256x256xf32> -> vector<256x256xf32>
    %c0_12 = arith.constant 0 : index
    %c0_13 = arith.constant 0 : index
    %23 = vector.load %arg5[%c0_12, %c0_13] : memref<1x256xf32, #tpu.memory_space<vmem>>, vector<1x256xf32>
    %24 = vector.broadcast %23 : vector<1x256xf32> to vector<256x256xf32>
    %25 = arith.addf %22, %24 : vector<256x256xf32>
    %26 = arith.mulf %25, %25 : vector<256x256xf32>
    %27 = arith.mulf %25, %26 : vector<256x256xf32>
    %cst_14 = arith.constant 4.471500e-02 : f32
    %28 = vector.broadcast %cst_14 : f32 to vector<256x256xf32>
    %29 = arith.mulf %28, %27 : vector<256x256xf32>
    %30 = arith.addf %25, %29 : vector<256x256xf32>
    %cst_15 = arith.constant 0.797884583 : f32
    %31 = vector.broadcast %cst_15 : f32 to vector<256x256xf32>
    %32 = arith.mulf %31, %30 : vector<256x256xf32>
    %33 = math.tanh %32 : vector<256x256xf32>
    %cst_16 = arith.constant 1.000000e+00 : f32
    %34 = vector.broadcast %cst_16 : f32 to vector<256x256xf32>
    %35 = arith.addf %34, %33 : vector<256x256xf32>
    %cst_17 = arith.constant 5.000000e-01 : f32
    %36 = vector.broadcast %cst_17 : f32 to vector<256x256xf32>
    %37 = arith.mulf %36, %35 : vector<256x256xf32>
    %38 = arith.mulf %25, %37 : vector<256x256xf32>
    %39 = arith.truncf %38 : vector<256x256xf32> to vector<256x256xbf16>
    %c0_18 = arith.constant 0 : index
    %c0_19 = arith.constant 0 : index
    %40 = vector.load %arg6[%c0_18, %c0_19] : memref<256x256xbf16, #tpu.memory_space<vmem>>, vector<256x256xbf16>
    %cst_20 = arith.constant dense<0.000000e+00> : vector<256x256xf32>
    %41 = tpu.matmul %39, %40, %cst_20 {dimension_numbers = #tpu.dot_dimension_numbers<[1], [0], [0], [1], [0, 0, 1, 1], [], []>} : vector<256x256xbf16>, vector<256x256xbf16>, vector<256x256xf32> -> vector<256x256xf32>
    %c0_21 = arith.constant 0 : index
    %c0_22 = arith.constant 0 : index
    %42 = vector.load %arg7[%c0_21, %c0_22] : memref<1x256xf32, #tpu.memory_space<vmem>>, vector<1x256xf32>
    %43 = vector.broadcast %42 : vector<1x256xf32> to vector<256x256xf32>
    %44 = arith.addf %41, %43 : vector<256x256xf32>
    %45 = arith.mulf %44, %44 : vector<256x256xf32>
    %cst_23 = arith.constant dense<0.000000e+00> : vector<256xf32>
    %46 = vector.multi_reduction <add>, %45, %cst_23 [1] : vector<256x256xf32> to vector<256xf32>
    %47 = vector.shape_cast %46 : vector<256xf32> to vector<256x1xf32>
    %cst_24 = arith.constant 1.000000e-24 : f32
    %48 = vector.broadcast %cst_24 : f32 to vector<256x1xf32>
    %49 = arith.maximumf %47, %48 : vector<256x1xf32>
    %50 = math.rsqrt %49 : vector<256x1xf32>
    %51 = vector.broadcast %50 : vector<256x1xf32> to vector<256x256xf32>
    %52 = arith.mulf %44, %51 : vector<256x256xf32>
    %c0_25 = arith.constant 0 : index
    %c0_26 = arith.constant 0 : index
    %53 = vector.load %arg8[%c0_25, %c0_26] : memref<256x256xf32, #tpu.memory_space<vmem>>, vector<256x256xf32>
    tpu.vector_store %arg8[%c0_25, %c0_26], %52 {strides = array<i32>} : memref<256x256xf32, #tpu.memory_space<vmem>>, vector<256x256xf32>,
    return
  }
  func.func @transform_0(%arg0: i32) -> (i32, i32) {
    %c0_i32 = arith.constant 0 : i32
    %c0_i32_0 = arith.constant 0 : i32
    return %arg0, %c0_i32 : i32, i32
  }
  func.func @transform_1(%arg0: i32) -> (i32, i32) {
    %c0_i32 = arith.constant 0 : i32
    %c0_i32_0 = arith.constant 0 : i32
    %c0_i32_1 = arith.constant 0 : i32
    return %c0_i32, %c0_i32_0 : i32, i32
  }
  func.func @transform_2(%arg0: i32) -> (i32, i32) {
    %c0_i32 = arith.constant 0 : i32
    %c0_i32_0 = arith.constant 0 : i32
    %c0_i32_1 = arith.constant 0 : i32
    return %c0_i32, %c0_i32_0 : i32, i32
  }
  func.func @transform_3(%arg0: i32) -> (i32, i32) {
    %c0_i32 = arith.constant 0 : i32
    %c0_i32_0 = arith.constant 0 : i32
    %c0_i32_1 = arith.constant 0 : i32
    return %c0_i32, %c0_i32_0 : i32, i32
  }
  func.func @transform_4(%arg0: i32) -> (i32, i32) {
    %c0_i32 = arith.constant 0 : i32
    %c0_i32_0 = arith.constant 0 : i32
    %c0_i32_1 = arith.constant 0 : i32
    return %c0_i32, %c0_i32_0 : i32, i32
  }
  func.func @transform_5(%arg0: i32) -> (i32, i32) {
    %c0_i32 = arith.constant 0 : i32
    %c0_i32_0 = arith.constant 0 : i32
    %c0_i32_1 = arith.constant 0 : i32
    return %c0_i32, %c0_i32_0 : i32, i32
  }
  func.func @transform_6(%arg0: i32) -> (i32, i32) {
    %c0_i32 = arith.constant 0 : i32
    %c0_i32_0 = arith.constant 0 : i32
    %c0_i32_1 = arith.constant 0 : i32
    return %c0_i32, %c0_i32_0 : i32, i32
  }
  func.func @transform_7(%arg0: i32) -> (i32, i32) {
    %c0_i32 = arith.constant 0 : i32
    %c0_i32_0 = arith.constant 0 : i32
    return %arg0, %c0_i32 : i32, i32
  }
}

</mosaic_0001>

<bundles_post_ra>
// kernel: tpu_custom_call.1
= control target key start
LH: loop header
LB: loop body
LE: loop exit
PB: predicated region body
PF: predicated region fallthrough
CT: control target
= control target key end

     0   :  { %12 = vsyncpa [#allocation3], 0  ;;  %s5650_s0 = inlined_call_operand.hbm [shape: f32[256,256], index: 0, kind: input, shape index: {}]   ;;  %s5651_s1 = inlined_call_operand.hbm [shape: bf16[256,256], index: 1, kind: input, shape index: {}]   ;;  %s5652_s2 = inlined_call_operand.vmem [shape: f32[1,256], index: 2, kind: input, shape index: {}]   ;;  %s5653_s3 = inlined_call_operand.hbm [shape: bf16[256,256], index: 3, kind: input, shape index: {}]   ;;  %s5654_s4 = inlined_call_operand.vmem [shape: f32[1,256], index: 4, kind: input, shape index: {}]   ;;  %s5655_s5 = inlined_call_operand.hbm [shape: bf16[256,256], index: 5, kind: input, shape index: {}]   ;;  %s5656_s6 = inlined_call_operand.vmem [shape: f32[1,256], index: 6, kind: input, shape index: {}]   ;;  %s5657_s7 = inlined_call_operand.hbm [shape: f32[256,256], index: 7, kind: output, shape index: {}]  }
   0x1   :  { %13 = vsyncpa [#allocation6], 0 }
   0x2   :  { %14 = vsyncpa [#allocation9], 0 }
   0x3   :  { %15 = vsyncpa [#allocation4], 0  ;;  %s3675_s24 = smov [#allocation5]   ;;  %s3557_s28 = scalar_lea.hbm %s5651_s1, 4096 }
   0x4   :  { %s33_s25 = sshll.u32 %s3675_s24, 4  ;;  %p3558_p0 = scmp.ne.s32.totalorder %s5651_s1, %s3557_s28  ;;  %s34_s25 = int_to_ptr.vmem [resolvable:$true] %s33_s25 }
   0x5   :  { %p3561_p1 = scmp.lt.u32.totalorder %s3557_s28, %s5651_s1 }
   0x7   :  { %p3563_p2 = pnand %p3561_p1, %p3558_p0 }
   0x9   :  { %3566 = shalt.err (!%p3563_p2)
}
   0xa   :  { %s3567_s10 = scalar_lea.vmem %s34_s25, 4096  ;;  %p3572_p4 = scmp.lt.s32.totalorder %s34_s25, %s34_s25 }
   0xb   :  { %p3568_p3 = scmp.ne.s32.totalorder %s34_s25, %s3567_s10  ;;  %p3573_p5 = scmp.lt.s32.totalorder %s3567_s10, %s3567_s10 }
   0xd   :  { %p3574_p6 = por %p3573_p5, %p3572_p4 }
   0xf   :  { %p3575_p7 = pnand %p3574_p6, %p3568_p3 }
  0x11   :  { %3578 = shalt.err (!%p3575_p7)
}
  0x12   :  { %s3676_s11 = smov 128   ;;  %s3677_s12 = smov 8  }
  0x13   :  { %39 = dma.hbm_to_vmem [thread:$0]  %s5651_s1, 4096, %s34_s25, [#allocation6], %s3676_s11, %s3676_s11, %s3677_s12  }
  0x14   :  { %s3678_s15 = smov [#allocation2]   ;;  %s3579_s19 = scalar_lea.hbm %s5650_s0, 8192 }
  0x15   :  { %s21_s16 = sshll.u32 %s3678_s15, 4  ;;  %p3580_p8 = scmp.ne.s32.totalorder %s5650_s0, %s3579_s19  ;;  %s22_s16 = int_to_ptr.vmem [resolvable:$true] %s21_s16 }
  0x16   :  { %p3583_p9 = scmp.lt.u32.totalorder %s3579_s19, %s5650_s0 }
  0x18   :  { %p3585_p10 = pnand %p3583_p9, %p3580_p8 }
  0x1a   :  { %3588 = shalt.err (!%p3585_p10)
}
  0x1b   :  { %s3589_s24 = scalar_lea.vmem %s22_s16, 8192  ;;  %p3594_p12 = scmp.lt.s32.totalorder %s22_s16, %s22_s16 }
  0x1c   :  { %p3590_p11 = scmp.ne.s32.totalorder %s22_s16, %s3589_s24  ;;  %p3595_p13 = scmp.lt.s32.totalorder %s3589_s24, %s3589_s24 }
  0x1e   :  { %p3596_p0 = por %p3595_p13, %p3594_p12 }
  0x20   :  { %p3597_p1 = pnand %p3596_p0, %p3590_p11 }
  0x22   :  { %3600 = shalt.err (!%p3597_p1)
}
  0x23   :  { %s3679_s1 = smov 256   ;;  %s3680_s25 = smov 16  }
  0x24   :  { %27 = dma.hbm_to_vmem [thread:$0]  %s5650_s0, 8192, %s22_s16, [#allocation3], %s3679_s1, %s3679_s1, %s3680_s25  }
  0x25   :  { %s3681_s28 = smov [#allocation7]   ;;  %s3682_s30 = smov [#allocation8]  }
  0x26   :  { %s47_s29 = sshll.u32 %s3681_s28, 4  ;;  %s61_s8 = sshll.u32 %s3682_s30, 4  ;;  %s48_s29 = int_to_ptr.vmem [resolvable:$true] %s47_s29  ;;  %s3754_s8 = int_to_ptr.vmem [resolvable:$true] %s61_s8 }
  0x27   :  { %s3601_s13 = scalar_lea.hbm %s5653_s3, 4096 }
  0x28   :  { %p3602_p2 = scmp.ne.s32.totalorder %s5653_s3, %s3601_s13  ;;  %p3605_p3 = scmp.lt.u32.totalorder %s3601_s13, %s5653_s3 }
  0x2a   :  { %p3607_p4 = pnand %p3605_p3, %p3602_p2 }
  0x2c   :  { %3610 = shalt.err (!%p3607_p4)
}
  0x2d   :  { %s3611_s0 = scalar_lea.vmem %s48_s29, 4096  ;;  %p3616_p6 = scmp.lt.s32.totalorder %s48_s29, %s48_s29 }
  0x2e   :  { %p3612_p5 = scmp.ne.s32.totalorder %s48_s29, %s3611_s0  ;;  %p3617_p7 = scmp.lt.s32.totalorder %s3611_s0, %s3611_s0 }
  0x30   :  { %p3618_p8 = por %p3617_p7, %p3616_p6 }
  0x32   :  { %p3619_p9 = pnand %p3618_p8, %p3612_p5 }
  0x34   :  { %3622 = shalt.err (!%p3619_p9)
}
  0x35   :  { %53 = dma.hbm_to_vmem [thread:$0]  %s5653_s3, 4096, %s48_s29, [#allocation6], %s3676_s11, %s3676_s11, %s3677_s12  }
  0x36   :  { %s3623_s22 = scalar_lea.hbm %s5655_s5, 4096 }
  0x37   :  { %p3624_p10 = scmp.ne.s32.totalorder %s5655_s5, %s3623_s22  ;;  %p3627_p11 = scmp.lt.u32.totalorder %s3623_s22, %s5655_s5 }
  0x39   :  { %p3629_p12 = pnand %p3627_p11, %p3624_p10 }
  0x3b   :  { %3632 = shalt.err (!%p3629_p12)
}
  0x3c   :  { %s3633_s28 = scalar_lea.vmem %s3754_s8, 4096  ;;  %p3638_p0 = scmp.lt.s32.totalorder %s3754_s8, %s3754_s8 }
  0x3d   :  { %p3634_p13 = scmp.ne.s32.totalorder %s3754_s8, %s3633_s28  ;;  %p3639_p1 = scmp.lt.s32.totalorder %s3633_s28, %s3633_s28 }
  0x3f   :  { %p3640_p2 = por %p3639_p1, %p3638_p0 }
  0x41   :  { %p3641_p3 = pnand %p3640_p2, %p3634_p13 }
  0x43   :  { %3644 = shalt.err (!%p3641_p3)
}
  0x44   :  { %67 = dma.hbm_to_vmem [thread:$0]  %s5655_s5, 4096, %s3754_s8, [#allocation9], %s3676_s11, %s3676_s11, %s3677_s12  }
  0x45   :  { %3667 = dma.done.wait [#allocation3], 8192  }
  0x46   :  { %3668 = vsyncadd [#allocation3], 4294959104 }
  0x47   :  { %3669 = dma.done.wait [#allocation6], 8192  }
  0x48   :  { %3670 = vsyncadd [#allocation6], 4294959104 }
  0x49   :  { %3671 = dma.done.wait [#allocation9], 4096  }
  0x4a   :  { %3672 = vsyncadd [#allocation9], 4294963200  ;;  %v3093_v0 = vld [vmem:[#allocation5 + $0x4] ss:$8 sps:$4 sm:$0xff]   ;;  %v3095_v1 = vld [vmem:[#allocation5] ss:$8 sps:$4 sm:$0xff]  }
  0x4b   :  { %382 = vmatprep.subr.bf16.mxu0 %v3093_v0  ;;  %v3096_v2 = vld [vmem:[#allocation5 + $0x14] ss:$8 sps:$4 sm:$0xff]   ;;  %3052 = vmatprep.subr.bf16.mxu1 %v3093_v0  ;;  %v3098_v3 = vld [vmem:[#allocation5 + $0x10] ss:$8 sps:$4 sm:$0xff]   ;;  %v3099_v4 = vld [vmem:[#allocation5 + $0x24] ss:$8 sps:$4 sm:$0xff]  }
  0x4c   :  { %383 = vmatpush1.bf16.msra.mxu0 %v3095_v1  ;;  %3068 = vmatpush1.bf16.msra.mxu1 %v3095_v1  ;;  %v3101_v5 = vld [vmem:[#allocation5 + $0x20] ss:$8 sps:$4 sm:$0xff]   ;;  %v3102_v6 = vld [vmem:[#allocation5 + $0x34] ss:$8 sps:$4 sm:$0xff]   ;;  %v3104_v7 = vld [vmem:[#allocation5 + $0x30] ss:$8 sps:$4 sm:$0xff]  }
  0x4d   :  { %384 = vmatprep.subr.bf16.mxu0 %v3096_v2  ;;  %3053 = vmatprep.subr.bf16.mxu1 %v3096_v2  ;;  %v3105_v8 = vld [vmem:[#allocation5 + $0x44] ss:$8 sps:$4 sm:$0xff]   ;;  %v3107_v9 = vld [vmem:[#allocation5 + $0x40] ss:$8 sps:$4 sm:$0xff]   ;;  %v3108_v10 = vld [vmem:[#allocation5 + $0x54] ss:$8 sps:$4 sm:$0xff]  }
  0x4e   :  { %v3110_v11 = vld [vmem:[#allocation5 + $0x50] ss:$8 sps:$4 sm:$0xff]   ;;  %v3111_v12 = vld [vmem:[#allocation5 + $0x64] ss:$8 sps:$4 sm:$0xff]   ;;  %v3113_v16 = vld [vmem:[#allocation5 + $0x60] ss:$8 sps:$4 sm:$0xff]  }
  0x4f   :  { %v83_v13 = vld [vmem:[#allocation2 + $0x8] sm:$0xff]  ;;  %v85_v14 = vld [vmem:[#allocation2 + $0x18] sm:$0xff]  ;;  %v82_v38 = vld [vmem:[#allocation2] sm:$0xff] }
  0x50   :  { %385 = vmatpush1.bf16.msra.mxu0 %v3098_v3  ;;  %3069 = vmatpush1.bf16.msra.mxu1 %v3098_v3  ;;  %v147_v15 = vpack.c.bf16 %v85_v14, %v83_v13  ;;  %v3114_v17 = vld [vmem:[#allocation5 + $0x74] ss:$8 sps:$4 sm:$0xff]   ;;  %v3116_v18 = vld [vmem:[#allocation5 + $0x70] ss:$8 sps:$4 sm:$0xff]   ;;  %v3117_v19 = vld [vmem:[#allocation5 + $0x84] ss:$8 sps:$4 sm:$0xff]  }
  0x51   :  { %386 = vmatprep.subr.bf16.mxu0 %v3099_v4  ;;  %3054 = vmatprep.subr.bf16.mxu1 %v3099_v4  ;;  %v115_v20 = vld [vmem:[#allocation2 + $0x108] sm:$0xff]  ;;  %v117_v21 = vld [vmem:[#allocation2 + $0x118] sm:$0xff]  ;;  %v84_v39 = vld [vmem:[#allocation2 + $0x10] sm:$0xff] }
  0x52   :  { %414 = vmatprep.mubr.bf16.mxu0 %v147_v15  ;;  %v163_v22 = vpack.c.bf16 %v117_v21, %v115_v20  ;;  %v3119_v23 = vld [vmem:[#allocation5 + $0x80] ss:$8 sps:$4 sm:$0xff]   ;;  %v3120_v24 = vld [vmem:[#allocation5 + $0x94] ss:$8 sps:$4 sm:$0xff]   ;;  %v3122_v25 = vld [vmem:[#allocation5 + $0x90] ss:$8 sps:$4 sm:$0xff]   ;;  %v146_v47 = vpack.c.bf16 %v84_v39, %v82_v38 }
  0x53   :  { %v3123_v26 = vld [vmem:[#allocation5 + $0xa4] ss:$8 sps:$4 sm:$0xff]   ;;  %v3125_v27 = vld [vmem:[#allocation5 + $0xa0] ss:$8 sps:$4 sm:$0xff]   ;;  %v3126_v28 = vld [vmem:[#allocation5 + $0xb4] ss:$8 sps:$4 sm:$0xff]  }
  0x54   :  { %387 = vmatpush1.bf16.msra.mxu0 %v3101_v5  ;;  %3070 = vmatpush1.bf16.msra.mxu1 %v3101_v5  ;;  %v3128_v29 = vld [vmem:[#allocation5 + $0xb0] ss:$8 sps:$4 sm:$0xff]   ;;  %v3129_v30 = vld [vmem:[#allocation5 + $0xc4] ss:$8 sps:$4 sm:$0xff]   ;;  %v3131_v31 = vld [vmem:[#allocation5 + $0xc0] ss:$8 sps:$4 sm:$0xff]  }
  0x55   :  { %388 = vmatprep.subr.bf16.mxu0 %v3102_v6  ;;  %3055 = vmatprep.subr.bf16.mxu1 %v3102_v6  ;;  %v3132_v32 = vld [vmem:[#allocation5 + $0xd4] ss:$8 sps:$4 sm:$0xff]   ;;  %v3134_v33 = vld [vmem:[#allocation5 + $0xd0] ss:$8 sps:$4 sm:$0xff]   ;;  %v3135_v34 = vld [vmem:[#allocation5 + $0xe4] ss:$8 sps:$4 sm:$0xff]  }
  0x56   :  { %494 = vmatprep.mubr.bf16.mxu1 %v163_v22  ;;  %v3137_v35 = vld [vmem:[#allocation5 + $0xe0] ss:$8 sps:$4 sm:$0xff]   ;;  %v3138_v36 = vld [vmem:[#allocation5 + $0xf4] ss:$8 sps:$4 sm:$0xff]   ;;  %v3140_v37 = vld [vmem:[#allocation5 + $0xf0] ss:$8 sps:$4 sm:$0xff]  }
  0x57   :  { %v114_v40 = vld [vmem:[#allocation2 + $0x100] sm:$0xff]  ;;  %v116_v41 = vld [vmem:[#allocation2 + $0x110] sm:$0xff]  ;;  %v87_v42 = vld [vmem:[#allocation2 + $0x28] sm:$0xff] }
  0x58   :  { %389 = vmatpush1.bf16.msra.mxu0 %v3104_v7  ;;  %3071 = vmatpush1.bf16.msra.mxu1 %v3104_v7  ;;  %v89_v43 = vld [vmem:[#allocation2 + $0x38] sm:$0xff]  ;;  %v119_v44 = vld [vmem:[#allocation2 + $0x128] sm:$0xff]  ;;  %v162_v48 = vpack.c.bf16 %v116_v41, %v114_v40  ;;  %v86_v53 = vld [vmem:[#allocation2 + $0x20] sm:$0xff] }
  0x59   :  { %390 = vmatprep.subr.bf16.mxu0 %v3105_v8  ;;  %3056 = vmatprep.subr.bf16.mxu1 %v3105_v8  ;;  %v121_v45 = vld [vmem:[#allocation2 + $0x138] sm:$0xff]  ;;  %v3143_v46 = vld [vmem:[#allocation7 + $0x4] ss:$8 sps:$4 sm:$0xff]   ;;  %v3141_v49 = vld [vmem:[#allocation7] ss:$8 sps:$4 sm:$0xff]   ;;  %v149_v50 = vpack.c.bf16 %v89_v43, %v87_v42 }
  0x5a   :  { %v165_v51 = vpack.c.bf16 %v121_v45, %v119_v44  ;;  %v3146_v52 = vld [vmem:[#allocation7 + $0x14] ss:$8 sps:$4 sm:$0xff]   ;;  %v118_v55 = vld [vmem:[#allocation2 + $0x120] sm:$0xff]  ;;  %v91_v57 = vld [vmem:[#allocation2 + $0x48] sm:$0xff] }
  0x5b   :  { %v88_v54 = vld [vmem:[#allocation2 + $0x30] sm:$0xff]  ;;  %v93_v58 = vld [vmem:[#allocation2 + $0x58] sm:$0xff]  ;;  %v123_v59 = vld [vmem:[#allocation2 + $0x148] sm:$0xff] }
  0x5c   :  { %391 = vmatpush1.bf16.msra.mxu0 %v3107_v9  ;;  %3072 = vmatpush1.bf16.msra.mxu1 %v3107_v9  ;;  %v120_v56 = vld [vmem:[#allocation2 + $0x130] sm:$0xff]  ;;  %v125_v60 = vld [vmem:[#allocation2 + $0x158] sm:$0xff]  ;;  %v3149_v62 = vld [vmem:[#allocation7 + $0x24] ss:$8 sps:$4 sm:$0xff]   ;;  %v148_v63 = vpack.c.bf16 %v88_v54, %v86_v53  ;;  %v151_v1 = vpack.c.bf16 %v93_v58, %v91_v57 }
  0x5d   :  { %392 = vmatprep.subr.bf16.mxu0 %v3108_v10  ;;  %3057 = vmatprep.subr.bf16.mxu1 %v3108_v10  ;;  %v3144_v61 = vld [vmem:[#allocation7 + $0x10] ss:$8 sps:$4 sm:$0xff]   ;;  %v164_v0 = vpack.c.bf16 %v120_v56, %v118_v55  ;;  %v167_v2 = vpack.c.bf16 %v125_v60, %v123_v59  ;;  %v3147_v3 = vld [vmem:[#allocation7 + $0x20] ss:$8 sps:$4 sm:$0xff]   ;;  %v3152_v4 = vld [vmem:[#allocation7 + $0x34] ss:$8 sps:$4 sm:$0xff]  }
  0x5e   :  { %v90_v5 = vld [vmem:[#allocation2 + $0x40] sm:$0xff]  ;;  %v92_v6 = vld [vmem:[#allocation2 + $0x50] sm:$0xff]  ;;  %v95_v7 = vld [vmem:[#allocation2 + $0x68] sm:$0xff] }
  0x5f   :  { %v97_v8 = vld [vmem:[#allocation2 + $0x78] sm:$0xff]  ;;  %v122_v9 = vld [vmem:[#allocation2 + $0x140] sm:$0xff]  ;;  %v124_v10 = vld [vmem:[#allocation2 + $0x150] sm:$0xff]  ;;  %v150_v15 = vpack.c.bf16 %v92_v6, %v90_v5 }
  0x60   :  { %393 = vmatpush1.bf16.msra.mxu0 %v3110_v11  ;;  %3073 = vmatpush1.bf16.msra.mxu1 %v3110_v11  ;;  %v127_v11 = vld [vmem:[#allocation2 + $0x168] sm:$0xff]  ;;  %v3150_v13 = vld [vmem:[#allocation7 + $0x30] ss:$8 sps:$4 sm:$0xff]   ;;  %v3158_v20 = vld [vmem:[#allocation7 + $0x54] ss:$8 sps:$4 sm:$0xff]  }
  0x61   :  { %394 = vmatprep.subr.bf16.mxu0 %v3111_v12  ;;  %3058 = vmatprep.subr.bf16.mxu1 %v3111_v12  ;;  %v129_v12 = vld [vmem:[#allocation2 + $0x178] sm:$0xff]  ;;  %v3155_v14 = vld [vmem:[#allocation7 + $0x44] ss:$8 sps:$4 sm:$0xff]   ;;  %v96_v22 = vld [vmem:[#allocation2 + $0x70] sm:$0xff] }
  0x62   :  { %v94_v21 = vld [vmem:[#allocation2 + $0x60] sm:$0xff]  ;;  %v100_v38 = vld [vmem:[#allocation2 + $0x90] sm:$0xff]  ;;  %v103_v39 = vld [vmem:[#allocation2 + $0xa8] sm:$0xff] }
  0x63   :  { %v105_v40 = vld [vmem:[#allocation2 + $0xb8] sm:$0xff]  ;;  %v130_v41 = vld [vmem:[#allocation2 + $0x180] sm:$0xff]  ;;  %v132_v42 = vld [vmem:[#allocation2 + $0x190] sm:$0xff] }
  0x64   :  { %395 = vmatpush1.bf16.msra.mxu0 %v3113_v16  ;;  %3074 = vmatpush1.bf16.msra.mxu1 %v3113_v16  ;;  %v166_v16 = vpack.c.bf16 %v124_v10, %v122_v9  ;;  %v135_v43 = vld [vmem:[#allocation2 + $0x1a8] sm:$0xff]  ;;  %v137_v44 = vld [vmem:[#allocation2 + $0x1b8] sm:$0xff]  ;;  %v134_v53 = vld [vmem:[#allocation2 + $0x1a0] sm:$0xff] }
  0x65   :  { %396 = vmatprep.subr.bf16.mxu0 %v3114_v17  ;;  %3059 = vmatprep.subr.bf16.mxu1 %v3114_v17  ;;  %v153_v17 = vpack.c.bf16 %v97_v8, %v95_v7  ;;  %v3162_v45 = vld [vmem:[#allocation7 + $0x70] ss:$8 sps:$4 sm:$0xff]   ;;  %v139_v56 = vld [vmem:[#allocation2 + $0x1c8] sm:$0xff]  ;;  %v110_v10 = vld [vmem:[#allocation2 + $0xe0] sm:$0xff] }
  0x66   :  { %v136_v54 = vld [vmem:[#allocation2 + $0x1b0] sm:$0xff]  ;;  %v109_v55 = vld [vmem:[#allocation2 + $0xd8] sm:$0xff] }
  0x67   :  { %v141_v57 = vld [vmem:[#allocation2 + $0x1d8] sm:$0xff]  ;;  %v172_v59 = vpack.c.bf16 %v136_v54, %v134_v53 }
  0x68   :  { %397 = vmatpush1.bf16.msra.mxu0 %v3116_v18  ;;  %3075 = vmatpush1.bf16.msra.mxu1 %v3116_v18  ;;  %v169_v18 = vpack.c.bf16 %v129_v12, %v127_v11  ;;  %v145_v5 = vld [vmem:[#allocation2 + $0x1f8] sm:$0xff]  ;;  %v112_v11 = vld [vmem:[#allocation2 + $0xf0] sm:$0xff]  ;;  %v142_v12 = vld [vmem:[#allocation2 + $0x1e0] sm:$0xff] }
  0x69   :  { %398 = vmatprep.subr.bf16.mxu0 %v3117_v19  ;;  %3060 = vmatprep.subr.bf16.mxu1 %v3117_v19  ;;  %v3153_v19 = vld [vmem:[#allocation7 + $0x40] ss:$8 sps:$4 sm:$0xff]  }
  0x6c   :  { %399 = vmatpush1.bf16.msra.mxu0 %v3119_v23  ;;  %3076 = vmatpush1.bf16.msra.mxu1 %v3119_v23  ;;  %v99_v23 = vld [vmem:[#allocation2 + $0x88] sm:$0xff] }
  0x6d   :  { %400 = vmatprep.subr.bf16.mxu0 %v3120_v24  ;;  %3061 = vmatprep.subr.bf16.mxu1 %v3120_v24  ;;  %v101_v24 = vld [vmem:[#allocation2 + $0x98] sm:$0xff] }
  0x70   :  { %401 = vmatpush1.bf16.msra.mxu0 %v3122_v25  ;;  %3077 = vmatpush1.bf16.msra.mxu1 %v3122_v25  ;;  %v126_v25 = vld [vmem:[#allocation2 + $0x160] sm:$0xff] }
  0x71   :  { %402 = vmatprep.subr.bf16.mxu0 %v3123_v26  ;;  %3062 = vmatprep.subr.bf16.mxu1 %v3123_v26  ;;  %v128_v26 = vld [vmem:[#allocation2 + $0x170] sm:$0xff] }
  0x74   :  { %403 = vmatpush1.bf16.msra.mxu0 %v3125_v27  ;;  %3078 = vmatpush1.bf16.msra.mxu1 %v3125_v27  ;;  %v131_v27 = vld [vmem:[#allocation2 + $0x188] sm:$0xff] }
  0x75   :  { %404 = vmatprep.subr.bf16.mxu0 %v3126_v28  ;;  %3063 = vmatprep.subr.bf16.mxu1 %v3126_v28  ;;  %v133_v28 = vld [vmem:[#allocation2 + $0x198] sm:$0xff] }
  0x78   :  { %405 = vmatpush1.bf16.msra.mxu0 %v3128_v29  ;;  %3079 = vmatpush1.bf16.msra.mxu1 %v3128_v29  ;;  %v3156_v29 = vld [vmem:[#allocation7 + $0x50] ss:$8 sps:$4 sm:$0xff]  }
  0x79   :  { %406 = vmatprep.subr.bf16.mxu0 %v3129_v30  ;;  %3064 = vmatprep.subr.bf16.mxu1 %v3129_v30  ;;  %v3161_v30 = vld [vmem:[#allocation7 + $0x64] ss:$8 sps:$4 sm:$0xff]  }
  0x7c   :  { %407 = vmatpush1.bf16.msra.mxu0 %v3131_v31  ;;  %3080 = vmatpush1.bf16.msra.mxu1 %v3131_v31  ;;  %v152_v31 = vpack.c.bf16 %v96_v22, %v94_v21  ;;  %v3171_v21 = vld [vmem:[#allocation7 + $0xa0] ss:$8 sps:$4 sm:$0xff]   ;;  %v3176_v22 = vld [vmem:[#allocation7 + $0xb4] ss:$8 sps:$4 sm:$0xff]  }
  0x7d   :  { %408 = vmatprep.subr.bf16.mxu0 %v3132_v32  ;;  %3065 = vmatprep.subr.bf16.mxu1 %v3132_v32  ;;  %v168_v32 = vpack.c.bf16 %v128_v26, %v126_v25  ;;  %v3177_v25 = vld [vmem:[#allocation7 + $0xc0] ss:$8 sps:$4 sm:$0xff]   ;;  %v3182_v26 = vld [vmem:[#allocation7 + $0xd4] ss:$8 sps:$4 sm:$0xff]  }
  0x80   :  { %409 = vmatpush1.bf16.msra.mxu0 %v3134_v33  ;;  %3081 = vmatpush1.bf16.msra.mxu1 %v3134_v33  ;;  %v155_v33 = vpack.c.bf16 %v101_v24, %v99_v23  ;;  %v3174_v23 = vld [vmem:[#allocation7 + $0xb0] ss:$8 sps:$4 sm:$0xff]   ;;  %v3179_v24 = vld [vmem:[#allocation7 + $0xc4] ss:$8 sps:$4 sm:$0xff]  }
  0x81   :  { %410 = vmatprep.subr.bf16.mxu0 %v3135_v34  ;;  %3066 = vmatprep.subr.bf16.mxu1 %v3135_v34  ;;  %v171_v34 = vpack.c.bf16 %v133_v28, %v131_v27  ;;  %v3180_v27 = vld [vmem:[#allocation7 + $0xd0] ss:$8 sps:$4 sm:$0xff]   ;;  %v3185_v28 = vld [vmem:[#allocation7 + $0xe4] ss:$8 sps:$4 sm:$0xff]  }
  0x84   :  { %411 = vmatpush1.bf16.msra.mxu0 %v3137_v35  ;;  %3082 = vmatpush1.bf16.msra.mxu1 %v3137_v35  ;;  %v3159_v35 = vld [vmem:[#allocation7 + $0x60] ss:$8 sps:$4 sm:$0xff]  }
  0x85   :  { %412 = vmatprep.subr.bf16.mxu0 %v3138_v36  ;;  %3067 = vmatprep.subr.bf16.mxu1 %v3138_v36  ;;  %v3164_v36 = vld [vmem:[#allocation7 + $0x74] ss:$8 sps:$4 sm:$0xff]  }
  0x88   :  { %413 = vmatpush1.bf16.msra.mxu0 %v3140_v37  ;;  %3083 = vmatpush1.bf16.msra.mxu1 %v3140_v37  ;;  %v98_v37 = vld [vmem:[#allocation2 + $0x80] sm:$0xff] }
  0x89   :  { %1387 = vmatprep.subr.bf16.mxu1 %v3143_v46  ;;  %v154_v46 = vpack.c.bf16 %v100_v38, %v98_v37 }
  0x8b   :  { %415 = vmatmul.mubr.bf16.vlgmr.msra.gmra.mrb[0].mxu0 %v146_v47  ;;  %495 = vmatmul.mubr.bf16.vlgmr.msra.gmra.mrb[0].mxu1 %v162_v48  ;;  %v170_v47 = vpack.c.bf16 %v132_v42, %v130_v41  ;;  %v157_v48 = vpack.c.bf16 %v105_v40, %v103_v39 }
  0x8c   :  { %424 = vmatprep.mubr.bf16.mxu0 %v149_v50  ;;  %504 = vmatprep.mubr.bf16.mxu1 %v165_v51  ;;  %v102_v50 = vld [vmem:[#allocation2 + $0xa0] sm:$0xff]  ;;  %v104_v51 = vld [vmem:[#allocation2 + $0xb0] sm:$0xff] }
  0x8d   :  { %1388 = vmatpush1.bf16.msra.mxu1 %v3141_v49  ;;  %v173_v49 = vpack.c.bf16 %v137_v44, %v135_v43  ;;  %v156_v58 = vpack.c.bf16 %v104_v51, %v102_v50 }
  0x8e   :  { %1389 = vmatprep.subr.bf16.mxu1 %v3146_v52  ;;  %v107_v52 = vld [vmem:[#allocation2 + $0xc8] sm:$0xff] }
  0x8f   :  { %v159_v60 = vpack.c.bf16 %v109_v55, %v107_v52 }
  0x91   :  { %1390 = vmatpush1.bf16.msra.mxu1 %v3144_v61  ;;  %v175_v61 = vpack.c.bf16 %v141_v57, %v139_v56 }
  0x92   :  { %1391 = vmatprep.subr.bf16.mxu1 %v3149_v62  ;;  %v106_v62 = vld [vmem:[#allocation2 + $0xc0] sm:$0xff] }
  0x93   :  { %425 = vmatmul.mubr.bf16.gmra.mrb[4].mxu0 %v148_v63  ;;  %505 = vmatmul.mubr.bf16.gmra.mrb[4].mxu1 %v164_v0  ;;  %v108_v63 = vld [vmem:[#allocation2 + $0xd0] sm:$0xff]  ;;  %v111_v0 = vld [vmem:[#allocation2 + $0xe8] sm:$0xff] }
  0x94   :  { %434 = vmatprep.mubr.bf16.mxu0 %v151_v1  ;;  %514 = vmatprep.mubr.bf16.mxu1 %v167_v2  ;;  %v138_v1 = vld [vmem:[#allocation2 + $0x1c0] sm:$0xff]  ;;  %v140_v2 = vld [vmem:[#allocation2 + $0x1d0] sm:$0xff]  ;;  %v158_v6 = vpack.c.bf16 %v108_v63, %v106_v62 }
  0x95   :  { %1392 = vmatpush1.bf16.msra.mxu1 %v3147_v3  ;;  %v113_v3 = vld [vmem:[#allocation2 + $0xf8] sm:$0xff]  ;;  %v174_v7 = vpack.c.bf16 %v140_v2, %v138_v1 }
  0x96   :  { %1393 = vmatprep.subr.bf16.mxu1 %v3152_v4  ;;  %v143_v4 = vld [vmem:[#allocation2 + $0x1e8] sm:$0xff]  ;;  %v161_v8 = vpack.c.bf16 %v113_v3, %v111_v0 }
  0x97   :  { %v177_v9 = vpack.c.bf16 %v145_v5, %v143_v4 }
  0x99   :  { %1394 = vmatpush1.bf16.msra.mxu1 %v3150_v13  ;;  %v144_v13 = vld [vmem:[#allocation2 + $0x1f0] sm:$0xff] }
  0x9a   :  { %1395 = vmatprep.subr.bf16.mxu1 %v3155_v14  ;;  %v160_v14 = vpack.c.bf16 %v112_v11, %v110_v10 }
  0x9b   :  { %435 = vmatmul.mubr.bf16.gmra.mrb[8].mxu0 %v150_v15  ;;  %515 = vmatmul.mubr.bf16.gmra.mrb[8].mxu1 %v166_v16  ;;  %v176_v15 = vpack.c.bf16 %v144_v13, %v142_v12  ;;  %v3167_v16 = vld [vmem:[#allocation7 + $0x84] ss:$8 sps:$4 sm:$0xff]  }
  0x9c   :  { %444 = vmatprep.mubr.bf16.mxu0 %v153_v17  ;;  %524 = vmatprep.mubr.bf16.mxu1 %v169_v18  ;;  %v3165_v17 = vld [vmem:[#allocation7 + $0x80] ss:$8 sps:$4 sm:$0xff]   ;;  %v3170_v18 = vld [vmem:[#allocation7 + $0x94] ss:$8 sps:$4 sm:$0xff]  }
  0x9d   :  { %1396 = vmatpush1.bf16.msra.mxu1 %v3153_v19  ;;  %v3168_v19 = vld [vmem:[#allocation7 + $0x90] ss:$8 sps:$4 sm:$0xff]  }
  0x9e   :  { %1397 = vmatprep.subr.bf16.mxu1 %v3158_v20  ;;  %v3173_v20 = vld [vmem:[#allocation7 + $0xa4] ss:$8 sps:$4 sm:$0xff]  }
  0xa1   :  { %1398 = vmatpush1.bf16.msra.mxu1 %v3156_v29  ;;  %v3183_v29 = vld [vmem:[#allocation7 + $0xe0] ss:$8 sps:$4 sm:$0xff]  }
  0xa2   :  { %1399 = vmatprep.subr.bf16.mxu1 %v3161_v30  ;;  %v3188_v30 = vld [vmem:[#allocation7 + $0xf4] ss:$8 sps:$4 sm:$0xff]  }
  0xa3   :  { %445 = vmatmul.mubr.bf16.gmra.mrb[12].mxu0 %v152_v31  ;;  %525 = vmatmul.mubr.bf16.gmra.mrb[12].mxu1 %v168_v32  ;;  %v3186_v31 = vld [vmem:[#allocation7 + $0xf0] ss:$8 sps:$4 sm:$0xff]   ;;  %v212_v32 = vlaneseq }
  0xa4   :  { %454 = vmatprep.mubr.bf16.mxu0 %v155_v33  ;;  %534 = vmatprep.mubr.bf16.mxu1 %v171_v34 }
  0xa5   :  { %1400 = vmatpush1.bf16.msra.mxu1 %v3159_v35  ;;  %v213_v33 = vshrl.u32 %v212_v32, 7  ;;  %v210_v35 = vld [vmem:[%s5652_s2] sm:$0x3] }
  0xa6   :  { %1401 = vmatprep.subr.bf16.mxu1 %v3164_v36 }
  0xa7   :  { %v3791_v34 = vsub.s32 0, %v213_v33  ;;  %v3796_v36 = vsub.s32 1, %v213_v33 }
  0xa9   :  { %1402 = vmatpush1.bf16.msra.mxu1 %v3162_v45  ;;  %5686 = vst [vmem:[#allocation15_spill] sm:$0xff] %v3791_v34  ;;  %5687 = vst [vmem:[#allocation16_spill] sm:$0xff] %v3796_v36  ;;  %v3799_v37 = vrot.slane %v210_v35, %v3791_v34  ;;  %v3802_v38 = vrot.slane %v210_v35, %v3796_v36 }
  0xaa   :  { %1403 = vmatprep.subr.bf16.mxu1 %v3167_v16 }
  0xab   :  { %455 = vmatmul.mubr.bf16.gmra.mrb[16].mxu0 %v154_v46  ;;  %535 = vmatmul.mubr.bf16.gmra.mrb[16].mxu1 %v170_v47 }
  0xac   :  { %464 = vmatprep.mubr.bf16.mxu0 %v157_v48  ;;  %544 = vmatprep.mubr.bf16.mxu1 %v173_v49 }
  0xad   :  { %1404 = vmatpush1.bf16.msra.mxu1 %v3165_v17 }
  0xae   :  { %1405 = vmatprep.subr.bf16.mxu1 %v3170_v18 }
  0xb1   :  { %1406 = vmatpush1.bf16.msra.mxu1 %v3168_v19 }
  0xb2   :  { %1407 = vmatprep.subr.bf16.mxu1 %v3173_v20 }
  0xb3   :  { %465 = vmatmul.mubr.bf16.gmra.mrb[20].mxu0 %v156_v58  ;;  %545 = vmatmul.mubr.bf16.gmra.mrb[20].mxu1 %v172_v59 }
  0xb4   :  { %474 = vmatprep.mubr.bf16.mxu0 %v159_v60  ;;  %554 = vmatprep.mubr.bf16.mxu1 %v175_v61 }
  0xb5   :  { %1408 = vmatpush1.bf16.msra.mxu1 %v3171_v21 }
  0xb6   :  { %1409 = vmatprep.subr.bf16.mxu1 %v3176_v22 }
  0xb9   :  { %1410 = vmatpush1.bf16.msra.mxu1 %v3174_v23 }
  0xba   :  { %1411 = vmatprep.subr.bf16.mxu1 %v3179_v24 }
  0xbb   :  { %475 = vmatmul.mubr.bf16.gmra.mrb[24].mxu0 %v158_v6  ;;  %555 = vmatmul.mubr.bf16.gmra.mrb[24].mxu1 %v174_v7 }
  0xbc   :  { %484 = vmatprep.mubr.bf16.mxu0 %v161_v8  ;;  %564 = vmatprep.mubr.bf16.mxu1 %v177_v9 }
  0xbd   :  { %1412 = vmatpush1.bf16.msra.mxu1 %v3177_v25 }
  0xbe   :  { %1413 = vmatprep.subr.bf16.mxu1 %v3182_v26 }
  0xc1   :  { %1414 = vmatpush1.bf16.msra.mxu1 %v3180_v27 }
  0xc2   :  { %1415 = vmatprep.subr.bf16.mxu1 %v3185_v28 }
  0xc3   :  { %485 = vmatmul.mubr.bf16.gmra.mrb[28].mxu0 %v160_v14  ;;  %565 = vmatmul.mubr.bf16.gmra.mrb[28].mxu1 %v176_v15 }
  0xc5   :  { %1416 = vmatpush1.bf16.msra.mxu1 %v3183_v29 }
  0xc6   :  { %1417 = vmatprep.subr.bf16.mxu1 %v3188_v30 }
  0xc9   :  { %1418 = vmatpush1.bf16.msra.mxu1 %v3186_v31 }
 0x15e   :  { %v416_v39 = vpop.f32.mrb[0].mxu0  ;;  %v496_v40 = vpop.f32.mrb[0].mxu1 }
 0x15f   :  { %v3805_v41 = vadd.f32 %v416_v39, %v3799_v37  ;;  %v418_v42 = vpop.f32.mrb[1].mxu0  ;;  %v3808_v43 = vadd.f32 %v496_v40, %v3799_v37  ;;  %v498_v44 = vpop.f32.mrb[1].mxu1 }
 0x160   :  { %v3811_v45 = vadd.f32 %v418_v42, %v3802_v38  ;;  %v420_v46 = vpop.f32.mrb[2].mxu0  ;;  %v3814_v47 = vadd.f32 %v498_v44, %v3802_v38  ;;  %v500_v48 = vpop.f32.mrb[2].mxu1 }
 0x161   :  { %5688 = vst [vmem:[#allocation17_spill] sm:$0xff] %v3808_v43  ;;  %v575_v49 = vmul.f32 %v3805_v41, %v3805_v41  ;;  %v3819_v50 = vadd.f32 %v420_v46, %v3799_v37  ;;  %v422_v51 = vpop.f32.mrb[3].mxu0  ;;  %v607_v52 = vmul.f32 %v3808_v43, %v3808_v43  ;;  %v3824_v53 = vadd.f32 %v500_v48, %v3799_v37  ;;  %v502_v54 = vpop.f32.mrb[3].mxu1 }
 0x162   :  { %5689 = vst [vmem:[#allocation18_spill] sm:$0xff] %v3814_v47  ;;  %v576_v55 = vmul.f32 %v3811_v45, %v3811_v45  ;;  %v3829_v56 = vadd.f32 %v422_v51, %v3802_v38  ;;  %v608_v57 = vmul.f32 %v3814_v47, %v3814_v47  ;;  %v3834_v58 = vadd.f32 %v502_v54, %v3802_v38 }
 0x163   :  { %5690 = vst [vmem:[#allocation19_spill] sm:$0xff] %v3824_v53  ;;  %v639_v59 = vmul.f32 %v575_v49, %v3805_v41  ;;  %v577_v60 = vmul.f32 %v3819_v50, %v3819_v50  ;;  %v671_v61 = vmul.f32 %v607_v52, %v3808_v43  ;;  %v609_v62 = vmul.f32 %v3824_v53, %v3824_v53 }
 0x164   :  { %5691 = vst [vmem:[#allocation20_spill] sm:$0xff] %v3834_v58  ;;  %v640_v63 = vmul.f32 %v576_v55, %v3811_v45  ;;  %v578_v0 = vmul.f32 %v3829_v56, %v3829_v56  ;;  %v672_v1 = vmul.f32 %v608_v57, %v3814_v47  ;;  %v610_v2 = vmul.f32 %v3834_v58, %v3834_v58 }
 0x165   :  { %v703_v3 = vmul.f32 0.044715, %v639_v59  ;;  %v641_v4 = vmul.f32 %v577_v60, %v3819_v50  ;;  %v735_v5 = vmul.f32 0.044715, %v671_v61  ;;  %v3850_v6 = vmul.f32 %v609_v62, %v3824_v53 }
 0x166   :  { %v704_v7 = vmul.f32 0.044715, %v640_v63  ;;  %v642_v8 = vmul.f32 %v578_v0, %v3829_v56  ;;  %v426_v9 = vpop.f32.mrb[4].mxu0  ;;  %v736_v10 = vmul.f32 0.044715, %v672_v1  ;;  %v3854_v11 = vmul.f32 %v610_v2, %v3834_v58  ;;  %v3856_v12 = vpop.f32.mrb[4].mxu1 }
 0x167   :  { %v767_v13 = vadd.f32 %v703_v3, %v3805_v41  ;;  %v705_v14 = vmul.f32 0.044715, %v641_v4  ;;  %v3860_v15 = vadd.f32 %v426_v9, %v3799_v37  ;;  %v428_v16 = vpop.f32.mrb[5].mxu0  ;;  %v799_v17 = vadd.f32 %v735_v5, %v3808_v43  ;;  %v3863_v18 = vpop.f32.mrb[5].mxu1 }
 0x168   :  { %v768_v19 = vadd.f32 %v704_v7, %v3811_v45  ;;  %v706_v20 = vmul.f32 0.044715, %v642_v8  ;;  %v3867_v21 = vadd.f32 %v428_v16, %v3802_v38  ;;  %v430_v22 = vpop.f32.mrb[6].mxu0  ;;  %v800_v23 = vadd.f32 %v736_v10, %v3814_v47  ;;  %v3870_v24 = vpop.f32.mrb[6].mxu1 }
 0x169   :  { %v831_v25 = vmul.f32 0.7978846, %v767_v13  ;;  %v769_v26 = vadd.f32 %v705_v14, %v3819_v50  ;;  %v579_v27 = vmul.f32 %v3860_v15, %v3860_v15  ;;  %v3876_v28 = vadd.f32 %v430_v22, %v3799_v37  ;;  %v432_v29 = vpop.f32.mrb[7].mxu0  ;;  %v3878_v30 = vpop.f32.mrb[7].mxu1 }
 0x16a   :  { %v832_v31 = vmul.f32 0.7978846, %v768_v19  ;;  %v770_v32 = vadd.f32 %v706_v20, %v3829_v56  ;;  %v580_v33 = vmul.f32 %v3867_v21, %v3867_v21  ;;  %v3884_v35 = vadd.f32 %v432_v29, %v3802_v38 }
 0x16b   :  { %3237 = vtanh.f32 %v831_v25  ;;  %v833_v39 = vmul.f32 0.7978846, %v769_v26  ;;  %v643_v40 = vmul.f32 %v579_v27, %v3860_v15  ;;  %v581_v42 = vmul.f32 %v3876_v28, %v3876_v28 }
 0x16c   :  { %3239 = vtanh.f32 %v832_v31  ;;  %v834_v44 = vmul.f32 0.7978846, %v770_v32  ;;  %v644_v46 = vmul.f32 %v580_v33, %v3867_v21  ;;  %v582_v48 = vmul.f32 %v3884_v35, %v3884_v35 }
 0x16d   :  { %3241 = vtanh.f32 %v833_v39  ;;  %v707_v49 = vmul.f32 0.044715, %v643_v40  ;;  %v645_v51 = vmul.f32 %v581_v42, %v3876_v28  ;;  %v863_v52 = vmul.f32 0.7978846, %v799_v17 }
 0x16e   :  { %3243 = vtanh.f32 %v834_v44  ;;  %v708_v54 = vmul.f32 0.044715, %v644_v46  ;;  %v646_v55 = vmul.f32 %v582_v48, %v3884_v35  ;;  %v436_v57 = vpop.f32.mrb[8].mxu0  ;;  %v864_v59 = vmul.f32 0.7978846, %v800_v23  ;;  %v3894_v60 = vpop.f32.mrb[8].mxu1 }
 0x16f   :  { %v771_v61 = vadd.f32 %v707_v49, %v3860_v15  ;;  %v709_v62 = vmul.f32 0.044715, %v645_v51  ;;  %v3898_v63 = vadd.f32 %v436_v57, %v3799_v37  ;;  %v438_v0 = vpop.f32.mrb[9].mxu0  ;;  %3245 = vtanh.f32 %v863_v52  ;;  %v3900_v1 = vpop.f32.mrb[9].mxu1 }
 0x170   :  { %v772_v2 = vadd.f32 %v708_v54, %v3867_v21  ;;  %v710_v3 = vmul.f32 0.044715, %v646_v55  ;;  %v3904_v4 = vadd.f32 %v438_v0, %v3802_v38  ;;  %v440_v5 = vpop.f32.mrb[10].mxu0  ;;  %3247 = vtanh.f32 %v864_v59  ;;  %v3906_v7 = vpop.f32.mrb[10].mxu1 }
 0x171   :  { %v835_v8 = vmul.f32 0.7978846, %v771_v61  ;;  %v773_v9 = vadd.f32 %v709_v62, %v3876_v28  ;;  %v583_v10 = vmul.f32 %v3898_v63, %v3898_v63  ;;  %v3912_v13 = vadd.f32 %v440_v5, %v3799_v37  ;;  %v442_v14 = vpop.f32.mrb[11].mxu0  ;;  %v3914_v16 = vpop.f32.mrb[11].mxu1 }
 0x172   :  { %v836_v17 = vmul.f32 0.7978846, %v772_v2  ;;  %v774_v19 = vadd.f32 %v710_v3, %v3884_v35  ;;  %v584_v20 = vmul.f32 %v3904_v4, %v3904_v4  ;;  %v3920_v22 = vadd.f32 %v442_v14, %v3802_v38 }
 0x173   :  { %3249 = vtanh.f32 %v835_v8  ;;  %v837_v23 = vmul.f32 0.7978846, %v773_v9  ;;  %v647_v25 = vmul.f32 %v583_v10, %v3898_v63  ;;  %v585_v26 = vmul.f32 %v3912_v13, %v3912_v13 }
 0x174   :  { %3251 = vtanh.f32 %v836_v17  ;;  %v838_v27 = vmul.f32 0.7978846, %v774_v19  ;;  %v648_v29 = vmul.f32 %v584_v20, %v3904_v4  ;;  %v586_v31 = vmul.f32 %v3920_v22, %v3920_v22 }
 0x175   :  { %v3238_v32 = vpop.eup %3237  ;;  %3253 = vtanh.f32 %v837_v23  ;;  %v711_v33 = vmul.f32 0.044715, %v647_v25  ;;  %v649_v39 = vmul.f32 %v585_v26, %v3912_v13  ;;  %v3930_v40 = vmul.f32 0.044715, %v3850_v6 }
 0x176   :  { %v3240_v42 = vpop.eup %3239  ;;  %v959_v44 = vadd.f32 1.0, %v3238_v32  ;;  %3255 = vtanh.f32 %v838_v27  ;;  %v712_v46 = vmul.f32 0.044715, %v648_v29  ;;  %v650_v48 = vmul.f32 %v586_v31, %v3920_v22  ;;  %v446_v49 = vpop.f32.mrb[12].mxu0 }
 0x177   :  { %v3933_v51 = vpop.f32.mrb[12].mxu1  ;;  %v3242_v52 = vpop.eup %3241  ;;  %v775_v54 = vadd.f32 %v711_v33, %v3898_v63  ;;  %v713_v55 = vmul.f32 0.044715, %v649_v39  ;;  %v3937_v57 = vadd.f32 %v446_v49, %v3799_v37  ;;  %v960_v61 = vadd.f32 1.0, %v3240_v42 }
 0x178   :  { %v448_v59 = vpop.f32.mrb[13].mxu0  ;;  %v3939_v6 = vpop.f32.mrb[13].mxu1  ;;  %v1023_v0 = vmul.f32 0.5, %v959_v44  ;;  %v961_v2 = vadd.f32 1.0, %v3242_v52  ;;  %v776_v3 = vadd.f32 %v712_v46, %v3904_v4  ;;  %v714_v5 = vmul.f32 0.044715, %v650_v48 }
 0x179   :  { %v3244_v62 = vpop.eup %3243  ;;  %v450_v8 = vpop.f32.mrb[14].mxu0  ;;  %v839_v14 = vmul.f32 0.7978846, %v775_v54  ;;  %v777_v17 = vadd.f32 %v713_v55, %v3912_v13  ;;  %v587_v19 = vmul.f32 %v3937_v57, %v3937_v57  ;;  %v3950_v20 = vadd.f32 %v448_v59, %v3802_v38 }
 0x17a   :  { %v3942_v9 = vpop.f32.mrb[14].mxu1  ;;  %v3944_v10 = vpop.eup %3245  ;;  %v3957_v27 = vmul.f32 %v1023_v0, %v3805_v41  ;;  %v1025_v29 = vmul.f32 0.5, %v961_v2  ;;  %v840_v31 = vmul.f32 0.7978846, %v776_v3  ;;  %v778_v32 = vadd.f32 %v714_v5, %v3920_v22 }
 0x17b   :  { %5692 = vst [vmem:[#allocation21_spill] sm:$0xff] %v3944_v10  ;;  %v452_v23 = vpop.f32.mrb[15].mxu0  ;;  %v3952_v25 = vpop.f32.mrb[15].mxu1  ;;  %3257 = vtanh.f32 %v839_v14  ;;  %v841_v33 = vmul.f32 0.7978846, %v777_v17  ;;  %v651_v39 = vmul.f32 %v587_v19, %v3937_v57  ;;  %v588_v42 = vmul.f32 %v3950_v20, %v3950_v20 }
 0x17c   :  { %v3954_v26 = vpop.eup %3247  ;;  %v3964_v44 = vmul.f32 %v1025_v29, %v3819_v50  ;;  %3259 = vtanh.f32 %v840_v31  ;;  %v842_v46 = vmul.f32 0.7978846, %v778_v32  ;;  %v3967_v48 = vadd.f32 %v450_v8, %v3799_v37 }
 0x17d   :  { %5693 = vst [vmem:[#allocation22_spill] sm:$0xff] %v3954_v26  ;;  %v3969_v41 = vpop.eup %3249  ;;  %3261 = vtanh.f32 %v841_v33  ;;  %v715_v49 = vmul.f32 0.044715, %v651_v39  ;;  %v652_v52 = vmul.f32 %v588_v42, %v3950_v20  ;;  %v3973_v54 = vadd.f32 %v452_v23, %v3802_v38 }
 0x17e   :  { %5694 = vst [vmem:[#allocation23_spill] sm:$0xff] %v3967_v48  ;;  %v3975_v55 = vpop.eup %3251  ;;  %3263 = vtanh.f32 %v842_v46  ;;  %v589_v59 = vmul.f32 %v3967_v48, %v3967_v48  ;;  %v456_v0 = vpop.f32.mrb[16].mxu0  ;;  %v962_v2 = vadd.f32 1.0, %v3244_v62  ;;  %v1024_v39 = vmul.f32 0.5, %v960_v61 }
 0x17f   :  { %v3981_v3 = vpop.f32.mrb[16].mxu1  ;;  %v3983_v5 = vpop.eup %3253  ;;  %v779_v8 = vadd.f32 %v715_v49, %v3937_v57  ;;  %v716_v14 = vmul.f32 0.044715, %v652_v52  ;;  %v590_v17 = vmul.f32 %v3973_v54, %v3973_v54  ;;  %v3989_v19 = vadd.f32 %v456_v0, %v3799_v37 }
 0x180   :  { %5695 = vst [vmem:[#allocation24_spill] sm:$0xff] %v3981_v3  ;;  %v458_v23 = vpop.f32.mrb[17].mxu0  ;;  %v3991_v29 = vpop.f32.mrb[17].mxu1  ;;  %v653_v62 = vmul.f32 %v589_v59, %v3967_v48  ;;  %v1026_v42 = vmul.f32 0.5, %v962_v2 }
 0x181   :  { %5696 = vst [vmem:[#allocation25_spill] sm:$0xff] %v3989_v19  ;;  %5697 = vst [vmem:[#allocation26_spill] sm:$0xff] %v3991_v29  ;;  %v3993_v31 = vpop.eup %3255  ;;  %v3997_v32 = vadd.f32 %v458_v23, %v3802_v38  ;;  %v460_v33 = vpop.f32.mrb[18].mxu0  ;;  %v843_v49 = vmul.f32 0.7978846, %v779_v8  ;;  %v780_v52 = vadd.f32 %v716_v14, %v3950_v20  ;;  %v654_v0 = vmul.f32 %v590_v17, %v3973_v54 }
 0x182   :  { %v3999_v46 = vpop.f32.mrb[18].mxu1  ;;  %v591_v50 = vmul.f32 %v3989_v19, %v3989_v19  ;;  %v462_v36 = vpop.f32.mrb[19].mxu0  ;;  %v717_v59 = vmul.f32 0.044715, %v653_v62  ;;  %v4010_v61 = vadd.f32 %v460_v33, %v3799_v37 }
 0x183   :  { %5698 = vst [vmem:[#allocation27_spill] sm:$0xff] %v3999_v46  ;;  %v4005_v34 = vpop.f32.mrb[19].mxu1  ;;  %v592_v23 = vmul.f32 %v3997_v32, %v3997_v32  ;;  %v4013_v2 = vadd.f32 %v462_v36, %v3802_v38  ;;  %3265 = vtanh.f32 %v843_v49  ;;  %v844_v8 = vmul.f32 0.7978846, %v780_v52 }
 0x184   :  { %5699 = vst [vmem:[#allocation28_spill] sm:$0xff] %v4005_v34  ;;  %v718_v14 = vmul.f32 0.044715, %v654_v0  ;;  %v655_v17 = vmul.f32 %v591_v50, %v3989_v19  ;;  %v781_v43 = vadd.f32 %v717_v59, %v3967_v48  ;;  %v593_v62 = vmul.f32 %v4010_v61, %v4010_v61 }
 0x185   :  { %v656_v10 = vmul.f32 %v592_v23, %v3997_v32  ;;  %v594_v47 = vmul.f32 %v4013_v2, %v4013_v2  ;;  %v4022_v33 = vpop.eup %3257  ;;  %3267 = vtanh.f32 %v844_v8  ;;  %v1088_v52 = vmul.f32 %v1024_v39, %v3811_v45 }
 0x186   :  { %v782_v36 = vadd.f32 %v718_v14, %v3973_v54  ;;  %v719_v49 = vmul.f32 0.044715, %v655_v17  ;;  %v4026_v0 = vpop.eup %3259  ;;  %v845_v50 = vmul.f32 0.7978846, %v781_v43  ;;  %v657_v23 = vmul.f32 %v593_v62, %v4010_v61  ;;  %v466_v34 = vpop.f32.mrb[20].mxu0 }
 0x187   :  { %v720_v59 = vmul.f32 0.044715, %v656_v10  ;;  %v658_v26 = vmul.f32 %v594_v47, %v4013_v2  ;;  %v4030_v46 = vpop.f32.mrb[20].mxu1  ;;  %v4032_v29 = vpop.eup %3261  ;;  %v1090_v14 = vmul.f32 %v1026_v42, %v3829_v56  ;;  %v801_v45 = vadd.f32 %v3930_v40, %v3824_v53 }
 0x188   :  { %5700 = vst [vmem:[#allocation29_spill] sm:$0xff] %v4030_v46  ;;  %v846_v3 = vmul.f32 0.7978846, %v782_v36  ;;  %v783_v8 = vadd.f32 %v719_v49, %v3989_v19  ;;  %v468_v39 = vpop.f32.mrb[21].mxu0  ;;  %v4038_v43 = vpop.f32.mrb[21].mxu1  ;;  %3269 = vtanh.f32 %v845_v50 }
 0x189   :  { %5701 = vst [vmem:[#allocation30_spill] sm:$0xff] %v4038_v43  ;;  %v4040_v10 = vpop.eup %3263  ;;  %v784_v47 = vadd.f32 %v720_v59, %v3997_v32  ;;  %v721_v17 = vmul.f32 0.044715, %v657_v23  ;;  %v722_v62 = vmul.f32 0.044715, %v658_v26  ;;  %v470_v46 = vpop.f32.mrb[22].mxu0  ;;  %v1152_v49 = vpack.c.bf16 %v1090_v14, %v1088_v52 }
 0x18a   :  { %v4043_v48 = vpop.f32.mrb[22].mxu1  ;;  %3271 = vtanh.f32 %v846_v3  ;;  %v847_v36 = vmul.f32 0.7978846, %v783_v8  ;;  %v865_v56 = vmul.f32 0.7978846, %v801_v45  ;;  %v472_v42 = vpop.f32.mrb[23].mxu0  ;;  %v4051_v26 = vadd.f32 %v466_v34, %v3799_v37 }
 0x18b   :  { %5702 = vst [vmem:[#allocation31_spill] sm:$0xff] %v4043_v48  ;;  %v4045_v19 = vpop.f32.mrb[23].mxu1  ;;  %v848_v40 = vmul.f32 0.7978846, %v784_v47  ;;  %v785_v53 = vadd.f32 %v721_v17, %v4010_v61  ;;  %v786_v43 = vadd.f32 %v722_v62, %v4013_v2  ;;  %v738_v50 = vmul.f32 0.044715, %v3854_v11  ;;  %1419 = vmatprep.mubr.bf16.mxu1 %v1152_v49 }
 0x18c   :  { %5703 = vst [vmem:[#allocation32_spill] sm:$0xff] %v4045_v19  ;;  %3273 = vtanh.f32 %v847_v36  ;;  %5704 = vst [vmem:[#allocation33_spill] sm:$0xff] %v4051_v26  ;;  %v4054_v3 = vadd.f32 %v468_v39, %v3802_v38  ;;  %v4057_v52 = vadd.f32 %v470_v46, %v3799_v37  ;;  %v5706_v8 = vpack.c.bf16 %v3964_v44, %v3957_v27 }
 0x18d   :  { %3275 = vtanh.f32 %v848_v40  ;;  %v849_v59 = vmul.f32 0.7978846, %v785_v53  ;;  %v850_v23 = vmul.f32 0.7978846, %v786_v43  ;;  %v802_v11 = vadd.f32 %v738_v50, %v3834_v58  ;;  %v4063_v14 = vpop.eup %3265 }
 0x18e   :  { %5705 = vst [vmem:[#allocation34_spill] sm:$0xff] %v4057_v52  ;;  %1420 = vmatmul.mubr.bf16.vlgmr.msra.gmra.mrb[32].mxu1 %v5706_v8  ;;  %3277 = vtanh.f32 %v865_v56  ;;  %v595_v34 = vmul.f32 %v4051_v26, %v4051_v26  ;;  %v596_v45 = vmul.f32 %v4054_v3, %v4054_v3  ;;  %v597_v46 = vmul.f32 %v4057_v52, %v4057_v52  ;;  %v4075_v44 = vpop.f32.mrb[24].mxu0  ;;  %v4077_v43 = vpop.f32.mrb[24].mxu1 }
 0x18f   :  { %3279 = vtanh.f32 %v849_v59  ;;  %v866_v53 = vmul.f32 0.7978846, %v802_v11  ;;  %v4072_v39 = vadd.f32 %v472_v42, %v3802_v38  ;;  %v964_v27 = vadd.f32 1.0, %v3975_v55  ;;  %5707 = vst [vmem:[#allocation35_spill] sm:$0xff] %v4077_v43  ;;  %v4079_v47 = vpop.eup %3267  ;;  %v4084_v49 = vpop.f32.mrb[25].mxu0 }
 0x190   :  { %3281 = vtanh.f32 %v850_v23  ;;  %v659_v17 = vmul.f32 %v595_v34, %v4051_v26  ;;  %v660_v62 = vmul.f32 %v596_v45, %v4054_v3  ;;  %v661_v36 = vmul.f32 %v597_v46, %v4057_v52  ;;  %v4086_v56 = vpop.f32.mrb[25].mxu1  ;;  %v4091_v50 = vpop.f32.mrb[26].mxu0 }
 0x191   :  { %5708 = vst [vmem:[#allocation36_spill] sm:$0xff] %v4086_v56  ;;  %3283 = vtanh.f32 %v866_v53  ;;  %v598_v55 = vmul.f32 %v4072_v39, %v4072_v39  ;;  %v966_v42 = vadd.f32 1.0, %v3993_v31  ;;  %v1028_v40 = vmul.f32 0.5, %v964_v27  ;;  %v4093_v59 = vpop.f32.mrb[26].mxu1  ;;  %v482_v27 = vpop.f32.mrb[27].mxu0 }
 0x192   :  { %5709 = vst [vmem:[#allocation37_spill] sm:$0xff] %v4093_v59  ;;  %v723_v23 = vmul.f32 0.044715, %v659_v17  ;;  %v724_v8 = vmul.f32 0.044715, %v660_v62  ;;  %v4097_v34 = vadd.f32 %v3856_v12, %v3799_v37  ;;  %v4099_v45 = vpop.eup %3269  ;;  %v963_v31 = vadd.f32 1.0, %v3969_v41 }
 0x193   :  { %v725_v11 = vmul.f32 0.044715, %v661_v36  ;;  %v662_v46 = vmul.f32 %v598_v55, %v4072_v39  ;;  %v1030_v53 = vmul.f32 0.5, %v966_v42  ;;  %v1092_v58 = vmul.f32 %v1028_v40, %v3867_v21  ;;  %v4104_v56 = vpop.f32.mrb[27].mxu1 }
 0x194   :  { %5710 = vst [vmem:[#allocation38_spill] sm:$0xff] %v4097_v34  ;;  %5711 = vst [vmem:[#allocation39_spill] sm:$0xff] %v4104_v56  ;;  %v4106_v59 = vpop.eup %3271  ;;  %v787_v17 = vadd.f32 %v723_v23, %v4051_v26  ;;  %v788_v62 = vadd.f32 %v724_v8, %v4054_v3  ;;  %v611_v36 = vmul.f32 %v4097_v34, %v4097_v34  ;;  %v965_v21 = vadd.f32 1.0, %v3983_v5 }
 0x195   :  { %v789_v12 = vadd.f32 %v725_v11, %v4057_v52  ;;  %v726_v55 = vmul.f32 0.044715, %v662_v46  ;;  %v1094_v42 = vmul.f32 %v1030_v53, %v3884_v35  ;;  %v1027_v41 = vmul.f32 0.5, %v963_v31 }
 0x196   :  { %v4115_v40 = vpop.eup %3273  ;;  %v851_v56 = vmul.f32 0.7978846, %v787_v17  ;;  %v852_v43 = vmul.f32 0.7978846, %v788_v62  ;;  %v675_v23 = vmul.f32 %v611_v36, %v4097_v34  ;;  %v1029_v52 = vmul.f32 0.5, %v965_v21  ;;  %v4122_v26 = vpop.f32.mrb[28].mxu0 }
 0x197   :  { %v853_v19 = vmul.f32 0.7978846, %v789_v12  ;;  %v4118_v48 = vpop.eup %3275  ;;  %v790_v8 = vadd.f32 %v726_v55, %v4072_v39  ;;  %v1154_v11 = vpack.c.bf16 %v1094_v42, %v1092_v58  ;;  %v1091_v46 = vmul.f32 %v1027_v41, %v3860_v15  ;;  %v4124_v35 = vpop.f32.mrb[28].mxu1 }
 0x198   :  { %5712 = vst [vmem:[#allocation40_spill] sm:$0xff] %v4124_v35  ;;  %v4126_v5 = vpop.eup %3277  ;;  %3285 = vtanh.f32 %v851_v56  ;;  %v739_v53 = vmul.f32 0.044715, %v675_v23  ;;  %v4130_v31 = vadd.f32 %v3863_v18, %v3802_v38  ;;  %v4134_v17 = vadd.f32 %v3870_v24, %v3799_v37  ;;  %v4136_v58 = vpop.f32.mrb[29].mxu0 }
 0x199   :  { %5713 = vst [vmem:[#allocation41_spill] sm:$0xff] %v4126_v5  ;;  %v4138_v62 = vpop.f32.mrb[29].mxu1  ;;  %v4140_v15 = vpop.eup %3279  ;;  %3287 = vtanh.f32 %v852_v43  ;;  %v854_v12 = vmul.f32 0.7978846, %v790_v8  ;;  %1429 = vmatprep.mubr.bf16.mxu1 %v1154_v11  ;;  %v1093_v56 = vmul.f32 %v1029_v52, %v3876_v28  ;;  %v4145_v36 = vadd.f32 %v3878_v30, %v3802_v38 }
 0x19a   :  { %5714 = vst [vmem:[#allocation42_spill] sm:$0xff] %v4134_v17  ;;  %5715 = vst [vmem:[#allocation43_spill] sm:$0xff] %v4138_v62  ;;  %v4147_v18 = vpop.f32.mrb[30].mxu0  ;;  %v4149_v55 = vpop.f32.mrb[30].mxu1  ;;  %3289 = vtanh.f32 %v853_v19  ;;  %v803_v42 = vadd.f32 %v739_v53, %v4097_v34  ;;  %v612_v43 = vmul.f32 %v4130_v31, %v4130_v31  ;;  %v613_v21 = vmul.f32 %v4134_v17, %v4134_v17 }
 0x19b   :  { %5716 = vst [vmem:[#allocation44_spill] sm:$0xff] %v4145_v36  ;;  %5717 = vst [vmem:[#allocation45_spill] sm:$0xff] %v4149_v55  ;;  %v4151_v24 = vpop.eup %3281  ;;  %v4158_v28 = vpop.f32.mrb[31].mxu0  ;;  %3291 = vtanh.f32 %v854_v12  ;;  %v1153_v41 = vpack.c.bf16 %v1093_v56, %v1091_v46  ;;  %v614_v23 = vmul.f32 %v4145_v36, %v4145_v36  ;;  %v4168_v19 = vadd.f32 %v4075_v44, %v3799_v37 }
 0x19c   :  { %v4160_v52 = vpop.f32.mrb[31].mxu1  ;;  %v4162_v30 = vpop.eup %3283  ;;  %v867_v8 = vmul.f32 0.7978846, %v803_v42  ;;  %v676_v11 = vmul.f32 %v612_v43, %v4130_v31  ;;  %v677_v53 = vmul.f32 %v613_v21, %v4134_v17  ;;  %v4174_v34 = vadd.f32 %v4084_v49, %v3802_v38 }
 0x19d   :  { %5718 = vst [vmem:[#allocation46_spill] sm:$0xff] %v4160_v52  ;;  %5719 = vst [vmem:[#allocation47_spill] sm:$0xff] %v4162_v30  ;;  %1430 = vmatmul.mubr.bf16.gmra.mrb[36].mxu1 %v1153_v41  ;;  %v678_v12 = vmul.f32 %v614_v23, %v4145_v36  ;;  %v599_v46 = vmul.f32 %v4168_v19, %v4168_v19  ;;  %v4181_v56 = vadd.f32 %v4091_v50, %v3799_v37 }
 0x19e   :  { %v4184_v44 = vadd.f32 %v482_v27, %v3802_v38  ;;  %3293 = vtanh.f32 %v867_v8  ;;  %v740_v42 = vmul.f32 0.044715, %v676_v11  ;;  %v741_v43 = vmul.f32 0.044715, %v677_v53 }
 0x19f   :  { %v600_v49 = vmul.f32 %v4174_v34, %v4174_v34  ;;  %v742_v21 = vmul.f32 0.044715, %v678_v12  ;;  %v663_v41 = vmul.f32 %v599_v46, %v4168_v19  ;;  %v601_v23 = vmul.f32 %v4181_v56, %v4181_v56 }
 0x1a0   :  { %v602_v5 = vmul.f32 %v4184_v44, %v4184_v44  ;;  %v804_v50 = vadd.f32 %v740_v42, %v4130_v31  ;;  %v805_v27 = vadd.f32 %v741_v43, %v4134_v17  ;;  %v968_v11 = vadd.f32 1.0, %v4026_v0 }
 0x1a1   :  { %v664_v8 = vmul.f32 %v600_v49, %v4174_v34  ;;  %v806_v53 = vadd.f32 %v742_v21, %v4145_v36  ;;  %v727_v52 = vmul.f32 0.044715, %v663_v41  ;;  %v665_v12 = vmul.f32 %v601_v23, %v4181_v56 }
 0x1a2   :  { %v666_v46 = vmul.f32 %v602_v5, %v4184_v44  ;;  %v4200_v55 = vpop.eup %3285  ;;  %v868_v30 = vmul.f32 0.7978846, %v804_v50  ;;  %v869_v62 = vmul.f32 0.7978846, %v805_v27  ;;  %v4204_v42 = vadd.f32 %v3894_v60, %v3799_v37 }
 0x1a3   :  { %v728_v35 = vmul.f32 0.044715, %v664_v8  ;;  %v4206_v43 = vpop.eup %3287  ;;  %v870_v49 = vmul.f32 0.7978846, %v806_v53  ;;  %v791_v0 = vadd.f32 %v727_v52, %v4168_v19  ;;  %v729_v21 = vmul.f32 0.044715, %v665_v12 }
 0x1a4   :  { %5720 = vst [vmem:[#allocation48_spill] sm:$0xff] %v4204_v42  ;;  %v730_v41 = vmul.f32 0.044715, %v666_v46  ;;  %v4209_v17 = vpop.eup %3289  ;;  %3295 = vtanh.f32 %v868_v30  ;;  %v970_v23 = vadd.f32 1.0, %v4040_v10  ;;  %v1032_v50 = vmul.f32 0.5, %v968_v11 }
 0x1a5   :  { %v792_v5 = vadd.f32 %v728_v35, %v4174_v34  ;;  %v4213_v27 = vpop.eup %3291  ;;  %3297 = vtanh.f32 %v869_v62  ;;  %v855_v60 = vmul.f32 0.7978846, %v791_v0  ;;  %v793_v8 = vadd.f32 %v729_v21, %v4181_v56 }
 0x1a6   :  { %v794_v53 = vadd.f32 %v730_v41, %v4184_v44  ;;  %3299 = vtanh.f32 %v870_v49  ;;  %v1034_v12 = vmul.f32 0.5, %v970_v23  ;;  %v1096_v46 = vmul.f32 %v1032_v50, %v3904_v4 }
 0x1a7   :  { %v856_v52 = vmul.f32 0.7978846, %v792_v5  ;;  %3301 = vtanh.f32 %v855_v60  ;;  %v857_v30 = vmul.f32 0.7978846, %v793_v8  ;;  %v615_v10 = vmul.f32 %v4204_v42, %v4204_v42  ;;  %v3191_v60 = vld [vmem:[#allocation8 + $0x4] ss:$8 sps:$4 sm:$0xff]  }
 0x1a8   :  { %v858_v36 = vmul.f32 0.7978846, %v794_v53  ;;  %v4220_v35 = vpop.eup %3293  ;;  %v1098_v62 = vmul.f32 %v1034_v12, %v3920_v22  ;;  %v967_v11 = vadd.f32 1.0, %v4022_v33  ;;  %v969_v0 = vadd.f32 1.0, %v4032_v29  ;;  %2392 = vmatprep.subr.bf16.mxu0 %v3191_v60 }
 0x1a9   :  { %3303 = vtanh.f32 %v856_v52  ;;  %v679_v49 = vmul.f32 %v615_v10, %v4204_v42  ;;  %v4228_v4 = vadd.f32 %v3900_v1, %v3802_v38  ;;  %v4232_v21 = vadd.f32 %v3906_v7, %v3799_v37  ;;  %v3189_v1 = vld [vmem:[#allocation8] ss:$8 sps:$4 sm:$0xff]   ;;  %v3194_v52 = vld [vmem:[#allocation8 + $0x14] ss:$8 sps:$4 sm:$0xff]  }
 0x1aa   :  { %3305 = vtanh.f32 %v857_v30  ;;  %v1156_v41 = vpack.c.bf16 %v1098_v62, %v1096_v46  ;;  %v1031_v5 = vmul.f32 0.5, %v967_v11  ;;  %v1033_v23 = vmul.f32 0.5, %v969_v0  ;;  %2393 = vmatpush1.bf16.msra.mxu0 %v3189_v1  ;;  %v3192_v62 = vld [vmem:[#allocation8 + $0x10] ss:$8 sps:$4 sm:$0xff]   ;;  %v3197_v11 = vld [vmem:[#allocation8 + $0x24] ss:$8 sps:$4 sm:$0xff]  }
 0x1ab   :  { %5721 = vst [vmem:[#allocation49_spill] sm:$0xff] %v4228_v4  ;;  %5722 = vst [vmem:[#allocation50_spill] sm:$0xff] %v4232_v21  ;;  %3307 = vtanh.f32 %v858_v36  ;;  %v743_v22 = vmul.f32 0.044715, %v679_v49  ;;  %v616_v33 = vmul.f32 %v4228_v4, %v4228_v4  ;;  %v617_v29 = vmul.f32 %v4232_v21, %v4232_v21  ;;  %2394 = vmatprep.subr.bf16.mxu0 %v3194_v52 }
 0x1ac   :  { %v4240_v50 = vadd.f32 %v3914_v16, %v3802_v38  ;;  %1439 = vmatprep.mubr.bf16.mxu1 %v1156_v41  ;;  %v1095_v7 = vmul.f32 %v1031_v5, %v3898_v63  ;;  %v1097_v36 = vmul.f32 %v1033_v23, %v3912_v13  ;;  %v4246_v8 = vadd.f32 %v4122_v26, %v3799_v37 }
 0x1ad   :  { %v4250_v53 = vadd.f32 %v4136_v58, %v3802_v38  ;;  %v807_v12 = vadd.f32 %v743_v22, %v4204_v42  ;;  %v680_v16 = vmul.f32 %v616_v33, %v4228_v4  ;;  %v681_v46 = vmul.f32 %v617_v29, %v4232_v21 }
 0x1ae   :  { %5723 = vst [vmem:[#allocation51_spill] sm:$0xff] %v4240_v50  ;;  %v618_v63 = vmul.f32 %v4240_v50, %v4240_v50  ;;  %v4257_v13 = vpop.eup %3295  ;;  %v1155_v30 = vpack.c.bf16 %v1097_v36, %v1095_v7  ;;  %v603_v26 = vmul.f32 %v4246_v8, %v4246_v8  ;;  %v4265_v10 = vadd.f32 %v4147_v18, %v3799_v37 }
 0x1af   :  { %v604_v58 = vmul.f32 %v4250_v53, %v4250_v53  ;;  %v4267_v0 = vpop.eup %3297  ;;  %v871_v49 = vmul.f32 0.7978846, %v807_v12  ;;  %v744_v41 = vmul.f32 0.044715, %v680_v16  ;;  %v745_v5 = vmul.f32 0.044715, %v681_v46  ;;  %2395 = vmatpush1.bf16.msra.mxu0 %v3192_v62 }
 0x1b0   :  { %v682_v23 = vmul.f32 %v618_v63, %v4240_v50  ;;  %v4270_v22 = vpop.eup %3299  ;;  %1440 = vmatmul.mubr.bf16.gmra.mrb[40].mxu1 %v1155_v30  ;;  %v667_v33 = vmul.f32 %v603_v26, %v4246_v8  ;;  %v605_v18 = vmul.f32 %v4265_v10, %v4265_v10  ;;  %v4278_v1 = vadd.f32 %v4158_v28, %v3802_v38  ;;  %v3195_v12 = vld [vmem:[#allocation8 + $0x20] ss:$8 sps:$4 sm:$0xff]   ;;  %v3200_v28 = vld [vmem:[#allocation8 + $0x34] ss:$8 sps:$4 sm:$0xff]  }
 0x1b1   :  { %v668_v29 = vmul.f32 %v604_v58, %v4250_v53  ;;  %v4280_v60 = vpop.eup %3301  ;;  %3309 = vtanh.f32 %v871_v49  ;;  %v808_v7 = vadd.f32 %v744_v41, %v4228_v4  ;;  %v809_v36 = vadd.f32 %v745_v5, %v4232_v21  ;;  %2396 = vmatprep.subr.bf16.mxu0 %v3197_v11  ;;  %v3198_v11 = vld [vmem:[#allocation8 + $0x30] ss:$8 sps:$4 sm:$0xff]  }
 0x1b2   :  { %v746_v52 = vmul.f32 0.044715, %v682_v23  ;;  %v731_v46 = vmul.f32 0.044715, %v667_v33  ;;  %v669_v30 = vmul.f32 %v605_v18, %v4265_v10  ;;  %v606_v26 = vmul.f32 %v4278_v1, %v4278_v1 }
 0x1b3   :  { %v4284_v16 = vpop.eup %3303  ;;  %v732_v63 = vmul.f32 0.044715, %v668_v29  ;;  %v872_v49 = vmul.f32 0.7978846, %v808_v7  ;;  %v873_v42 = vmul.f32 0.7978846, %v809_v36  ;;  %2397 = vmatpush1.bf16.msra.mxu0 %v3195_v12 }
 0x1b4   :  { %v4289_v58 = vpop.eup %3305  ;;  %v810_v41 = vadd.f32 %v746_v52, %v4240_v50  ;;  %v972_v5 = vadd.f32 1.0, %v4079_v47  ;;  %v795_v33 = vadd.f32 %v731_v46, %v4246_v8  ;;  %v733_v18 = vmul.f32 0.044715, %v669_v30  ;;  %2398 = vmatprep.subr.bf16.mxu0 %v3200_v28  ;;  %v3203_v30 = vld [vmem:[#allocation8 + $0x44] ss:$8 sps:$4 sm:$0xff]  }
 0x1b5   :  { %v4293_v23 = vpop.eup %3307  ;;  %v796_v29 = vadd.f32 %v732_v63, %v4250_v53  ;;  %v670_v21 = vmul.f32 %v606_v26, %v4278_v1  ;;  %3311 = vtanh.f32 %v872_v49  ;;  %v974_v4 = vadd.f32 1.0, %v4106_v59 }
 0x1b6   :  { %v874_v62 = vmul.f32 0.7978846, %v810_v41  ;;  %v1036_v7 = vmul.f32 0.5, %v972_v5  ;;  %3313 = vtanh.f32 %v873_v42  ;;  %v859_v36 = vmul.f32 0.7978846, %v795_v33 }
 0x1b7   :  { %v860_v52 = vmul.f32 0.7978846, %v796_v29  ;;  %v797_v47 = vadd.f32 %v733_v18, %v4265_v10  ;;  %v734_v50 = vmul.f32 0.044715, %v670_v21  ;;  %v1038_v46 = vmul.f32 0.5, %v974_v4  ;;  %2399 = vmatpush1.bf16.msra.mxu0 %v3198_v11 }
 0x1b8   :  { %3315 = vtanh.f32 %v874_v62  ;;  %v1100_v63 = vmul.f32 %v1036_v7, %v3950_v20  ;;  %v4303_v59 = vadd.f32 %v3933_v51, %v3799_v37  ;;  %v971_v42 = vadd.f32 1.0, %v4063_v14  ;;  %v3201_v51 = vld [vmem:[#allocation8 + $0x40] ss:$8 sps:$4 sm:$0xff]   ;;  %2400 = vmatprep.subr.bf16.mxu0 %v3203_v30 }
 0x1b9   :  { %3317 = vtanh.f32 %v859_v36  ;;  %v861_v26 = vmul.f32 0.7978846, %v797_v47  ;;  %v798_v49 = vadd.f32 %v734_v50, %v4278_v1  ;;  %v1102_v12 = vmul.f32 %v1038_v46, %v3973_v54  ;;  %v5724_v62 = vld [vmem:[#allocation23_spill] sm:$0xff] }
 0x1ba   :  { %3319 = vtanh.f32 %v860_v52  ;;  %v973_v21 = vadd.f32 1.0, %v4099_v45  ;;  %v619_v20 = vmul.f32 %v4303_v59, %v4303_v59  ;;  %v1035_v4 = vmul.f32 0.5, %v971_v42  ;;  %v3206_v45 = vld [vmem:[#allocation8 + $0x54] ss:$8 sps:$4 sm:$0xff]   ;;  %v5725_v42 = vld [vmem:[#allocation24_spill] sm:$0xff] }
 0x1bb   :  { %3321 = vtanh.f32 %v861_v26  ;;  %v4313_v28 = vadd.f32 %v3939_v6, %v3802_v38  ;;  %v4315_v41 = vpop.eup %3309  ;;  %v862_v14 = vmul.f32 0.7978846, %v798_v49  ;;  %v1158_v5 = vpack.c.bf16 %v1102_v12, %v1100_v63  ;;  %2401 = vmatpush1.bf16.msra.mxu0 %v3201_v51 }
 0x1bc   :  { %v1037_v50 = vmul.f32 0.5, %v973_v21  ;;  %v4319_v54 = vadd.f32 %v3942_v9, %v3799_v37  ;;  %v683_v33 = vmul.f32 %v619_v20, %v4303_v59  ;;  %v1099_v29 = vmul.f32 %v1035_v4, %v3937_v57  ;;  %2402 = vmatprep.subr.bf16.mxu0 %v3206_v45 }
 0x1bd   :  { %v620_v6 = vmul.f32 %v4313_v28, %v4313_v28  ;;  %v4327_v18 = vadd.f32 %v3952_v25, %v3802_v38  ;;  %3323 = vtanh.f32 %v862_v14  ;;  %1449 = vmatprep.mubr.bf16.mxu1 %v1158_v5  ;;  %v976_v36 = vadd.f32 1.0, %v4118_v48  ;;  %v3204_v25 = vld [vmem:[#allocation8 + $0x50] ss:$8 sps:$4 sm:$0xff]   ;;  %v3209_v48 = vld [vmem:[#allocation8 + $0x64] ss:$8 sps:$4 sm:$0xff]  }
 0x1be   :  { %v1101_v7 = vmul.f32 %v1037_v50, %v5724_v62  ;;  %v621_v9 = vmul.f32 %v4319_v54, %v4319_v54  ;;  %v747_v52 = vmul.f32 0.044715, %v683_v33  ;;  %v978_v11 = vadd.f32 1.0, %v4151_v24 }
 0x1bf   :  { %v684_v47 = vmul.f32 %v620_v6, %v4313_v28  ;;  %v622_v57 = vmul.f32 %v4327_v18, %v4327_v18  ;;  %v4337_v46 = vpop.eup %3311  ;;  %v1040_v26 = vmul.f32 0.5, %v976_v36  ;;  %v4342_v49 = vadd.f32 %v5725_v42, %v3799_v37  ;;  %2403 = vmatpush1.bf16.msra.mxu0 %v3204_v25 }
 0x1c0   :  { %v1157_v63 = vpack.c.bf16 %v1101_v7, %v1099_v29  ;;  %v685_v30 = vmul.f32 %v621_v9, %v4319_v54  ;;  %v4344_v12 = vpop.eup %3313  ;;  %v811_v21 = vadd.f32 %v747_v52, %v4303_v59  ;;  %v1042_v4 = vmul.f32 0.5, %v978_v11  ;;  %v3207_v9 = vld [vmem:[#allocation8 + $0x60] ss:$8 sps:$4 sm:$0xff]   ;;  %2404 = vmatprep.subr.bf16.mxu0 %v3209_v48 }
 0x1c1   :  { %v748_v20 = vmul.f32 0.044715, %v684_v47  ;;  %v686_v24 = vmul.f32 %v622_v57, %v4327_v18  ;;  %v1104_v5 = vmul.f32 %v1040_v26, %v3997_v32  ;;  %v623_v50 = vmul.f32 %v4342_v49, %v4342_v49  ;;  %v5728_v48 = vld [vmem:[#allocation27_spill] sm:$0xff] }
 0x1c2   :  { %v4348_v51 = vpop.eup %3315  ;;  %1450 = vmatmul.mubr.bf16.gmra.mrb[44].mxu1 %v1157_v63  ;;  %v749_v14 = vmul.f32 0.044715, %v685_v30  ;;  %v975_v45 = vadd.f32 1.0, %v4115_v40  ;;  %v875_v29 = vmul.f32 0.7978846, %v811_v21  ;;  %v1106_v7 = vmul.f32 %v1042_v4, %v4013_v2  ;;  %v5726_v21 = vld [vmem:[#allocation25_spill] sm:$0xff] }
 0x1c3   :  { %v4354_v33 = vpop.eup %3317  ;;  %v812_v6 = vadd.f32 %v748_v20, %v4313_v28  ;;  %v750_v62 = vmul.f32 0.044715, %v686_v24  ;;  %v687_v32 = vmul.f32 %v623_v50, %v4342_v49  ;;  %v977_v47 = vadd.f32 1.0, %v4140_v15  ;;  %v3212_v40 = vld [vmem:[#allocation8 + $0x74] ss:$8 sps:$4 sm:$0xff]   ;;  %2405 = vmatpush1.bf16.msra.mxu0 %v3207_v9 }
 0x1c4   :  { %v4358_v36 = vpop.eup %3319  ;;  %v813_v52 = vadd.f32 %v749_v14, %v4319_v54  ;;  %v1039_v57 = vmul.f32 0.5, %v975_v45  ;;  %3325 = vtanh.f32 %v875_v29  ;;  %v1160_v2 = vpack.c.bf16 %v1106_v7, %v1104_v5  ;;  %v5727_v15 = vld [vmem:[#allocation26_spill] sm:$0xff]  ;;  %2406 = vmatprep.subr.bf16.mxu0 %v3212_v40 }
 0x1c5   :  { %v4363_v11 = vpop.eup %3321  ;;  %v876_v63 = vmul.f32 0.7978846, %v812_v6  ;;  %v814_v30 = vadd.f32 %v750_v62, %v4327_v18  ;;  %v751_v26 = vmul.f32 0.044715, %v687_v32  ;;  %v1041_v42 = vmul.f32 0.5, %v977_v47  ;;  %v5729_v6 = vld [vmem:[#allocation28_spill] sm:$0xff] }
 0x1c6   :  { %v877_v25 = vmul.f32 0.7978846, %v813_v52  ;;  %v1103_v20 = vmul.f32 %v1039_v57, %v5726_v21  ;;  %1459 = vmatprep.mubr.bf16.mxu1 %v1160_v2  ;;  %v4369_v4 = vadd.f32 %v5727_v15, %v3802_v38  ;;  %v4373_v14 = vadd.f32 %v5728_v48, %v3799_v37  ;;  %v3210_v50 = vld [vmem:[#allocation8 + $0x70] ss:$8 sps:$4 sm:$0xff]  }
 0x1c7   :  { %3327 = vtanh.f32 %v876_v63  ;;  %v878_v24 = vmul.f32 0.7978846, %v814_v30  ;;  %v4375_v45 = vpop.eup %3323  ;;  %v815_v5 = vadd.f32 %v751_v26, %v4342_v49  ;;  %v1105_v29 = vmul.f32 %v1041_v42, %v4010_v61  ;;  %v5730_v2 = vld [vmem:[#allocation29_spill] sm:$0xff]  ;;  %2407 = vmatpush1.bf16.msra.mxu0 %v3210_v50 }
 0x1c8   :  { %3329 = vtanh.f32 %v877_v25  ;;  %v4381_v62 = vadd.f32 %v5729_v6, %v3802_v38  ;;  %v624_v7 = vmul.f32 %v4369_v4, %v4369_v4  ;;  %v625_v9 = vmul.f32 %v4373_v14, %v4373_v14 }
 0x1c9   :  { %3331 = vtanh.f32 %v878_v24  ;;  %v980_v52 = vadd.f32 1.0, %v4206_v43  ;;  %v879_v32 = vmul.f32 0.7978846, %v815_v5  ;;  %v1159_v47 = vpack.c.bf16 %v1105_v29, %v1103_v20 }
 0x1ca   :  { %v626_v57 = vmul.f32 %v4381_v62, %v4381_v62  ;;  %v982_v61 = vadd.f32 1.0, %v4213_v27  ;;  %v688_v63 = vmul.f32 %v624_v7, %v4369_v4  ;;  %v689_v40 = vmul.f32 %v625_v9, %v4373_v14  ;;  %v5731_v9 = vld [vmem:[#allocation30_spill] sm:$0xff] }
 0x1cb   :  { %v1044_v30 = vmul.f32 0.5, %v980_v52  ;;  %v4395_v25 = vadd.f32 %v5730_v2, %v3799_v37  ;;  %3333 = vtanh.f32 %v879_v32  ;;  %1460 = vmatmul.mubr.bf16.gmra.mrb[48].mxu1 %v1159_v47  ;;  %v979_v42 = vadd.f32 1.0, %v4200_v55 }
 0x1cc   :  { %v690_v43 = vmul.f32 %v626_v57, %v4381_v62  ;;  %v1046_v26 = vmul.f32 0.5, %v982_v61  ;;  %v752_v21 = vmul.f32 0.044715, %v688_v63  ;;  %v753_v20 = vmul.f32 0.044715, %v689_v40 }
 0x1cd   :  { %v1108_v27 = vmul.f32 %v1044_v30, %v4054_v3  ;;  %v627_v24 = vmul.f32 %v4395_v25, %v4395_v25  ;;  %v981_v5 = vadd.f32 1.0, %v4209_v17  ;;  %v1043_v50 = vmul.f32 0.5, %v979_v42 }
 0x1ce   :  { %v754_v15 = vmul.f32 0.044715, %v690_v43  ;;  %v1110_v48 = vmul.f32 %v1046_v26, %v4072_v39  ;;  %v4404_v29 = vpop.eup %3325  ;;  %v816_v6 = vadd.f32 %v752_v21, %v4369_v4  ;;  %v817_v7 = vadd.f32 %v753_v20, %v4373_v14  ;;  %v5732_v39 = vld [vmem:[#allocation33_spill] sm:$0xff]  ;;  %v5733_v26 = vld [vmem:[#allocation34_spill] sm:$0xff]  ;;  %v5734_v21 = vld [vmem:[#allocation31_spill] sm:$0xff] }
 0x1cf   :  { %v691_v55 = vmul.f32 %v627_v24, %v4395_v25  ;;  %v4411_v3 = vadd.f32 %v5731_v9, %v3802_v38  ;;  %v1045_v47 = vmul.f32 0.5, %v981_v5  ;;  %v1107_v57 = vmul.f32 %v1043_v50, %v5732_v39 }
 0x1d0   :  { %v818_v52 = vadd.f32 %v754_v15, %v4381_v62  ;;  %v1162_v32 = vpack.c.bf16 %v1110_v48, %v1108_v27  ;;  %v880_v61 = vmul.f32 0.7978846, %v816_v6  ;;  %v881_v63 = vmul.f32 0.7978846, %v817_v7  ;;  %v5735_v27 = vld [vmem:[#allocation32_spill] sm:$0xff] }
 0x1d1   :  { %v4415_v17 = vpop.eup %3327  ;;  %v755_v40 = vmul.f32 0.044715, %v691_v55  ;;  %v628_v30 = vmul.f32 %v4411_v3, %v4411_v3  ;;  %v1109_v42 = vmul.f32 %v1045_v47, %v5733_v26  ;;  %v4424_v20 = vadd.f32 %v5734_v21, %v3799_v37 }
 0x1d2   :  { %v4419_v2 = vpop.eup %3329  ;;  %v882_v43 = vmul.f32 0.7978846, %v818_v52  ;;  %1469 = vmatprep.mubr.bf16.mxu1 %v1162_v32  ;;  %v4428_v24 = vadd.f32 %v5735_v27, %v3802_v38  ;;  %3335 = vtanh.f32 %v880_v61  ;;  %v984_v50 = vadd.f32 1.0, %v4284_v16 }
 0x1d3   :  { %v4430_v15 = vpop.eup %3331  ;;  %v819_v48 = vadd.f32 %v755_v40, %v4395_v25  ;;  %v692_v5 = vmul.f32 %v628_v30, %v4411_v3  ;;  %3337 = vtanh.f32 %v881_v63  ;;  %v1161_v6 = vpack.c.bf16 %v1109_v42, %v1107_v57  ;;  %v5736_v57 = vld [vmem:[#allocation35_spill] sm:$0xff] }
 0x1d4   :  { %v629_v7 = vmul.f32 %v4424_v20, %v4424_v20  ;;  %v630_v55 = vmul.f32 %v4428_v24, %v4428_v24  ;;  %3339 = vtanh.f32 %v882_v43  ;;  %v986_v32 = vadd.f32 1.0, %v4293_v23 }
 0x1d5   :  { %v883_v9 = vmul.f32 0.7978846, %v819_v48  ;;  %v756_v52 = vmul.f32 0.044715, %v692_v5  ;;  %v4440_v47 = vpop.eup %3333  ;;  %1470 = vmatmul.mubr.bf16.gmra.mrb[52].mxu1 %v1161_v6  ;;  %v1048_v61 = vmul.f32 0.5, %v984_v50  ;;  %v4446_v63 = vadd.f32 %v5736_v57, %v3799_v37 }
 0x1d6   :  { %v693_v39 = vmul.f32 %v629_v7, %v4424_v20  ;;  %v694_v16 = vmul.f32 %v630_v55, %v4428_v24  ;;  %v1050_v30 = vmul.f32 0.5, %v986_v32  ;;  %v983_v43 = vadd.f32 1.0, %v4280_v60  ;;  %v5737_v60 = vld [vmem:[#allocation36_spill] sm:$0xff] }
 0x1d7   :  { %3341 = vtanh.f32 %v883_v9  ;;  %v820_v40 = vadd.f32 %v756_v52, %v4411_v3  ;;  %v1112_v42 = vmul.f32 %v1048_v61, %v4174_v34  ;;  %v631_v21 = vmul.f32 %v4446_v63, %v4446_v63 }
 0x1d8   :  { %v757_v26 = vmul.f32 0.044715, %v693_v39  ;;  %v758_v23 = vmul.f32 0.044715, %v694_v16  ;;  %v1114_v48 = vmul.f32 %v1050_v30, %v4184_v44  ;;  %v985_v5 = vadd.f32 1.0, %v4289_v58 }
 0x1d9   :  { %v884_v27 = vmul.f32 0.7978846, %v820_v40  ;;  %v1047_v50 = vmul.f32 0.5, %v983_v43  ;;  %v695_v55 = vmul.f32 %v631_v21, %v4446_v63  ;;  %v4460_v9 = vadd.f32 %v5737_v60, %v3802_v38  ;;  %v5738_v40 = vld [vmem:[#allocation37_spill] sm:$0xff]  ;;  %v5739_v43 = vld [vmem:[#allocation39_spill] sm:$0xff] }
 0x1da   :  { %v821_v6 = vadd.f32 %v757_v26, %v4424_v20  ;;  %v822_v7 = vadd.f32 %v758_v23, %v4428_v24  ;;  %v1164_v34 = vpack.c.bf16 %v1114_v48, %v1112_v42  ;;  %v1049_v52 = vmul.f32 0.5, %v985_v5 }
 0x1db   :  { %3343 = vtanh.f32 %v884_v27  ;;  %v1111_v32 = vmul.f32 %v1047_v50, %v4168_v19  ;;  %v759_v16 = vmul.f32 0.044715, %v695_v55  ;;  %v632_v58 = vmul.f32 %v4460_v9, %v4460_v9 }
 0x1dc   :  { %v885_v39 = vmul.f32 0.7978846, %v821_v6  ;;  %v886_v44 = vmul.f32 0.7978846, %v822_v7  ;;  %v4465_v61 = vpop.eup %3335  ;;  %1479 = vmatprep.mubr.bf16.mxu1 %v1164_v34  ;;  %v1113_v57 = vmul.f32 %v1049_v52, %v4181_v56  ;;  %v4470_v30 = vadd.f32 %v5738_v40, %v3799_v37  ;;  %v5740_v52 = vld [vmem:[#allocation40_spill] sm:$0xff] }
 0x1dd   :  { %v4474_v26 = vadd.f32 %v5739_v43, %v3802_v38  ;;  %v988_v19 = vadd.f32 1.0, %v4358_v36  ;;  %v4477_v23 = vpop.eup %3337  ;;  %v823_v42 = vadd.f32 %v759_v16, %v4446_v63  ;;  %v696_v21 = vmul.f32 %v632_v58, %v4460_v9 }
 0x1de   :  { %3345 = vtanh.f32 %v885_v39  ;;  %v990_v27 = vadd.f32 1.0, %v4375_v45  ;;  %v4482_v56 = vpop.eup %3339  ;;  %v1163_v48 = vpack.c.bf16 %v1113_v57, %v1111_v32  ;;  %v633_v5 = vmul.f32 %v4470_v30, %v4470_v30 }
 0x1df   :  { %3347 = vtanh.f32 %v886_v44  ;;  %v634_v50 = vmul.f32 %v4474_v26, %v4474_v26  ;;  %v887_v36 = vmul.f32 0.7978846, %v823_v42  ;;  %v760_v6 = vmul.f32 0.044715, %v696_v21 }
 0x1e0   :  { %v1052_v7 = vmul.f32 0.5, %v988_v19  ;;  %v1054_v55 = vmul.f32 0.5, %v990_v27  ;;  %1480 = vmatmul.mubr.bf16.gmra.mrb[56].mxu1 %v1163_v48  ;;  %v697_v34 = vmul.f32 %v633_v5, %v4470_v30  ;;  %v4494_v32 = vadd.f32 %v5740_v52, %v3799_v37  ;;  %v5742_v48 = vld [vmem:[#allocation43_spill] sm:$0xff] }
 0x1e1   :  { %v4488_v60 = vpop.eup %3341  ;;  %v698_v45 = vmul.f32 %v634_v50, %v4474_v26  ;;  %v987_v39 = vadd.f32 1.0, %v4354_v33  ;;  %3349 = vtanh.f32 %v887_v36  ;;  %v824_v44 = vadd.f32 %v760_v6, %v4460_v9 }
 0x1e2   :  { %5741 = vst [vmem:[#allocation23_spill] sm:$0xff] %v4494_v32  ;;  %v1116_v16 = vmul.f32 %v1052_v7, %v4250_v53  ;;  %v1118_v58 = vmul.f32 %v1054_v55, %v4278_v1  ;;  %v761_v57 = vmul.f32 0.044715, %v697_v34  ;;  %v635_v43 = vmul.f32 %v4494_v32, %v4494_v32  ;;  %v5743_v7 = vld [vmem:[#allocation22_spill] sm:$0xff] }
 0x1e3   :  { %v762_v40 = vmul.f32 0.044715, %v698_v45  ;;  %v989_v19 = vadd.f32 1.0, %v4363_v11  ;;  %v888_v42 = vmul.f32 0.7978846, %v824_v44  ;;  %v1051_v27 = vmul.f32 0.5, %v987_v39 }
 0x1e4   :  { %v1166_v21 = vpack.c.bf16 %v1118_v58, %v1116_v16  ;;  %v4505_v33 = vadd.f32 %v5742_v48, %v3802_v38  ;;  %v825_v53 = vadd.f32 %v761_v57, %v4470_v30  ;;  %v699_v50 = vmul.f32 %v635_v43, %v4494_v32  ;;  %v5744_v58 = vld [vmem:[#allocation47_spill] sm:$0xff]  ;;  %v5745_v43 = vld [vmem:[#allocation45_spill] sm:$0xff] }
 0x1e5   :  { %v4507_v5 = vpop.eup %3343  ;;  %v826_v1 = vadd.f32 %v762_v40, %v4474_v26  ;;  %v1053_v36 = vmul.f32 0.5, %v989_v19  ;;  %3351 = vtanh.f32 %v888_v42  ;;  %v1115_v11 = vmul.f32 %v1051_v27, %v4246_v8  ;;  %v5746_v27 = vld [vmem:[#allocation46_spill] sm:$0xff] }
 0x1e6   :  { %1489 = vmatprep.mubr.bf16.mxu1 %v1166_v21  ;;  %v636_v6 = vmul.f32 %v4505_v33, %v4505_v33  ;;  %v992_v55 = vadd.f32 1.0, %v5743_v7  ;;  %v889_v34 = vmul.f32 0.7978846, %v825_v53  ;;  %v763_v52 = vmul.f32 0.044715, %v699_v50  ;;  %v5748_v7 = vld [vmem:[#allocation21_spill] sm:$0xff] }
 0x1e7   :  { %v890_v45 = vmul.f32 0.7978846, %v826_v1  ;;  %v1117_v39 = vmul.f32 %v1053_v36, %v4265_v10  ;;  %v994_v57 = vadd.f32 1.0, %v5744_v58  ;;  %v4523_v8 = vadd.f32 %v5745_v43, %v3799_v37  ;;  %v5747_v1 = vld [vmem:[#allocation18_spill] sm:$0xff] }
 0x1e8   :  { %v4517_v44 = vpop.eup %3345  ;;  %v700_v16 = vmul.f32 %v636_v6, %v4505_v33  ;;  %v1056_v40 = vmul.f32 0.5, %v992_v55  ;;  %3353 = vtanh.f32 %v889_v34  ;;  %v827_v42 = vadd.f32 %v763_v52, %v4494_v32  ;;  %v5749_v34 = vld [vmem:[#allocation20_spill] sm:$0xff]  ;;  %v5750_v52 = vld [vmem:[#allocation41_spill] sm:$0xff] }
 0x1e9   :  { %v4525_v19 = vpop.eup %3347  ;;  %v1165_v21 = vpack.c.bf16 %v1117_v39, %v1115_v11  ;;  %v4530_v10 = vadd.f32 %v5746_v27, %v3802_v38  ;;  %3355 = vtanh.f32 %v890_v45  ;;  %v1058_v53 = vmul.f32 0.5, %v994_v57 }
 0x1ea   :  { %v764_v48 = vmul.f32 0.044715, %v700_v16  ;;  %v1120_v50 = vmul.f32 %v1056_v40, %v5747_v1  ;;  %v891_v36 = vmul.f32 0.7978846, %v827_v42  ;;  %v637_v37 = vmul.f32 %v4523_v8, %v4523_v8 }
 0x1eb   :  { %1490 = vmatmul.mubr.bf16.gmra.mrb[60].mxu1 %v1165_v21  ;;  %v638_v6 = vmul.f32 %v4530_v10, %v4530_v10  ;;  %v991_v55 = vadd.f32 1.0, %v5748_v7  ;;  %v4538_v11 = vpop.eup %3349  ;;  %v1122_v45 = vmul.f32 %v1058_v53, %v5749_v34  ;;  %v993_v39 = vadd.f32 1.0, %v5750_v52  ;;  %v5753_v52 = vld [vmem:[#allocation44_spill] sm:$0xff] }
 0x1ec   :  { %v828_v38 = vadd.f32 %v764_v48, %v4505_v33  ;;  %v996_v16 = vadd.f32 1.0, %v4257_v13  ;;  %3357 = vtanh.f32 %v891_v36  ;;  %v701_v58 = vmul.f32 %v637_v37, %v4523_v8  ;;  %v5751_v48 = vld [vmem:[#allocation17_spill] sm:$0xff]  ;;  %v5752_v13 = vld [vmem:[#allocation19_spill] sm:$0xff] }
 0x1ed   :  { %v702_v57 = vmul.f32 %v638_v6, %v4530_v10  ;;  %v1055_v40 = vmul.f32 0.5, %v991_v55  ;;  %v1168_v42 = vpack.c.bf16 %v1122_v45, %v1120_v50  ;;  %v1057_v21 = vmul.f32 0.5, %v993_v39 }
 0x1ee   :  { %v892_v43 = vmul.f32 0.7978846, %v828_v38  ;;  %v998_v27 = vadd.f32 1.0, %v4270_v22  ;;  %v765_v1 = vmul.f32 0.044715, %v701_v58  ;;  %v1060_v53 = vmul.f32 0.5, %v996_v16 }
 0x1ef   :  { %v766_v7 = vmul.f32 0.044715, %v702_v57  ;;  %v1119_v32 = vmul.f32 %v1055_v40, %v5751_v48  ;;  %v4548_v34 = vpop.eup %3351  ;;  %1499 = vmatprep.mubr.bf16.mxu1 %v1168_v42  ;;  %v1121_v36 = vmul.f32 %v1057_v21, %v5752_v13  ;;  %v995_v6 = vadd.f32 1.0, %v4220_v35  ;;  %v5756_v13 = vld [vmem:[#allocation49_spill] sm:$0xff] }
 0x1f0   :  { %3359 = vtanh.f32 %v892_v43  ;;  %v1062_v37 = vmul.f32 0.5, %v998_v27  ;;  %v829_v55 = vadd.f32 %v765_v1, %v4523_v8  ;;  %v1124_v22 = vmul.f32 %v1060_v53, %v4130_v31  ;;  %v5754_v31 = vld [vmem:[#allocation38_spill] sm:$0xff] }
 0x1f1   :  { %v830_v50 = vadd.f32 %v766_v7, %v4530_v10  ;;  %v997_v38 = vadd.f32 1.0, %v4267_v0  ;;  %v1167_v45 = vpack.c.bf16 %v1121_v36, %v1119_v32  ;;  %v1059_v16 = vmul.f32 0.5, %v995_v6  ;;  %v5755_v7 = vld [vmem:[#allocation42_spill] sm:$0xff] }
 0x1f2   :  { %v1126_v39 = vmul.f32 %v1062_v37, %v5753_v52  ;;  %v1000_v58 = vadd.f32 1.0, %v4337_v46  ;;  %v4558_v57 = vpop.eup %3353  ;;  %v893_v40 = vmul.f32 0.7978846, %v829_v55  ;;  %v1002_v35 = vadd.f32 1.0, %v4348_v51 }
 0x1f3   :  { %v894_v43 = vmul.f32 0.7978846, %v830_v50  ;;  %v1061_v42 = vmul.f32 0.5, %v997_v38  ;;  %v4561_v21 = vpop.eup %3355  ;;  %1500 = vmatmul.mubr.bf16.gmra.mrb[64].mxu1 %v1167_v45  ;;  %v1123_v1 = vmul.f32 %v1059_v16, %v5754_v31  ;;  %v999_v32 = vadd.f32 1.0, %v4315_v41  ;;  %v5757_v50 = vld [vmem:[#allocation51_spill] sm:$0xff]  ;;  %v5758_v45 = vld [vmem:[#allocation48_spill] sm:$0xff] }
 0x1f4   :  { %v1170_v27 = vpack.c.bf16 %v1126_v39, %v1124_v22  ;;  %v1064_v0 = vmul.f32 0.5, %v1000_v58  ;;  %3361 = vtanh.f32 %v893_v40  ;;  %v1066_v46 = vmul.f32 0.5, %v1002_v35  ;;  %v5759_v40 = vld [vmem:[#allocation50_spill] sm:$0xff] }
 0x1f5   :  { %v1125_v48 = vmul.f32 %v1061_v42, %v5755_v7  ;;  %v1001_v53 = vadd.f32 1.0, %v4344_v12  ;;  %3363 = vtanh.f32 %v894_v43  ;;  %v1063_v51 = vmul.f32 0.5, %v999_v32 }
 0x1f6   :  { %1509 = vmatprep.mubr.bf16.mxu1 %v1170_v27  ;;  %v1128_v36 = vmul.f32 %v1064_v0, %v5756_v13  ;;  %v1004_v37 = vadd.f32 1.0, %v4415_v17  ;;  %v4569_v6 = vpop.eup %3357  ;;  %v1130_v22 = vmul.f32 %v1066_v46, %v5757_v50  ;;  %v1006_v41 = vadd.f32 1.0, %v4430_v15 }
 0x1f7   :  { %v1169_v55 = vpack.c.bf16 %v1125_v48, %v1123_v1  ;;  %v1065_v38 = vmul.f32 0.5, %v1001_v53  ;;  %v1127_v52 = vmul.f32 %v1063_v51, %v5758_v45  ;;  %v1003_v12 = vadd.f32 1.0, %v4404_v29  ;;  %v3213_v45 = vld [vmem:[#allocation8 + $0x80] ss:$8 sps:$4 sm:$0xff]  }
 0x1f8   :  { %v1068_v39 = vmul.f32 0.5, %v1004_v37  ;;  %v1005_v16 = vadd.f32 1.0, %v4419_v2  ;;  %v1172_v58 = vpack.c.bf16 %v1130_v22, %v1128_v36  ;;  %v1070_v42 = vmul.f32 0.5, %v1006_v41 }
 0x1f9   :  { %v1129_v43 = vmul.f32 %v1065_v38, %v5759_v40  ;;  %v1008_v17 = vadd.f32 1.0, %v4465_v61  ;;  %v1067_v31 = vmul.f32 0.5, %v1003_v12  ;;  %v1010_v15 = vadd.f32 1.0, %v4482_v56  ;;  %v3215_v12 = vld [vmem:[#allocation8 + $0x84] ss:$8 sps:$4 sm:$0xff]  }
 0x1fa   :  { %v3360_v35 = vpop.eup %3359  ;;  %v1132_v27 = vmul.f32 %v1068_v39, %v4313_v28  ;;  %v1069_v1 = vmul.f32 0.5, %v1005_v16  ;;  %v1134_v32 = vmul.f32 %v1070_v42, %v4327_v18  ;;  %v1007_v29 = vadd.f32 1.0, %v4440_v47  ;;  %2408 = vmatprep.subr.bf16.mxu0 %v3215_v12 }
 0x1fb   :  { %v1171_v0 = vpack.c.bf16 %v1129_v43, %v1127_v52  ;;  %v1072_v7 = vmul.f32 0.5, %v1008_v17  ;;  %1510 = vmatmul.mubr.bf16.gmra.mrb[68].mxu1 %v1169_v55  ;;  %v4583_v2 = vmul.f32 %v1067_v31, %v4303_v59  ;;  %v1074_v61 = vmul.f32 0.5, %v1010_v15  ;;  %2409 = vmatpush1.bf16.msra.mxu0 %v3213_v45  ;;  %v3221_v15 = vld [vmem:[#allocation8 + $0xa4] ss:$8 sps:$4 sm:$0xff]  }
 0x1fc   :  { %v4586_v48 = vmul.f32 %v1069_v1, %v4319_v54  ;;  %v1009_v28 = vadd.f32 1.0, %v4477_v23  ;;  %1519 = vmatprep.mubr.bf16.mxu1 %v1172_v58  ;;  %v1174_v46 = vpack.c.bf16 %v1134_v32, %v1132_v27  ;;  %v1071_v53 = vmul.f32 0.5, %v1007_v29  ;;  %v3218_v58 = vld [vmem:[#allocation8 + $0x94] ss:$8 sps:$4 sm:$0xff]  }
 0x1fd   :  { %v4590_v56 = vmul.f32 %v1072_v7, %v4369_v4  ;;  %v1012_v18 = vadd.f32 1.0, %v4507_v5  ;;  %v4596_v59 = vmul.f32 %v1074_v61, %v4381_v62  ;;  %v1014_v54 = vadd.f32 1.0, %v4525_v19  ;;  %2410 = vmatprep.subr.bf16.mxu0 %v3218_v58 }
 0x1fe   :  { %v1173_v47 = vpack.c.bf16 %v4586_v48, %v4583_v2  ;;  %v1073_v13 = vmul.f32 0.5, %v1009_v28  ;;  %v3362_v36 = vpop.eup %3361  ;;  %v4600_v23 = vmul.f32 %v1071_v53, %v4342_v49  ;;  %v1011_v4 = vadd.f32 1.0, %v4488_v60  ;;  %v3219_v28 = vld [vmem:[#allocation8 + $0xa0] ss:$8 sps:$4 sm:$0xff]   ;;  %v3233_v48 = vld [vmem:[#allocation8 + $0xe4] ss:$8 sps:$4 sm:$0xff]  }
 0x1ff   :  { %v1076_v51 = vmul.f32 0.5, %v1012_v18  ;;  %v1013_v37 = vadd.f32 1.0, %v4517_v44  ;;  %v3364_v55 = vpop.eup %3363  ;;  %v1176_v5 = vpack.c.bf16 %v4596_v59, %v4590_v56  ;;  %v1078_v62 = vmul.f32 0.5, %v1014_v54  ;;  %v3224_v56 = vld [vmem:[#allocation8 + $0xb4] ss:$8 sps:$4 sm:$0xff]  }
 0x200   :  { %v1137_v50 = vmul.f32 %v1073_v13, %v4373_v14  ;;  %v1016_v22 = vadd.f32 1.0, %v4548_v34  ;;  %v1075_v38 = vmul.f32 0.5, %v1011_v4  ;;  %v1018_v49 = vadd.f32 1.0, %v4561_v21  ;;  %v3227_v18 = vld [vmem:[#allocation8 + $0xc4] ss:$8 sps:$4 sm:$0xff]  }
 0x201   :  { %v1140_v19 = vmul.f32 %v1076_v51, %v4411_v3  ;;  %v1077_v41 = vmul.f32 0.5, %v1013_v37  ;;  %v1142_v44 = vmul.f32 %v1078_v62, %v4428_v24  ;;  %v1015_v39 = vadd.f32 1.0, %v4538_v11  ;;  %v3230_v59 = vld [vmem:[#allocation8 + $0xd4] ss:$8 sps:$4 sm:$0xff]   ;;  %v3231_v2 = vld [vmem:[#allocation8 + $0xe0] ss:$8 sps:$4 sm:$0xff]  }
 0x202   :  { %v1175_v60 = vpack.c.bf16 %v1137_v50, %v4600_v23  ;;  %v1080_v52 = vmul.f32 0.5, %v1016_v22  ;;  %v1139_v14 = vmul.f32 %v1075_v38, %v4395_v25  ;;  %v1082_v34 = vmul.f32 0.5, %v1018_v49  ;;  %v3216_v25 = vld [vmem:[#allocation8 + $0x90] ss:$8 sps:$4 sm:$0xff]   ;;  %v1215_v54 = vld [vmem:[%s5654_s4] sm:$0x3] }
 0x203   :  { %v1141_v16 = vmul.f32 %v1077_v41, %v4424_v20  ;;  %v1017_v3 = vadd.f32 1.0, %v4558_v57  ;;  %1520 = vmatmul.mubr.bf16.gmra.mrb[72].mxu1 %v1171_v0  ;;  %v1178_v40 = vpack.c.bf16 %v1142_v44, %v1140_v19  ;;  %v1079_v43 = vmul.f32 0.5, %v1015_v39  ;;  %2411 = vmatpush1.bf16.msra.mxu0 %v3216_v25  ;;  %v3234_v13 = vld [vmem:[#allocation8 + $0xf0] ss:$8 sps:$4 sm:$0xff]   ;;  %v5762_v51 = vld [vmem:[#allocation16_spill] sm:$0xff] }
 0x204   :  { %v1144_v21 = vmul.f32 %v1080_v52, %v4460_v9  ;;  %v1020_v42 = vadd.f32 1.0, %v3360_v35  ;;  %1529 = vmatprep.mubr.bf16.mxu1 %v1174_v46  ;;  %v1146_v11 = vmul.f32 %v1082_v34, %v4474_v26  ;;  %v1022_v27 = vadd.f32 1.0, %v3364_v55  ;;  %2412 = vmatprep.subr.bf16.mxu0 %v3221_v15 }
 0x205   :  { %v1177_v24 = vpack.c.bf16 %v1141_v16, %v1139_v14  ;;  %v1081_v17 = vmul.f32 0.5, %v1017_v3  ;;  %v1143_v20 = vmul.f32 %v1079_v43, %v4446_v63  ;;  %v1019_v57 = vadd.f32 1.0, %v4569_v6  ;;  %v5760_v63 = vld [vmem:[#allocation23_spill] sm:$0xff] }
 0x206   :  { %v1084_v31 = vmul.f32 0.5, %v1020_v42  ;;  %v1021_v1 = vadd.f32 1.0, %v3362_v36  ;;  %v1180_v9 = vpack.c.bf16 %v1146_v11, %v1144_v21  ;;  %v1086_v0 = vmul.f32 0.5, %v1022_v27  ;;  %v5761_v36 = vld [vmem:[#allocation15_spill] sm:$0xff] }
 0x207   :  { %v1145_v35 = vmul.f32 %v1081_v17, %v4470_v30  ;;  %v1083_v7 = vmul.f32 0.5, %v1019_v57  ;;  %2413 = vmatpush1.bf16.msra.mxu0 %v3219_v28  ;;  %v4632_v23 = vrot.slane %v1215_v54, %v5761_v36  ;;  %v4635_v4 = vrot.slane %v1215_v54, %v5762_v51 }
 0x208   :  { %v1148_v32 = vmul.f32 %v1084_v31, %v4505_v33  ;;  %v1085_v26 = vmul.f32 0.5, %v1021_v1  ;;  %v1150_v61 = vmul.f32 %v1086_v0, %v4530_v10  ;;  %v3222_v33 = vld [vmem:[#allocation8 + $0xb0] ss:$8 sps:$4 sm:$0xff]   ;;  %2414 = vmatprep.subr.bf16.mxu0 %v3224_v56  ;;  %v3225_v10 = vld [vmem:[#allocation8 + $0xc0] ss:$8 sps:$4 sm:$0xff]  }
 0x209   :  { %v1179_v29 = vpack.c.bf16 %v1145_v35, %v1143_v20  ;;  %v1147_v46 = vmul.f32 %v1083_v7, %v5760_v63 }
 0x20a   :  { %v1149_v6 = vmul.f32 %v1085_v26, %v4523_v8  ;;  %v1182_v53 = vpack.c.bf16 %v1150_v61, %v1148_v32  ;;  %v3228_v8 = vld [vmem:[#allocation8 + $0xd0] ss:$8 sps:$4 sm:$0xff]  }
 0x20b   :  { %1530 = vmatmul.mubr.bf16.gmra.mrb[76].mxu1 %v1173_v47  ;;  %2415 = vmatpush1.bf16.msra.mxu0 %v3222_v33  ;;  %v3236_v47 = vld [vmem:[#allocation8 + $0xf4] ss:$8 sps:$4 sm:$0xff]  }
 0x20c   :  { %v1181_v30 = vpack.c.bf16 %v1149_v6, %v1147_v46  ;;  %1539 = vmatprep.mubr.bf16.mxu1 %v1176_v5  ;;  %2416 = vmatprep.subr.bf16.mxu0 %v3227_v18 }
 0x20f   :  { %2417 = vmatpush1.bf16.msra.mxu0 %v3225_v10 }
 0x210   :  { %2418 = vmatprep.subr.bf16.mxu0 %v3230_v59 }
 0x213   :  { %1540 = vmatmul.mubr.bf16.gmra.mrb[80].mxu1 %v1175_v60  ;;  %2419 = vmatpush1.bf16.msra.mxu0 %v3228_v8 }
 0x214   :  { %1549 = vmatprep.mubr.bf16.mxu1 %v1178_v40  ;;  %2420 = vmatprep.subr.bf16.mxu0 %v3233_v48 }
 0x217   :  { %2421 = vmatpush1.bf16.msra.mxu0 %v3231_v2 }
 0x218   :  { %2422 = vmatprep.subr.bf16.mxu0 %v3236_v47 }
 0x21b   :  { %1550 = vmatmul.mubr.bf16.gmra.mrb[84].mxu1 %v1177_v24  ;;  %2423 = vmatpush1.bf16.msra.mxu0 %v3234_v13 }
 0x21c   :  { %1559 = vmatprep.mubr.bf16.mxu1 %v1180_v9 }
 0x223   :  { %1560 = vmatmul.mubr.bf16.gmra.mrb[88].mxu1 %v1179_v29 }
 0x224   :  { %1569 = vmatprep.mubr.bf16.mxu1 %v1182_v53 }
 0x22b   :  { %1570 = vmatmul.mubr.bf16.gmra.mrb[92].mxu1 %v1181_v30 }
 0x261   :  { %v1421_v37 = vpop.f32.mrb[32].mxu1 }
 0x262   :  { %v4638_v55 = vadd.f32 %v1421_v37, %v4632_v23  ;;  %v1423_v5 = vpop.f32.mrb[33].mxu1 }
 0x263   :  { %v4641_v50 = vadd.f32 %v1423_v5, %v4635_v4  ;;  %v1425_v62 = vpop.f32.mrb[34].mxu1 }
 0x264   :  { %v1580_v22 = vmul.f32 %v4638_v55, %v4638_v55  ;;  %v4646_v19 = vadd.f32 %v1425_v62, %v4632_v23  ;;  %v1427_v38 = vpop.f32.mrb[35].mxu1 }
 0x265   :  { %v1581_v41 = vmul.f32 %v4641_v50, %v4641_v50  ;;  %v4651_v49 = vadd.f32 %v1427_v38, %v4635_v4 }
 0x266   :  { %v1644_v45 = vmul.f32 %v1580_v22, %v4638_v55  ;;  %v1582_v60 = vmul.f32 %v4646_v19, %v4646_v19 }
 0x267   :  { %v1645_v44 = vmul.f32 %v1581_v41, %v4641_v50  ;;  %v1583_v52 = vmul.f32 %v4651_v49, %v4651_v49 }
 0x268   :  { %v1708_v39 = vmul.f32 0.044715, %v1644_v45  ;;  %v1646_v12 = vmul.f32 %v1582_v60, %v4646_v19 }
 0x269   :  { %v1709_v14 = vmul.f32 0.044715, %v1645_v44  ;;  %v1647_v16 = vmul.f32 %v1583_v52, %v4651_v49 }
 0x26a   :  { %v1772_v34 = vadd.f32 %v1708_v39, %v4638_v55  ;;  %v1710_v3 = vmul.f32 0.044715, %v1646_v12 }
 0x26b   :  { %v1773_v58 = vadd.f32 %v1709_v14, %v4641_v50  ;;  %v1711_v40 = vmul.f32 0.044715, %v1647_v16 }
 0x26c   :  { %v1836_v21 = vmul.f32 0.7978846, %v1772_v34  ;;  %v1774_v43 = vadd.f32 %v1710_v3, %v4646_v19 }
 0x26d   :  { %v1837_v42 = vmul.f32 0.7978846, %v1773_v58  ;;  %v1775_v24 = vadd.f32 %v1711_v40, %v4651_v49 }
 0x26e   :  { %3365 = vtanh.f32 %v1836_v21  ;;  %v1838_v11 = vmul.f32 0.7978846, %v1774_v43 }
 0x26f   :  { %3367 = vtanh.f32 %v1837_v42  ;;  %v1839_v17 = vmul.f32 0.7978846, %v1775_v24 }
 0x270   :  { %3369 = vtanh.f32 %v1838_v11  ;;  %v1431_v27 = vpop.f32.mrb[36].mxu1 }
 0x271   :  { %3371 = vtanh.f32 %v1839_v17  ;;  %v4666_v25 = vadd.f32 %v1431_v27, %v4632_v23  ;;  %v1433_v20 = vpop.f32.mrb[37].mxu1 }
 0x272   :  { %v4669_v31 = vadd.f32 %v1433_v20, %v4635_v4  ;;  %v1435_v57 = vpop.f32.mrb[38].mxu1 }
 0x273   :  { %v1584_v1 = vmul.f32 %v4666_v25, %v4666_v25  ;;  %v4674_v15 = vadd.f32 %v1435_v57, %v4632_v23  ;;  %v1437_v9 = vpop.f32.mrb[39].mxu1 }
 0x274   :  { %v1585_v35 = vmul.f32 %v4669_v31, %v4669_v31  ;;  %v4679_v0 = vadd.f32 %v1437_v9, %v4635_v4 }
 0x275   :  { %v1648_v32 = vmul.f32 %v1584_v1, %v4666_v25  ;;  %v1586_v7 = vmul.f32 %v4674_v15, %v4674_v15 }
 0x276   :  { %v1649_v26 = vmul.f32 %v1585_v35, %v4669_v31  ;;  %v1587_v29 = vmul.f32 %v4679_v0, %v4679_v0 }
 0x277   :  { %v1712_v28 = vmul.f32 0.044715, %v1648_v32  ;;  %v1650_v63 = vmul.f32 %v1586_v7, %v4674_v15 }
 0x278   :  { %v3366_v61 = vpop.eup %3365  ;;  %v1713_v56 = vmul.f32 0.044715, %v1649_v26  ;;  %v1651_v53 = vmul.f32 %v1587_v29, %v4679_v0 }
 0x279   :  { %v3368_v46 = vpop.eup %3367  ;;  %v1964_v6 = vadd.f32 1.0, %v3366_v61  ;;  %v1776_v33 = vadd.f32 %v1712_v28, %v4666_v25  ;;  %v1714_v10 = vmul.f32 0.044715, %v1650_v63 }
 0x27a   :  { %v3370_v30 = vpop.eup %3369  ;;  %v1965_v18 = vadd.f32 1.0, %v3368_v46  ;;  %v1777_v48 = vadd.f32 %v1713_v56, %v4669_v31  ;;  %v1715_v47 = vmul.f32 0.044715, %v1651_v53 }
 0x27b   :  { %v3372_v59 = vpop.eup %3371  ;;  %v2028_v8 = vmul.f32 0.5, %v1964_v6  ;;  %v1966_v2 = vadd.f32 1.0, %v3370_v30  ;;  %v1840_v13 = vmul.f32 0.7978846, %v1776_v33  ;;  %v1778_v54 = vadd.f32 %v1714_v10, %v4674_v15 }
 0x27c   :  { %v1967_v37 = vadd.f32 1.0, %v3372_v59  ;;  %v2029_v5 = vmul.f32 0.5, %v1965_v18  ;;  %v1841_v22 = vmul.f32 0.7978846, %v1777_v48  ;;  %v1779_v38 = vadd.f32 %v1715_v47, %v4679_v0 }
 0x27d   :  { %v2030_v62 = vmul.f32 0.5, %v1966_v2  ;;  %3373 = vtanh.f32 %v1840_v13  ;;  %v1842_v41 = vmul.f32 0.7978846, %v1778_v54  ;;  %v2092_v60 = vmul.f32 %v2028_v8, %v4638_v55 }
 0x27e   :  { %v2031_v45 = vmul.f32 0.5, %v1967_v37  ;;  %3375 = vtanh.f32 %v1841_v22  ;;  %v1843_v52 = vmul.f32 0.7978846, %v1779_v38  ;;  %v2093_v39 = vmul.f32 %v2029_v5, %v4641_v50 }
 0x27f   :  { %v2094_v44 = vmul.f32 %v2030_v62, %v4646_v19  ;;  %3377 = vtanh.f32 %v1842_v41 }
 0x280   :  { %v2095_v12 = vmul.f32 %v2031_v45, %v4651_v49  ;;  %3379 = vtanh.f32 %v1843_v52 }
 0x281   :  { %v2156_v14 = vpack.c.bf16 %v2094_v44, %v2092_v60 }
 0x282   :  { %v2157_v16 = vpack.c.bf16 %v2095_v12, %v2093_v39 }
 0x283   :  { %v1441_v34 = vpop.f32.mrb[40].mxu1 }
 0x284   :  { %2424 = vmatprep.mubr.bf16.mxu0 %v2157_v16  ;;  %v4698_v3 = vadd.f32 %v1441_v34, %v4632_v23  ;;  %v1443_v58 = vpop.f32.mrb[41].mxu1 }
 0x285   :  { %2425 = vmatmul.mubr.bf16.vlgmr.msra.gmra.mrb[32].mxu0 %v2156_v14  ;;  %v4701_v55 = vadd.f32 %v1443_v58, %v4635_v4  ;;  %v1445_v19 = vpop.f32.mrb[42].mxu1 }
 0x286   :  { %v1588_v40 = vmul.f32 %v4698_v3, %v4698_v3  ;;  %v4706_v50 = vadd.f32 %v1445_v19, %v4632_v23  ;;  %v1447_v49 = vpop.f32.mrb[43].mxu1 }
 0x287   :  { %v3374_v21 = vpop.eup %3373  ;;  %v1589_v43 = vmul.f32 %v4701_v55, %v4701_v55  ;;  %v4711_v42 = vadd.f32 %v1447_v49, %v4635_v4 }
 0x288   :  { %v3376_v24 = vpop.eup %3375  ;;  %v1652_v11 = vmul.f32 %v1588_v40, %v4698_v3  ;;  %v1590_v17 = vmul.f32 %v4706_v50, %v4706_v50  ;;  %v1968_v27 = vadd.f32 1.0, %v3374_v21 }
 0x289   :  { %v3378_v20 = vpop.eup %3377  ;;  %v1653_v57 = vmul.f32 %v1589_v43, %v4701_v55  ;;  %v1591_v1 = vmul.f32 %v4711_v42, %v4711_v42  ;;  %v1969_v9 = vadd.f32 1.0, %v3376_v24 }
 0x28a   :  { %v3380_v35 = vpop.eup %3379  ;;  %v1716_v32 = vmul.f32 0.044715, %v1652_v11  ;;  %v1654_v7 = vmul.f32 %v1590_v17, %v4706_v50  ;;  %v1970_v26 = vadd.f32 1.0, %v3378_v20  ;;  %v2032_v29 = vmul.f32 0.5, %v1968_v27 }
 0x28b   :  { %v1717_v61 = vmul.f32 0.044715, %v1653_v57  ;;  %v1655_v28 = vmul.f32 %v1591_v1, %v4711_v42  ;;  %v1971_v63 = vadd.f32 1.0, %v3380_v35  ;;  %v2033_v46 = vmul.f32 0.5, %v1969_v9 }
 0x28c   :  { %v1780_v6 = vadd.f32 %v1716_v32, %v4698_v3  ;;  %v1718_v56 = vmul.f32 0.044715, %v1654_v7  ;;  %v2034_v53 = vmul.f32 0.5, %v1970_v26  ;;  %v2096_v8 = vmul.f32 %v2032_v29, %v4666_v25 }
 0x28d   :  { %v1781_v30 = vadd.f32 %v1717_v61, %v4701_v55  ;;  %v1719_v33 = vmul.f32 0.044715, %v1655_v28  ;;  %v2035_v10 = vmul.f32 0.5, %v1971_v63  ;;  %v2097_v13 = vmul.f32 %v2033_v46, %v4669_v31 }
 0x28e   :  { %v1844_v18 = vmul.f32 0.7978846, %v1780_v6  ;;  %v1782_v59 = vadd.f32 %v1718_v56, %v4706_v50  ;;  %v2098_v2 = vmul.f32 %v2034_v53, %v4674_v15 }
 0x28f   :  { %v1845_v48 = vmul.f32 0.7978846, %v1781_v30  ;;  %v1783_v47 = vadd.f32 %v1719_v33, %v4711_v42  ;;  %v2099_v54 = vmul.f32 %v2035_v10, %v4679_v0 }
 0x290   :  { %3381 = vtanh.f32 %v1844_v18  ;;  %v1846_v37 = vmul.f32 0.7978846, %v1782_v59  ;;  %v2158_v5 = vpack.c.bf16 %v2098_v2, %v2096_v8 }
 0x291   :  { %3383 = vtanh.f32 %v1845_v48  ;;  %v1847_v62 = vmul.f32 0.7978846, %v1783_v47  ;;  %v2159_v22 = vpack.c.bf16 %v2099_v54, %v2097_v13 }
 0x292   :  { %3385 = vtanh.f32 %v1846_v37 }
 0x293   :  { %3387 = vtanh.f32 %v1847_v62  ;;  %2434 = vmatprep.mubr.bf16.mxu0 %v2159_v22 }
 0x294   :  { %2435 = vmatmul.mubr.bf16.gmra.mrb[36].mxu0 %v2158_v5 }
 0x295   :  { %v1451_v38 = vpop.f32.mrb[44].mxu1 }
 0x296   :  { %v4730_v25 = vadd.f32 %v1451_v38, %v4632_v23  ;;  %v1453_v15 = vpop.f32.mrb[45].mxu1 }
 0x297   :  { %v4733_v41 = vadd.f32 %v1453_v15, %v4635_v4  ;;  %v1455_v31 = vpop.f32.mrb[46].mxu1 }
 0x298   :  { %v1592_v0 = vmul.f32 %v4730_v25, %v4730_v25  ;;  %v4738_v45 = vadd.f32 %v1455_v31, %v4632_v23  ;;  %v1457_v60 = vpop.f32.mrb[47].mxu1 }
 0x299   :  { %v1593_v44 = vmul.f32 %v4733_v41, %v4733_v41  ;;  %v4743_v52 = vadd.f32 %v1457_v60, %v4635_v4 }
 0x29a   :  { %v1656_v39 = vmul.f32 %v1592_v0, %v4730_v25  ;;  %v1594_v12 = vmul.f32 %v4738_v45, %v4738_v45  ;;  %v3382_v14 = vpop.eup %3381 }
 0x29b   :  { %v1657_v16 = vmul.f32 %v1593_v44, %v4733_v41  ;;  %v1595_v34 = vmul.f32 %v4743_v52, %v4743_v52  ;;  %v3384_v58 = vpop.eup %3383  ;;  %v1972_v49 = vadd.f32 1.0, %v3382_v14 }
 0x29c   :  { %v1720_v19 = vmul.f32 0.044715, %v1656_v39  ;;  %v1658_v40 = vmul.f32 %v1594_v12, %v4738_v45  ;;  %v3386_v21 = vpop.eup %3385  ;;  %v1973_v11 = vadd.f32 1.0, %v3384_v58 }
 0x29d   :  { %v1721_v43 = vmul.f32 0.044715, %v1657_v16  ;;  %v1659_v24 = vmul.f32 %v1595_v34, %v4743_v52  ;;  %v3388_v17 = vpop.eup %3387  ;;  %v1974_v57 = vadd.f32 1.0, %v3386_v21  ;;  %v2036_v1 = vmul.f32 0.5, %v1972_v49 }
 0x29e   :  { %v1784_v27 = vadd.f32 %v1720_v19, %v4730_v25  ;;  %v1722_v20 = vmul.f32 0.044715, %v1658_v40  ;;  %v1461_v32 = vpop.f32.mrb[48].mxu1  ;;  %v1975_v7 = vadd.f32 1.0, %v3388_v17  ;;  %v2037_v26 = vmul.f32 0.5, %v1973_v11 }
 0x29f   :  { %v1785_v9 = vadd.f32 %v1721_v43, %v4733_v41  ;;  %v1723_v35 = vmul.f32 0.044715, %v1659_v24  ;;  %v4757_v28 = vadd.f32 %v1461_v32, %v4632_v23  ;;  %v1463_v63 = vpop.f32.mrb[49].mxu1  ;;  %v2038_v46 = vmul.f32 0.5, %v1974_v57 }
 0x2a0   :  { %v1848_v29 = vmul.f32 0.7978846, %v1784_v27  ;;  %v1786_v61 = vadd.f32 %v1722_v20, %v4738_v45  ;;  %v4761_v53 = vadd.f32 %v1463_v63, %v4635_v4  ;;  %v1465_v30 = vpop.f32.mrb[50].mxu1  ;;  %v2039_v33 = vmul.f32 0.5, %v1975_v7 }
 0x2a1   :  { %v1849_v6 = vmul.f32 0.7978846, %v1785_v9  ;;  %v1787_v56 = vadd.f32 %v1723_v35, %v4743_v52  ;;  %v1596_v18 = vmul.f32 %v4757_v28, %v4757_v28  ;;  %v4766_v59 = vadd.f32 %v1465_v30, %v4632_v23  ;;  %v1467_v8 = vpop.f32.mrb[51].mxu1 }
 0x2a2   :  { %3389 = vtanh.f32 %v1848_v29  ;;  %v1850_v10 = vmul.f32 0.7978846, %v1786_v61  ;;  %v1597_v48 = vmul.f32 %v4761_v53, %v4761_v53  ;;  %v4771_v47 = vadd.f32 %v1467_v8, %v4635_v4 }
 0x2a3   :  { %3391 = vtanh.f32 %v1849_v6  ;;  %v1851_v2 = vmul.f32 0.7978846, %v1787_v56  ;;  %v1660_v13 = vmul.f32 %v1596_v18, %v4757_v28  ;;  %v1598_v54 = vmul.f32 %v4766_v59, %v4766_v59 }
 0x2a4   :  { %3393 = vtanh.f32 %v1850_v10  ;;  %v2101_v37 = vmul.f32 %v2037_v26, %v4701_v55  ;;  %v1661_v5 = vmul.f32 %v1597_v48, %v4761_v53  ;;  %v1599_v62 = vmul.f32 %v4771_v47, %v4771_v47 }
 0x2a5   :  { %3395 = vtanh.f32 %v1851_v2  ;;  %v2103_v22 = vmul.f32 %v2039_v33, %v4711_v42  ;;  %v1724_v38 = vmul.f32 0.044715, %v1660_v13  ;;  %v1662_v15 = vmul.f32 %v1598_v54, %v4766_v59 }
 0x2a6   :  { %v2100_v31 = vmul.f32 %v2036_v1, %v4698_v3  ;;  %v2102_v0 = vmul.f32 %v2038_v46, %v4706_v50  ;;  %v1725_v60 = vmul.f32 0.044715, %v1661_v5  ;;  %v1663_v44 = vmul.f32 %v1599_v62, %v4771_v47 }
 0x2a7   :  { %v2161_v39 = vpack.c.bf16 %v2103_v22, %v2101_v37  ;;  %v1788_v55 = vadd.f32 %v1724_v38, %v4757_v28  ;;  %v1726_v12 = vmul.f32 0.044715, %v1662_v15 }
 0x2a8   :  { %v2160_v14 = vpack.c.bf16 %v2102_v0, %v2100_v31  ;;  %v1789_v16 = vadd.f32 %v1725_v60, %v4761_v53  ;;  %v1727_v34 = vmul.f32 0.044715, %v1663_v44  ;;  %v1471_v58 = vpop.f32.mrb[52].mxu1 }
 0x2a9   :  { %2444 = vmatprep.mubr.bf16.mxu0 %v2161_v39  ;;  %v1852_v42 = vmul.f32 0.7978846, %v1788_v55  ;;  %v1790_v19 = vadd.f32 %v1726_v12, %v4766_v59  ;;  %v4789_v3 = vadd.f32 %v1471_v58, %v4632_v23  ;;  %v1473_v50 = vpop.f32.mrb[53].mxu1 }
 0x2aa   :  { %2445 = vmatmul.mubr.bf16.gmra.mrb[40].mxu0 %v2160_v14  ;;  %v1853_v40 = vmul.f32 0.7978846, %v1789_v16  ;;  %v1791_v49 = vadd.f32 %v1727_v34, %v4771_v47  ;;  %v4793_v21 = vadd.f32 %v1473_v50, %v4635_v4  ;;  %v1475_v43 = vpop.f32.mrb[54].mxu1 }
 0x2ab   :  { %3397 = vtanh.f32 %v1852_v42  ;;  %v1854_v11 = vmul.f32 0.7978846, %v1790_v19  ;;  %v1600_v17 = vmul.f32 %v4789_v3, %v4789_v3  ;;  %v4798_v27 = vadd.f32 %v1475_v43, %v4632_v23  ;;  %v1477_v20 = vpop.f32.mrb[55].mxu1 }
 0x2ac   :  { %v3390_v24 = vpop.eup %3389  ;;  %3399 = vtanh.f32 %v1853_v40  ;;  %v1855_v1 = vmul.f32 0.7978846, %v1791_v49  ;;  %v1601_v9 = vmul.f32 %v4793_v21, %v4793_v21  ;;  %v4803_v35 = vadd.f32 %v1477_v20, %v4635_v4 }
 0x2ad   :  { %v3392_v57 = vpop.eup %3391  ;;  %3401 = vtanh.f32 %v1854_v11  ;;  %v1664_v7 = vmul.f32 %v1600_v17, %v4789_v3  ;;  %v1602_v26 = vmul.f32 %v4798_v27, %v4798_v27  ;;  %v1976_v6 = vadd.f32 1.0, %v3390_v24 }
 0x2ae   :  { %v3394_v32 = vpop.eup %3393  ;;  %v1977_v29 = vadd.f32 1.0, %v3392_v57  ;;  %3403 = vtanh.f32 %v1855_v1  ;;  %v1665_v63 = vmul.f32 %v1601_v9, %v4793_v21  ;;  %v1603_v46 = vmul.f32 %v4803_v35, %v4803_v35 }
 0x2af   :  { %v3396_v61 = vpop.eup %3395  ;;  %v1728_v56 = vmul.f32 0.044715, %v1664_v7  ;;  %v1666_v30 = vmul.f32 %v1602_v26, %v4798_v27  ;;  %v1978_v2 = vadd.f32 1.0, %v3394_v32  ;;  %v2040_v48 = vmul.f32 0.5, %v1976_v6 }
 0x2b0   :  { %v1979_v33 = vadd.f32 1.0, %v3396_v61  ;;  %v2041_v10 = vmul.f32 0.5, %v1977_v29  ;;  %v1729_v18 = vmul.f32 0.044715, %v1665_v63  ;;  %v1667_v8 = vmul.f32 %v1603_v46, %v4803_v35 }
 0x2b1   :  { %v1792_v13 = vadd.f32 %v1728_v56, %v4789_v3  ;;  %v1730_v54 = vmul.f32 0.044715, %v1666_v30  ;;  %v2042_v38 = vmul.f32 0.5, %v1978_v2  ;;  %v2104_v44 = vmul.f32 %v2040_v48, %v4730_v25 }
 0x2b2   :  { %v2043_v37 = vmul.f32 0.5, %v1979_v33  ;;  %v1793_v5 = vadd.f32 %v1729_v18, %v4793_v21  ;;  %v1731_v62 = vmul.f32 0.044715, %v1667_v8  ;;  %v2105_v22 = vmul.f32 %v2041_v10, %v4733_v41 }
 0x2b3   :  { %v1856_v15 = vmul.f32 0.7978846, %v1792_v13  ;;  %v1794_v31 = vadd.f32 %v1730_v54, %v4798_v27  ;;  %v1481_v0 = vpop.f32.mrb[56].mxu1  ;;  %v2106_v16 = vmul.f32 %v2042_v38, %v4738_v45 }
 0x2b4   :  { %v2107_v60 = vmul.f32 %v2043_v37, %v4743_v52  ;;  %v1857_v39 = vmul.f32 0.7978846, %v1793_v5  ;;  %v1795_v55 = vadd.f32 %v1731_v62, %v4803_v35  ;;  %v4821_v12 = vadd.f32 %v1481_v0, %v4632_v23  ;;  %v1483_v14 = vpop.f32.mrb[57].mxu1 }
 0x2b5   :  { %v3398_v34 = vpop.eup %3397  ;;  %3405 = vtanh.f32 %v1856_v15  ;;  %v1858_v41 = vmul.f32 0.7978846, %v1794_v31  ;;  %v4825_v58 = vadd.f32 %v1483_v14, %v4635_v4  ;;  %v1485_v42 = vpop.f32.mrb[58].mxu1  ;;  %v2162_v11 = vpack.c.bf16 %v2106_v16, %v2104_v44 }
 0x2b6   :  { %v2163_v19 = vpack.c.bf16 %v2107_v60, %v2105_v22  ;;  %v3400_v52 = vpop.eup %3399  ;;  %3407 = vtanh.f32 %v1857_v39  ;;  %v1859_v25 = vmul.f32 0.7978846, %v1795_v55  ;;  %v1604_v50 = vmul.f32 %v4821_v12, %v4821_v12  ;;  %v1487_v49 = vpop.f32.mrb[59].mxu1 }
 0x2b7   :  { %v4830_v40 = vadd.f32 %v1485_v42, %v4632_v23  ;;  %v3402_v43 = vpop.eup %3401  ;;  %3409 = vtanh.f32 %v1858_v41  ;;  %v1605_v45 = vmul.f32 %v4825_v58, %v4825_v58  ;;  %v4835_v24 = vadd.f32 %v1487_v49, %v4635_v4 }
 0x2b8   :  { %2454 = vmatprep.mubr.bf16.mxu0 %v2163_v19  ;;  %v3404_v17 = vpop.eup %3403  ;;  %3411 = vtanh.f32 %v1859_v25  ;;  %v1668_v20 = vmul.f32 %v1604_v50, %v4821_v12  ;;  %v1981_v1 = vadd.f32 1.0, %v3400_v52  ;;  %v1980_v26 = vadd.f32 1.0, %v3398_v34 }
 0x2b9   :  { %v1606_v57 = vmul.f32 %v4830_v40, %v4830_v40  ;;  %v1669_v9 = vmul.f32 %v1605_v45, %v4825_v58  ;;  %v1607_v32 = vmul.f32 %v4835_v24, %v4835_v24  ;;  %2455 = vmatmul.mubr.bf16.gmra.mrb[44].mxu0 %v2162_v11  ;;  %v1983_v7 = vadd.f32 1.0, %v3404_v17 }
 0x2ba   :  { %v1732_v29 = vmul.f32 0.044715, %v1668_v20  ;;  %v2045_v63 = vmul.f32 0.5, %v1981_v1  ;;  %v1982_v46 = vadd.f32 1.0, %v3402_v43  ;;  %v2044_v33 = vmul.f32 0.5, %v1980_v26 }
 0x2bb   :  { %v1670_v61 = vmul.f32 %v1606_v57, %v4830_v40  ;;  %v1733_v6 = vmul.f32 0.044715, %v1669_v9  ;;  %v1671_v56 = vmul.f32 %v1607_v32, %v4835_v24  ;;  %v2047_v30 = vmul.f32 0.5, %v1983_v7 }
 0x2bc   :  { %v1796_v10 = vadd.f32 %v1732_v29, %v4821_v12  ;;  %v2109_v8 = vmul.f32 %v2045_v63, %v4761_v53  ;;  %v2046_v2 = vmul.f32 0.5, %v1982_v46  ;;  %v2108_v5 = vmul.f32 %v2044_v33, %v4757_v28 }
 0x2bd   :  { %v1734_v18 = vmul.f32 0.044715, %v1670_v61  ;;  %v1797_v48 = vadd.f32 %v1733_v6, %v4825_v58  ;;  %v1735_v13 = vmul.f32 0.044715, %v1671_v56  ;;  %v2111_v37 = vmul.f32 %v2047_v30, %v4771_v47 }
 0x2be   :  { %v1491_v54 = vpop.f32.mrb[60].mxu1  ;;  %v1860_v62 = vmul.f32 0.7978846, %v1796_v10  ;;  %v2110_v31 = vmul.f32 %v2046_v2, %v4766_v59 }
 0x2bf   :  { %v1798_v22 = vadd.f32 %v1734_v18, %v4830_v40  ;;  %v4852_v38 = vadd.f32 %v1491_v54, %v4632_v23  ;;  %v1493_v15 = vpop.f32.mrb[61].mxu1  ;;  %v3406_v0 = vpop.eup %3405  ;;  %v1861_v53 = vmul.f32 0.7978846, %v1797_v48  ;;  %v1799_v60 = vadd.f32 %v1735_v13, %v4835_v24 }
 0x2c0   :  { %v4857_v44 = vadd.f32 %v1493_v15, %v4635_v4  ;;  %v1495_v39 = vpop.f32.mrb[62].mxu1  ;;  %v2165_v47 = vpack.c.bf16 %v2111_v37, %v2109_v8  ;;  %v3408_v55 = vpop.eup %3407  ;;  %3413 = vtanh.f32 %v1860_v62  ;;  %v2164_v49 = vpack.c.bf16 %v2110_v31, %v2108_v5 }
 0x2c1   :  { %v1862_v28 = vmul.f32 0.7978846, %v1798_v22  ;;  %v1608_v14 = vmul.f32 %v4852_v38, %v4852_v38  ;;  %v4862_v16 = vadd.f32 %v1495_v39, %v4632_v23  ;;  %v1497_v34 = vpop.f32.mrb[63].mxu1  ;;  %v3410_v59 = vpop.eup %3409  ;;  %3415 = vtanh.f32 %v1861_v53 }
 0x2c2   :  { %v1863_v41 = vmul.f32 0.7978846, %v1799_v60  ;;  %v1609_v42 = vmul.f32 %v4857_v44, %v4857_v44  ;;  %v4867_v19 = vadd.f32 %v1497_v34, %v4635_v4  ;;  %2464 = vmatprep.mubr.bf16.mxu0 %v2165_v47  ;;  %v3412_v52 = vpop.eup %3411  ;;  %v1985_v11 = vadd.f32 1.0, %v3408_v55 }
 0x2c3   :  { %3417 = vtanh.f32 %v1862_v28  ;;  %v1672_v25 = vmul.f32 %v1608_v14, %v4852_v38  ;;  %v1610_v50 = vmul.f32 %v4862_v16, %v4862_v16  ;;  %2465 = vmatmul.mubr.bf16.gmra.mrb[48].mxu0 %v2164_v49  ;;  %v1987_v57 = vadd.f32 1.0, %v3412_v52 }
 0x2c4   :  { %3419 = vtanh.f32 %v1863_v41  ;;  %v1673_v43 = vmul.f32 %v1609_v42, %v4857_v44  ;;  %v1611_v45 = vmul.f32 %v4867_v19, %v4867_v19  ;;  %v1984_v1 = vadd.f32 1.0, %v3406_v0 }
 0x2c5   :  { %v1736_v17 = vmul.f32 0.044715, %v1672_v25  ;;  %v1674_v20 = vmul.f32 %v1610_v50, %v4862_v16  ;;  %v2049_v7 = vmul.f32 0.5, %v1985_v11  ;;  %v1986_v26 = vadd.f32 1.0, %v3410_v59 }
 0x2c6   :  { %v1737_v9 = vmul.f32 0.044715, %v1673_v43  ;;  %v1675_v32 = vmul.f32 %v1611_v45, %v4867_v19  ;;  %v1501_v63 = vpop.f32.mrb[64].mxu1  ;;  %v2051_v46 = vmul.f32 0.5, %v1987_v57  ;;  %v2048_v6 = vmul.f32 0.5, %v1984_v1 }
 0x2c7   :  { %v1800_v29 = vadd.f32 %v1736_v17, %v4852_v38  ;;  %v1738_v61 = vmul.f32 0.044715, %v1674_v20  ;;  %v4880_v33 = vadd.f32 %v1501_v63, %v4632_v23  ;;  %v1503_v10 = vpop.f32.mrb[65].mxu1  ;;  %v2113_v18 = vmul.f32 %v2049_v7, %v4793_v21 }
 0x2c8   :  { %v1801_v56 = vadd.f32 %v1737_v9, %v4857_v44  ;;  %v1739_v30 = vmul.f32 0.044715, %v1675_v32  ;;  %v4885_v48 = vadd.f32 %v1503_v10, %v4635_v4  ;;  %v1505_v13 = vpop.f32.mrb[66].mxu1  ;;  %v2115_v54 = vmul.f32 %v2051_v46, %v4803_v35 }
 0x2c9   :  { %v1864_v8 = vmul.f32 0.7978846, %v1800_v29  ;;  %v1802_v2 = vadd.f32 %v1738_v61, %v4862_v16  ;;  %v1612_v62 = vmul.f32 %v4880_v33, %v4880_v33  ;;  %v4892_v22 = vadd.f32 %v1505_v13, %v4632_v23  ;;  %v1507_v15 = vpop.f32.mrb[67].mxu1 }
 0x2ca   :  { %v1865_v37 = vmul.f32 0.7978846, %v1801_v56  ;;  %v1803_v5 = vadd.f32 %v1739_v30, %v4867_v19  ;;  %v4894_v21 = vpop.eup %3413  ;;  %v1613_v0 = vmul.f32 %v4885_v48, %v4885_v48  ;;  %v4899_v53 = vadd.f32 %v1507_v15, %v4635_v4 }
 0x2cb   :  { %3421 = vtanh.f32 %v1864_v8  ;;  %v1866_v31 = vmul.f32 0.7978846, %v1802_v2  ;;  %v3416_v35 = vpop.eup %3415  ;;  %v1676_v39 = vmul.f32 %v1612_v62, %v4880_v33  ;;  %v1614_v47 = vmul.f32 %v4892_v22, %v4892_v22 }
 0x2cc   :  { %3423 = vtanh.f32 %v1865_v37  ;;  %v1867_v60 = vmul.f32 0.7978846, %v1803_v5  ;;  %v1677_v28 = vmul.f32 %v1613_v0, %v4885_v48  ;;  %v1615_v14 = vmul.f32 %v4899_v53, %v4899_v53 }
 0x2cd   :  { %v4904_v55 = vpop.eup %3417  ;;  %3425 = vtanh.f32 %v1866_v31  ;;  %v2167_v34 = vpack.c.bf16 %v2115_v54, %v2113_v18  ;;  %v1740_v41 = vmul.f32 0.044715, %v1676_v39  ;;  %v1678_v42 = vmul.f32 %v1614_v47, %v4892_v22 }
 0x2ce   :  { %v3420_v59 = vpop.eup %3419  ;;  %3427 = vtanh.f32 %v1867_v60  ;;  %v2050_v52 = vmul.f32 0.5, %v1986_v26  ;;  %v1741_v25 = vmul.f32 0.044715, %v1677_v28  ;;  %v1679_v50 = vmul.f32 %v1615_v14, %v4899_v53  ;;  %v1511_v49 = vpop.f32.mrb[68].mxu1 }
 0x2cf   :  { %2474 = vmatprep.mubr.bf16.mxu0 %v2167_v34  ;;  %v2112_v43 = vmul.f32 %v2048_v6, %v4789_v3  ;;  %v1989_v45 = vadd.f32 1.0, %v3416_v35  ;;  %v1804_v11 = vadd.f32 %v1740_v41, %v4880_v33  ;;  %v1742_v17 = vmul.f32 0.044715, %v1678_v42  ;;  %v1513_v57 = vpop.f32.mrb[69].mxu1 }
 0x2d0   :  { %v4914_v20 = vadd.f32 %v1511_v49, %v4632_v23  ;;  %v2114_v1 = vmul.f32 %v2050_v52, %v4798_v27  ;;  %v1805_v9 = vadd.f32 %v1741_v25, %v4885_v48  ;;  %v1743_v32 = vmul.f32 0.044715, %v1679_v50  ;;  %v1515_v26 = vpop.f32.mrb[70].mxu1 }
 0x2d1   :  { %v4919_v7 = vadd.f32 %v1513_v57, %v4635_v4  ;;  %v1991_v29 = vadd.f32 1.0, %v3420_v59  ;;  %v1868_v61 = vmul.f32 0.7978846, %v1804_v11  ;;  %v1806_v3 = vadd.f32 %v1742_v17, %v4892_v22  ;;  %v1517_v6 = vpop.f32.mrb[71].mxu1 }
 0x2d2   :  { %v1616_v63 = vmul.f32 %v4914_v20, %v4914_v20  ;;  %v4925_v46 = vadd.f32 %v1515_v26, %v4632_v23  ;;  %v1869_v56 = vmul.f32 0.7978846, %v1805_v9  ;;  %v1807_v27 = vadd.f32 %v1743_v32, %v4899_v53 }
 0x2d3   :  { %v1617_v30 = vmul.f32 %v4919_v7, %v4919_v7  ;;  %v4931_v10 = vadd.f32 %v1517_v6, %v4635_v4  ;;  %3429 = vtanh.f32 %v1868_v61  ;;  %v1870_v18 = vmul.f32 0.7978846, %v1806_v3 }
 0x2d4   :  { %v1680_v8 = vmul.f32 %v1616_v63, %v4914_v20  ;;  %v1618_v2 = vmul.f32 %v4925_v46, %v4925_v46  ;;  %3431 = vtanh.f32 %v1869_v56  ;;  %v1871_v54 = vmul.f32 0.7978846, %v1807_v27 }
 0x2d5   :  { %v4936_v13 = vpop.eup %3421  ;;  %v1681_v37 = vmul.f32 %v1617_v30, %v4919_v7  ;;  %v1619_v5 = vmul.f32 %v4931_v10, %v4931_v10  ;;  %3433 = vtanh.f32 %v1870_v18  ;;  %v2166_v0 = vpack.c.bf16 %v2114_v1, %v2112_v43 }
 0x2d6   :  { %v4941_v62 = vpop.eup %3423  ;;  %v1744_v15 = vmul.f32 0.044715, %v1680_v8  ;;  %v1682_v31 = vmul.f32 %v1618_v2, %v4925_v46  ;;  %3435 = vtanh.f32 %v1871_v54  ;;  %v1521_v47 = vpop.f32.mrb[72].mxu1  ;;  %v2053_v28 = vmul.f32 0.5, %v1989_v45 }
 0x2d7   :  { %v4944_v35 = vpop.eup %3425  ;;  %v1745_v60 = vmul.f32 0.044715, %v1681_v37  ;;  %v1683_v39 = vmul.f32 %v1619_v5, %v4931_v10  ;;  %2475 = vmatmul.mubr.bf16.gmra.mrb[52].mxu0 %v2166_v0  ;;  %v4951_v41 = vadd.f32 %v1521_v47, %v4632_v23  ;;  %v1523_v42 = vpop.f32.mrb[73].mxu1  ;;  %v2055_v52 = vmul.f32 0.5, %v1991_v29 }
 0x2d8   :  { %v4947_v14 = vpop.eup %3427  ;;  %v1808_v34 = vadd.f32 %v1744_v15, %v4914_v20  ;;  %v1746_v59 = vmul.f32 0.044715, %v1682_v31  ;;  %v4955_v49 = vadd.f32 %v1523_v42, %v4635_v4  ;;  %v1525_v43 = vpop.f32.mrb[74].mxu1  ;;  %v2117_v45 = vmul.f32 %v2053_v28, %v4825_v58 }
 0x2d9   :  { %v1809_v25 = vadd.f32 %v1745_v60, %v4919_v7  ;;  %v1747_v50 = vmul.f32 0.044715, %v1683_v39  ;;  %v1620_v57 = vmul.f32 %v4951_v41, %v4951_v41  ;;  %v4962_v1 = vadd.f32 %v1525_v43, %v4632_v23  ;;  %v1527_v9 = vpop.f32.mrb[75].mxu1 }
 0x2da   :  { %v1872_v11 = vmul.f32 0.7978846, %v1808_v34  ;;  %v1810_v17 = vadd.f32 %v1746_v59, %v4925_v46  ;;  %v1621_v29 = vmul.f32 %v4955_v49, %v4955_v49  ;;  %v4968_v61 = vadd.f32 %v1527_v9, %v4635_v4 }
 0x2db   :  { %v1873_v32 = vmul.f32 0.7978846, %v1809_v25  ;;  %v1811_v26 = vadd.f32 %v1747_v50, %v4931_v10  ;;  %v1684_v3 = vmul.f32 %v1620_v57, %v4951_v41  ;;  %v1622_v63 = vmul.f32 %v4962_v1, %v4962_v1 }
 0x2dc   :  { %3437 = vtanh.f32 %v1872_v11  ;;  %v1874_v58 = vmul.f32 0.7978846, %v1810_v17  ;;  %v1685_v56 = vmul.f32 %v1621_v29, %v4955_v49  ;;  %v1623_v27 = vmul.f32 %v4968_v61, %v4968_v61 }
 0x2dd   :  { %3439 = vtanh.f32 %v1873_v32  ;;  %v1875_v6 = vmul.f32 0.7978846, %v1811_v26  ;;  %v4976_v30 = vpop.eup %3429  ;;  %v1748_v18 = vmul.f32 0.044715, %v1684_v3  ;;  %v1686_v8 = vmul.f32 %v1622_v63, %v4962_v1 }
 0x2de   :  { %3441 = vtanh.f32 %v1874_v58  ;;  %v2119_v2 = vmul.f32 %v2055_v52, %v4835_v24  ;;  %v4980_v54 = vpop.eup %3431  ;;  %v1749_v37 = vmul.f32 0.044715, %v1685_v56  ;;  %v1687_v5 = vmul.f32 %v1623_v27, %v4968_v61  ;;  %v1531_v31 = vpop.f32.mrb[76].mxu1 }
 0x2df   :  { %3443 = vtanh.f32 %v1875_v6  ;;  %v1988_v15 = vadd.f32 1.0, %v4894_v21  ;;  %v4984_v0 = vpop.eup %3433  ;;  %v1812_v60 = vadd.f32 %v1748_v18, %v4951_v41  ;;  %v1750_v39 = vmul.f32 0.044715, %v1686_v8  ;;  %v1533_v34 = vpop.f32.mrb[77].mxu1 }
 0x2e0   :  { %v2169_v47 = vpack.c.bf16 %v2119_v2, %v2117_v45  ;;  %v1990_v28 = vadd.f32 1.0, %v4904_v55  ;;  %v4988_v59 = vpop.eup %3435  ;;  %v1813_v24 = vadd.f32 %v1749_v37, %v4955_v49  ;;  %v1751_v42 = vmul.f32 0.044715, %v1687_v5  ;;  %v1535_v21 = vpop.f32.mrb[78].mxu1 }
 0x2e1   :  { %v2052_v52 = vmul.f32 0.5, %v1988_v15  ;;  %v4992_v25 = vadd.f32 %v1531_v31, %v4632_v23  ;;  %v1876_v50 = vmul.f32 0.7978846, %v1812_v60  ;;  %v1814_v43 = vadd.f32 %v1750_v39, %v4962_v1  ;;  %v1537_v55 = vpop.f32.mrb[79].mxu1 }
 0x2e2   :  { %2484 = vmatprep.mubr.bf16.mxu0 %v2169_v47  ;;  %v2054_v11 = vmul.f32 0.5, %v1990_v28  ;;  %v4996_v45 = vadd.f32 %v1533_v34, %v4635_v4  ;;  %v1877_v17 = vmul.f32 0.7978846, %v1813_v24  ;;  %v1815_v57 = vadd.f32 %v1751_v42, %v4968_v61 }
 0x2e3   :  { %v2116_v9 = vmul.f32 %v2052_v52, %v4821_v12  ;;  %v1624_v32 = vmul.f32 %v4992_v25, %v4992_v25  ;;  %3445 = vtanh.f32 %v1876_v50  ;;  %v1878_v26 = vmul.f32 0.7978846, %v1814_v43 }
 0x2e4   :  { %v2118_v29 = vmul.f32 %v2054_v11, %v4830_v40  ;;  %v1625_v58 = vmul.f32 %v4996_v45, %v4996_v45  ;;  %3447 = vtanh.f32 %v1877_v17  ;;  %v1879_v3 = vmul.f32 0.7978846, %v1815_v57 }
 0x2e5   :  { %v1688_v63 = vmul.f32 %v1624_v32, %v4992_v25  ;;  %v5007_v6 = vadd.f32 %v1535_v21, %v4632_v23  ;;  %3449 = vtanh.f32 %v1878_v26  ;;  %v5013_v18 = vadd.f32 %v1537_v55, %v4635_v4 }
 0x2e6   :  { %v5009_v56 = vpop.eup %3437  ;;  %v2168_v12 = vpack.c.bf16 %v2118_v29, %v2116_v9  ;;  %v1689_v27 = vmul.f32 %v1625_v58, %v4996_v45  ;;  %3451 = vtanh.f32 %v1879_v3  ;;  %v1993_v37 = vadd.f32 1.0, %v4941_v62  ;;  %v1541_v5 = vpop.f32.mrb[80].mxu1 }
 0x2e7   :  { %v5015_v40 = vpop.eup %3439  ;;  %v1752_v8 = vmul.f32 0.044715, %v1688_v63  ;;  %v1626_v2 = vmul.f32 %v5007_v6, %v5007_v6  ;;  %v1627_v60 = vmul.f32 %v5013_v18, %v5013_v18  ;;  %v1995_v39 = vadd.f32 1.0, %v4947_v14  ;;  %v1543_v28 = vpop.f32.mrb[81].mxu1 }
 0x2e8   :  { %v5020_v15 = vpop.eup %3441  ;;  %2485 = vmatmul.mubr.bf16.gmra.mrb[56].mxu0 %v2168_v12  ;;  %v1753_v31 = vmul.f32 0.044715, %v1689_v27  ;;  %v1992_v47 = vadd.f32 1.0, %v4936_v13  ;;  %v2057_v62 = vmul.f32 0.5, %v1993_v37  ;;  %v1994_v52 = vadd.f32 1.0, %v4944_v35  ;;  %v1545_v21 = vpop.f32.mrb[82].mxu1 }
 0x2e9   :  { %v5026_v34 = vpop.eup %3443  ;;  %v1816_v24 = vadd.f32 %v1752_v8, %v4992_v25  ;;  %v1690_v42 = vmul.f32 %v1626_v2, %v5007_v6  ;;  %v1691_v43 = vmul.f32 %v1627_v60, %v5013_v18  ;;  %v2059_v11 = vmul.f32 0.5, %v1995_v39  ;;  %v1547_v14 = vpop.f32.mrb[83].mxu1 }
 0x2ea   :  { %v1817_v50 = vadd.f32 %v1753_v31, %v4996_v45  ;;  %v2056_v55 = vmul.f32 0.5, %v1992_v47  ;;  %v2121_v57 = vmul.f32 %v2057_v62, %v4857_v44  ;;  %v2058_v9 = vmul.f32 0.5, %v1994_v52 }
 0x2eb   :  { %v1880_v17 = vmul.f32 0.7978846, %v1816_v24  ;;  %v1754_v13 = vmul.f32 0.044715, %v1690_v42  ;;  %v1755_v26 = vmul.f32 0.044715, %v1691_v43  ;;  %v2123_v29 = vmul.f32 %v2059_v11, %v4867_v19 }
 0x2ec   :  { %v1881_v32 = vmul.f32 0.7978846, %v1817_v50  ;;  %v2120_v58 = vmul.f32 %v2056_v55, %v4852_v38  ;;  %v2122_v3 = vmul.f32 %v2058_v9, %v4862_v16  ;;  %v5039_v63 = vadd.f32 %v1541_v5, %v4632_v23 }
 0x2ed   :  { %3453 = vtanh.f32 %v1880_v17  ;;  %v1818_v35 = vadd.f32 %v1754_v13, %v5007_v6  ;;  %v5041_v12 = vpop.eup %3445  ;;  %v1819_v44 = vadd.f32 %v1755_v26, %v5013_v18  ;;  %v2171_v27 = vpack.c.bf16 %v2123_v29, %v2121_v57 }
 0x2ee   :  { %3455 = vtanh.f32 %v1881_v32  ;;  %v5045_v8 = vadd.f32 %v1543_v28, %v4635_v4  ;;  %v5047_v19 = vpop.eup %3447  ;;  %v2170_v2 = vpack.c.bf16 %v2122_v3, %v2120_v58  ;;  %v1628_v37 = vmul.f32 %v5039_v63, %v5039_v63  ;;  %v1551_v5 = vpop.f32.mrb[84].mxu1 }
 0x2ef   :  { %v1882_v38 = vmul.f32 0.7978846, %v1818_v35  ;;  %v5052_v16 = vadd.f32 %v1545_v21, %v4632_v23  ;;  %v5054_v31 = vpop.eup %3449  ;;  %v1883_v60 = vmul.f32 0.7978846, %v1819_v44  ;;  %2494 = vmatprep.mubr.bf16.mxu0 %v2171_v27  ;;  %v5059_v47 = vadd.f32 %v1547_v14, %v4635_v4  ;;  %v1553_v24 = vpop.f32.mrb[85].mxu1 }
 0x2f0   :  { %v1629_v39 = vmul.f32 %v5045_v8, %v5045_v8  ;;  %v1997_v28 = vadd.f32 1.0, %v4980_v54  ;;  %v5062_v42 = vpop.eup %3451  ;;  %2495 = vmatmul.mubr.bf16.gmra.mrb[60].mxu0 %v2170_v2  ;;  %v1692_v62 = vmul.f32 %v1628_v37, %v5039_v63  ;;  %v1999_v21 = vadd.f32 1.0, %v4988_v59  ;;  %v1555_v50 = vpop.f32.mrb[86].mxu1 }
 0x2f1   :  { %3457 = vtanh.f32 %v1882_v38  ;;  %v1630_v52 = vmul.f32 %v5052_v16, %v5052_v16  ;;  %v1631_v11 = vmul.f32 %v5059_v47, %v5059_v47  ;;  %v1557_v55 = vpop.f32.mrb[87].mxu1  ;;  %v1996_v57 = vadd.f32 1.0, %v4976_v30 }
 0x2f2   :  { %3459 = vtanh.f32 %v1883_v60  ;;  %v1693_v43 = vmul.f32 %v1629_v39, %v5045_v8  ;;  %v2061_v54 = vmul.f32 0.5, %v1997_v28  ;;  %v1756_v14 = vmul.f32 0.044715, %v1692_v62 }
 0x2f3   :  { %v1694_v17 = vmul.f32 %v1630_v52, %v5052_v16  ;;  %v2063_v13 = vmul.f32 0.5, %v1999_v21  ;;  %v1695_v32 = vmul.f32 %v1631_v11, %v5059_v47  ;;  %v1998_v26 = vadd.f32 1.0, %v4984_v0 }
 0x2f4   :  { %v1757_v9 = vmul.f32 0.044715, %v1693_v43  ;;  %v2125_v59 = vmul.f32 %v2061_v54, %v4885_v48  ;;  %v1820_v29 = vadd.f32 %v1756_v14, %v5039_v63  ;;  %v2060_v3 = vmul.f32 0.5, %v1996_v57 }
 0x2f5   :  { %v1758_v58 = vmul.f32 0.044715, %v1694_v17  ;;  %v2127_v35 = vmul.f32 %v2063_v13, %v4899_v53  ;;  %v1759_v27 = vmul.f32 0.044715, %v1695_v32  ;;  %v2062_v38 = vmul.f32 0.5, %v1998_v26 }
 0x2f6   :  { %v1821_v44 = vadd.f32 %v1757_v9, %v5045_v8  ;;  %v5080_v2 = vadd.f32 %v1551_v5, %v4632_v23  ;;  %v1884_v37 = vmul.f32 0.7978846, %v1820_v29  ;;  %v2124_v0 = vmul.f32 %v2060_v3, %v4880_v33  ;;  %v1561_v39 = vpop.f32.mrb[88].mxu1 }
 0x2f7   :  { %v5082_v30 = vpop.eup %3453  ;;  %v1822_v48 = vadd.f32 %v1758_v58, %v5052_v16  ;;  %v2173_v60 = vpack.c.bf16 %v2127_v35, %v2125_v59  ;;  %v1823_v62 = vadd.f32 %v1759_v27, %v5059_v47  ;;  %v2126_v52 = vmul.f32 %v2062_v38, %v4892_v22  ;;  %v1563_v21 = vpop.f32.mrb[89].mxu1 }
 0x2f8   :  { %v5086_v28 = vpop.eup %3455  ;;  %v1885_v53 = vmul.f32 0.7978846, %v1821_v44  ;;  %v1632_v5 = vmul.f32 %v5080_v2, %v5080_v2  ;;  %3461 = vtanh.f32 %v1884_v37  ;;  %v5093_v11 = vadd.f32 %v1553_v24, %v4635_v4  ;;  %v1565_v54 = vpop.f32.mrb[90].mxu1 }
 0x2f9   :  { %v1886_v43 = vmul.f32 0.7978846, %v1822_v48  ;;  %2504 = vmatprep.mubr.bf16.mxu0 %v2173_v60  ;;  %v5096_v33 = vadd.f32 %v1555_v50, %v4632_v23  ;;  %v1887_v14 = vmul.f32 0.7978846, %v1823_v62  ;;  %v2172_v17 = vpack.c.bf16 %v2126_v52, %v2124_v0  ;;  %v1567_v22 = vpop.f32.mrb[91].mxu1 }
 0x2fa   :  { %3463 = vtanh.f32 %v1885_v53  ;;  %v1696_v13 = vmul.f32 %v1632_v5, %v5080_v2  ;;  %v1633_v9 = vmul.f32 %v5093_v11, %v5093_v11  ;;  %v5106_v32 = vadd.f32 %v1557_v55, %v4635_v4 }
 0x2fb   :  { %v5099_v57 = vpop.eup %3457  ;;  %3465 = vtanh.f32 %v1886_v43  ;;  %v1634_v24 = vmul.f32 %v5096_v33, %v5096_v33  ;;  %2505 = vmatmul.mubr.bf16.gmra.mrb[64].mxu0 %v2172_v17  ;;  %v2001_v26 = vadd.f32 1.0, %v5015_v40  ;;  %v2003_v29 = vadd.f32 1.0, %v5026_v34 }
 0x2fc   :  { %v5108_v50 = vpop.eup %3459  ;;  %3467 = vtanh.f32 %v1887_v14  ;;  %v1760_v59 = vmul.f32 0.044715, %v1696_v13  ;;  %v1697_v58 = vmul.f32 %v1633_v9, %v5093_v11  ;;  %v1635_v3 = vmul.f32 %v5106_v32, %v5106_v32 }
 0x2fd   :  { %v1698_v35 = vmul.f32 %v1634_v24, %v5096_v33  ;;  %v2000_v44 = vadd.f32 1.0, %v5009_v56  ;;  %v2065_v27 = vmul.f32 0.5, %v2001_v26  ;;  %v2067_v38 = vmul.f32 0.5, %v2003_v29 }
 0x2fe   :  { %v1824_v55 = vadd.f32 %v1760_v59, %v5080_v2  ;;  %v2002_v37 = vadd.f32 1.0, %v5020_v15  ;;  %v1761_v48 = vmul.f32 0.044715, %v1697_v58  ;;  %v1699_v40 = vmul.f32 %v1635_v3, %v5106_v32  ;;  %v1571_v0 = vpop.f32.mrb[92].mxu1 }
 0x2ff   :  { %v1762_v60 = vmul.f32 0.044715, %v1698_v35  ;;  %v2064_v34 = vmul.f32 0.5, %v2000_v44  ;;  %v2129_v62 = vmul.f32 %v2065_v27, %v4919_v7  ;;  %v2131_v52 = vmul.f32 %v2067_v38, %v4931_v10  ;;  %v5122_v43 = vpop.f32.mrb[93].mxu1 }
 0x300   :  { %v1888_v53 = vmul.f32 0.7978846, %v1824_v55  ;;  %v2066_v5 = vmul.f32 0.5, %v2002_v37  ;;  %v1825_v56 = vadd.f32 %v1761_v48, %v5093_v11  ;;  %v1763_v17 = vmul.f32 0.044715, %v1699_v40  ;;  %v5127_v13 = vpop.f32.mrb[94].mxu1 }
 0x301   :  { %v1826_v14 = vadd.f32 %v1762_v60, %v5096_v33  ;;  %v2128_v15 = vmul.f32 %v2064_v34, %v4914_v20  ;;  %v2175_v9 = vpack.c.bf16 %v2131_v52, %v2129_v62  ;;  %v5131_v7 = vadd.f32 %v1561_v39, %v4632_v23  ;;  %v5133_v10 = vpop.f32.mrb[95].mxu1 }
 0x302   :  { %3469 = vtanh.f32 %v1888_v53  ;;  %v2130_v24 = vmul.f32 %v2066_v5, %v4925_v46  ;;  %v5135_v59 = vpop.eup %3461  ;;  %v1889_v26 = vmul.f32 0.7978846, %v1825_v56  ;;  %v1827_v58 = vadd.f32 %v1763_v17, %v5106_v32 }
 0x303   :  { %v1890_v29 = vmul.f32 0.7978846, %v1826_v14  ;;  %v5139_v35 = vadd.f32 %v1563_v21, %v4635_v4  ;;  %2514 = vmatprep.mubr.bf16.mxu0 %v2175_v9  ;;  %v1636_v46 = vmul.f32 %v5131_v7, %v5131_v7  ;;  %v5146_v39 = vadd.f32 %v1565_v54, %v4632_v23 }
 0x304   :  { %v5141_v20 = vpop.eup %3463  ;;  %v2174_v3 = vpack.c.bf16 %v2130_v24, %v2128_v15  ;;  %v5149_v44 = vadd.f32 %v1567_v22, %v4635_v4  ;;  %3471 = vtanh.f32 %v1889_v26  ;;  %v1891_v27 = vmul.f32 0.7978846, %v1827_v58 }
 0x305   :  { %v5151_v55 = vpop.eup %3465  ;;  %v1637_v21 = vmul.f32 %v5139_v35, %v5139_v35  ;;  %v2005_v38 = vadd.f32 1.0, %v5047_v19  ;;  %3473 = vtanh.f32 %v1890_v29  ;;  %v1700_v48 = vmul.f32 %v1636_v46, %v5131_v7 }
 0x306   :  { %v5156_v37 = vpop.eup %3467  ;;  %2515 = vmatmul.mubr.bf16.gmra.mrb[68].mxu0 %v2174_v3  ;;  %v1638_v54 = vmul.f32 %v5146_v39, %v5146_v39  ;;  %v1639_v22 = vmul.f32 %v5149_v44, %v5149_v44  ;;  %3475 = vtanh.f32 %v1891_v27  ;;  %v2007_v40 = vadd.f32 1.0, %v5062_v42 }
 0x307   :  { %v1701_v60 = vmul.f32 %v1637_v21, %v5139_v35  ;;  %v2069_v34 = vmul.f32 0.5, %v2005_v38  ;;  %v1764_v53 = vmul.f32 0.044715, %v1700_v48  ;;  %v2004_v52 = vadd.f32 1.0, %v5041_v12 }
 0x308   :  { %v1702_v19 = vmul.f32 %v1638_v54, %v5146_v39  ;;  %v1703_v62 = vmul.f32 %v1639_v22, %v5149_v44  ;;  %v2071_v56 = vmul.f32 0.5, %v2007_v40  ;;  %v2006_v17 = vadd.f32 1.0, %v5054_v31 }
 0x309   :  { %v1765_v5 = vmul.f32 0.044715, %v1701_v60  ;;  %v2133_v14 = vmul.f32 %v2069_v34, %v4955_v49  ;;  %v1828_v15 = vadd.f32 %v1764_v53, %v5131_v7  ;;  %v2068_v26 = vmul.f32 0.5, %v2004_v52 }
 0x30a   :  { %v1766_v9 = vmul.f32 0.044715, %v1702_v19  ;;  %v1767_v24 = vmul.f32 0.044715, %v1703_v62  ;;  %v2135_v29 = vmul.f32 %v2071_v56, %v4968_v61  ;;  %v2070_v58 = vmul.f32 0.5, %v2006_v17 }
 0x30b   :  { %v1829_v42 = vadd.f32 %v1765_v5, %v5139_v35  ;;  %v5174_v3 = vadd.f32 %v1571_v0, %v4632_v23  ;;  %v1892_v46 = vmul.f32 0.7978846, %v1828_v15  ;;  %v2132_v27 = vmul.f32 %v2068_v26, %v4951_v41 }
 0x30c   :  { %v5176_v12 = vpop.eup %3469  ;;  %v1830_v49 = vadd.f32 %v1766_v9, %v5146_v39  ;;  %v1831_v31 = vadd.f32 %v1767_v24, %v5149_v44  ;;  %v2177_v38 = vpack.c.bf16 %v2135_v29, %v2133_v14  ;;  %v2134_v48 = vmul.f32 %v2070_v58, %v4962_v1 }
 0x30d   :  { %v1893_v21 = vmul.f32 0.7978846, %v1829_v42  ;;  %v1640_v61 = vmul.f32 %v5174_v3, %v5174_v3  ;;  %3477 = vtanh.f32 %v1892_v46  ;;  %v5186_v22 = vadd.f32 %v5122_v43, %v4635_v4 }
 0x30e   :  { %v1894_v54 = vmul.f32 0.7978846, %v1830_v49  ;;  %v1895_v0 = vmul.f32 0.7978846, %v1831_v31  ;;  %v3472_v60 = vpop.eup %3471  ;;  %2524 = vmatprep.mubr.bf16.mxu0 %v2177_v38  ;;  %v2176_v40 = vpack.c.bf16 %v2134_v48, %v2132_v27  ;;  %v5191_v34 = vadd.f32 %v5127_v13, %v4632_v23 }
 0x30f   :  { %3479 = vtanh.f32 %v1893_v21  ;;  %v1704_v41 = vmul.f32 %v1640_v61, %v5174_v3  ;;  %v5193_v1 = vpop.eup %3473  ;;  %v1641_v53 = vmul.f32 %v5186_v22, %v5186_v22  ;;  %v5199_v43 = vadd.f32 %v5133_v10, %v4635_v4 }
 0x310   :  { %3481 = vtanh.f32 %v1894_v54  ;;  %v2009_v19 = vadd.f32 1.0, %v5086_v28  ;;  %v3476_v62 = vpop.eup %3475  ;;  %2525 = vmatmul.mubr.bf16.gmra.mrb[72].mxu0 %v2176_v40  ;;  %v1642_v23 = vmul.f32 %v5191_v34, %v5191_v34  ;;  %v2011_v13 = vadd.f32 1.0, %v5108_v50 }
 0x311   :  { %3483 = vtanh.f32 %v1895_v0  ;;  %v1768_v52 = vmul.f32 0.044715, %v1704_v41  ;;  %v1705_v5 = vmul.f32 %v1641_v53, %v5186_v22  ;;  %v1643_v56 = vmul.f32 %v5199_v43, %v5199_v43 }
 0x312   :  { %v2073_v14 = vmul.f32 0.5, %v2009_v19  ;;  %v2008_v4 = vadd.f32 1.0, %v5082_v30  ;;  %v1706_v28 = vmul.f32 %v1642_v23, %v5191_v34  ;;  %v2075_v17 = vmul.f32 0.5, %v2011_v13 }
 0x313   :  { %v1832_v10 = vadd.f32 %v1768_v52, %v5174_v3  ;;  %v2010_v15 = vadd.f32 1.0, %v5099_v57  ;;  %v1769_v9 = vmul.f32 0.044715, %v1705_v5  ;;  %v1707_v24 = vmul.f32 %v1643_v56, %v5199_v43 }
 0x314   :  { %v2137_v50 = vmul.f32 %v2073_v14, %v4996_v45  ;;  %v2072_v26 = vmul.f32 0.5, %v2008_v4  ;;  %v1770_v29 = vmul.f32 0.044715, %v1706_v28  ;;  %v2139_v58 = vmul.f32 %v2075_v17, %v5013_v18 }
 0x315   :  { %v1896_v42 = vmul.f32 0.7978846, %v1832_v10  ;;  %v2074_v46 = vmul.f32 0.5, %v2010_v15  ;;  %v1833_v30 = vadd.f32 %v1769_v9, %v5186_v22  ;;  %v1771_v49 = vmul.f32 0.044715, %v1707_v24 }
 0x316   :  { %v2136_v31 = vmul.f32 %v2072_v26, %v4992_v25  ;;  %v2013_v27 = vadd.f32 1.0, %v5141_v20  ;;  %v1834_v57 = vadd.f32 %v1770_v29, %v5191_v34  ;;  %v2179_v21 = vpack.c.bf16 %v2139_v58, %v2137_v50 }
 0x317   :  { %3485 = vtanh.f32 %v1896_v42  ;;  %v2138_v38 = vmul.f32 %v2074_v46, %v5007_v6  ;;  %v3478_v45 = vpop.eup %3477  ;;  %v1897_v48 = vmul.f32 0.7978846, %v1833_v30  ;;  %v1835_v61 = vadd.f32 %v1771_v49, %v5199_v43 }
 0x318   :  { %v2015_v18 = vadd.f32 1.0, %v5156_v37  ;;  %v2077_v54 = vmul.f32 0.5, %v2013_v27  ;;  %v1898_v40 = vmul.f32 0.7978846, %v1834_v57  ;;  %2534 = vmatprep.mubr.bf16.mxu0 %v2179_v21  ;;  %v2012_v25 = vadd.f32 1.0, %v5135_v59 }
 0x319   :  { %v3480_v0 = vpop.eup %3479  ;;  %v2178_v41 = vpack.c.bf16 %v2138_v38, %v2136_v31  ;;  %v2014_v20 = vadd.f32 1.0, %v5151_v55  ;;  %3487 = vtanh.f32 %v1897_v48  ;;  %v1899_v19 = vmul.f32 0.7978846, %v1835_v61 }
 0x31a   :  { %v3482_v53 = vpop.eup %3481  ;;  %v2079_v52 = vmul.f32 0.5, %v2015_v18  ;;  %v2141_v6 = vmul.f32 %v2077_v54, %v5045_v8  ;;  %3489 = vtanh.f32 %v1898_v40  ;;  %v2076_v13 = vmul.f32 0.5, %v2012_v25 }
 0x31b   :  { %v3484_v23 = vpop.eup %3483  ;;  %2535 = vmatmul.mubr.bf16.gmra.mrb[76].mxu0 %v2178_v41  ;;  %v2078_v37 = vmul.f32 0.5, %v2014_v20  ;;  %v2017_v5 = vadd.f32 1.0, %v3472_v60  ;;  %3491 = vtanh.f32 %v1899_v19  ;;  %v2019_v14 = vadd.f32 1.0, %v3476_v62 }
 0x31c   :  { %v2143_v56 = vmul.f32 %v2079_v52, %v5059_v47  ;;  %v2016_v59 = vadd.f32 1.0, %v5176_v12  ;;  %v2140_v55 = vmul.f32 %v2076_v13, %v5039_v63  ;;  %v2018_v28 = vadd.f32 1.0, %v5193_v1 }
 0x31d   :  { %v2142_v4 = vmul.f32 %v2078_v37, %v5052_v16  ;;  %v2081_v10 = vmul.f32 0.5, %v2017_v5  ;;  %v2083_v17 = vmul.f32 0.5, %v2019_v14  ;;  %v2021_v9 = vadd.f32 1.0, %v3480_v0 }
 0x31e   :  { %v2181_v8 = vpack.c.bf16 %v2143_v56, %v2141_v6  ;;  %v2080_v15 = vmul.f32 0.5, %v2016_v59  ;;  %v2082_v50 = vmul.f32 0.5, %v2018_v28  ;;  %v2023_v60 = vadd.f32 1.0, %v3484_v23 }
 0x31f   :  { %v2180_v24 = vpack.c.bf16 %v2142_v4, %v2140_v55  ;;  %v2145_v47 = vmul.f32 %v2081_v10, %v5093_v11  ;;  %v2147_v62 = vmul.f32 %v2083_v17, %v5106_v32  ;;  %v2085_v12 = vmul.f32 0.5, %v2021_v9 }
 0x320   :  { %2544 = vmatprep.mubr.bf16.mxu0 %v2181_v8  ;;  %v2020_v26 = vadd.f32 1.0, %v3478_v45  ;;  %v2144_v16 = vmul.f32 %v2080_v15, %v5080_v2  ;;  %v2146_v42 = vmul.f32 %v2082_v50, %v5096_v33  ;;  %v2087_v1 = vmul.f32 0.5, %v2023_v60 }
 0x321   :  { %v3486_v63 = vpop.eup %3485  ;;  %v2022_v29 = vadd.f32 1.0, %v3482_v53  ;;  %v2183_v58 = vpack.c.bf16 %v2147_v62, %v2145_v47  ;;  %v2149_v31 = vmul.f32 %v2085_v12, %v5139_v35  ;;  %v2220_v53 = vld [vmem:[%s5656_s6] sm:$0x3]  ;;  %s3683_s6 = smov [#allocation10]  }
 0x322   :  { %v2084_v46 = vmul.f32 0.5, %v2020_v26  ;;  %v2024_v30 = vadd.f32 1.0, %v3486_v63  ;;  %v2182_v49 = vpack.c.bf16 %v2146_v42, %v2144_v16  ;;  %v2151_v11 = vmul.f32 %v2087_v1, %v5149_v44  ;;  %s2942_s8 = sshll.u32 %s3683_s6, 4  ;;  %s2943_s8 = int_to_ptr.vmem [resolvable:$true] %s2942_s8 }
 0x323   :  { %2545 = vmatmul.mubr.bf16.gmra.mrb[80].mxu0 %v2180_v24  ;;  %v2086_v27 = vmul.f32 0.5, %v2022_v29  ;;  %v3488_v32 = vpop.eup %3487  ;;  %v5246_v19 = vrot.slane %v2220_v53, %v5761_v36  ;;  %s3645_s9 = scalar_lea.vmem %s2943_s8, 8192  ;;  %p3650_p5 = scmp.lt.s32.totalorder %s2943_s8, %s2943_s8 }
 0x324   :  { %2554 = vmatprep.mubr.bf16.mxu0 %v2183_v58  ;;  %v3490_v57 = vpop.eup %3489  ;;  %v2185_v21 = vpack.c.bf16 %v2151_v11, %v2149_v31  ;;  %v2148_v2 = vmul.f32 %v2084_v46, %v5131_v7  ;;  %v2025_v38 = vadd.f32 1.0, %v3488_v32  ;;  %v2088_v61 = vmul.f32 0.5, %v2024_v30  ;;  %p3646_p4 = scmp.ne.s32.totalorder %s2943_s8, %s3645_s9  ;;  %p3651_p6 = scmp.lt.s32.totalorder %s3645_s9, %s3645_s9 }
 0x325   :  { %v2150_v33 = vmul.f32 %v2086_v27, %v5146_v39  ;;  %v3492_v45 = vpop.eup %3491  ;;  %v2026_v48 = vadd.f32 1.0, %v3490_v57 }
 0x326   :  { %v2027_v54 = vadd.f32 1.0, %v3492_v45  ;;  %v2089_v0 = vmul.f32 0.5, %v2025_v38  ;;  %v2152_v44 = vmul.f32 %v2088_v61, %v5174_v3  ;;  %v5249_v3 = vrot.slane %v2220_v53, %v5762_v51  ;;  %p3652_p7 = por %p3651_p6, %p3650_p5 }
 0x327   :  { %v2184_v18 = vpack.c.bf16 %v2150_v33, %v2148_v2  ;;  %v2090_v40 = vmul.f32 0.5, %v2026_v48 }
 0x328   :  { %v2091_v35 = vmul.f32 0.5, %v2027_v54  ;;  %v2153_v25 = vmul.f32 %v2089_v0, %v5186_v22  ;;  %p3653_p8 = pnand %p3652_p7, %p3646_p4 }
 0x329   :  { %v2154_v41 = vmul.f32 %v2090_v40, %v5191_v34 }
 0x32a   :  { %v2155_v7 = vmul.f32 %v2091_v35, %v5199_v43 }
 0x32b   :  { %2555 = vmatmul.mubr.bf16.gmra.mrb[84].mxu0 %v2182_v49  ;;  %v2186_v39 = vpack.c.bf16 %v2154_v41, %v2152_v44 }
 0x32c   :  { %2564 = vmatprep.mubr.bf16.mxu0 %v2185_v21  ;;  %v2187_v20 = vpack.c.bf16 %v2155_v7, %v2153_v25 }
 0x333   :  { %2565 = vmatmul.mubr.bf16.gmra.mrb[88].mxu0 %v2184_v18 }
 0x334   :  { %2574 = vmatprep.mubr.bf16.mxu0 %v2187_v20 }
 0x33b   :  { %2575 = vmatmul.mubr.bf16.gmra.mrb[92].mxu0 %v2186_v39 }
 0x358   :  { %v2426_v34 = vpop.f32.mrb[32].mxu0 }
 0x359   :  { %v5252_v22 = vadd.f32 %v2426_v34, %v5246_v19  ;;  %v2428_v43 = vpop.f32.mrb[33].mxu0 }
 0x35a   :  { %v5255_v52 = vadd.f32 %v2428_v43, %v5249_v3  ;;  %v2430_v6 = vpop.f32.mrb[34].mxu0 }
 0x35b   :  { %v5258_v23 = vadd.f32 %v2430_v6, %v5246_v19  ;;  %v2432_v13 = vpop.f32.mrb[35].mxu0  ;;  %v2585_v36 = vmul.f32 %v5252_v22, %v5252_v22 }
 0x35c   :  { %v5263_v37 = vadd.f32 %v2432_v13, %v5249_v3  ;;  %v2586_v51 = vmul.f32 %v5255_v52, %v5255_v52 }
 0x35d   :  { %v2587_v5 = vmul.f32 %v5258_v23, %v5258_v23 }
 0x35e   :  { %v2588_v56 = vmul.f32 %v5263_v37, %v5263_v37  ;;  %v2649_v14 = vadd.f32 %v2586_v51, %v2585_v36 }
 0x360   :  { %2650 = vadd.xlane.f32.xlu0 %v2649_v14  ;;  %v2652_v59 = vadd.f32 %v2588_v56, %v2587_v5 }
 0x364   :  { %2653 = vadd.xlane.f32.xlu0 %v2652_v59 }
 0x367   :  { %v2436_v55 = vpop.f32.mrb[36].mxu0 }
 0x368   :  { %v5272_v4 = vadd.f32 %v2436_v55, %v5246_v19  ;;  %v2438_v10 = vpop.f32.mrb[37].mxu0 }
 0x369   :  { %v5275_v28 = vadd.f32 %v2438_v10, %v5249_v3  ;;  %v2440_v8 = vpop.f32.mrb[38].mxu0 }
 0x36a   :  { %v5278_v17 = vadd.f32 %v2440_v8, %v5246_v19  ;;  %v2442_v15 = vpop.f32.mrb[39].mxu0  ;;  %v2589_v9 = vmul.f32 %v5272_v4, %v5272_v4 }
 0x36b   :  { %v5283_v24 = vadd.f32 %v2442_v15, %v5249_v3  ;;  %v2590_v50 = vmul.f32 %v5275_v28, %v5275_v28 }
 0x36c   :  { %v2591_v60 = vmul.f32 %v5278_v17, %v5278_v17 }
 0x36d   :  { %v2592_v47 = vmul.f32 %v5283_v24, %v5283_v24  ;;  %v2655_v62 = vadd.f32 %v2590_v50, %v2589_v9 }
 0x36f   :  { %2656 = vadd.xlane.f32.xlu1 %v2655_v62  ;;  %v2658_v12 = vadd.f32 %v2592_v47, %v2591_v60 }
 0x373   :  { %2659 = vadd.xlane.f32.xlu1 %v2658_v12 }
 0x37d   :  { %v2446_v26 = vpop.f32.mrb[40].mxu0 }
 0x37e   :  { %v5292_v63 = vadd.f32 %v2446_v26, %v5246_v19  ;;  %v2448_v16 = vpop.f32.mrb[41].mxu0 }
 0x37f   :  { %v5295_v42 = vadd.f32 %v2448_v16, %v5249_v3  ;;  %v2450_v1 = vpop.f32.mrb[42].mxu0 }
 0x380   :  { %v2593_v29 = vmul.f32 %v5292_v63, %v5292_v63  ;;  %v5300_v58 = vadd.f32 %v2450_v1, %v5246_v19  ;;  %v2452_v46 = vpop.f32.mrb[43].mxu0 }
 0x381   :  { %v2594_v30 = vmul.f32 %v5295_v42, %v5295_v42  ;;  %v5305_v49 = vadd.f32 %v2452_v46, %v5249_v3 }
 0x382   :  { %v2595_v31 = vmul.f32 %v5300_v58, %v5300_v58 }
 0x383   :  { %v2596_v11 = vmul.f32 %v5305_v49, %v5305_v49  ;;  %v2661_v27 = vadd.f32 %v2594_v30, %v2593_v29 }
 0x385   :  { %2662 = vadd.xlane.f32.xlu0 %v2661_v27  ;;  %v2664_v32 = vadd.f32 %v2596_v11, %v2595_v31 }
 0x387   :  { %2665 = vadd.xlane.f32.xlu1 %v2664_v32 }
 0x38c   :  { %v2456_v57 = vpop.f32.mrb[44].mxu0 }
 0x38d   :  { %v5312_v21 = vadd.f32 %v2456_v57, %v5246_v19  ;;  %v2458_v2 = vpop.f32.mrb[45].mxu0 }
 0x38e   :  { %v5315_v33 = vadd.f32 %v2458_v2, %v5249_v3  ;;  %v2460_v38 = vpop.f32.mrb[46].mxu0 }
 0x38f   :  { %v2597_v45 = vmul.f32 %v5312_v21, %v5312_v21  ;;  %v5320_v48 = vadd.f32 %v2460_v38, %v5246_v19  ;;  %v2462_v61 = vpop.f32.mrb[47].mxu0 }
 0x390   :  { %v2598_v18 = vmul.f32 %v5315_v33, %v5315_v33  ;;  %v5325_v54 = vadd.f32 %v2462_v61, %v5249_v3 }
 0x391   :  { %v2599_v0 = vmul.f32 %v5320_v48, %v5320_v48 }
 0x392   :  { %v2600_v40 = vmul.f32 %v5325_v54, %v5325_v54  ;;  %v2667_v35 = vadd.f32 %v2598_v18, %v2597_v45 }
 0x394   :  { %2668 = vadd.xlane.f32.xlu0 %v2667_v35  ;;  %v2670_v44 = vadd.f32 %v2600_v40, %v2599_v0 }
 0x396   :  { %2671 = vadd.xlane.f32.xlu1 %v2670_v44  ;;  %v2466_v41 = vpop.f32.mrb[48].mxu0 }
 0x397   :  { %v5332_v25 = vadd.f32 %v2466_v41, %v5246_v19  ;;  %v2468_v7 = vpop.f32.mrb[49].mxu0 }
 0x398   :  { %v5335_v39 = vadd.f32 %v2468_v7, %v5249_v3  ;;  %v2470_v20 = vpop.f32.mrb[50].mxu0 }
 0x399   :  { %v2601_v53 = vmul.f32 %v5332_v25, %v5332_v25  ;;  %v5340_v34 = vadd.f32 %v2470_v20, %v5246_v19  ;;  %v2472_v43 = vpop.f32.mrb[51].mxu0 }
 0x39a   :  { %v2602_v6 = vmul.f32 %v5335_v39, %v5335_v39  ;;  %v5345_v13 = vadd.f32 %v2472_v43, %v5249_v3 }
 0x39b   :  { %v2603_v36 = vmul.f32 %v5340_v34, %v5340_v34 }
 0x39c   :  { %v2604_v51 = vmul.f32 %v5345_v13, %v5345_v13  ;;  %v2673_v5 = vadd.f32 %v2602_v6, %v2601_v53 }
 0x39e   :  { %2674 = vadd.xlane.f32.xlu0 %v2673_v5  ;;  %v2676_v56 = vadd.f32 %v2604_v51, %v2603_v36 }
 0x3a0   :  { %2677 = vadd.xlane.f32.xlu1 %v2676_v56 }
 0x3aa   :  { %v2476_v14 = vpop.f32.mrb[52].mxu0 }
 0x3ab   :  { %v5352_v59 = vadd.f32 %v2476_v14, %v5246_v19  ;;  %v2478_v55 = vpop.f32.mrb[53].mxu0 }
 0x3ac   :  { %v5355_v10 = vadd.f32 %v2478_v55, %v5249_v3  ;;  %v2480_v8 = vpop.f32.mrb[54].mxu0 }
 0x3ad   :  { %v2605_v15 = vmul.f32 %v5352_v59, %v5352_v59  ;;  %v5360_v9 = vadd.f32 %v2480_v8, %v5246_v19  ;;  %v2482_v50 = vpop.f32.mrb[55].mxu0 }
 0x3ae   :  { %v2606_v60 = vmul.f32 %v5355_v10, %v5355_v10  ;;  %v5365_v47 = vadd.f32 %v2482_v50, %v5249_v3 }
 0x3af   :  { %v2607_v62 = vmul.f32 %v5360_v9, %v5360_v9 }
 0x3b0   :  { %v2608_v12 = vmul.f32 %v5365_v47, %v5365_v47  ;;  %v2679_v26 = vadd.f32 %v2606_v60, %v2605_v15 }
 0x3b2   :  { %2680 = vadd.xlane.f32.xlu0 %v2679_v26  ;;  %v2682_v16 = vadd.f32 %v2608_v12, %v2607_v62 }
 0x3b4   :  { %2683 = vadd.xlane.f32.xlu1 %v2682_v16 }
 0x3bb   :  { %v2486_v1 = vpop.f32.mrb[56].mxu0 }
 0x3bc   :  { %v5372_v29 = vadd.f32 %v2486_v1, %v5246_v19  ;;  %v2488_v46 = vpop.f32.mrb[57].mxu0 }
 0x3bd   :  { %v5375_v30 = vadd.f32 %v2488_v46, %v5249_v3  ;;  %v2490_v31 = vpop.f32.mrb[58].mxu0 }
 0x3be   :  { %v2609_v11 = vmul.f32 %v5372_v29, %v5372_v29  ;;  %v5380_v27 = vadd.f32 %v2490_v31, %v5246_v19  ;;  %v2492_v32 = vpop.f32.mrb[59].mxu0 }
 0x3bf   :  { %v2610_v57 = vmul.f32 %v5375_v30, %v5375_v30  ;;  %v5385_v2 = vadd.f32 %v2492_v32, %v5249_v3 }
 0x3c0   :  { %v2611_v38 = vmul.f32 %v5380_v27, %v5380_v27 }
 0x3c1   :  { %v2612_v45 = vmul.f32 %v5385_v2, %v5385_v2  ;;  %v2685_v61 = vadd.f32 %v2610_v57, %v2609_v11 }
 0x3c3   :  { %2686 = vadd.xlane.f32.xlu0 %v2685_v61  ;;  %v2688_v18 = vadd.f32 %v2612_v45, %v2611_v38  ;;  %v2496_v0 = vpop.f32.mrb[60].mxu0 }
 0x3c4   :  { %v5392_v40 = vadd.f32 %v2496_v0, %v5246_v19  ;;  %v2498_v35 = vpop.f32.mrb[61].mxu0 }
 0x3c5   :  { %2689 = vadd.xlane.f32.xlu1 %v2688_v18  ;;  %v5395_v44 = vadd.f32 %v2498_v35, %v5249_v3  ;;  %v2500_v41 = vpop.f32.mrb[62].mxu0 }
 0x3c6   :  { %v2613_v7 = vmul.f32 %v5392_v40, %v5392_v40  ;;  %v5400_v20 = vadd.f32 %v2500_v41, %v5246_v19  ;;  %v2502_v53 = vpop.f32.mrb[63].mxu0 }
 0x3c7   :  { %v2614_v43 = vmul.f32 %v5395_v44, %v5395_v44  ;;  %v5405_v6 = vadd.f32 %v2502_v53, %v5249_v3 }
 0x3c8   :  { %v2615_v36 = vmul.f32 %v5400_v20, %v5400_v20 }
 0x3c9   :  { %v2616_v51 = vmul.f32 %v5405_v6, %v5405_v6  ;;  %v2691_v5 = vadd.f32 %v2614_v43, %v2613_v7 }
 0x3cb   :  { %2692 = vadd.xlane.f32.xlu0 %v2691_v5  ;;  %v2694_v56 = vadd.f32 %v2616_v51, %v2615_v36 }
 0x3cd   :  { %2695 = vadd.xlane.f32.xlu1 %v2694_v56 }
 0x3ce   :  { %v2506_v14 = vpop.f32.mrb[64].mxu0 }
 0x3cf   :  { %v5412_v55 = vadd.f32 %v2506_v14, %v5246_v19  ;;  %v2508_v8 = vpop.f32.mrb[65].mxu0 }
 0x3d0   :  { %v5415_v15 = vadd.f32 %v2508_v8, %v5249_v3  ;;  %v2510_v50 = vpop.f32.mrb[66].mxu0 }
 0x3d1   :  { %v2617_v60 = vmul.f32 %v5412_v55, %v5412_v55  ;;  %v5420_v62 = vadd.f32 %v2510_v50, %v5246_v19  ;;  %v2512_v12 = vpop.f32.mrb[67].mxu0 }
 0x3d2   :  { %v2618_v26 = vmul.f32 %v5415_v15, %v5415_v15  ;;  %v5425_v16 = vadd.f32 %v2512_v12, %v5249_v3 }
 0x3d3   :  { %v2619_v1 = vmul.f32 %v5420_v62, %v5420_v62 }
 0x3d4   :  { %v2620_v46 = vmul.f32 %v5425_v16, %v5425_v16  ;;  %v2697_v31 = vadd.f32 %v2618_v26, %v2617_v60 }
 0x3d6   :  { %2698 = vadd.xlane.f32.xlu0 %v2697_v31  ;;  %v2700_v11 = vadd.f32 %v2620_v46, %v2619_v1 }
 0x3d8   :  { %2701 = vadd.xlane.f32.xlu1 %v2700_v11 }
 0x3d9   :  { %v2516_v32 = vpop.f32.mrb[68].mxu0 }
 0x3da   :  { %v5432_v57 = vadd.f32 %v2516_v32, %v5246_v19  ;;  %v2518_v38 = vpop.f32.mrb[69].mxu0 }
 0x3db   :  { %v5435_v45 = vadd.f32 %v2518_v38, %v5249_v3  ;;  %v2520_v61 = vpop.f32.mrb[70].mxu0 }
 0x3dc   :  { %v2621_v18 = vmul.f32 %v5432_v57, %v5432_v57  ;;  %v5440_v0 = vadd.f32 %v2520_v61, %v5246_v19  ;;  %v2522_v35 = vpop.f32.mrb[71].mxu0 }
 0x3dd   :  { %v2622_v41 = vmul.f32 %v5435_v45, %v5435_v45  ;;  %v5445_v7 = vadd.f32 %v2522_v35, %v5249_v3 }
 0x3de   :  { %v2623_v53 = vmul.f32 %v5440_v0, %v5440_v0 }
 0x3df   :  { %v2624_v43 = vmul.f32 %v5445_v7, %v5445_v7  ;;  %v2703_v36 = vadd.f32 %v2622_v41, %v2621_v18 }
 0x3e1   :  { %2704 = vadd.xlane.f32.xlu0 %v2703_v36  ;;  %v2706_v51 = vadd.f32 %v2624_v43, %v2623_v53 }
 0x3e3   :  { %2707 = vadd.xlane.f32.xlu1 %v2706_v51  ;;  %v2526_v5 = vpop.f32.mrb[72].mxu0 }
 0x3e4   :  { %v5452_v56 = vadd.f32 %v2526_v5, %v5246_v19  ;;  %v2528_v14 = vpop.f32.mrb[73].mxu0 }
 0x3e5   :  { %v5455_v8 = vadd.f32 %v2528_v14, %v5249_v3  ;;  %v2530_v50 = vpop.f32.mrb[74].mxu0 }
 0x3e6   :  { %v2625_v60 = vmul.f32 %v5452_v56, %v5452_v56  ;;  %v5460_v12 = vadd.f32 %v2530_v50, %v5246_v19  ;;  %v2532_v26 = vpop.f32.mrb[75].mxu0 }
 0x3e7   :  { %v2626_v1 = vmul.f32 %v5455_v8, %v5455_v8  ;;  %v5465_v46 = vadd.f32 %v2532_v26, %v5249_v3 }
 0x3e8   :  { %v2627_v31 = vmul.f32 %v5460_v12, %v5460_v12 }
 0x3e9   :  { %v2628_v11 = vmul.f32 %v5465_v46, %v5465_v46  ;;  %v2709_v32 = vadd.f32 %v2626_v1, %v2625_v60 }
 0x3eb   :  { %2710 = vadd.xlane.f32.xlu0 %v2709_v32  ;;  %v2712_v38 = vadd.f32 %v2628_v11, %v2627_v31 }
 0x3ed   :  { %v2651_v61 = vpop.xlane.xlu0 %2650  ;;  %2713 = vadd.xlane.f32.xlu1 %v2712_v38 }
 0x3ee   :  { %v2536_v18 = vpop.f32.mrb[76].mxu0  ;;  %v2745_v35 = vmax.f32 %v2651_v61, 1e-24 }
 0x3ef   :  { %v5472_v41 = vadd.f32 %v2536_v18, %v5246_v19  ;;  %v2538_v53 = vpop.f32.mrb[77].mxu0 }
 0x3f0   :  { %v5475_v43 = vadd.f32 %v2538_v53, %v5249_v3  ;;  %v2540_v36 = vpop.f32.mrb[78].mxu0  ;;  %3493 = vrsqrt.f32 %v2745_v35 }
 0x3f1   :  { %v2629_v51 = vmul.f32 %v5472_v41, %v5472_v41  ;;  %v5480_v5 = vadd.f32 %v2540_v36, %v5246_v19  ;;  %v2542_v14 = vpop.f32.mrb[79].mxu0  ;;  %v2654_v50 = vpop.xlane.xlu0 %2653 }
 0x3f2   :  { %v2630_v60 = vmul.f32 %v5475_v43, %v5475_v43  ;;  %v5485_v26 = vadd.f32 %v2542_v14, %v5249_v3  ;;  %v2746_v1 = vmax.f32 %v2654_v50, 1e-24 }
 0x3f3   :  { %5763 = vst [vmem:[#allocation24_spill] sm:$0xff] %v5480_v5  ;;  %v2631_v31 = vmul.f32 %v5480_v5, %v5480_v5 }
 0x3f4   :  { %5764 = vst [vmem:[#allocation25_spill] sm:$0xff] %v5485_v26  ;;  %v2632_v11 = vmul.f32 %v5485_v26, %v5485_v26  ;;  %v2715_v32 = vadd.f32 %v2630_v60, %v2629_v51  ;;  %3495 = vrsqrt.f32 %v2746_v1 }
 0x3f6   :  { %v2546_v38 = vpop.f32.mrb[80].mxu0  ;;  %2716 = vadd.xlane.f32.xlu0 %v2715_v32  ;;  %v2718_v61 = vadd.f32 %v2632_v11, %v2631_v31 }
 0x3f7   :  { %v5492_v18 = vadd.f32 %v2546_v38, %v5246_v19  ;;  %v2548_v35 = vpop.f32.mrb[81].mxu0 }
 0x3f8   :  { %v5495_v53 = vadd.f32 %v2548_v35, %v5249_v3  ;;  %v2550_v36 = vpop.f32.mrb[82].mxu0  ;;  %2719 = vadd.xlane.f32.xlu1 %v2718_v61 }
 0x3f9   :  { %5765 = vst [vmem:[#allocation26_spill] sm:$0xff] %v5492_v18  ;;  %v2633_v14 = vmul.f32 %v5492_v18, %v5492_v18  ;;  %v5500_v50 = vadd.f32 %v2550_v36, %v5246_v19  ;;  %v2552_v51 = vpop.f32.mrb[83].mxu0 }
 0x3fa   :  { %5766 = vst [vmem:[#allocation27_spill] sm:$0xff] %v5495_v53  ;;  %v3494_v60 = vpop.eup %3493  ;;  %v2634_v1 = vmul.f32 %v5495_v53, %v5495_v53  ;;  %v5505_v31 = vadd.f32 %v2552_v51, %v5249_v3 }
 0x3fb   :  { %5767 = vst [vmem:[#allocation28_spill] sm:$0xff] %v5500_v50  ;;  %v2635_v11 = vmul.f32 %v5500_v50, %v5500_v50  ;;  %v2809_v32 = vmul.f32 %v3494_v60, %v5252_v22  ;;  %v2810_v38 = vmul.f32 %v3494_v60, %v5255_v52 }
 0x3fc   :  { %v2636_v61 = vmul.f32 %v5505_v31, %v5505_v31  ;;  %v2721_v35 = vadd.f32 %v2634_v1, %v2633_v14  ;;  %v2657_v36 = vpop.xlane.xlu1 %2656 }
 0x3fd   :  { %2873 = vst [vmem:[#allocation10] sm:$0xff] %v2809_v32  ;;  %2874 = vst [vmem:[#allocation10 + $0x8] sm:$0xff] %v2810_v38  ;;  %v2747_v51 = vmax.f32 %v2657_v36, 1e-24 }
 0x3fe   :  { %v3496_v18 = vpop.eup %3495  ;;  %v2556_v26 = vpop.f32.mrb[84].mxu0  ;;  %2722 = vadd.xlane.f32.xlu0 %v2721_v35  ;;  %v2724_v53 = vadd.f32 %v2636_v61, %v2635_v11 }
 0x3ff   :  { %v5514_v5 = vadd.f32 %v2556_v26, %v5246_v19  ;;  %v2558_v50 = vpop.f32.mrb[85].mxu0  ;;  %v2811_v22 = vmul.f32 %v3496_v18, %v5258_v23  ;;  %v2812_v52 = vmul.f32 %v3496_v18, %v5263_v37  ;;  %3497 = vrsqrt.f32 %v2747_v51 }
 0x400   :  { %v5519_v60 = vadd.f32 %v2558_v50, %v5249_v3  ;;  %v2560_v14 = vpop.f32.mrb[86].mxu0  ;;  %2725 = vadd.xlane.f32.xlu1 %v2724_v53  ;;  %v2660_v26 = vpop.xlane.xlu1 %2659 }
 0x401   :  { %v2637_v1 = vmul.f32 %v5514_v5, %v5514_v5  ;;  %v5524_v11 = vadd.f32 %v2560_v14, %v5246_v19  ;;  %v2562_v32 = vpop.f32.mrb[87].mxu0  ;;  %2875 = vst [vmem:[#allocation10 + $0x10] sm:$0xff] %v2811_v22  ;;  %2876 = vst [vmem:[#allocation10 + $0x18] sm:$0xff] %v2812_v52  ;;  %v2748_v18 = vmax.f32 %v2660_v26, 1e-24 }
 0x402   :  { %v2638_v23 = vmul.f32 %v5519_v60, %v5519_v60  ;;  %v5529_v37 = vadd.f32 %v2562_v32, %v5249_v3 }
 0x403   :  { %v2639_v53 = vmul.f32 %v5524_v11, %v5524_v11  ;;  %3499 = vrsqrt.f32 %v2748_v18 }
 0x404   :  { %v2640_v50 = vmul.f32 %v5529_v37, %v5529_v37  ;;  %v2727_v38 = vadd.f32 %v2638_v23, %v2637_v1 }
 0x406   :  { %v2566_v61 = vpop.f32.mrb[88].mxu0  ;;  %2728 = vadd.xlane.f32.xlu0 %v2727_v38  ;;  %v2730_v35 = vadd.f32 %v2640_v50, %v2639_v53 }
 0x407   :  { %v5536_v36 = vadd.f32 %v2566_v61, %v5246_v19  ;;  %v2568_v51 = vpop.f32.mrb[89].mxu0 }
 0x408   :  { %v5539_v22 = vadd.f32 %v2568_v51, %v5249_v3  ;;  %v2570_v52 = vpop.f32.mrb[90].mxu0  ;;  %2731 = vadd.xlane.f32.xlu1 %v2730_v35 }
 0x409   :  { %5768 = vst [vmem:[#allocation29_spill] sm:$0xff] %v5536_v36  ;;  %v2641_v14 = vmul.f32 %v5536_v36, %v5536_v36  ;;  %v5544_v32 = vadd.f32 %v2570_v52, %v5246_v19  ;;  %v2572_v1 = vpop.f32.mrb[91].mxu0  ;;  %v3498_v26 = vpop.eup %3497 }
 0x40a   :  { %5769 = vst [vmem:[#allocation30_spill] sm:$0xff] %v5539_v22  ;;  %v2642_v23 = vmul.f32 %v5539_v22, %v5539_v22  ;;  %v5549_v18 = vadd.f32 %v2572_v1, %v5249_v3  ;;  %v2813_v50 = vmul.f32 %v3498_v26, %v5272_v4  ;;  %v2814_v38 = vmul.f32 %v3498_v26, %v5275_v28 }
 0x40b   :  { %5770 = vst [vmem:[#allocation33_spill] sm:$0xff] %v5544_v32  ;;  %v2643_v53 = vmul.f32 %v5544_v32, %v5544_v32 }
 0x40c   :  { %v2644_v61 = vmul.f32 %v5549_v18, %v5549_v18  ;;  %v2733_v35 = vadd.f32 %v2642_v23, %v2641_v14  ;;  %2877 = vst [vmem:[#allocation10 + $0x20] sm:$0xff] %v2813_v50  ;;  %2878 = vst [vmem:[#allocation10 + $0x28] sm:$0xff] %v2814_v38 }
 0x40d   :  { %v3500_v51 = vpop.eup %3499 }
 0x40e   :  { %v2576_v52 = vpop.f32.mrb[92].mxu0  ;;  %2734 = vadd.xlane.f32.xlu0 %v2733_v35  ;;  %v2736_v22 = vadd.f32 %v2644_v61, %v2643_v53  ;;  %v2815_v32 = vmul.f32 %v3500_v51, %v5278_v17  ;;  %v2816_v4 = vmul.f32 %v3500_v51, %v5283_v24 }
 0x40f   :  { %v5558_v1 = vadd.f32 %v2576_v52, %v5246_v19  ;;  %v2578_v36 = vpop.f32.mrb[93].mxu0 }
 0x410   :  { %v5563_v28 = vadd.f32 %v2578_v36, %v5249_v3  ;;  %v2580_v26 = vpop.f32.mrb[94].mxu0  ;;  %2737 = vadd.xlane.f32.xlu1 %v2736_v22  ;;  %2879 = vst [vmem:[#allocation10 + $0x30] sm:$0xff] %v2815_v32  ;;  %2880 = vst [vmem:[#allocation10 + $0x38] sm:$0xff] %v2816_v4 }
 0x411   :  { %v2645_v14 = vmul.f32 %v5558_v1, %v5558_v1  ;;  %v5568_v23 = vadd.f32 %v2580_v26, %v5246_v19  ;;  %v2582_v53 = vpop.f32.mrb[95].mxu0 }
 0x412   :  { %v2646_v50 = vmul.f32 %v5563_v28, %v5563_v28  ;;  %v5573_v17 = vadd.f32 %v2582_v53, %v5249_v3  ;;  %v2663_v24 = vpop.xlane.xlu0 %2662 }
 0x413   :  { %v2647_v36 = vmul.f32 %v5568_v23, %v5568_v23  ;;  %v2749_v22 = vmax.f32 %v2663_v24, 1e-24 }
 0x414   :  { %v2648_v38 = vmul.f32 %v5573_v17, %v5573_v17  ;;  %v2739_v61 = vadd.f32 %v2646_v50, %v2645_v14  ;;  %v2666_v19 = vpop.xlane.xlu1 %2665 }
 0x415   :  { %3501 = vrsqrt.f32 %v2749_v22  ;;  %v2750_v35 = vmax.f32 %v2666_v19, 1e-24 }
 0x416   :  { %2740 = vadd.xlane.f32.xlu0 %v2739_v61  ;;  %v2742_v32 = vadd.f32 %v2648_v38, %v2647_v36 }
 0x417   :  { %3503 = vrsqrt.f32 %v2750_v35 }
 0x418   :  { %2743 = vadd.xlane.f32.xlu1 %v2742_v32 }
 0x41f   :  { %v3502_v51 = vpop.eup %3501 }
 0x420   :  { %v2817_v3 = vmul.f32 %v3502_v51, %v5292_v63  ;;  %v2818_v52 = vmul.f32 %v3502_v51, %v5295_v42 }
 0x421   :  { %v3504_v4 = vpop.eup %3503  ;;  %v2669_v14 = vpop.xlane.xlu0 %2668 }
 0x422   :  { %2881 = vst [vmem:[#allocation10 + $0x40] sm:$0xff] %v2817_v3  ;;  %2882 = vst [vmem:[#allocation10 + $0x48] sm:$0xff] %v2818_v52  ;;  %v2819_v26 = vmul.f32 %v3504_v4, %v5300_v58  ;;  %v2820_v53 = vmul.f32 %v3504_v4, %v5305_v49  ;;  %v2751_v50 = vmax.f32 %v2669_v14, 1e-24 }
 0x423   :  { %v2672_v24 = vpop.xlane.xlu1 %2671 }
 0x424   :  { %2883 = vst [vmem:[#allocation10 + $0x50] sm:$0xff] %v2819_v26  ;;  %2884 = vst [vmem:[#allocation10 + $0x58] sm:$0xff] %v2820_v53  ;;  %3505 = vrsqrt.f32 %v2751_v50  ;;  %v2752_v36 = vmax.f32 %v2672_v24, 1e-24 }
 0x426   :  { %3507 = vrsqrt.f32 %v2752_v36 }
 0x42b   :  { %v2675_v22 = vpop.xlane.xlu0 %2674 }
 0x42c   :  { %v2753_v38 = vmax.f32 %v2675_v22, 1e-24 }
 0x42d   :  { %v2678_v61 = vpop.xlane.xlu1 %2677 }
 0x42e   :  { %v3506_v63 = vpop.eup %3505  ;;  %3509 = vrsqrt.f32 %v2753_v38  ;;  %v2754_v58 = vmax.f32 %v2678_v61, 1e-24 }
 0x42f   :  { %v2821_v42 = vmul.f32 %v3506_v63, %v5312_v21  ;;  %v2822_v19 = vmul.f32 %v3506_v63, %v5315_v33 }
 0x430   :  { %v3508_v35 = vpop.eup %3507  ;;  %3511 = vrsqrt.f32 %v2754_v58 }
 0x431   :  { %2885 = vst [vmem:[#allocation10 + $0x60] sm:$0xff] %v2821_v42  ;;  %2886 = vst [vmem:[#allocation10 + $0x68] sm:$0xff] %v2822_v19  ;;  %v2823_v49 = vmul.f32 %v3508_v35, %v5320_v48  ;;  %v2824_v32 = vmul.f32 %v3508_v35, %v5325_v54 }
 0x433   :  { %2887 = vst [vmem:[#allocation10 + $0x70] sm:$0xff] %v2823_v49  ;;  %2888 = vst [vmem:[#allocation10 + $0x78] sm:$0xff] %v2824_v32 }
 0x438   :  { %v3510_v51 = vpop.eup %3509 }
 0x439   :  { %v2825_v3 = vmul.f32 %v3510_v51, %v5332_v25  ;;  %v2826_v52 = vmul.f32 %v3510_v51, %v5335_v39 }
 0x43a   :  { %v3512_v21 = vpop.eup %3511 }
 0x43b   :  { %2889 = vst [vmem:[#allocation10 + $0x80] sm:$0xff] %v2825_v3  ;;  %2890 = vst [vmem:[#allocation10 + $0x88] sm:$0xff] %v2826_v52  ;;  %v2827_v33 = vmul.f32 %v3512_v21, %v5340_v34  ;;  %v2828_v4 = vmul.f32 %v3512_v21, %v5345_v13 }
 0x43d   :  { %2891 = vst [vmem:[#allocation10 + $0x90] sm:$0xff] %v2827_v33  ;;  %2892 = vst [vmem:[#allocation10 + $0x98] sm:$0xff] %v2828_v4 }
 0x43f   :  { %v2681_v48 = vpop.xlane.xlu0 %2680 }
 0x440   :  { %v2755_v26 = vmax.f32 %v2681_v48, 1e-24 }
 0x441   :  { %v2684_v54 = vpop.xlane.xlu1 %2683 }
 0x442   :  { %3513 = vrsqrt.f32 %v2755_v26  ;;  %v2756_v53 = vmax.f32 %v2684_v54, 1e-24 }
 0x444   :  { %3515 = vrsqrt.f32 %v2756_v53 }
 0x44c   :  { %v3514_v14 = vpop.eup %3513 }
 0x44d   :  { %v2829_v25 = vmul.f32 %v3514_v14, %v5352_v59  ;;  %v2830_v39 = vmul.f32 %v3514_v14, %v5355_v10 }
 0x44e   :  { %v3516_v50 = vpop.eup %3515 }
 0x44f   :  { %2893 = vst [vmem:[#allocation10 + $0xa0] sm:$0xff] %v2829_v25  ;;  %2894 = vst [vmem:[#allocation10 + $0xa8] sm:$0xff] %v2830_v39  ;;  %v2831_v34 = vmul.f32 %v3516_v50, %v5360_v9  ;;  %v2832_v13 = vmul.f32 %v3516_v50, %v5365_v47 }
 0x450   :  { %v2687_v24 = vpop.xlane.xlu0 %2686 }
 0x451   :  { %v2757_v36 = vmax.f32 %v2687_v24, 1e-24  ;;  %2895 = vst [vmem:[#allocation10 + $0xb0] sm:$0xff] %v2831_v34  ;;  %2896 = vst [vmem:[#allocation10 + $0xb8] sm:$0xff] %v2832_v13 }
 0x452   :  { %v2690_v22 = vpop.xlane.xlu1 %2689 }
 0x453   :  { %3517 = vrsqrt.f32 %v2757_v36  ;;  %v2758_v38 = vmax.f32 %v2690_v22, 1e-24 }
 0x455   :  { %3519 = vrsqrt.f32 %v2758_v38 }
 0x458   :  { %v2693_v63 = vpop.xlane.xlu0 %2692 }
 0x459   :  { %v2759_v61 = vmax.f32 %v2693_v63, 1e-24 }
 0x45a   :  { %v2696_v59 = vpop.xlane.xlu1 %2695 }
 0x45b   :  { %3521 = vrsqrt.f32 %v2759_v61  ;;  %v2760_v10 = vmax.f32 %v2696_v59, 1e-24 }
 0x45d   :  { %v3518_v42 = vpop.eup %3517  ;;  %3523 = vrsqrt.f32 %v2760_v10 }
 0x45e   :  { %v2833_v19 = vmul.f32 %v3518_v42, %v5372_v29  ;;  %v2834_v9 = vmul.f32 %v3518_v42, %v5375_v30 }
 0x45f   :  { %v3520_v47 = vpop.eup %3519 }
 0x460   :  { %2897 = vst [vmem:[#allocation10 + $0xc0] sm:$0xff] %v2833_v19  ;;  %2898 = vst [vmem:[#allocation10 + $0xc8] sm:$0xff] %v2834_v9  ;;  %v2835_v58 = vmul.f32 %v3520_v47, %v5380_v27  ;;  %v2836_v35 = vmul.f32 %v3520_v47, %v5385_v2 }
 0x462   :  { %2899 = vst [vmem:[#allocation10 + $0xd0] sm:$0xff] %v2835_v58  ;;  %2900 = vst [vmem:[#allocation10 + $0xd8] sm:$0xff] %v2836_v35  ;;  %v5771_v58 = vld [vmem:[#allocation24_spill] sm:$0xff]  ;;  %v5772_v35 = vld [vmem:[#allocation25_spill] sm:$0xff] }
 0x463   :  { %v2699_v49 = vpop.xlane.xlu0 %2698 }
 0x464   :  { %v2761_v32 = vmax.f32 %v2699_v49, 1e-24 }
 0x465   :  { %v3522_v51 = vpop.eup %3521  ;;  %v2702_v3 = vpop.xlane.xlu1 %2701 }
 0x466   :  { %v2837_v52 = vmul.f32 %v3522_v51, %v5392_v40  ;;  %v2838_v29 = vmul.f32 %v3522_v51, %v5395_v44  ;;  %3525 = vrsqrt.f32 %v2761_v32  ;;  %v2762_v30 = vmax.f32 %v2702_v3, 1e-24 }
 0x467   :  { %v3524_v21 = vpop.eup %3523 }
 0x468   :  { %2901 = vst [vmem:[#allocation10 + $0xe0] sm:$0xff] %v2837_v52  ;;  %2902 = vst [vmem:[#allocation10 + $0xe8] sm:$0xff] %v2838_v29  ;;  %v2839_v33 = vmul.f32 %v3524_v21, %v5400_v20  ;;  %v2840_v27 = vmul.f32 %v3524_v21, %v5405_v6  ;;  %3527 = vrsqrt.f32 %v2762_v30  ;;  %v5773_v29 = vld [vmem:[#allocation26_spill] sm:$0xff]  ;;  %v5774_v30 = vld [vmem:[#allocation27_spill] sm:$0xff] }
 0x46a   :  { %2903 = vst [vmem:[#allocation10 + $0xf0] sm:$0xff] %v2839_v33  ;;  %2904 = vst [vmem:[#allocation10 + $0xf8] sm:$0xff] %v2840_v27  ;;  %v5775_v33 = vld [vmem:[#allocation28_spill] sm:$0xff] }
 0x46e   :  { %v2705_v2 = vpop.xlane.xlu0 %2704 }
 0x46f   :  { %v2763_v4 = vmax.f32 %v2705_v2, 1e-24 }
 0x470   :  { %v2708_v48 = vpop.xlane.xlu1 %2707  ;;  %v3526_v26 = vpop.eup %3525 }
 0x471   :  { %3529 = vrsqrt.f32 %v2763_v4  ;;  %v2764_v40 = vmax.f32 %v2708_v48, 1e-24  ;;  %v2841_v44 = vmul.f32 %v3526_v26, %v5412_v55  ;;  %v2842_v54 = vmul.f32 %v3526_v26, %v5415_v15 }
 0x472   :  { %v3528_v53 = vpop.eup %3527 }
 0x473   :  { %3531 = vrsqrt.f32 %v2764_v40  ;;  %2905 = vst [vmem:[#allocation10 + $0x100] sm:$0xff] %v2841_v44  ;;  %2906 = vst [vmem:[#allocation10 + $0x108] sm:$0xff] %v2842_v54  ;;  %v2843_v20 = vmul.f32 %v3528_v53, %v5420_v62  ;;  %v2844_v6 = vmul.f32 %v3528_v53, %v5425_v16 }
 0x475   :  { %2907 = vst [vmem:[#allocation10 + $0x110] sm:$0xff] %v2843_v20  ;;  %2908 = vst [vmem:[#allocation10 + $0x118] sm:$0xff] %v2844_v6 }
 0x478   :  { %v2711_v14 = vpop.xlane.xlu0 %2710 }
 0x479   :  { %v2765_v25 = vmax.f32 %v2711_v14, 1e-24 }
 0x47a   :  { %v2714_v50 = vpop.xlane.xlu1 %2713 }
 0x47b   :  { %v3530_v39 = vpop.eup %3529  ;;  %3533 = vrsqrt.f32 %v2765_v25  ;;  %v2766_v15 = vmax.f32 %v2714_v50, 1e-24 }
 0x47c   :  { %v2845_v34 = vmul.f32 %v3530_v39, %v5432_v57  ;;  %v2846_v55 = vmul.f32 %v3530_v39, %v5435_v45 }
 0x47d   :  { %v3532_v13 = vpop.eup %3531  ;;  %3535 = vrsqrt.f32 %v2766_v15  ;;  %v5777_v15 = vld [vmem:[#allocation30_spill] sm:$0xff] }
 0x47e   :  { %2909 = vst [vmem:[#allocation10 + $0x120] sm:$0xff] %v2845_v34  ;;  %2910 = vst [vmem:[#allocation10 + $0x128] sm:$0xff] %v2846_v55  ;;  %v2847_v24 = vmul.f32 %v3532_v13, %v5440_v0  ;;  %v2848_v62 = vmul.f32 %v3532_v13, %v5445_v7  ;;  %v5776_v55 = vld [vmem:[#allocation29_spill] sm:$0xff] }
 0x480   :  { %2911 = vst [vmem:[#allocation10 + $0x130] sm:$0xff] %v2847_v24  ;;  %2912 = vst [vmem:[#allocation10 + $0x138] sm:$0xff] %v2848_v62  ;;  %v5778_v24 = vld [vmem:[#allocation33_spill] sm:$0xff] }
 0x483   :  { %v2717_v16 = vpop.xlane.xlu0 %2716 }
 0x484   :  { %v2767_v36 = vmax.f32 %v2717_v16, 1e-24 }
 0x485   :  { %v2720_v22 = vpop.xlane.xlu1 %2719  ;;  %v3534_v38 = vpop.eup %3533 }
 0x486   :  { %3537 = vrsqrt.f32 %v2767_v36  ;;  %v2768_v57 = vmax.f32 %v2720_v22, 1e-24  ;;  %v2849_v45 = vmul.f32 %v3534_v38, %v5452_v56  ;;  %v2850_v63 = vmul.f32 %v3534_v38, %v5455_v8 }
 0x487   :  { %v3536_v61 = vpop.eup %3535 }
 0x488   :  { %3539 = vrsqrt.f32 %v2768_v57  ;;  %2913 = vst [vmem:[#allocation10 + $0x140] sm:$0xff] %v2849_v45  ;;  %2914 = vst [vmem:[#allocation10 + $0x148] sm:$0xff] %v2850_v63  ;;  %v2851_v0 = vmul.f32 %v3536_v61, %v5460_v12  ;;  %v2852_v7 = vmul.f32 %v3536_v61, %v5465_v46 }
 0x48a   :  { %2915 = vst [vmem:[#allocation10 + $0x150] sm:$0xff] %v2851_v0  ;;  %2916 = vst [vmem:[#allocation10 + $0x158] sm:$0xff] %v2852_v7 }
 0x48b   :  { %v2723_v59 = vpop.xlane.xlu0 %2722 }
 0x48c   :  { %v2769_v10 = vmax.f32 %v2723_v59, 1e-24 }
 0x48d   :  { %v2726_v42 = vpop.xlane.xlu1 %2725 }
 0x48e   :  { %3541 = vrsqrt.f32 %v2769_v10  ;;  %v2770_v19 = vmax.f32 %v2726_v42, 1e-24 }
 0x490   :  { %v3538_v9 = vpop.eup %3537  ;;  %3543 = vrsqrt.f32 %v2770_v19 }
 0x491   :  { %v2853_v56 = vmul.f32 %v3538_v9, %v5472_v41  ;;  %v2854_v8 = vmul.f32 %v3538_v9, %v5475_v43 }
 0x492   :  { %v3540_v47 = vpop.eup %3539 }
 0x493   :  { %2917 = vst [vmem:[#allocation10 + $0x160] sm:$0xff] %v2853_v56  ;;  %2918 = vst [vmem:[#allocation10 + $0x168] sm:$0xff] %v2854_v8  ;;  %v2855_v12 = vmul.f32 %v3540_v47, %v5771_v58  ;;  %v2856_v46 = vmul.f32 %v3540_v47, %v5772_v35  ;;  %v2729_v49 = vpop.xlane.xlu0 %2728 }
 0x494   :  { %v2771_v32 = vmax.f32 %v2729_v49, 1e-24 }
 0x495   :  { %2919 = vst [vmem:[#allocation10 + $0x170] sm:$0xff] %v2855_v12  ;;  %2920 = vst [vmem:[#allocation10 + $0x178] sm:$0xff] %v2856_v46  ;;  %v2732_v51 = vpop.xlane.xlu1 %2731 }
 0x496   :  { %3545 = vrsqrt.f32 %v2771_v32  ;;  %v2772_v3 = vmax.f32 %v2732_v51, 1e-24 }
 0x498   :  { %v3542_v52 = vpop.eup %3541  ;;  %3547 = vrsqrt.f32 %v2772_v3 }
 0x499   :  { %v2857_v41 = vmul.f32 %v3542_v52, %v5773_v29  ;;  %v2858_v43 = vmul.f32 %v3542_v52, %v5774_v30 }
 0x49a   :  { %v3544_v21 = vpop.eup %3543 }
 0x49b   :  { %2921 = vst [vmem:[#allocation10 + $0x180] sm:$0xff] %v2857_v41  ;;  %2922 = vst [vmem:[#allocation10 + $0x188] sm:$0xff] %v2858_v43  ;;  %v2859_v27 = vmul.f32 %v3544_v21, %v5775_v33  ;;  %v2860_v2 = vmul.f32 %v3544_v21, %v5505_v31  ;;  %v2735_v4 = vpop.xlane.xlu0 %2734 }
 0x49c   :  { %v2773_v48 = vmax.f32 %v2735_v4, 1e-24 }
 0x49d   :  { %2923 = vst [vmem:[#allocation10 + $0x190] sm:$0xff] %v2859_v27  ;;  %2924 = vst [vmem:[#allocation10 + $0x198] sm:$0xff] %v2860_v2  ;;  %v2738_v26 = vpop.xlane.xlu1 %2737 }
 0x49e   :  { %3549 = vrsqrt.f32 %v2773_v48  ;;  %v2774_v40 = vmax.f32 %v2738_v26, 1e-24 }
 0x4a0   :  { %v3546_v44 = vpop.eup %3545  ;;  %3551 = vrsqrt.f32 %v2774_v40 }
 0x4a1   :  { %v2861_v54 = vmul.f32 %v3546_v44, %v5514_v5  ;;  %v2862_v53 = vmul.f32 %v3546_v44, %v5519_v60 }
 0x4a2   :  { %v3548_v20 = vpop.eup %3547 }
 0x4a3   :  { %2925 = vst [vmem:[#allocation10 + $0x1a0] sm:$0xff] %v2861_v54  ;;  %2926 = vst [vmem:[#allocation10 + $0x1a8] sm:$0xff] %v2862_v53  ;;  %v2863_v6 = vmul.f32 %v3548_v20, %v5524_v11  ;;  %v2864_v31 = vmul.f32 %v3548_v20, %v5529_v37  ;;  %v2741_v14 = vpop.xlane.xlu0 %2740 }
 0x4a4   :  { %v2775_v25 = vmax.f32 %v2741_v14, 1e-24 }
 0x4a5   :  { %2927 = vst [vmem:[#allocation10 + $0x1b0] sm:$0xff] %v2863_v6  ;;  %2928 = vst [vmem:[#allocation10 + $0x1b8] sm:$0xff] %v2864_v31  ;;  %v2744_v39 = vpop.xlane.xlu1 %2743 }
 0x4a6   :  { %3553 = vrsqrt.f32 %v2775_v25  ;;  %v2776_v50 = vmax.f32 %v2744_v39, 1e-24 }
 0x4a8   :  { %v3550_v34 = vpop.eup %3549  ;;  %3555 = vrsqrt.f32 %v2776_v50 }
 0x4a9   :  { %v2865_v5 = vmul.f32 %v3550_v34, %v5776_v55  ;;  %v2866_v60 = vmul.f32 %v3550_v34, %v5777_v15 }
 0x4aa   :  { %v3552_v13 = vpop.eup %3551 }
 0x4ab   :  { %2929 = vst [vmem:[#allocation10 + $0x1c0] sm:$0xff] %v2865_v5  ;;  %2930 = vst [vmem:[#allocation10 + $0x1c8] sm:$0xff] %v2866_v60  ;;  %v2867_v11 = vmul.f32 %v3552_v13, %v5778_v24  ;;  %v2868_v37 = vmul.f32 %v3552_v13, %v5549_v18 }
 0x4ad   :  { %2931 = vst [vmem:[#allocation10 + $0x1d0] sm:$0xff] %v2867_v11  ;;  %2932 = vst [vmem:[#allocation10 + $0x1d8] sm:$0xff] %v2868_v37 }
 0x4b0   :  { %v3554_v62 = vpop.eup %3553 }
 0x4b1   :  { %v2869_v16 = vmul.f32 %v3554_v62, %v5558_v1  ;;  %v2870_v36 = vmul.f32 %v3554_v62, %v5563_v28 }
 0x4b2   :  { %v3556_v22 = vpop.eup %3555 }
 0x4b3   :  { %2933 = vst [vmem:[#allocation10 + $0x1e0] sm:$0xff] %v2869_v16  ;;  %2934 = vst [vmem:[#allocation10 + $0x1e8] sm:$0xff] %v2870_v36  ;;  %v2871_v38 = vmul.f32 %v3556_v22, %v5568_v23  ;;  %v2872_v57 = vmul.f32 %v3556_v22, %v5573_v17 }
 0x4b5   :  { %2935 = vst [vmem:[#allocation10 + $0x1f0] sm:$0xff] %v2871_v38  ;;  %2936 = vst [vmem:[#allocation10 + $0x1f8] sm:$0xff] %v2872_v57 }
 0x4b6   :  { %3656 = shalt.err (!%p3653_p8)
}
 0x4b7   :  { %s3657_s14 = scalar_lea.hbm %s5657_s7, 8192 }
 0x4b8   :  { %p3658_p9 = scmp.ne.s32.totalorder %s5657_s7, %s3657_s14  ;;  %p3661_p10 = scmp.lt.u32.totalorder %s3657_s14, %s5657_s7 }
 0x4ba   :  { %p3663_p11 = pnand %p3661_p10, %p3658_p9 }
 0x4bc   :  { %3666 = shalt.err (!%p3663_p11)
}
 0x4bd   :  { %2948 = dma.vmem_to_hbm [thread:$0]  %s2943_s8, 8192, %s5657_s7, [#allocation4], %s3679_s1, %s3679_s1, %s3680_s25  }
 0x4be   :  { %3673 = dma.done.wait [#allocation4], 8192  }
 0x4bf   :  { %3674 = vsyncadd [#allocation4], 4294959104 }
 0x4c0   :  { %2952 = vsyncpa [#allocation3], 1 }
 0x4c1   :  { %2953 = vsyncpa [#allocation6], 1 }
 0x4c2   :  { %2954 = vsyncpa [#allocation9], 1 }
 0x4c3   :  { %2955 = vsyncpa [#allocation4], 1 }

// kernel: tpu_custom_call.1
= control target key start
LH: loop header
LB: loop body
LE: loop exit
PB: predicated region body
PF: predicated region fallthrough
CT: control target
= control target key end

     0   :  { %12 = vsyncpa [#allocation3], 0  ;;  %s5650_s0 = inlined_call_operand.hbm [shape: f32[256,256], index: 0, kind: input, shape index: {}]   ;;  %s5651_s1 = inlined_call_operand.hbm [shape: bf16[256,256], index: 1, kind: input, shape index: {}]   ;;  %s5652_s2 = inlined_call_operand.vmem [shape: f32[1,256], index: 2, kind: input, shape index: {}]   ;;  %s5653_s3 = inlined_call_operand.hbm [shape: bf16[256,256], index: 3, kind: input, shape index: {}]   ;;  %s5654_s4 = inlined_call_operand.vmem [shape: f32[1,256], index: 4, kind: input, shape index: {}]   ;;  %s5655_s5 = inlined_call_operand.hbm [shape: bf16[256,256], index: 5, kind: input, shape index: {}]   ;;  %s5656_s6 = inlined_call_operand.vmem [shape: f32[1,256], index: 6, kind: input, shape index: {}]   ;;  %s5657_s7 = inlined_call_operand.hbm [shape: f32[256,256], index: 7, kind: output, shape index: {}]  }
   0x1   :  { %13 = vsyncpa [#allocation6], 0 }
   0x2   :  { %14 = vsyncpa [#allocation9], 0 }
   0x3   :  { %15 = vsyncpa [#allocation4], 0  ;;  %s3675_s24 = smov [#allocation5]   ;;  %s3557_s28 = scalar_lea.hbm %s5651_s1, 4096 }
   0x4   :  { %s33_s25 = sshll.u32 %s3675_s24, 4  ;;  %p3558_p0 = scmp.ne.s32.totalorder %s5651_s1, %s3557_s28  ;;  %s34_s25 = int_to_ptr.vmem [resolvable:$true] %s33_s25 }
   0x5   :  { %p3561_p1 = scmp.lt.u32.totalorder %s3557_s28, %s5651_s1 }
   0x7   :  { %p3563_p2 = pnand %p3561_p1, %p3558_p0 }
   0x9   :  { %3566 = shalt.err (!%p3563_p2)
}
   0xa   :  { %s3567_s10 = scalar_lea.vmem %s34_s25, 4096  ;;  %p3572_p4 = scmp.lt.s32.totalorder %s34_s25, %s34_s25 }
   0xb   :  { %p3568_p3 = scmp.ne.s32.totalorder %s34_s25, %s3567_s10  ;;  %p3573_p5 = scmp.lt.s32.totalorder %s3567_s10, %s3567_s10 }
   0xd   :  { %p3574_p6 = por %p3573_p5, %p3572_p4 }
   0xf   :  { %p3575_p7 = pnand %p3574_p6, %p3568_p3 }
  0x11   :  { %3578 = shalt.err (!%p3575_p7)
}
  0x12   :  { %s3676_s11 = smov 128   ;;  %s3677_s12 = smov 8  }
  0x13   :  { %39 = dma.hbm_to_vmem [thread:$0]  %s5651_s1, 4096, %s34_s25, [#allocation6], %s3676_s11, %s3676_s11, %s3677_s12  }
  0x14   :  { %s3678_s15 = smov [#allocation2]   ;;  %s3579_s19 = scalar_lea.hbm %s5650_s0, 8192 }
  0x15   :  { %s21_s16 = sshll.u32 %s3678_s15, 4  ;;  %p3580_p8 = scmp.ne.s32.totalorder %s5650_s0, %s3579_s19  ;;  %s22_s16 = int_to_ptr.vmem [resolvable:$true] %s21_s16 }
  0x16   :  { %p3583_p9 = scmp.lt.u32.totalorder %s3579_s19, %s5650_s0 }
  0x18   :  { %p3585_p10 = pnand %p3583_p9, %p3580_p8 }
  0x1a   :  { %3588 = shalt.err (!%p3585_p10)
}
  0x1b   :  { %s3589_s24 = scalar_lea.vmem %s22_s16, 8192  ;;  %p3594_p12 = scmp.lt.s32.totalorder %s22_s16, %s22_s16 }
  0x1c   :  { %p3590_p11 = scmp.ne.s32.totalorder %s22_s16, %s3589_s24  ;;  %p3595_p13 = scmp.lt.s32.totalorder %s3589_s24, %s3589_s24 }
  0x1e   :  { %p3596_p0 = por %p3595_p13, %p3594_p12 }
  0x20   :  { %p3597_p1 = pnand %p3596_p0, %p3590_p11 }
  0x22   :  { %3600 = shalt.err (!%p3597_p1)
}
  0x23   :  { %s3679_s1 = smov 256   ;;  %s3680_s25 = smov 16  }
  0x24   :  { %27 = dma.hbm_to_vmem [thread:$0]  %s5650_s0, 8192, %s22_s16, [#allocation3], %s3679_s1, %s3679_s1, %s3680_s25  }
  0x25   :  { %s3681_s28 = smov [#allocation7]   ;;  %s3682_s30 = smov [#allocation8]  }
  0x26   :  { %s47_s29 = sshll.u32 %s3681_s28, 4  ;;  %s61_s8 = sshll.u32 %s3682_s30, 4  ;;  %s48_s29 = int_to_ptr.vmem [resolvable:$true] %s47_s29  ;;  %s3754_s8 = int_to_ptr.vmem [resolvable:$true] %s61_s8 }
  0x27   :  { %s3601_s13 = scalar_lea.hbm %s5653_s3, 4096 }
  0x28   :  { %p3602_p2 = scmp.ne.s32.totalorder %s5653_s3, %s3601_s13  ;;  %p3605_p3 = scmp.lt.u32.totalorder %s3601_s13, %s5653_s3 }
  0x2a   :  { %p3607_p4 = pnand %p3605_p3, %p3602_p2 }
  0x2c   :  { %3610 = shalt.err (!%p3607_p4)
}
  0x2d   :  { %s3611_s0 = scalar_lea.vmem %s48_s29, 4096  ;;  %p3616_p6 = scmp.lt.s32.totalorder %s48_s29, %s48_s29 }
  0x2e   :  { %p3612_p5 = scmp.ne.s32.totalorder %s48_s29, %s3611_s0  ;;  %p3617_p7 = scmp.lt.s32.totalorder %s3611_s0, %s3611_s0 }
  0x30   :  { %p3618_p8 = por %p3617_p7, %p3616_p6 }
  0x32   :  { %p3619_p9 = pnand %p3618_p8, %p3612_p5 }
  0x34   :  { %3622 = shalt.err (!%p3619_p9)
}
  0x35   :  { %53 = dma.hbm_to_vmem [thread:$0]  %s5653_s3, 4096, %s48_s29, [#allocation6], %s3676_s11, %s3676_s11, %s3677_s12  }
  0x36   :  { %s3623_s22 = scalar_lea.hbm %s5655_s5, 4096 }
  0x37   :  { %p3624_p10 = scmp.ne.s32.totalorder %s5655_s5, %s3623_s22  ;;  %p3627_p11 = scmp.lt.u32.totalorder %s3623_s22, %s5655_s5 }
  0x39   :  { %p3629_p12 = pnand %p3627_p11, %p3624_p10 }
  0x3b   :  { %3632 = shalt.err (!%p3629_p12)
}
  0x3c   :  { %s3633_s28 = scalar_lea.vmem %s3754_s8, 4096  ;;  %p3638_p0 = scmp.lt.s32.totalorder %s3754_s8, %s3754_s8 }
  0x3d   :  { %p3634_p13 = scmp.ne.s32.totalorder %s3754_s8, %s3633_s28  ;;  %p3639_p1 = scmp.lt.s32.totalorder %s3633_s28, %s3633_s28 }
  0x3f   :  { %p3640_p2 = por %p3639_p1, %p3638_p0 }
  0x41   :  { %p3641_p3 = pnand %p3640_p2, %p3634_p13 }
  0x43   :  { %3644 = shalt.err (!%p3641_p3)
}
  0x44   :  { %67 = dma.hbm_to_vmem [thread:$0]  %s5655_s5, 4096, %s3754_s8, [#allocation9], %s3676_s11, %s3676_s11, %s3677_s12  }
  0x45   :  { %3667 = dma.done.wait [#allocation3], 8192  }
  0x46   :  { %3668 = vsyncadd [#allocation3], 4294959104 }
  0x47   :  { %3669 = dma.done.wait [#allocation6], 8192  }
  0x48   :  { %3670 = vsyncadd [#allocation6], 4294959104 }
  0x49   :  { %3671 = dma.done.wait [#allocation9], 4096  }
  0x4a   :  { %3672 = vsyncadd [#allocation9], 4294963200  ;;  %v3093_v0 = vld [vmem:[#allocation5 + $0x4] ss:$8 sps:$4 sm:$0xff]   ;;  %v3095_v1 = vld [vmem:[#allocation5] ss:$8 sps:$4 sm:$0xff]  }
  0x4b   :  { %382 = vmatprep.subr.bf16.mxu0 %v3093_v0  ;;  %v3096_v2 = vld [vmem:[#allocation5 + $0x14] ss:$8 sps:$4 sm:$0xff]   ;;  %3052 = vmatprep.subr.bf16.mxu1 %v3093_v0  ;;  %v3098_v3 = vld [vmem:[#allocation5 + $0x10] ss:$8 sps:$4 sm:$0xff]   ;;  %v3099_v4 = vld [vmem:[#allocation5 + $0x24] ss:$8 sps:$4 sm:$0xff]  }
  0x4c   :  { %383 = vmatpush1.bf16.msra.mxu0 %v3095_v1  ;;  %3068 = vmatpush1.bf16.msra.mxu1 %v3095_v1  ;;  %v3101_v5 = vld [vmem:[#allocation5 + $0x20] ss:$8 sps:$4 sm:$0xff]   ;;  %v3102_v6 = vld [vmem:[#allocation5 + $0x34] ss:$8 sps:$4 sm:$0xff]   ;;  %v3104_v7 = vld [vmem:[#allocation5 + $0x30] ss:$8 sps:$4 sm:$0xff]  }
  0x4d   :  { %384 = vmatprep.subr.bf16.mxu0 %v3096_v2  ;;  %3053 = vmatprep.subr.bf16.mxu1 %v3096_v2  ;;  %v3105_v8 = vld [vmem:[#allocation5 + $0x44] ss:$8 sps:$4 sm:$0xff]   ;;  %v3107_v9 = vld [vmem:[#allocation5 + $0x40] ss:$8 sps:$4 sm:$0xff]   ;;  %v3108_v10 = vld [vmem:[#allocation5 + $0x54] ss:$8 sps:$4 sm:$0xff]  }
  0x4e   :  { %v3110_v11 = vld [vmem:[#allocation5 + $0x50] ss:$8 sps:$4 sm:$0xff]   ;;  %v3111_v12 = vld [vmem:[#allocation5 + $0x64] ss:$8 sps:$4 sm:$0xff]   ;;  %v3113_v16 = vld [vmem:[#allocation5 + $0x60] ss:$8 sps:$4 sm:$0xff]  }
  0x4f   :  { %v83_v13 = vld [vmem:[#allocation2 + $0x8] sm:$0xff]  ;;  %v85_v14 = vld [vmem:[#allocation2 + $0x18] sm:$0xff]  ;;  %v82_v38 = vld [vmem:[#allocation2] sm:$0xff] }
  0x50   :  { %385 = vmatpush1.bf16.msra.mxu0 %v3098_v3  ;;  %3069 = vmatpush1.bf16.msra.mxu1 %v3098_v3  ;;  %v147_v15 = vpack.c.bf16 %v85_v14, %v83_v13  ;;  %v3114_v17 = vld [vmem:[#allocation5 + $0x74] ss:$8 sps:$4 sm:$0xff]   ;;  %v3116_v18 = vld [vmem:[#allocation5 + $0x70] ss:$8 sps:$4 sm:$0xff]   ;;  %v3117_v19 = vld [vmem:[#allocation5 + $0x84] ss:$8 sps:$4 sm:$0xff]  }
  0x51   :  { %386 = vmatprep.subr.bf16.mxu0 %v3099_v4  ;;  %3054 = vmatprep.subr.bf16.mxu1 %v3099_v4  ;;  %v115_v20 = vld [vmem:[#allocation2 + $0x108] sm:$0xff]  ;;  %v117_v21 = vld [vmem:[#allocation2 + $0x118] sm:$0xff]  ;;  %v84_v39 = vld [vmem:[#allocation2 + $0x10] sm:$0xff] }
  0x52   :  { %414 = vmatprep.mubr.bf16.mxu0 %v147_v15  ;;  %v163_v22 = vpack.c.bf16 %v117_v21, %v115_v20  ;;  %v3119_v23 = vld [vmem:[#allocation5 + $0x80] ss:$8 sps:$4 sm:$0xff]   ;;  %v3120_v24 = vld [vmem:[#allocation5 + $0x94] ss:$8 sps:$4 sm:$0xff]   ;;  %v3122_v25 = vld [vmem:[#allocation5 + $0x90] ss:$8 sps:$4 sm:$0xff]   ;;  %v146_v47 = vpack.c.bf16 %v84_v39, %v82_v38 }
  0x53   :  { %v3123_v26 = vld [vmem:[#allocation5 + $0xa4] ss:$8 sps:$4 sm:$0xff]   ;;  %v3125_v27 = vld [vmem:[#allocation5 + $0xa0] ss:$8 sps:$4 sm:$0xff]   ;;  %v3126_v28 = vld [vmem:[#allocation5 + $0xb4] ss:$8 sps:$4 sm:$0xff]  }
  0x54   :  { %387 = vmatpush1.bf16.msra.mxu0 %v3101_v5  ;;  %3070 = vmatpush1.bf16.msra.mxu1 %v3101_v5  ;;  %v3128_v29 = vld [vmem:[#allocation5 + $0xb0] ss:$8 sps:$4 sm:$0xff]   ;;  %v3129_v30 = vld [vmem:[#allocation5 + $0xc4] ss:$8 sps:$4 sm:$0xff]   ;;  %v3131_v31 = vld [vmem:[#allocation5 + $0xc0] ss:$8 sps:$4 sm:$0xff]  }
  0x55   :  { %388 = vmatprep.subr.bf16.mxu0 %v3102_v6  ;;  %3055 = vmatprep.subr.bf16.mxu1 %v3102_v6  ;;  %v3132_v32 = vld [vmem:[#allocation5 + $0xd4] ss:$8 sps:$4 sm:$0xff]   ;;  %v3134_v33 = vld [vmem:[#allocation5 + $0xd0] ss:$8 sps:$4 sm:$0xff]   ;;  %v3135_v34 = vld [vmem:[#allocation5 + $0xe4] ss:$8 sps:$4 sm:$0xff]  }
  0x56   :  { %494 = vmatprep.mubr.bf16.mxu1 %v163_v22  ;;  %v3137_v35 = vld [vmem:[#allocation5 + $0xe0] ss:$8 sps:$4 sm:$0xff]   ;;  %v3138_v36 = vld [vmem:[#allocation5 + $0xf4] ss:$8 sps:$4 sm:$0xff]   ;;  %v3140_v37 = vld [vmem:[#allocation5 + $0xf0] ss:$8 sps:$4 sm:$0xff]  }
  0x57   :  { %v114_v40 = vld [vmem:[#allocation2 + $0x100] sm:$0xff]  ;;  %v116_v41 = vld [vmem:[#allocation2 + $0x110] sm:$0xff]  ;;  %v87_v42 = vld [vmem:[#allocation2 + $0x28] sm:$0xff] }
  0x58   :  { %389 = vmatpush1.bf16.msra.mxu0 %v3104_v7  ;;  %3071 = vmatpush1.bf16.msra.mxu1 %v3104_v7  ;;  %v89_v43 = vld [vmem:[#allocation2 + $0x38] sm:$0xff]  ;;  %v119_v44 = vld [vmem:[#allocation2 + $0x128] sm:$0xff]  ;;  %v162_v48 = vpack.c.bf16 %v116_v41, %v114_v40  ;;  %v86_v53 = vld [vmem:[#allocation2 + $0x20] sm:$0xff] }
  0x59   :  { %390 = vmatprep.subr.bf16.mxu0 %v3105_v8  ;;  %3056 = vmatprep.subr.bf16.mxu1 %v3105_v8  ;;  %v121_v45 = vld [vmem:[#allocation2 + $0x138] sm:$0xff]  ;;  %v3143_v46 = vld [vmem:[#allocation7 + $0x4] ss:$8 sps:$4 sm:$0xff]   ;;  %v3141_v49 = vld [vmem:[#allocation7] ss:$8 sps:$4 sm:$0xff]   ;;  %v149_v50 = vpack.c.bf16 %v89_v43, %v87_v42 }
  0x5a   :  { %v165_v51 = vpack.c.bf16 %v121_v45, %v119_v44  ;;  %v3146_v52 = vld [vmem:[#allocation7 + $0x14] ss:$8 sps:$4 sm:$0xff]   ;;  %v118_v55 = vld [vmem:[#allocation2 + $0x120] sm:$0xff]  ;;  %v91_v57 = vld [vmem:[#allocation2 + $0x48] sm:$0xff] }
  0x5b   :  { %v88_v54 = vld [vmem:[#allocation2 + $0x30] sm:$0xff]  ;;  %v93_v58 = vld [vmem:[#allocation2 + $0x58] sm:$0xff]  ;;  %v123_v59 = vld [vmem:[#allocation2 + $0x148] sm:$0xff] }
  0x5c   :  { %391 = vmatpush1.bf16.msra.mxu0 %v3107_v9  ;;  %3072 = vmatpush1.bf16.msra.mxu1 %v3107_v9  ;;  %v120_v56 = vld [vmem:[#allocation2 + $0x130] sm:$0xff]  ;;  %v125_v60 = vld [vmem:[#allocation2 + $0x158] sm:$0xff]  ;;  %v3149_v62 = vld [vmem:[#allocation7 + $0x24] ss:$8 sps:$4 sm:$0xff]   ;;  %v148_v63 = vpack.c.bf16 %v88_v54, %v86_v53  ;;  %v151_v1 = vpack.c.bf16 %v93_v58, %v91_v57 }
  0x5d   :  { %392 = vmatprep.subr.bf16.mxu0 %v3108_v10  ;;  %3057 = vmatprep.subr.bf16.mxu1 %v3108_v10  ;;  %v3144_v61 = vld [vmem:[#allocation7 + $0x10] ss:$8 sps:$4 sm:$0xff]   ;;  %v164_v0 = vpack.c.bf16 %v120_v56, %v118_v55  ;;  %v167_v2 = vpack.c.bf16 %v125_v60, %v123_v59  ;;  %v3147_v3 = vld [vmem:[#allocation7 + $0x20] ss:$8 sps:$4 sm:$0xff]   ;;  %v3152_v4 = vld [vmem:[#allocation7 + $0x34] ss:$8 sps:$4 sm:$0xff]  }
  0x5e   :  { %v90_v5 = vld [vmem:[#allocation2 + $0x40] sm:$0xff]  ;;  %v92_v6 = vld [vmem:[#allocation2 + $0x50] sm:$0xff]  ;;  %v95_v7 = vld [vmem:[#allocation2 + $0x68] sm:$0xff] }
  0x5f   :  { %v97_v8 = vld [vmem:[#allocation2 + $0x78] sm:$0xff]  ;;  %v122_v9 = vld [vmem:[#allocation2 + $0x140] sm:$0xff]  ;;  %v124_v10 = vld [vmem:[#allocation2 + $0x150] sm:$0xff]  ;;  %v150_v15 = vpack.c.bf16 %v92_v6, %v90_v5 }
  0x60   :  { %393 = vmatpush1.bf16.msra.mxu0 %v3110_v11  ;;  %3073 = vmatpush1.bf16.msra.mxu1 %v3110_v11  ;;  %v127_v11 = vld [vmem:[#allocation2 + $0x168] sm:$0xff]  ;;  %v3150_v13 = vld [vmem:[#allocation7 + $0x30] ss:$8 sps:$4 sm:$0xff]   ;;  %v3158_v20 = vld [vmem:[#allocation7 + $0x54] ss:$8 sps:$4 sm:$0xff]  }
  0x61   :  { %394 = vmatprep.subr.bf16.mxu0 %v3111_v12  ;;  %3058 = vmatprep.subr.bf16.mxu1 %v3111_v12  ;;  %v129_v12 = vld [vmem:[#allocation2 + $0x178] sm:$0xff]  ;;  %v3155_v14 = vld [vmem:[#allocation7 + $0x44] ss:$8 sps:$4 sm:$0xff]   ;;  %v96_v22 = vld [vmem:[#allocation2 + $0x70] sm:$0xff] }
  0x62   :  { %v94_v21 = vld [vmem:[#allocation2 + $0x60] sm:$0xff]  ;;  %v100_v38 = vld [vmem:[#allocation2 + $0x90] sm:$0xff]  ;;  %v103_v39 = vld [vmem:[#allocation2 + $0xa8] sm:$0xff] }
  0x63   :  { %v105_v40 = vld [vmem:[#allocation2 + $0xb8] sm:$0xff]  ;;  %v130_v41 = vld [vmem:[#allocation2 + $0x180] sm:$0xff]  ;;  %v132_v42 = vld [vmem:[#allocation2 + $0x190] sm:$0xff] }
  0x64   :  { %395 = vmatpush1.bf16.msra.mxu0 %v3113_v16  ;;  %3074 = vmatpush1.bf16.msra.mxu1 %v3113_v16  ;;  %v166_v16 = vpack.c.bf16 %v124_v10, %v122_v9  ;;  %v135_v43 = vld [vmem:[#allocation2 + $0x1a8] sm:$0xff]  ;;  %v137_v44 = vld [vmem:[#allocation2 + $0x1b8] sm:$0xff]  ;;  %v134_v53 = vld [vmem:[#allocation2 + $0x1a0] sm:$0xff] }
  0x65   :  { %396 = vmatprep.subr.bf16.mxu0 %v3114_v17  ;;  %3059 = vmatprep.subr.bf16.mxu1 %v3114_v17  ;;  %v153_v17 = vpack.c.bf16 %v97_v8, %v95_v7  ;;  %v3162_v45 = vld [vmem:[#allocation7 + $0x70] ss:$8 sps:$4 sm:$0xff]   ;;  %v139_v56 = vld [vmem:[#allocation2 + $0x1c8] sm:$0xff]  ;;  %v110_v10 = vld [vmem:[#allocation2 + $0xe0] sm:$0xff] }
  0x66   :  { %v136_v54 = vld [vmem:[#allocation2 + $0x1b0] sm:$0xff]  ;;  %v109_v55 = vld [vmem:[#allocation2 + $0xd8] sm:$0xff] }
  0x67   :  { %v141_v57 = vld [vmem:[#allocation2 + $0x1d8] sm:$0xff]  ;;  %v172_v59 = vpack.c.bf16 %v136_v54, %v134_v53 }
  0x68   :  { %397 = vmatpush1.bf16.msra.mxu0 %v3116_v18  ;;  %3075 = vmatpush1.bf16.msra.mxu1 %v3116_v18  ;;  %v169_v18 = vpack.c.bf16 %v129_v12, %v127_v11  ;;  %v145_v5 = vld [vmem:[#allocation2 + $0x1f8] sm:$0xff]  ;;  %v112_v11 = vld [vmem:[#allocation2 + $0xf0] sm:$0xff]  ;;  %v142_v12 = vld [vmem:[#allocation2 + $0x1e0] sm:$0xff] }
  0x69   :  { %398 = vmatprep.subr.bf16.mxu0 %v3117_v19  ;;  %3060 = vmatprep.subr.bf16.mxu1 %v3117_v19  ;;  %v3153_v19 = vld [vmem:[#allocation7 + $0x40] ss:$8 sps:$4 sm:$0xff]  }
  0x6c   :  { %399 = vmatpush1.bf16.msra.mxu0 %v3119_v23  ;;  %3076 = vmatpush1.bf16.msra.mxu1 %v3119_v23  ;;  %v99_v23 = vld [vmem:[#allocation2 + $0x88] sm:$0xff] }
  0x6d   :  { %400 = vmatprep.subr.bf16.mxu0 %v3120_v24  ;;  %3061 = vmatprep.subr.bf16.mxu1 %v3120_v24  ;;  %v101_v24 = vld [vmem:[#allocation2 + $0x98] sm:$0xff] }
  0x70   :  { %401 = vmatpush1.bf16.msra.mxu0 %v3122_v25  ;;  %3077 = vmatpush1.bf16.msra.mxu1 %v3122_v25  ;;  %v126_v25 = vld [vmem:[#allocation2 + $0x160] sm:$0xff] }
  0x71   :  { %402 = vmatprep.subr.bf16.mxu0 %v3123_v26  ;;  %3062 = vmatprep.subr.bf16.mxu1 %v3123_v26  ;;  %v128_v26 = vld [vmem:[#allocation2 + $0x170] sm:$0xff] }
  0x74   :  { %403 = vmatpush1.bf16.msra.mxu0 %v3125_v27  ;;  %3078 = vmatpush1.bf16.msra.mxu1 %v3125_v27  ;;  %v131_v27 = vld [vmem:[#allocation2 + $0x188] sm:$0xff] }
  0x75   :  { %404 = vmatprep.subr.bf16.mxu0 %v3126_v28  ;;  %3063 = vmatprep.subr.bf16.mxu1 %v3126_v28  ;;  %v133_v28 = vld [vmem:[#allocation2 + $0x198] sm:$0xff] }
  0x78   :  { %405 = vmatpush1.bf16.msra.mxu0 %v3128_v29  ;;  %3079 = vmatpush1.bf16.msra.mxu1 %v3128_v29  ;;  %v3156_v29 = vld [vmem:[#allocation7 + $0x50] ss:$8 sps:$4 sm:$0xff]  }
  0x79   :  { %406 = vmatprep.subr.bf16.mxu0 %v3129_v30  ;;  %3064 = vmatprep.subr.bf16.mxu1 %v3129_v30  ;;  %v3161_v30 = vld [vmem:[#allocation7 + $0x64] ss:$8 sps:$4 sm:$0xff]  }
  0x7c   :  { %407 = vmatpush1.bf16.msra.mxu0 %v3131_v31  ;;  %3080 = vmatpush1.bf16.msra.mxu1 %v3131_v31  ;;  %v152_v31 = vpack.c.bf16 %v96_v22, %v94_v21  ;;  %v3171_v21 = vld [vmem:[#allocation7 + $0xa0] ss:$8 sps:$4 sm:$0xff]   ;;  %v3176_v22 = vld [vmem:[#allocation7 + $0xb4] ss:$8 sps:$4 sm:$0xff]  }
  0x7d   :  { %408 = vmatprep.subr.bf16.mxu0 %v3132_v32  ;;  %3065 = vmatprep.subr.bf16.mxu1 %v3132_v32  ;;  %v168_v32 = vpack.c.bf16 %v128_v26, %v126_v25  ;;  %v3177_v25 = vld [vmem:[#allocation7 + $0xc0] ss:$8 sps:$4 sm:$0xff]   ;;  %v3182_v26 = vld [vmem:[#allocation7 + $0xd4] ss:$8 sps:$4 sm:$0xff]  }
  0x80   :  { %409 = vmatpush1.bf16.msra.mxu0 %v3134_v33  ;;  %3081 = vmatpush1.bf16.msra.mxu1 %v3134_v33  ;;  %v155_v33 = vpack.c.bf16 %v101_v24, %v99_v23  ;;  %v3174_v23 = vld [vmem:[#allocation7 + $0xb0] ss:$8 sps:$4 sm:$0xff]   ;;  %v3179_v24 = vld [vmem:[#allocation7 + $0xc4] ss:$8 sps:$4 sm:$0xff]  }
  0x81   :  { %410 = vmatprep.subr.bf16.mxu0 %v3135_v34  ;;  %3066 = vmatprep.subr.bf16.mxu1 %v3135_v34  ;;  %v171_v34 = vpack.c.bf16 %v133_v28, %v131_v27  ;;  %v3180_v27 = vld [vmem:[#allocation7 + $0xd0] ss:$8 sps:$4 sm:$0xff]   ;;  %v3185_v28 = vld [vmem:[#allocation7 + $0xe4] ss:$8 sps:$4 sm:$0xff]  }
  0x84   :  { %411 = vmatpush1.bf16.msra.mxu0 %v3137_v35  ;;  %3082 = vmatpush1.bf16.msra.mxu1 %v3137_v35  ;;  %v3159_v35 = vld [vmem:[#allocation7 + $0x60] ss:$8 sps:$4 sm:$0xff]  }
  0x85   :  { %412 = vmatprep.subr.bf16.mxu0 %v3138_v36  ;;  %3067 = vmatprep.subr.bf16.mxu1 %v3138_v36  ;;  %v3164_v36 = vld [vmem:[#allocation7 + $0x74] ss:$8 sps:$4 sm:$0xff]  }
  0x88   :  { %413 = vmatpush1.bf16.msra.mxu0 %v3140_v37  ;;  %3083 = vmatpush1.bf16.msra.mxu1 %v3140_v37  ;;  %v98_v37 = vld [vmem:[#allocation2 + $0x80] sm:$0xff] }
  0x89   :  { %1387 = vmatprep.subr.bf16.mxu1 %v3143_v46  ;;  %v154_v46 = vpack.c.bf16 %v100_v38, %v98_v37 }
  0x8b   :  { %415 = vmatmul.mubr.bf16.vlgmr.msra.gmra.mrb[0].mxu0 %v146_v47  ;;  %495 = vmatmul.mubr.bf16.vlgmr.msra.gmra.mrb[0].mxu1 %v162_v48  ;;  %v170_v47 = vpack.c.bf16 %v132_v42, %v130_v41  ;;  %v157_v48 = vpack.c.bf16 %v105_v40, %v103_v39 }
  0x8c   :  { %424 = vmatprep.mubr.bf16.mxu0 %v149_v50  ;;  %504 = vmatprep.mubr.bf16.mxu1 %v165_v51  ;;  %v102_v50 = vld [vmem:[#allocation2 + $0xa0] sm:$0xff]  ;;  %v104_v51 = vld [vmem:[#allocation2 + $0xb0] sm:$0xff] }
  0x8d   :  { %1388 = vmatpush1.bf16.msra.mxu1 %v3141_v49  ;;  %v173_v49 = vpack.c.bf16 %v137_v44, %v135_v43  ;;  %v156_v58 = vpack.c.bf16 %v104_v51, %v102_v50 }
  0x8e   :  { %1389 = vmatprep.subr.bf16.mxu1 %v3146_v52  ;;  %v107_v52 = vld [vmem:[#allocation2 + $0xc8] sm:$0xff] }
  0x8f   :  { %v159_v60 = vpack.c.bf16 %v109_v55, %v107_v52 }
  0x91   :  { %1390 = vmatpush1.bf16.msra.mxu1 %v3144_v61  ;;  %v175_v61 = vpack.c.bf16 %v141_v57, %v139_v56 }
  0x92   :  { %1391 = vmatprep.subr.bf16.mxu1 %v3149_v62  ;;  %v106_v62 = vld [vmem:[#allocation2 + $0xc0] sm:$0xff] }
  0x93   :  { %425 = vmatmul.mubr.bf16.gmra.mrb[4].mxu0 %v148_v63  ;;  %505 = vmatmul.mubr.bf16.gmra.mrb[4].mxu1 %v164_v0  ;;  %v108_v63 = vld [vmem:[#allocation2 + $0xd0] sm:$0xff]  ;;  %v111_v0 = vld [vmem:[#allocation2 + $0xe8] sm:$0xff] }
  0x94   :  { %434 = vmatprep.mubr.bf16.mxu0 %v151_v1  ;;  %514 = vmatprep.mubr.bf16.mxu1 %v167_v2  ;;  %v138_v1 = vld [vmem:[#allocation2 + $0x1c0] sm:$0xff]  ;;  %v140_v2 = vld [vmem:[#allocation2 + $0x1d0] sm:$0xff]  ;;  %v158_v6 = vpack.c.bf16 %v108_v63, %v106_v62 }
  0x95   :  { %1392 = vmatpush1.bf16.msra.mxu1 %v3147_v3  ;;  %v113_v3 = vld [vmem:[#allocation2 + $0xf8] sm:$0xff]  ;;  %v174_v7 = vpack.c.bf16 %v140_v2, %v138_v1 }
  0x96   :  { %1393 = vmatprep.subr.bf16.mxu1 %v3152_v4  ;;  %v143_v4 = vld [vmem:[#allocation2 + $0x1e8] sm:$0xff]  ;;  %v161_v8 = vpack.c.bf16 %v113_v3, %v111_v0 }
  0x97   :  { %v177_v9 = vpack.c.bf16 %v145_v5, %v143_v4 }
  0x99   :  { %1394 = vmatpush1.bf16.msra.mxu1 %v3150_v13  ;;  %v144_v13 = vld [vmem:[#allocation2 + $0x1f0] sm:$0xff] }
  0x9a   :  { %1395 = vmatprep.subr.bf16.mxu1 %v3155_v14  ;;  %v160_v14 = vpack.c.bf16 %v112_v11, %v110_v10 }
  0x9b   :  { %435 = vmatmul.mubr.bf16.gmra.mrb[8].mxu0 %v150_v15  ;;  %515 = vmatmul.mubr.bf16.gmra.mrb[8].mxu1 %v166_v16  ;;  %v176_v15 = vpack.c.bf16 %v144_v13, %v142_v12  ;;  %v3167_v16 = vld [vmem:[#allocation7 + $0x84] ss:$8 sps:$4 sm:$0xff]  }
  0x9c   :  { %444 = vmatprep.mubr.bf16.mxu0 %v153_v17  ;;  %524 = vmatprep.mubr.bf16.mxu1 %v169_v18  ;;  %v3165_v17 = vld [vmem:[#allocation7 + $0x80] ss:$8 sps:$4 sm:$0xff]   ;;  %v3170_v18 = vld [vmem:[#allocation7 + $0x94] ss:$8 sps:$4 sm:$0xff]  }
  0x9d   :  { %1396 = vmatpush1.bf16.msra.mxu1 %v3153_v19  ;;  %v3168_v19 = vld [vmem:[#allocation7 + $0x90] ss:$8 sps:$4 sm:$0xff]  }
  0x9e   :  { %1397 = vmatprep.subr.bf16.mxu1 %v3158_v20  ;;  %v3173_v20 = vld [vmem:[#allocation7 + $0xa4] ss:$8 sps:$4 sm:$0xff]  }
  0xa1   :  { %1398 = vmatpush1.bf16.msra.mxu1 %v3156_v29  ;;  %v3183_v29 = vld [vmem:[#allocation7 + $0xe0] ss:$8 sps:$4 sm:$0xff]  }
  0xa2   :  { %1399 = vmatprep.subr.bf16.mxu1 %v3161_v30  ;;  %v3188_v30 = vld [vmem:[#allocation7 + $0xf4] ss:$8 sps:$4 sm:$0xff]  }
  0xa3   :  { %445 = vmatmul.mubr.bf16.gmra.mrb[12].mxu0 %v152_v31  ;;  %525 = vmatmul.mubr.bf16.gmra.mrb[12].mxu1 %v168_v32  ;;  %v3186_v31 = vld [vmem:[#allocation7 + $0xf0] ss:$8 sps:$4 sm:$0xff]   ;;  %v212_v32 = vlaneseq }
  0xa4   :  { %454 = vmatprep.mubr.bf16.mxu0 %v155_v33  ;;  %534 = vmatprep.mubr.bf16.mxu1 %v171_v34 }
  0xa5   :  { %1400 = vmatpush1.bf16.msra.mxu1 %v3159_v35  ;;  %v213_v33 = vshrl.u32 %v212_v32, 7  ;;  %v210_v35 = vld [vmem:[%s5652_s2] sm:$0x3] }
  0xa6   :  { %1401 = vmatprep.subr.bf16.mxu1 %v3164_v36 }
  0xa7   :  { %v3791_v34 = vsub.s32 0, %v213_v33  ;;  %v3796_v36 = vsub.s32 1, %v213_v33 }
  0xa9   :  { %1402 = vmatpush1.bf16.msra.mxu1 %v3162_v45  ;;  %5686 = vst [vmem:[#allocation15_spill] sm:$0xff] %v3791_v34  ;;  %5687 = vst [vmem:[#allocation16_spill] sm:$0xff] %v3796_v36  ;;  %v3799_v37 = vrot.slane %v210_v35, %v3791_v34  ;;  %v3802_v38 = vrot.slane %v210_v35, %v3796_v36 }
  0xaa   :  { %1403 = vmatprep.subr.bf16.mxu1 %v3167_v16 }
  0xab   :  { %455 = vmatmul.mubr.bf16.gmra.mrb[16].mxu0 %v154_v46  ;;  %535 = vmatmul.mubr.bf16.gmra.mrb[16].mxu1 %v170_v47 }
  0xac   :  { %464 = vmatprep.mubr.bf16.mxu0 %v157_v48  ;;  %544 = vmatprep.mubr.bf16.mxu1 %v173_v49 }
  0xad   :  { %1404 = vmatpush1.bf16.msra.mxu1 %v3165_v17 }
  0xae   :  { %1405 = vmatprep.subr.bf16.mxu1 %v3170_v18 }
  0xb1   :  { %1406 = vmatpush1.bf16.msra.mxu1 %v3168_v19 }
  0xb2   :  { %1407 = vmatprep.subr.bf16.mxu1 %v3173_v20 }
  0xb3   :  { %465 = vmatmul.mubr.bf16.gmra.mrb[20].mxu0 %v156_v58  ;;  %545 = vmatmul.mubr.bf16.gmra.mrb[20].mxu1 %v172_v59 }
  0xb4   :  { %474 = vmatprep.mubr.bf16.mxu0 %v159_v60  ;;  %554 = vmatprep.mubr.bf16.mxu1 %v175_v61 }
  0xb5   :  { %1408 = vmatpush1.bf16.msra.mxu1 %v3171_v21 }
  0xb6   :  { %1409 = vmatprep.subr.bf16.mxu1 %v3176_v22 }
  0xb9   :  { %1410 = vmatpush1.bf16.msra.mxu1 %v3174_v23 }
  0xba   :  { %1411 = vmatprep.subr.bf16.mxu1 %v3179_v24 }
  0xbb   :  { %475 = vmatmul.mubr.bf16.gmra.mrb[24].mxu0 %v158_v6  ;;  %555 = vmatmul.mubr.bf16.gmra.mrb[24].mxu1 %v174_v7 }
  0xbc   :  { %484 = vmatprep.mubr.bf16.mxu0 %v161_v8  ;;  %564 = vmatprep.mubr.bf16.mxu1 %v177_v9 }
  0xbd   :  { %1412 = vmatpush1.bf16.msra.mxu1 %v3177_v25 }
  0xbe   :  { %1413 = vmatprep.subr.bf16.mxu1 %v3182_v26 }
  0xc1   :  { %1414 = vmatpush1.bf16.msra.mxu1 %v3180_v27 }
  0xc2   :  { %1415 = vmatprep.subr.bf16.mxu1 %v3185_v28 }
  0xc3   :  { %485 = vmatmul.mubr.bf16.gmra.mrb[28].mxu0 %v160_v14  ;;  %565 = vmatmul.mubr.bf16.gmra.mrb[28].mxu1 %v176_v15 }
  0xc5   :  { %1416 = vmatpush1.bf16.msra.mxu1 %v3183_v29 }
  0xc6   :  { %1417 = vmatprep.subr.bf16.mxu1 %v3188_v30 }
  0xc9   :  { %1418 = vmatpush1.bf16.msra.mxu1 %v3186_v31 }
 0x15e   :  { %v416_v39 = vpop.f32.mrb[0].mxu0  ;;  %v496_v40 = vpop.f32.mrb[0].mxu1 }
 0x15f   :  { %v3805_v41 = vadd.f32 %v416_v39, %v3799_v37  ;;  %v418_v42 = vpop.f32.mrb[1].mxu0  ;;  %v3808_v43 = vadd.f32 %v496_v40, %v3799_v37  ;;  %v498_v44 = vpop.f32.mrb[1].mxu1 }
 0x160   :  { %v3811_v45 = vadd.f32 %v418_v42, %v3802_v38  ;;  %v420_v46 = vpop.f32.mrb[2].mxu0  ;;  %v3814_v47 = vadd.f32 %v498_v44, %v3802_v38  ;;  %v500_v48 = vpop.f32.mrb[2].mxu1 }
 0x161   :  { %5688 = vst [vmem:[#allocation17_spill] sm:$0xff] %v3808_v43  ;;  %v575_v49 = vmul.f32 %v3805_v41, %v3805_v41  ;;  %v3819_v50 = vadd.f32 %v420_v46, %v3799_v37  ;;  %v422_v51 = vpop.f32.mrb[3].mxu0  ;;  %v607_v52 = vmul.f32 %v3808_v43, %v3808_v43  ;;  %v3824_v53 = vadd.f32 %v500_v48, %v3799_v37  ;;  %v502_v54 = vpop.f32.mrb[3].mxu1 }
 0x162   :  { %5689 = vst [vmem:[#allocation18_spill] sm:$0xff] %v3814_v47  ;;  %v576_v55 = vmul.f32 %v3811_v45, %v3811_v45  ;;  %v3829_v56 = vadd.f32 %v422_v51, %v3802_v38  ;;  %v608_v57 = vmul.f32 %v3814_v47, %v3814_v47  ;;  %v3834_v58 = vadd.f32 %v502_v54, %v3802_v38 }
 0x163   :  { %5690 = vst [vmem:[#allocation19_spill] sm:$0xff] %v3824_v53  ;;  %v639_v59 = vmul.f32 %v575_v49, %v3805_v41  ;;  %v577_v60 = vmul.f32 %v3819_v50, %v3819_v50  ;;  %v671_v61 = vmul.f32 %v607_v52, %v3808_v43  ;;  %v609_v62 = vmul.f32 %v3824_v53, %v3824_v53 }
 0x164   :  { %5691 = vst [vmem:[#allocation20_spill] sm:$0xff] %v3834_v58  ;;  %v640_v63 = vmul.f32 %v576_v55, %v3811_v45  ;;  %v578_v0 = vmul.f32 %v3829_v56, %v3829_v56  ;;  %v672_v1 = vmul.f32 %v608_v57, %v3814_v47  ;;  %v610_v2 = vmul.f32 %v3834_v58, %v3834_v58 }
 0x165   :  { %v703_v3 = vmul.f32 0.044715, %v639_v59  ;;  %v641_v4 = vmul.f32 %v577_v60, %v3819_v50  ;;  %v735_v5 = vmul.f32 0.044715, %v671_v61  ;;  %v3850_v6 = vmul.f32 %v609_v62, %v3824_v53 }
 0x166   :  { %v704_v7 = vmul.f32 0.044715, %v640_v63  ;;  %v642_v8 = vmul.f32 %v578_v0, %v3829_v56  ;;  %v426_v9 = vpop.f32.mrb[4].mxu0  ;;  %v736_v10 = vmul.f32 0.044715, %v672_v1  ;;  %v3854_v11 = vmul.f32 %v610_v2, %v3834_v58  ;;  %v3856_v12 = vpop.f32.mrb[4].mxu1 }
 0x167   :  { %v767_v13 = vadd.f32 %v703_v3, %v3805_v41  ;;  %v705_v14 = vmul.f32 0.044715, %v641_v4  ;;  %v3860_v15 = vadd.f32 %v426_v9, %v3799_v37  ;;  %v428_v16 = vpop.f32.mrb[5].mxu0  ;;  %v799_v17 = vadd.f32 %v735_v5, %v3808_v43  ;;  %v3863_v18 = vpop.f32.mrb[5].mxu1 }
 0x168   :  { %v768_v19 = vadd.f32 %v704_v7, %v3811_v45  ;;  %v706_v20 = vmul.f32 0.044715, %v642_v8  ;;  %v3867_v21 = vadd.f32 %v428_v16, %v3802_v38  ;;  %v430_v22 = vpop.f32.mrb[6].mxu0  ;;  %v800_v23 = vadd.f32 %v736_v10, %v3814_v47  ;;  %v3870_v24 = vpop.f32.mrb[6].mxu1 }
 0x169   :  { %v831_v25 = vmul.f32 0.7978846, %v767_v13  ;;  %v769_v26 = vadd.f32 %v705_v14, %v3819_v50  ;;  %v579_v27 = vmul.f32 %v3860_v15, %v3860_v15  ;;  %v3876_v28 = vadd.f32 %v430_v22, %v3799_v37  ;;  %v432_v29 = vpop.f32.mrb[7].mxu0  ;;  %v3878_v30 = vpop.f32.mrb[7].mxu1 }
 0x16a   :  { %v832_v31 = vmul.f32 0.7978846, %v768_v19  ;;  %v770_v32 = vadd.f32 %v706_v20, %v3829_v56  ;;  %v580_v33 = vmul.f32 %v3867_v21, %v3867_v21  ;;  %v3884_v35 = vadd.f32 %v432_v29, %v3802_v38 }
 0x16b   :  { %3237 = vtanh.f32 %v831_v25  ;;  %v833_v39 = vmul.f32 0.7978846, %v769_v26  ;;  %v643_v40 = vmul.f32 %v579_v27, %v3860_v15  ;;  %v581_v42 = vmul.f32 %v3876_v28, %v3876_v28 }
 0x16c   :  { %3239 = vtanh.f32 %v832_v31  ;;  %v834_v44 = vmul.f32 0.7978846, %v770_v32  ;;  %v644_v46 = vmul.f32 %v580_v33, %v3867_v21  ;;  %v582_v48 = vmul.f32 %v3884_v35, %v3884_v35 }
 0x16d   :  { %3241 = vtanh.f32 %v833_v39  ;;  %v707_v49 = vmul.f32 0.044715, %v643_v40  ;;  %v645_v51 = vmul.f32 %v581_v42, %v3876_v28  ;;  %v863_v52 = vmul.f32 0.7978846, %v799_v17 }
 0x16e   :  { %3243 = vtanh.f32 %v834_v44  ;;  %v708_v54 = vmul.f32 0.044715, %v644_v46  ;;  %v646_v55 = vmul.f32 %v582_v48, %v3884_v35  ;;  %v436_v57 = vpop.f32.mrb[8].mxu0  ;;  %v864_v59 = vmul.f32 0.7978846, %v800_v23  ;;  %v3894_v60 = vpop.f32.mrb[8].mxu1 }
 0x16f   :  { %v771_v61 = vadd.f32 %v707_v49, %v3860_v15  ;;  %v709_v62 = vmul.f32 0.044715, %v645_v51  ;;  %v3898_v63 = vadd.f32 %v436_v57, %v3799_v37  ;;  %v438_v0 = vpop.f32.mrb[9].mxu0  ;;  %3245 = vtanh.f32 %v863_v52  ;;  %v3900_v1 = vpop.f32.mrb[9].mxu1 }
 0x170   :  { %v772_v2 = vadd.f32 %v708_v54, %v3867_v21  ;;  %v710_v3 = vmul.f32 0.044715, %v646_v55  ;;  %v3904_v4 = vadd.f32 %v438_v0, %v3802_v38  ;;  %v440_v5 = vpop.f32.mrb[10].mxu0  ;;  %3247 = vtanh.f32 %v864_v59  ;;  %v3906_v7 = vpop.f32.mrb[10].mxu1 }
 0x171   :  { %v835_v8 = vmul.f32 0.7978846, %v771_v61  ;;  %v773_v9 = vadd.f32 %v709_v62, %v3876_v28  ;;  %v583_v10 = vmul.f32 %v3898_v63, %v3898_v63  ;;  %v3912_v13 = vadd.f32 %v440_v5, %v3799_v37  ;;  %v442_v14 = vpop.f32.mrb[11].mxu0  ;;  %v3914_v16 = vpop.f32.mrb[11].mxu1 }
 0x172   :  { %v836_v17 = vmul.f32 0.7978846, %v772_v2  ;;  %v774_v19 = vadd.f32 %v710_v3, %v3884_v35  ;;  %v584_v20 = vmul.f32 %v3904_v4, %v3904_v4  ;;  %v3920_v22 = vadd.f32 %v442_v14, %v3802_v38 }
 0x173   :  { %3249 = vtanh.f32 %v835_v8  ;;  %v837_v23 = vmul.f32 0.7978846, %v773_v9  ;;  %v647_v25 = vmul.f32 %v583_v10, %v3898_v63  ;;  %v585_v26 = vmul.f32 %v3912_v13, %v3912_v13 }
 0x174   :  { %3251 = vtanh.f32 %v836_v17  ;;  %v838_v27 = vmul.f32 0.7978846, %v774_v19  ;;  %v648_v29 = vmul.f32 %v584_v20, %v3904_v4  ;;  %v586_v31 = vmul.f32 %v3920_v22, %v3920_v22 }
 0x175   :  { %v3238_v32 = vpop.eup %3237  ;;  %3253 = vtanh.f32 %v837_v23  ;;  %v711_v33 = vmul.f32 0.044715, %v647_v25  ;;  %v649_v39 = vmul.f32 %v585_v26, %v3912_v13  ;;  %v3930_v40 = vmul.f32 0.044715, %v3850_v6 }
 0x176   :  { %v3240_v42 = vpop.eup %3239  ;;  %v959_v44 = vadd.f32 1.0, %v3238_v32  ;;  %3255 = vtanh.f32 %v838_v27  ;;  %v712_v46 = vmul.f32 0.044715, %v648_v29  ;;  %v650_v48 = vmul.f32 %v586_v31, %v3920_v22  ;;  %v446_v49 = vpop.f32.mrb[12].mxu0 }
 0x177   :  { %v3933_v51 = vpop.f32.mrb[12].mxu1  ;;  %v3242_v52 = vpop.eup %3241  ;;  %v775_v54 = vadd.f32 %v711_v33, %v3898_v63  ;;  %v713_v55 = vmul.f32 0.044715, %v649_v39  ;;  %v3937_v57 = vadd.f32 %v446_v49, %v3799_v37  ;;  %v960_v61 = vadd.f32 1.0, %v3240_v42 }
 0x178   :  { %v448_v59 = vpop.f32.mrb[13].mxu0  ;;  %v3939_v6 = vpop.f32.mrb[13].mxu1  ;;  %v1023_v0 = vmul.f32 0.5, %v959_v44  ;;  %v961_v2 = vadd.f32 1.0, %v3242_v52  ;;  %v776_v3 = vadd.f32 %v712_v46, %v3904_v4  ;;  %v714_v5 = vmul.f32 0.044715, %v650_v48 }
 0x179   :  { %v3244_v62 = vpop.eup %3243  ;;  %v450_v8 = vpop.f32.mrb[14].mxu0  ;;  %v839_v14 = vmul.f32 0.7978846, %v775_v54  ;;  %v777_v17 = vadd.f32 %v713_v55, %v3912_v13  ;;  %v587_v19 = vmul.f32 %v3937_v57, %v3937_v57  ;;  %v3950_v20 = vadd.f32 %v448_v59, %v3802_v38 }
 0x17a   :  { %v3942_v9 = vpop.f32.mrb[14].mxu1  ;;  %v3944_v10 = vpop.eup %3245  ;;  %v3957_v27 = vmul.f32 %v1023_v0, %v3805_v41  ;;  %v1025_v29 = vmul.f32 0.5, %v961_v2  ;;  %v840_v31 = vmul.f32 0.7978846, %v776_v3  ;;  %v778_v32 = vadd.f32 %v714_v5, %v3920_v22 }
 0x17b   :  { %5692 = vst [vmem:[#allocation21_spill] sm:$0xff] %v3944_v10  ;;  %v452_v23 = vpop.f32.mrb[15].mxu0  ;;  %v3952_v25 = vpop.f32.mrb[15].mxu1  ;;  %3257 = vtanh.f32 %v839_v14  ;;  %v841_v33 = vmul.f32 0.7978846, %v777_v17  ;;  %v651_v39 = vmul.f32 %v587_v19, %v3937_v57  ;;  %v588_v42 = vmul.f32 %v3950_v20, %v3950_v20 }
 0x17c   :  { %v3954_v26 = vpop.eup %3247  ;;  %v3964_v44 = vmul.f32 %v1025_v29, %v3819_v50  ;;  %3259 = vtanh.f32 %v840_v31  ;;  %v842_v46 = vmul.f32 0.7978846, %v778_v32  ;;  %v3967_v48 = vadd.f32 %v450_v8, %v3799_v37 }
 0x17d   :  { %5693 = vst [vmem:[#allocation22_spill] sm:$0xff] %v3954_v26  ;;  %v3969_v41 = vpop.eup %3249  ;;  %3261 = vtanh.f32 %v841_v33  ;;  %v715_v49 = vmul.f32 0.044715, %v651_v39  ;;  %v652_v52 = vmul.f32 %v588_v42, %v3950_v20  ;;  %v3973_v54 = vadd.f32 %v452_v23, %v3802_v38 }
 0x17e   :  { %5694 = vst [vmem:[#allocation23_spill] sm:$0xff] %v3967_v48  ;;  %v3975_v55 = vpop.eup %3251  ;;  %3263 = vtanh.f32 %v842_v46  ;;  %v589_v59 = vmul.f32 %v3967_v48, %v3967_v48  ;;  %v456_v0 = vpop.f32.mrb[16].mxu0  ;;  %v962_v2 = vadd.f32 1.0, %v3244_v62  ;;  %v1024_v39 = vmul.f32 0.5, %v960_v61 }
 0x17f   :  { %v3981_v3 = vpop.f32.mrb[16].mxu1  ;;  %v3983_v5 = vpop.eup %3253  ;;  %v779_v8 = vadd.f32 %v715_v49, %v3937_v57  ;;  %v716_v14 = vmul.f32 0.044715, %v652_v52  ;;  %v590_v17 = vmul.f32 %v3973_v54, %v3973_v54  ;;  %v3989_v19 = vadd.f32 %v456_v0, %v3799_v37 }
 0x180   :  { %5695 = vst [vmem:[#allocation24_spill] sm:$0xff] %v3981_v3  ;;  %v458_v23 = vpop.f32.mrb[17].mxu0  ;;  %v3991_v29 = vpop.f32.mrb[17].mxu1  ;;  %v653_v62 = vmul.f32 %v589_v59, %v3967_v48  ;;  %v1026_v42 = vmul.f32 0.5, %v962_v2 }
 0x181   :  { %5696 = vst [vmem:[#allocation25_spill] sm:$0xff] %v3989_v19  ;;  %5697 = vst [vmem:[#allocation26_spill] sm:$0xff] %v3991_v29  ;;  %v3993_v31 = vpop.eup %3255  ;;  %v3997_v32 = vadd.f32 %v458_v23, %v3802_v38  ;;  %v460_v33 = vpop.f32.mrb[18].mxu0  ;;  %v843_v49 = vmul.f32 0.7978846, %v779_v8  ;;  %v780_v52 = vadd.f32 %v716_v14, %v3950_v20  ;;  %v654_v0 = vmul.f32 %v590_v17, %v3973_v54 }
 0x182   :  { %v3999_v46 = vpop.f32.mrb[18].mxu1  ;;  %v591_v50 = vmul.f32 %v3989_v19, %v3989_v19  ;;  %v462_v36 = vpop.f32.mrb[19].mxu0  ;;  %v717_v59 = vmul.f32 0.044715, %v653_v62  ;;  %v4010_v61 = vadd.f32 %v460_v33, %v3799_v37 }
 0x183   :  { %5698 = vst [vmem:[#allocation27_spill] sm:$0xff] %v3999_v46  ;;  %v4005_v34 = vpop.f32.mrb[19].mxu1  ;;  %v592_v23 = vmul.f32 %v3997_v32, %v3997_v32  ;;  %v4013_v2 = vadd.f32 %v462_v36, %v3802_v38  ;;  %3265 = vtanh.f32 %v843_v49  ;;  %v844_v8 = vmul.f32 0.7978846, %v780_v52 }
 0x184   :  { %5699 = vst [vmem:[#allocation28_spill] sm:$0xff] %v4005_v34  ;;  %v718_v14 = vmul.f32 0.044715, %v654_v0  ;;  %v655_v17 = vmul.f32 %v591_v50, %v3989_v19  ;;  %v781_v43 = vadd.f32 %v717_v59, %v3967_v48  ;;  %v593_v62 = vmul.f32 %v4010_v61, %v4010_v61 }
 0x185   :  { %v656_v10 = vmul.f32 %v592_v23, %v3997_v32  ;;  %v594_v47 = vmul.f32 %v4013_v2, %v4013_v2  ;;  %v4022_v33 = vpop.eup %3257  ;;  %3267 = vtanh.f32 %v844_v8  ;;  %v1088_v52 = vmul.f32 %v1024_v39, %v3811_v45 }
 0x186   :  { %v782_v36 = vadd.f32 %v718_v14, %v3973_v54  ;;  %v719_v49 = vmul.f32 0.044715, %v655_v17  ;;  %v4026_v0 = vpop.eup %3259  ;;  %v845_v50 = vmul.f32 0.7978846, %v781_v43  ;;  %v657_v23 = vmul.f32 %v593_v62, %v4010_v61  ;;  %v466_v34 = vpop.f32.mrb[20].mxu0 }
 0x187   :  { %v720_v59 = vmul.f32 0.044715, %v656_v10  ;;  %v658_v26 = vmul.f32 %v594_v47, %v4013_v2  ;;  %v4030_v46 = vpop.f32.mrb[20].mxu1  ;;  %v4032_v29 = vpop.eup %3261  ;;  %v1090_v14 = vmul.f32 %v1026_v42, %v3829_v56  ;;  %v801_v45 = vadd.f32 %v3930_v40, %v3824_v53 }
 0x188   :  { %5700 = vst [vmem:[#allocation29_spill] sm:$0xff] %v4030_v46  ;;  %v846_v3 = vmul.f32 0.7978846, %v782_v36  ;;  %v783_v8 = vadd.f32 %v719_v49, %v3989_v19  ;;  %v468_v39 = vpop.f32.mrb[21].mxu0  ;;  %v4038_v43 = vpop.f32.mrb[21].mxu1  ;;  %3269 = vtanh.f32 %v845_v50 }
 0x189   :  { %5701 = vst [vmem:[#allocation30_spill] sm:$0xff] %v4038_v43  ;;  %v4040_v10 = vpop.eup %3263  ;;  %v784_v47 = vadd.f32 %v720_v59, %v3997_v32  ;;  %v721_v17 = vmul.f32 0.044715, %v657_v23  ;;  %v722_v62 = vmul.f32 0.044715, %v658_v26  ;;  %v470_v46 = vpop.f32.mrb[22].mxu0  ;;  %v1152_v49 = vpack.c.bf16 %v1090_v14, %v1088_v52 }
 0x18a   :  { %v4043_v48 = vpop.f32.mrb[22].mxu1  ;;  %3271 = vtanh.f32 %v846_v3  ;;  %v847_v36 = vmul.f32 0.7978846, %v783_v8  ;;  %v865_v56 = vmul.f32 0.7978846, %v801_v45  ;;  %v472_v42 = vpop.f32.mrb[23].mxu0  ;;  %v4051_v26 = vadd.f32 %v466_v34, %v3799_v37 }
 0x18b   :  { %5702 = vst [vmem:[#allocation31_spill] sm:$0xff] %v4043_v48  ;;  %v4045_v19 = vpop.f32.mrb[23].mxu1  ;;  %v848_v40 = vmul.f32 0.7978846, %v784_v47  ;;  %v785_v53 = vadd.f32 %v721_v17, %v4010_v61  ;;  %v786_v43 = vadd.f32 %v722_v62, %v4013_v2  ;;  %v738_v50 = vmul.f32 0.044715, %v3854_v11  ;;  %1419 = vmatprep.mubr.bf16.mxu1 %v1152_v49 }
 0x18c   :  { %5703 = vst [vmem:[#allocation32_spill] sm:$0xff] %v4045_v19  ;;  %3273 = vtanh.f32 %v847_v36  ;;  %5704 = vst [vmem:[#allocation33_spill] sm:$0xff] %v4051_v26  ;;  %v4054_v3 = vadd.f32 %v468_v39, %v3802_v38  ;;  %v4057_v52 = vadd.f32 %v470_v46, %v3799_v37  ;;  %v5706_v8 = vpack.c.bf16 %v3964_v44, %v3957_v27 }
 0x18d   :  { %3275 = vtanh.f32 %v848_v40  ;;  %v849_v59 = vmul.f32 0.7978846, %v785_v53  ;;  %v850_v23 = vmul.f32 0.7978846, %v786_v43  ;;  %v802_v11 = vadd.f32 %v738_v50, %v3834_v58  ;;  %v4063_v14 = vpop.eup %3265 }
 0x18e   :  { %5705 = vst [vmem:[#allocation34_spill] sm:$0xff] %v4057_v52  ;;  %1420 = vmatmul.mubr.bf16.vlgmr.msra.gmra.mrb[32].mxu1 %v5706_v8  ;;  %3277 = vtanh.f32 %v865_v56  ;;  %v595_v34 = vmul.f32 %v4051_v26, %v4051_v26  ;;  %v596_v45 = vmul.f32 %v4054_v3, %v4054_v3  ;;  %v597_v46 = vmul.f32 %v4057_v52, %v4057_v52  ;;  %v4075_v44 = vpop.f32.mrb[24].mxu0  ;;  %v4077_v43 = vpop.f32.mrb[24].mxu1 }
 0x18f   :  { %3279 = vtanh.f32 %v849_v59  ;;  %v866_v53 = vmul.f32 0.7978846, %v802_v11  ;;  %v4072_v39 = vadd.f32 %v472_v42, %v3802_v38  ;;  %v964_v27 = vadd.f32 1.0, %v3975_v55  ;;  %5707 = vst [vmem:[#allocation35_spill] sm:$0xff] %v4077_v43  ;;  %v4079_v47 = vpop.eup %3267  ;;  %v4084_v49 = vpop.f32.mrb[25].mxu0 }
 0x190   :  { %3281 = vtanh.f32 %v850_v23  ;;  %v659_v17 = vmul.f32 %v595_v34, %v4051_v26  ;;  %v660_v62 = vmul.f32 %v596_v45, %v4054_v3  ;;  %v661_v36 = vmul.f32 %v597_v46, %v4057_v52  ;;  %v4086_v56 = vpop.f32.mrb[25].mxu1  ;;  %v4091_v50 = vpop.f32.mrb[26].mxu0 }
 0x191   :  { %5708 = vst [vmem:[#allocation36_spill] sm:$0xff] %v4086_v56  ;;  %3283 = vtanh.f32 %v866_v53  ;;  %v598_v55 = vmul.f32 %v4072_v39, %v4072_v39  ;;  %v966_v42 = vadd.f32 1.0, %v3993_v31  ;;  %v1028_v40 = vmul.f32 0.5, %v964_v27  ;;  %v4093_v59 = vpop.f32.mrb[26].mxu1  ;;  %v482_v27 = vpop.f32.mrb[27].mxu0 }
 0x192   :  { %5709 = vst [vmem:[#allocation37_spill] sm:$0xff] %v4093_v59  ;;  %v723_v23 = vmul.f32 0.044715, %v659_v17  ;;  %v724_v8 = vmul.f32 0.044715, %v660_v62  ;;  %v4097_v34 = vadd.f32 %v3856_v12, %v3799_v37  ;;  %v4099_v45 = vpop.eup %3269  ;;  %v963_v31 = vadd.f32 1.0, %v3969_v41 }
 0x193   :  { %v725_v11 = vmul.f32 0.044715, %v661_v36  ;;  %v662_v46 = vmul.f32 %v598_v55, %v4072_v39  ;;  %v1030_v53 = vmul.f32 0.5, %v966_v42  ;;  %v1092_v58 = vmul.f32 %v1028_v40, %v3867_v21  ;;  %v4104_v56 = vpop.f32.mrb[27].mxu1 }
 0x194   :  { %5710 = vst [vmem:[#allocation38_spill] sm:$0xff] %v4097_v34  ;;  %5711 = vst [vmem:[#allocation39_spill] sm:$0xff] %v4104_v56  ;;  %v4106_v59 = vpop.eup %3271  ;;  %v787_v17 = vadd.f32 %v723_v23, %v4051_v26  ;;  %v788_v62 = vadd.f32 %v724_v8, %v4054_v3  ;;  %v611_v36 = vmul.f32 %v4097_v34, %v4097_v34  ;;  %v965_v21 = vadd.f32 1.0, %v3983_v5 }
 0x195   :  { %v789_v12 = vadd.f32 %v725_v11, %v4057_v52  ;;  %v726_v55 = vmul.f32 0.044715, %v662_v46  ;;  %v1094_v42 = vmul.f32 %v1030_v53, %v3884_v35  ;;  %v1027_v41 = vmul.f32 0.5, %v963_v31 }
 0x196   :  { %v4115_v40 = vpop.eup %3273  ;;  %v851_v56 = vmul.f32 0.7978846, %v787_v17  ;;  %v852_v43 = vmul.f32 0.7978846, %v788_v62  ;;  %v675_v23 = vmul.f32 %v611_v36, %v4097_v34  ;;  %v1029_v52 = vmul.f32 0.5, %v965_v21  ;;  %v4122_v26 = vpop.f32.mrb[28].mxu0 }
 0x197   :  { %v853_v19 = vmul.f32 0.7978846, %v789_v12  ;;  %v4118_v48 = vpop.eup %3275  ;;  %v790_v8 = vadd.f32 %v726_v55, %v4072_v39  ;;  %v1154_v11 = vpack.c.bf16 %v1094_v42, %v1092_v58  ;;  %v1091_v46 = vmul.f32 %v1027_v41, %v3860_v15  ;;  %v4124_v35 = vpop.f32.mrb[28].mxu1 }
 0x198   :  { %5712 = vst [vmem:[#allocation40_spill] sm:$0xff] %v4124_v35  ;;  %v4126_v5 = vpop.eup %3277  ;;  %3285 = vtanh.f32 %v851_v56  ;;  %v739_v53 = vmul.f32 0.044715, %v675_v23  ;;  %v4130_v31 = vadd.f32 %v3863_v18, %v3802_v38  ;;  %v4134_v17 = vadd.f32 %v3870_v24, %v3799_v37  ;;  %v4136_v58 = vpop.f32.mrb[29].mxu0 }
 0x199   :  { %5713 = vst [vmem:[#allocation41_spill] sm:$0xff] %v4126_v5  ;;  %v4138_v62 = vpop.f32.mrb[29].mxu1  ;;  %v4140_v15 = vpop.eup %3279  ;;  %3287 = vtanh.f32 %v852_v43  ;;  %v854_v12 = vmul.f32 0.7978846, %v790_v8  ;;  %1429 = vmatprep.mubr.bf16.mxu1 %v1154_v11  ;;  %v1093_v56 = vmul.f32 %v1029_v52, %v3876_v28  ;;  %v4145_v36 = vadd.f32 %v3878_v30, %v3802_v38 }
 0x19a   :  { %5714 = vst [vmem:[#allocation42_spill] sm:$0xff] %v4134_v17  ;;  %5715 = vst [vmem:[#allocation43_spill] sm:$0xff] %v4138_v62  ;;  %v4147_v18 = vpop.f32.mrb[30].mxu0  ;;  %v4149_v55 = vpop.f32.mrb[30].mxu1  ;;  %3289 = vtanh.f32 %v853_v19  ;;  %v803_v42 = vadd.f32 %v739_v53, %v4097_v34  ;;  %v612_v43 = vmul.f32 %v4130_v31, %v4130_v31  ;;  %v613_v21 = vmul.f32 %v4134_v17, %v4134_v17 }
 0x19b   :  { %5716 = vst [vmem:[#allocation44_spill] sm:$0xff] %v4145_v36  ;;  %5717 = vst [vmem:[#allocation45_spill] sm:$0xff] %v4149_v55  ;;  %v4151_v24 = vpop.eup %3281  ;;  %v4158_v28 = vpop.f32.mrb[31].mxu0  ;;  %3291 = vtanh.f32 %v854_v12  ;;  %v1153_v41 = vpack.c.bf16 %v1093_v56, %v1091_v46  ;;  %v614_v23 = vmul.f32 %v4145_v36, %v4145_v36  ;;  %v4168_v19 = vadd.f32 %v4075_v44, %v3799_v37 }
 0x19c   :  { %v4160_v52 = vpop.f32.mrb[31].mxu1  ;;  %v4162_v30 = vpop.eup %3283  ;;  %v867_v8 = vmul.f32 0.7978846, %v803_v42  ;;  %v676_v11 = vmul.f32 %v612_v43, %v4130_v31  ;;  %v677_v53 = vmul.f32 %v613_v21, %v4134_v17  ;;  %v4174_v34 = vadd.f32 %v4084_v49, %v3802_v38 }
 0x19d   :  { %5718 = vst [vmem:[#allocation46_spill] sm:$0xff] %v4160_v52  ;;  %5719 = vst [vmem:[#allocation47_spill] sm:$0xff] %v4162_v30  ;;  %1430 = vmatmul.mubr.bf16.gmra.mrb[36].mxu1 %v1153_v41  ;;  %v678_v12 = vmul.f32 %v614_v23, %v4145_v36  ;;  %v599_v46 = vmul.f32 %v4168_v19, %v4168_v19  ;;  %v4181_v56 = vadd.f32 %v4091_v50, %v3799_v37 }
 0x19e   :  { %v4184_v44 = vadd.f32 %v482_v27, %v3802_v38  ;;  %3293 = vtanh.f32 %v867_v8  ;;  %v740_v42 = vmul.f32 0.044715, %v676_v11  ;;  %v741_v43 = vmul.f32 0.044715, %v677_v53 }
 0x19f   :  { %v600_v49 = vmul.f32 %v4174_v34, %v4174_v34  ;;  %v742_v21 = vmul.f32 0.044715, %v678_v12  ;;  %v663_v41 = vmul.f32 %v599_v46, %v4168_v19  ;;  %v601_v23 = vmul.f32 %v4181_v56, %v4181_v56 }
 0x1a0   :  { %v602_v5 = vmul.f32 %v4184_v44, %v4184_v44  ;;  %v804_v50 = vadd.f32 %v740_v42, %v4130_v31  ;;  %v805_v27 = vadd.f32 %v741_v43, %v4134_v17  ;;  %v968_v11 = vadd.f32 1.0, %v4026_v0 }
 0x1a1   :  { %v664_v8 = vmul.f32 %v600_v49, %v4174_v34  ;;  %v806_v53 = vadd.f32 %v742_v21, %v4145_v36  ;;  %v727_v52 = vmul.f32 0.044715, %v663_v41  ;;  %v665_v12 = vmul.f32 %v601_v23, %v4181_v56 }
 0x1a2   :  { %v666_v46 = vmul.f32 %v602_v5, %v4184_v44  ;;  %v4200_v55 = vpop.eup %3285  ;;  %v868_v30 = vmul.f32 0.7978846, %v804_v50  ;;  %v869_v62 = vmul.f32 0.7978846, %v805_v27  ;;  %v4204_v42 = vadd.f32 %v3894_v60, %v3799_v37 }
 0x1a3   :  { %v728_v35 = vmul.f32 0.044715, %v664_v8  ;;  %v4206_v43 = vpop.eup %3287  ;;  %v870_v49 = vmul.f32 0.7978846, %v806_v53  ;;  %v791_v0 = vadd.f32 %v727_v52, %v4168_v19  ;;  %v729_v21 = vmul.f32 0.044715, %v665_v12 }
 0x1a4   :  { %5720 = vst [vmem:[#allocation48_spill] sm:$0xff] %v4204_v42  ;;  %v730_v41 = vmul.f32 0.044715, %v666_v46  ;;  %v4209_v17 = vpop.eup %3289  ;;  %3295 = vtanh.f32 %v868_v30  ;;  %v970_v23 = vadd.f32 1.0, %v4040_v10  ;;  %v1032_v50 = vmul.f32 0.5, %v968_v11 }
 0x1a5   :  { %v792_v5 = vadd.f32 %v728_v35, %v4174_v34  ;;  %v4213_v27 = vpop.eup %3291  ;;  %3297 = vtanh.f32 %v869_v62  ;;  %v855_v60 = vmul.f32 0.7978846, %v791_v0  ;;  %v793_v8 = vadd.f32 %v729_v21, %v4181_v56 }
 0x1a6   :  { %v794_v53 = vadd.f32 %v730_v41, %v4184_v44  ;;  %3299 = vtanh.f32 %v870_v49  ;;  %v1034_v12 = vmul.f32 0.5, %v970_v23  ;;  %v1096_v46 = vmul.f32 %v1032_v50, %v3904_v4 }
 0x1a7   :  { %v856_v52 = vmul.f32 0.7978846, %v792_v5  ;;  %3301 = vtanh.f32 %v855_v60  ;;  %v857_v30 = vmul.f32 0.7978846, %v793_v8  ;;  %v615_v10 = vmul.f32 %v4204_v42, %v4204_v42  ;;  %v3191_v60 = vld [vmem:[#allocation8 + $0x4] ss:$8 sps:$4 sm:$0xff]  }
 0x1a8   :  { %v858_v36 = vmul.f32 0.7978846, %v794_v53  ;;  %v4220_v35 = vpop.eup %3293  ;;  %v1098_v62 = vmul.f32 %v1034_v12, %v3920_v22  ;;  %v967_v11 = vadd.f32 1.0, %v4022_v33  ;;  %v969_v0 = vadd.f32 1.0, %v4032_v29  ;;  %2392 = vmatprep.subr.bf16.mxu0 %v3191_v60 }
 0x1a9   :  { %3303 = vtanh.f32 %v856_v52  ;;  %v679_v49 = vmul.f32 %v615_v10, %v4204_v42  ;;  %v4228_v4 = vadd.f32 %v3900_v1, %v3802_v38  ;;  %v4232_v21 = vadd.f32 %v3906_v7, %v3799_v37  ;;  %v3189_v1 = vld [vmem:[#allocation8] ss:$8 sps:$4 sm:$0xff]   ;;  %v3194_v52 = vld [vmem:[#allocation8 + $0x14] ss:$8 sps:$4 sm:$0xff]  }
 0x1aa   :  { %3305 = vtanh.f32 %v857_v30  ;;  %v1156_v41 = vpack.c.bf16 %v1098_v62, %v1096_v46  ;;  %v1031_v5 = vmul.f32 0.5, %v967_v11  ;;  %v1033_v23 = vmul.f32 0.5, %v969_v0  ;;  %2393 = vmatpush1.bf16.msra.mxu0 %v3189_v1  ;;  %v3192_v62 = vld [vmem:[#allocation8 + $0x10] ss:$8 sps:$4 sm:$0xff]   ;;  %v3197_v11 = vld [vmem:[#allocation8 + $0x24] ss:$8 sps:$4 sm:$0xff]  }
 0x1ab   :  { %5721 = vst [vmem:[#allocation49_spill] sm:$0xff] %v4228_v4  ;;  %5722 = vst [vmem:[#allocation50_spill] sm:$0xff] %v4232_v21  ;;  %3307 = vtanh.f32 %v858_v36  ;;  %v743_v22 = vmul.f32 0.044715, %v679_v49  ;;  %v616_v33 = vmul.f32 %v4228_v4, %v4228_v4  ;;  %v617_v29 = vmul.f32 %v4232_v21, %v4232_v21  ;;  %2394 = vmatprep.subr.bf16.mxu0 %v3194_v52 }
 0x1ac   :  { %v4240_v50 = vadd.f32 %v3914_v16, %v3802_v38  ;;  %1439 = vmatprep.mubr.bf16.mxu1 %v1156_v41  ;;  %v1095_v7 = vmul.f32 %v1031_v5, %v3898_v63  ;;  %v1097_v36 = vmul.f32 %v1033_v23, %v3912_v13  ;;  %v4246_v8 = vadd.f32 %v4122_v26, %v3799_v37 }
 0x1ad   :  { %v4250_v53 = vadd.f32 %v4136_v58, %v3802_v38  ;;  %v807_v12 = vadd.f32 %v743_v22, %v4204_v42  ;;  %v680_v16 = vmul.f32 %v616_v33, %v4228_v4  ;;  %v681_v46 = vmul.f32 %v617_v29, %v4232_v21 }
 0x1ae   :  { %5723 = vst [vmem:[#allocation51_spill] sm:$0xff] %v4240_v50  ;;  %v618_v63 = vmul.f32 %v4240_v50, %v4240_v50  ;;  %v4257_v13 = vpop.eup %3295  ;;  %v1155_v30 = vpack.c.bf16 %v1097_v36, %v1095_v7  ;;  %v603_v26 = vmul.f32 %v4246_v8, %v4246_v8  ;;  %v4265_v10 = vadd.f32 %v4147_v18, %v3799_v37 }
 0x1af   :  { %v604_v58 = vmul.f32 %v4250_v53, %v4250_v53  ;;  %v4267_v0 = vpop.eup %3297  ;;  %v871_v49 = vmul.f32 0.7978846, %v807_v12  ;;  %v744_v41 = vmul.f32 0.044715, %v680_v16  ;;  %v745_v5 = vmul.f32 0.044715, %v681_v46  ;;  %2395 = vmatpush1.bf16.msra.mxu0 %v3192_v62 }
 0x1b0   :  { %v682_v23 = vmul.f32 %v618_v63, %v4240_v50  ;;  %v4270_v22 = vpop.eup %3299  ;;  %1440 = vmatmul.mubr.bf16.gmra.mrb[40].mxu1 %v1155_v30  ;;  %v667_v33 = vmul.f32 %v603_v26, %v4246_v8  ;;  %v605_v18 = vmul.f32 %v4265_v10, %v4265_v10  ;;  %v4278_v1 = vadd.f32 %v4158_v28, %v3802_v38  ;;  %v3195_v12 = vld [vmem:[#allocation8 + $0x20] ss:$8 sps:$4 sm:$0xff]   ;;  %v3200_v28 = vld [vmem:[#allocation8 + $0x34] ss:$8 sps:$4 sm:$0xff]  }
 0x1b1   :  { %v668_v29 = vmul.f32 %v604_v58, %v4250_v53  ;;  %v4280_v60 = vpop.eup %3301  ;;  %3309 = vtanh.f32 %v871_v49  ;;  %v808_v7 = vadd.f32 %v744_v41, %v4228_v4  ;;  %v809_v36 = vadd.f32 %v745_v5, %v4232_v21  ;;  %2396 = vmatprep.subr.bf16.mxu0 %v3197_v11  ;;  %v3198_v11 = vld [vmem:[#allocation8 + $0x30] ss:$8 sps:$4 sm:$0xff]  }
 0x1b2   :  { %v746_v52 = vmul.f32 0.044715, %v682_v23  ;;  %v731_v46 = vmul.f32 0.044715, %v667_v33  ;;  %v669_v30 = vmul.f32 %v605_v18, %v4265_v10  ;;  %v606_v26 = vmul.f32 %v4278_v1, %v4278_v1 }
 0x1b3   :  { %v4284_v16 = vpop.eup %3303  ;;  %v732_v63 = vmul.f32 0.044715, %v668_v29  ;;  %v872_v49 = vmul.f32 0.7978846, %v808_v7  ;;  %v873_v42 = vmul.f32 0.7978846, %v809_v36  ;;  %2397 = vmatpush1.bf16.msra.mxu0 %v3195_v12 }
 0x1b4   :  { %v4289_v58 = vpop.eup %3305  ;;  %v810_v41 = vadd.f32 %v746_v52, %v4240_v50  ;;  %v972_v5 = vadd.f32 1.0, %v4079_v47  ;;  %v795_v33 = vadd.f32 %v731_v46, %v4246_v8  ;;  %v733_v18 = vmul.f32 0.044715, %v669_v30  ;;  %2398 = vmatprep.subr.bf16.mxu0 %v3200_v28  ;;  %v3203_v30 = vld [vmem:[#allocation8 + $0x44] ss:$8 sps:$4 sm:$0xff]  }
 0x1b5   :  { %v4293_v23 = vpop.eup %3307  ;;  %v796_v29 = vadd.f32 %v732_v63, %v4250_v53  ;;  %v670_v21 = vmul.f32 %v606_v26, %v4278_v1  ;;  %3311 = vtanh.f32 %v872_v49  ;;  %v974_v4 = vadd.f32 1.0, %v4106_v59 }
 0x1b6   :  { %v874_v62 = vmul.f32 0.7978846, %v810_v41  ;;  %v1036_v7 = vmul.f32 0.5, %v972_v5  ;;  %3313 = vtanh.f32 %v873_v42  ;;  %v859_v36 = vmul.f32 0.7978846, %v795_v33 }
 0x1b7   :  { %v860_v52 = vmul.f32 0.7978846, %v796_v29  ;;  %v797_v47 = vadd.f32 %v733_v18, %v4265_v10  ;;  %v734_v50 = vmul.f32 0.044715, %v670_v21  ;;  %v1038_v46 = vmul.f32 0.5, %v974_v4  ;;  %2399 = vmatpush1.bf16.msra.mxu0 %v3198_v11 }
 0x1b8   :  { %3315 = vtanh.f32 %v874_v62  ;;  %v1100_v63 = vmul.f32 %v1036_v7, %v3950_v20  ;;  %v4303_v59 = vadd.f32 %v3933_v51, %v3799_v37  ;;  %v971_v42 = vadd.f32 1.0, %v4063_v14  ;;  %v3201_v51 = vld [vmem:[#allocation8 + $0x40] ss:$8 sps:$4 sm:$0xff]   ;;  %2400 = vmatprep.subr.bf16.mxu0 %v3203_v30 }
 0x1b9   :  { %3317 = vtanh.f32 %v859_v36  ;;  %v861_v26 = vmul.f32 0.7978846, %v797_v47  ;;  %v798_v49 = vadd.f32 %v734_v50, %v4278_v1  ;;  %v1102_v12 = vmul.f32 %v1038_v46, %v3973_v54  ;;  %v5724_v62 = vld [vmem:[#allocation23_spill] sm:$0xff] }
 0x1ba   :  { %3319 = vtanh.f32 %v860_v52  ;;  %v973_v21 = vadd.f32 1.0, %v4099_v45  ;;  %v619_v20 = vmul.f32 %v4303_v59, %v4303_v59  ;;  %v1035_v4 = vmul.f32 0.5, %v971_v42  ;;  %v3206_v45 = vld [vmem:[#allocation8 + $0x54] ss:$8 sps:$4 sm:$0xff]   ;;  %v5725_v42 = vld [vmem:[#allocation24_spill] sm:$0xff] }
 0x1bb   :  { %3321 = vtanh.f32 %v861_v26  ;;  %v4313_v28 = vadd.f32 %v3939_v6, %v3802_v38  ;;  %v4315_v41 = vpop.eup %3309  ;;  %v862_v14 = vmul.f32 0.7978846, %v798_v49  ;;  %v1158_v5 = vpack.c.bf16 %v1102_v12, %v1100_v63  ;;  %2401 = vmatpush1.bf16.msra.mxu0 %v3201_v51 }
 0x1bc   :  { %v1037_v50 = vmul.f32 0.5, %v973_v21  ;;  %v4319_v54 = vadd.f32 %v3942_v9, %v3799_v37  ;;  %v683_v33 = vmul.f32 %v619_v20, %v4303_v59  ;;  %v1099_v29 = vmul.f32 %v1035_v4, %v3937_v57  ;;  %2402 = vmatprep.subr.bf16.mxu0 %v3206_v45 }
 0x1bd   :  { %v620_v6 = vmul.f32 %v4313_v28, %v4313_v28  ;;  %v4327_v18 = vadd.f32 %v3952_v25, %v3802_v38  ;;  %3323 = vtanh.f32 %v862_v14  ;;  %1449 = vmatprep.mubr.bf16.mxu1 %v1158_v5  ;;  %v976_v36 = vadd.f32 1.0, %v4118_v48  ;;  %v3204_v25 = vld [vmem:[#allocation8 + $0x50] ss:$8 sps:$4 sm:$0xff]   ;;  %v3209_v48 = vld [vmem:[#allocation8 + $0x64] ss:$8 sps:$4 sm:$0xff]  }
 0x1be   :  { %v1101_v7 = vmul.f32 %v1037_v50, %v5724_v62  ;;  %v621_v9 = vmul.f32 %v4319_v54, %v4319_v54  ;;  %v747_v52 = vmul.f32 0.044715, %v683_v33  ;;  %v978_v11 = vadd.f32 1.0, %v4151_v24 }
 0x1bf   :  { %v684_v47 = vmul.f32 %v620_v6, %v4313_v28  ;;  %v622_v57 = vmul.f32 %v4327_v18, %v4327_v18  ;;  %v4337_v46 = vpop.eup %3311  ;;  %v1040_v26 = vmul.f32 0.5, %v976_v36  ;;  %v4342_v49 = vadd.f32 %v5725_v42, %v3799_v37  ;;  %2403 = vmatpush1.bf16.msra.mxu0 %v3204_v25 }
 0x1c0   :  { %v1157_v63 = vpack.c.bf16 %v1101_v7, %v1099_v29  ;;  %v685_v30 = vmul.f32 %v621_v9, %v4319_v54  ;;  %v4344_v12 = vpop.eup %3313  ;;  %v811_v21 = vadd.f32 %v747_v52, %v4303_v59  ;;  %v1042_v4 = vmul.f32 0.5, %v978_v11  ;;  %v3207_v9 = vld [vmem:[#allocation8 + $0x60] ss:$8 sps:$4 sm:$0xff]   ;;  %2404 = vmatprep.subr.bf16.mxu0 %v3209_v48 }
 0x1c1   :  { %v748_v20 = vmul.f32 0.044715, %v684_v47  ;;  %v686_v24 = vmul.f32 %v622_v57, %v4327_v18  ;;  %v1104_v5 = vmul.f32 %v1040_v26, %v3997_v32  ;;  %v623_v50 = vmul.f32 %v4342_v49, %v4342_v49  ;;  %v5728_v48 = vld [vmem:[#allocation27_spill] sm:$0xff] }
 0x1c2   :  { %v4348_v51 = vpop.eup %3315  ;;  %1450 = vmatmul.mubr.bf16.gmra.mrb[44].mxu1 %v1157_v63  ;;  %v749_v14 = vmul.f32 0.044715, %v685_v30  ;;  %v975_v45 = vadd.f32 1.0, %v4115_v40  ;;  %v875_v29 = vmul.f32 0.7978846, %v811_v21  ;;  %v1106_v7 = vmul.f32 %v1042_v4, %v4013_v2  ;;  %v5726_v21 = vld [vmem:[#allocation25_spill] sm:$0xff] }
 0x1c3   :  { %v4354_v33 = vpop.eup %3317  ;;  %v812_v6 = vadd.f32 %v748_v20, %v4313_v28  ;;  %v750_v62 = vmul.f32 0.044715, %v686_v24  ;;  %v687_v32 = vmul.f32 %v623_v50, %v4342_v49  ;;  %v977_v47 = vadd.f32 1.0, %v4140_v15  ;;  %v3212_v40 = vld [vmem:[#allocation8 + $0x74] ss:$8 sps:$4 sm:$0xff]   ;;  %2405 = vmatpush1.bf16.msra.mxu0 %v3207_v9 }
 0x1c4   :  { %v4358_v36 = vpop.eup %3319  ;;  %v813_v52 = vadd.f32 %v749_v14, %v4319_v54  ;;  %v1039_v57 = vmul.f32 0.5, %v975_v45  ;;  %3325 = vtanh.f32 %v875_v29  ;;  %v1160_v2 = vpack.c.bf16 %v1106_v7, %v1104_v5  ;;  %v5727_v15 = vld [vmem:[#allocation26_spill] sm:$0xff]  ;;  %2406 = vmatprep.subr.bf16.mxu0 %v3212_v40 }
 0x1c5   :  { %v4363_v11 = vpop.eup %3321  ;;  %v876_v63 = vmul.f32 0.7978846, %v812_v6  ;;  %v814_v30 = vadd.f32 %v750_v62, %v4327_v18  ;;  %v751_v26 = vmul.f32 0.044715, %v687_v32  ;;  %v1041_v42 = vmul.f32 0.5, %v977_v47  ;;  %v5729_v6 = vld [vmem:[#allocation28_spill] sm:$0xff] }
 0x1c6   :  { %v877_v25 = vmul.f32 0.7978846, %v813_v52  ;;  %v1103_v20 = vmul.f32 %v1039_v57, %v5726_v21  ;;  %1459 = vmatprep.mubr.bf16.mxu1 %v1160_v2  ;;  %v4369_v4 = vadd.f32 %v5727_v15, %v3802_v38  ;;  %v4373_v14 = vadd.f32 %v5728_v48, %v3799_v37  ;;  %v3210_v50 = vld [vmem:[#allocation8 + $0x70] ss:$8 sps:$4 sm:$0xff]  }
 0x1c7   :  { %3327 = vtanh.f32 %v876_v63  ;;  %v878_v24 = vmul.f32 0.7978846, %v814_v30  ;;  %v4375_v45 = vpop.eup %3323  ;;  %v815_v5 = vadd.f32 %v751_v26, %v4342_v49  ;;  %v1105_v29 = vmul.f32 %v1041_v42, %v4010_v61  ;;  %v5730_v2 = vld [vmem:[#allocation29_spill] sm:$0xff]  ;;  %2407 = vmatpush1.bf16.msra.mxu0 %v3210_v50 }
 0x1c8   :  { %3329 = vtanh.f32 %v877_v25  ;;  %v4381_v62 = vadd.f32 %v5729_v6, %v3802_v38  ;;  %v624_v7 = vmul.f32 %v4369_v4, %v4369_v4  ;;  %v625_v9 = vmul.f32 %v4373_v14, %v4373_v14 }
 0x1c9   :  { %3331 = vtanh.f32 %v878_v24  ;;  %v980_v52 = vadd.f32 1.0, %v4206_v43  ;;  %v879_v32 = vmul.f32 0.7978846, %v815_v5  ;;  %v1159_v47 = vpack.c.bf16 %v1105_v29, %v1103_v20 }
 0x1ca   :  { %v626_v57 = vmul.f32 %v4381_v62, %v4381_v62  ;;  %v982_v61 = vadd.f32 1.0, %v4213_v27  ;;  %v688_v63 = vmul.f32 %v624_v7, %v4369_v4  ;;  %v689_v40 = vmul.f32 %v625_v9, %v4373_v14  ;;  %v5731_v9 = vld [vmem:[#allocation30_spill] sm:$0xff] }
 0x1cb   :  { %v1044_v30 = vmul.f32 0.5, %v980_v52  ;;  %v4395_v25 = vadd.f32 %v5730_v2, %v3799_v37  ;;  %3333 = vtanh.f32 %v879_v32  ;;  %1460 = vmatmul.mubr.bf16.gmra.mrb[48].mxu1 %v1159_v47  ;;  %v979_v42 = vadd.f32 1.0, %v4200_v55 }
 0x1cc   :  { %v690_v43 = vmul.f32 %v626_v57, %v4381_v62  ;;  %v1046_v26 = vmul.f32 0.5, %v982_v61  ;;  %v752_v21 = vmul.f32 0.044715, %v688_v63  ;;  %v753_v20 = vmul.f32 0.044715, %v689_v40 }
 0x1cd   :  { %v1108_v27 = vmul.f32 %v1044_v30, %v4054_v3  ;;  %v627_v24 = vmul.f32 %v4395_v25, %v4395_v25  ;;  %v981_v5 = vadd.f32 1.0, %v4209_v17  ;;  %v1043_v50 = vmul.f32 0.5, %v979_v42 }
 0x1ce   :  { %v754_v15 = vmul.f32 0.044715, %v690_v43  ;;  %v1110_v48 = vmul.f32 %v1046_v26, %v4072_v39  ;;  %v4404_v29 = vpop.eup %3325  ;;  %v816_v6 = vadd.f32 %v752_v21, %v4369_v4  ;;  %v817_v7 = vadd.f32 %v753_v20, %v4373_v14  ;;  %v5732_v39 = vld [vmem:[#allocation33_spill] sm:$0xff]  ;;  %v5733_v26 = vld [vmem:[#allocation34_spill] sm:$0xff]  ;;  %v5734_v21 = vld [vmem:[#allocation31_spill] sm:$0xff] }
 0x1cf   :  { %v691_v55 = vmul.f32 %v627_v24, %v4395_v25  ;;  %v4411_v3 = vadd.f32 %v5731_v9, %v3802_v38  ;;  %v1045_v47 = vmul.f32 0.5, %v981_v5  ;;  %v1107_v57 = vmul.f32 %v1043_v50, %v5732_v39 }
 0x1d0   :  { %v818_v52 = vadd.f32 %v754_v15, %v4381_v62  ;;  %v1162_v32 = vpack.c.bf16 %v1110_v48, %v1108_v27  ;;  %v880_v61 = vmul.f32 0.7978846, %v816_v6  ;;  %v881_v63 = vmul.f32 0.7978846, %v817_v7  ;;  %v5735_v27 = vld [vmem:[#allocation32_spill] sm:$0xff] }
 0x1d1   :  { %v4415_v17 = vpop.eup %3327  ;;  %v755_v40 = vmul.f32 0.044715, %v691_v55  ;;  %v628_v30 = vmul.f32 %v4411_v3, %v4411_v3  ;;  %v1109_v42 = vmul.f32 %v1045_v47, %v5733_v26  ;;  %v4424_v20 = vadd.f32 %v5734_v21, %v3799_v37 }
 0x1d2   :  { %v4419_v2 = vpop.eup %3329  ;;  %v882_v43 = vmul.f32 0.7978846, %v818_v52  ;;  %1469 = vmatprep.mubr.bf16.mxu1 %v1162_v32  ;;  %v4428_v24 = vadd.f32 %v5735_v27, %v3802_v38  ;;  %3335 = vtanh.f32 %v880_v61  ;;  %v984_v50 = vadd.f32 1.0, %v4284_v16 }
 0x1d3   :  { %v4430_v15 = vpop.eup %3331  ;;  %v819_v48 = vadd.f32 %v755_v40, %v4395_v25  ;;  %v692_v5 = vmul.f32 %v628_v30, %v4411_v3  ;;  %3337 = vtanh.f32 %v881_v63  ;;  %v1161_v6 = vpack.c.bf16 %v1109_v42, %v1107_v57  ;;  %v5736_v57 = vld [vmem:[#allocation35_spill] sm:$0xff] }
 0x1d4   :  { %v629_v7 = vmul.f32 %v4424_v20, %v4424_v20  ;;  %v630_v55 = vmul.f32 %v4428_v24, %v4428_v24  ;;  %3339 = vtanh.f32 %v882_v43  ;;  %v986_v32 = vadd.f32 1.0, %v4293_v23 }
 0x1d5   :  { %v883_v9 = vmul.f32 0.7978846, %v819_v48  ;;  %v756_v52 = vmul.f32 0.044715, %v692_v5  ;;  %v4440_v47 = vpop.eup %3333  ;;  %1470 = vmatmul.mubr.bf16.gmra.mrb[52].mxu1 %v1161_v6  ;;  %v1048_v61 = vmul.f32 0.5, %v984_v50  ;;  %v4446_v63 = vadd.f32 %v5736_v57, %v3799_v37 }
 0x1d6   :  { %v693_v39 = vmul.f32 %v629_v7, %v4424_v20  ;;  %v694_v16 = vmul.f32 %v630_v55, %v4428_v24  ;;  %v1050_v30 = vmul.f32 0.5, %v986_v32  ;;  %v983_v43 = vadd.f32 1.0, %v4280_v60  ;;  %v5737_v60 = vld [vmem:[#allocation36_spill] sm:$0xff] }
 0x1d7   :  { %3341 = vtanh.f32 %v883_v9  ;;  %v820_v40 = vadd.f32 %v756_v52, %v4411_v3  ;;  %v1112_v42 = vmul.f32 %v1048_v61, %v4174_v34  ;;  %v631_v21 = vmul.f32 %v4446_v63, %v4446_v63 }
 0x1d8   :  { %v757_v26 = vmul.f32 0.044715, %v693_v39  ;;  %v758_v23 = vmul.f32 0.044715, %v694_v16  ;;  %v1114_v48 = vmul.f32 %v1050_v30, %v4184_v44  ;;  %v985_v5 = vadd.f32 1.0, %v4289_v58 }
 0x1d9   :  { %v884_v27 = vmul.f32 0.7978846, %v820_v40  ;;  %v1047_v50 = vmul.f32 0.5, %v983_v43  ;;  %v695_v55 = vmul.f32 %v631_v21, %v4446_v63  ;;  %v4460_v9 = vadd.f32 %v5737_v60, %v3802_v38  ;;  %v5738_v40 = vld [vmem:[#allocation37_spill] sm:$0xff]  ;;  %v5739_v43 = vld [vmem:[#allocation39_spill] sm:$0xff] }
 0x1da   :  { %v821_v6 = vadd.f32 %v757_v26, %v4424_v20  ;;  %v822_v7 = vadd.f32 %v758_v23, %v4428_v24  ;;  %v1164_v34 = vpack.c.bf16 %v1114_v48, %v1112_v42  ;;  %v1049_v52 = vmul.f32 0.5, %v985_v5 }
 0x1db   :  { %3343 = vtanh.f32 %v884_v27  ;;  %v1111_v32 = vmul.f32 %v1047_v50, %v4168_v19  ;;  %v759_v16 = vmul.f32 0.044715, %v695_v55  ;;  %v632_v58 = vmul.f32 %v4460_v9, %v4460_v9 }
 0x1dc   :  { %v885_v39 = vmul.f32 0.7978846, %v821_v6  ;;  %v886_v44 = vmul.f32 0.7978846, %v822_v7  ;;  %v4465_v61 = vpop.eup %3335  ;;  %1479 = vmatprep.mubr.bf16.mxu1 %v1164_v34  ;;  %v1113_v57 = vmul.f32 %v1049_v52, %v4181_v56  ;;  %v4470_v30 = vadd.f32 %v5738_v40, %v3799_v37  ;;  %v5740_v52 = vld [vmem:[#allocation40_spill] sm:$0xff] }
 0x1dd   :  { %v4474_v26 = vadd.f32 %v5739_v43, %v3802_v38  ;;  %v988_v19 = vadd.f32 1.0, %v4358_v36  ;;  %v4477_v23 = vpop.eup %3337  ;;  %v823_v42 = vadd.f32 %v759_v16, %v4446_v63  ;;  %v696_v21 = vmul.f32 %v632_v58, %v4460_v9 }
 0x1de   :  { %3345 = vtanh.f32 %v885_v39  ;;  %v990_v27 = vadd.f32 1.0, %v4375_v45  ;;  %v4482_v56 = vpop.eup %3339  ;;  %v1163_v48 = vpack.c.bf16 %v1113_v57, %v1111_v32  ;;  %v633_v5 = vmul.f32 %v4470_v30, %v4470_v30 }
 0x1df   :  { %3347 = vtanh.f32 %v886_v44  ;;  %v634_v50 = vmul.f32 %v4474_v26, %v4474_v26  ;;  %v887_v36 = vmul.f32 0.7978846, %v823_v42  ;;  %v760_v6 = vmul.f32 0.044715, %v696_v21 }
 0x1e0   :  { %v1052_v7 = vmul.f32 0.5, %v988_v19  ;;  %v1054_v55 = vmul.f32 0.5, %v990_v27  ;;  %1480 = vmatmul.mubr.bf16.gmra.mrb[56].mxu1 %v1163_v48  ;;  %v697_v34 = vmul.f32 %v633_v5, %v4470_v30  ;;  %v4494_v32 = vadd.f32 %v5740_v52, %v3799_v37  ;;  %v5742_v48 = vld [vmem:[#allocation43_spill] sm:$0xff] }
 0x1e1   :  { %v4488_v60 = vpop.eup %3341  ;;  %v698_v45 = vmul.f32 %v634_v50, %v4474_v26  ;;  %v987_v39 = vadd.f32 1.0, %v4354_v33  ;;  %3349 = vtanh.f32 %v887_v36  ;;  %v824_v44 = vadd.f32 %v760_v6, %v4460_v9 }
 0x1e2   :  { %5741 = vst [vmem:[#allocation23_spill] sm:$0xff] %v4494_v32  ;;  %v1116_v16 = vmul.f32 %v1052_v7, %v4250_v53  ;;  %v1118_v58 = vmul.f32 %v1054_v55, %v4278_v1  ;;  %v761_v57 = vmul.f32 0.044715, %v697_v34  ;;  %v635_v43 = vmul.f32 %v4494_v32, %v4494_v32  ;;  %v5743_v7 = vld [vmem:[#allocation22_spill] sm:$0xff] }
 0x1e3   :  { %v762_v40 = vmul.f32 0.044715, %v698_v45  ;;  %v989_v19 = vadd.f32 1.0, %v4363_v11  ;;  %v888_v42 = vmul.f32 0.7978846, %v824_v44  ;;  %v1051_v27 = vmul.f32 0.5, %v987_v39 }
 0x1e4   :  { %v1166_v21 = vpack.c.bf16 %v1118_v58, %v1116_v16  ;;  %v4505_v33 = vadd.f32 %v5742_v48, %v3802_v38  ;;  %v825_v53 = vadd.f32 %v761_v57, %v4470_v30  ;;  %v699_v50 = vmul.f32 %v635_v43, %v4494_v32  ;;  %v5744_v58 = vld [vmem:[#allocation47_spill] sm:$0xff]  ;;  %v5745_v43 = vld [vmem:[#allocation45_spill] sm:$0xff] }
 0x1e5   :  { %v4507_v5 = vpop.eup %3343  ;;  %v826_v1 = vadd.f32 %v762_v40, %v4474_v26  ;;  %v1053_v36 = vmul.f32 0.5, %v989_v19  ;;  %3351 = vtanh.f32 %v888_v42  ;;  %v1115_v11 = vmul.f32 %v1051_v27, %v4246_v8  ;;  %v5746_v27 = vld [vmem:[#allocation46_spill] sm:$0xff] }
 0x1e6   :  { %1489 = vmatprep.mubr.bf16.mxu1 %v1166_v21  ;;  %v636_v6 = vmul.f32 %v4505_v33, %v4505_v33  ;;  %v992_v55 = vadd.f32 1.0, %v5743_v7  ;;  %v889_v34 = vmul.f32 0.7978846, %v825_v53  ;;  %v763_v52 = vmul.f32 0.044715, %v699_v50  ;;  %v5748_v7 = vld [vmem:[#allocation21_spill] sm:$0xff] }
 0x1e7   :  { %v890_v45 = vmul.f32 0.7978846, %v826_v1  ;;  %v1117_v39 = vmul.f32 %v1053_v36, %v4265_v10  ;;  %v994_v57 = vadd.f32 1.0, %v5744_v58  ;;  %v4523_v8 = vadd.f32 %v5745_v43, %v3799_v37  ;;  %v5747_v1 = vld [vmem:[#allocation18_spill] sm:$0xff] }
 0x1e8   :  { %v4517_v44 = vpop.eup %3345  ;;  %v700_v16 = vmul.f32 %v636_v6, %v4505_v33  ;;  %v1056_v40 = vmul.f32 0.5, %v992_v55  ;;  %3353 = vtanh.f32 %v889_v34  ;;  %v827_v42 = vadd.f32 %v763_v52, %v4494_v32  ;;  %v5749_v34 = vld [vmem:[#allocation20_spill] sm:$0xff]  ;;  %v5750_v52 = vld [vmem:[#allocation41_spill] sm:$0xff] }
 0x1e9   :  { %v4525_v19 = vpop.eup %3347  ;;  %v1165_v21 = vpack.c.bf16 %v1117_v39, %v1115_v11  ;;  %v4530_v10 = vadd.f32 %v5746_v27, %v3802_v38  ;;  %3355 = vtanh.f32 %v890_v45  ;;  %v1058_v53 = vmul.f32 0.5, %v994_v57 }
 0x1ea   :  { %v764_v48 = vmul.f32 0.044715, %v700_v16  ;;  %v1120_v50 = vmul.f32 %v1056_v40, %v5747_v1  ;;  %v891_v36 = vmul.f32 0.7978846, %v827_v42  ;;  %v637_v37 = vmul.f32 %v4523_v8, %v4523_v8 }
 0x1eb   :  { %1490 = vmatmul.mubr.bf16.gmra.mrb[60].mxu1 %v1165_v21  ;;  %v638_v6 = vmul.f32 %v4530_v10, %v4530_v10  ;;  %v991_v55 = vadd.f32 1.0, %v5748_v7  ;;  %v4538_v11 = vpop.eup %3349  ;;  %v1122_v45 = vmul.f32 %v1058_v53, %v5749_v34  ;;  %v993_v39 = vadd.f32 1.0, %v5750_v52  ;;  %v5753_v52 = vld [vmem:[#allocation44_spill] sm:$0xff] }
 0x1ec   :  { %v828_v38 = vadd.f32 %v764_v48, %v4505_v33  ;;  %v996_v16 = vadd.f32 1.0, %v4257_v13  ;;  %3357 = vtanh.f32 %v891_v36  ;;  %v701_v58 = vmul.f32 %v637_v37, %v4523_v8  ;;  %v5751_v48 = vld [vmem:[#allocation17_spill] sm:$0xff]  ;;  %v5752_v13 = vld [vmem:[#allocation19_spill] sm:$0xff] }
 0x1ed   :  { %v702_v57 = vmul.f32 %v638_v6, %v4530_v10  ;;  %v1055_v40 = vmul.f32 0.5, %v991_v55  ;;  %v1168_v42 = vpack.c.bf16 %v1122_v45, %v1120_v50  ;;  %v1057_v21 = vmul.f32 0.5, %v993_v39 }
 0x1ee   :  { %v892_v43 = vmul.f32 0.7978846, %v828_v38  ;;  %v998_v27 = vadd.f32 1.0, %v4270_v22  ;;  %v765_v1 = vmul.f32 0.044715, %v701_v58  ;;  %v1060_v53 = vmul.f32 0.5, %v996_v16 }
 0x1ef   :  { %v766_v7 = vmul.f32 0.044715, %v702_v57  ;;  %v1119_v32 = vmul.f32 %v1055_v40, %v5751_v48  ;;  %v4548_v34 = vpop.eup %3351  ;;  %1499 = vmatprep.mubr.bf16.mxu1 %v1168_v42  ;;  %v1121_v36 = vmul.f32 %v1057_v21, %v5752_v13  ;;  %v995_v6 = vadd.f32 1.0, %v4220_v35  ;;  %v5756_v13 = vld [vmem:[#allocation49_spill] sm:$0xff] }
 0x1f0   :  { %3359 = vtanh.f32 %v892_v43  ;;  %v1062_v37 = vmul.f32 0.5, %v998_v27  ;;  %v829_v55 = vadd.f32 %v765_v1, %v4523_v8  ;;  %v1124_v22 = vmul.f32 %v1060_v53, %v4130_v31  ;;  %v5754_v31 = vld [vmem:[#allocation38_spill] sm:$0xff] }
 0x1f1   :  { %v830_v50 = vadd.f32 %v766_v7, %v4530_v10  ;;  %v997_v38 = vadd.f32 1.0, %v4267_v0  ;;  %v1167_v45 = vpack.c.bf16 %v1121_v36, %v1119_v32  ;;  %v1059_v16 = vmul.f32 0.5, %v995_v6  ;;  %v5755_v7 = vld [vmem:[#allocation42_spill] sm:$0xff] }
 0x1f2   :  { %v1126_v39 = vmul.f32 %v1062_v37, %v5753_v52  ;;  %v1000_v58 = vadd.f32 1.0, %v4337_v46  ;;  %v4558_v57 = vpop.eup %3353  ;;  %v893_v40 = vmul.f32 0.7978846, %v829_v55  ;;  %v1002_v35 = vadd.f32 1.0, %v4348_v51 }
 0x1f3   :  { %v894_v43 = vmul.f32 0.7978846, %v830_v50  ;;  %v1061_v42 = vmul.f32 0.5, %v997_v38  ;;  %v4561_v21 = vpop.eup %3355  ;;  %1500 = vmatmul.mubr.bf16.gmra.mrb[64].mxu1 %v1167_v45  ;;  %v1123_v1 = vmul.f32 %v1059_v16, %v5754_v31  ;;  %v999_v32 = vadd.f32 1.0, %v4315_v41  ;;  %v5757_v50 = vld [vmem:[#allocation51_spill] sm:$0xff]  ;;  %v5758_v45 = vld [vmem:[#allocation48_spill] sm:$0xff] }
 0x1f4   :  { %v1170_v27 = vpack.c.bf16 %v1126_v39, %v1124_v22  ;;  %v1064_v0 = vmul.f32 0.5, %v1000_v58  ;;  %3361 = vtanh.f32 %v893_v40  ;;  %v1066_v46 = vmul.f32 0.5, %v1002_v35  ;;  %v5759_v40 = vld [vmem:[#allocation50_spill] sm:$0xff] }
 0x1f5   :  { %v1125_v48 = vmul.f32 %v1061_v42, %v5755_v7  ;;  %v1001_v53 = vadd.f32 1.0, %v4344_v12  ;;  %3363 = vtanh.f32 %v894_v43  ;;  %v1063_v51 = vmul.f32 0.5, %v999_v32 }
 0x1f6   :  { %1509 = vmatprep.mubr.bf16.mxu1 %v1170_v27  ;;  %v1128_v36 = vmul.f32 %v1064_v0, %v5756_v13  ;;  %v1004_v37 = vadd.f32 1.0, %v4415_v17  ;;  %v4569_v6 = vpop.eup %3357  ;;  %v1130_v22 = vmul.f32 %v1066_v46, %v5757_v50  ;;  %v1006_v41 = vadd.f32 1.0, %v4430_v15 }
 0x1f7   :  { %v1169_v55 = vpack.c.bf16 %v1125_v48, %v1123_v1  ;;  %v1065_v38 = vmul.f32 0.5, %v1001_v53  ;;  %v1127_v52 = vmul.f32 %v1063_v51, %v5758_v45  ;;  %v1003_v12 = vadd.f32 1.0, %v4404_v29  ;;  %v3213_v45 = vld [vmem:[#allocation8 + $0x80] ss:$8 sps:$4 sm:$0xff]  }
 0x1f8   :  { %v1068_v39 = vmul.f32 0.5, %v1004_v37  ;;  %v1005_v16 = vadd.f32 1.0, %v4419_v2  ;;  %v1172_v58 = vpack.c.bf16 %v1130_v22, %v1128_v36  ;;  %v1070_v42 = vmul.f32 0.5, %v1006_v41 }
 0x1f9   :  { %v1129_v43 = vmul.f32 %v1065_v38, %v5759_v40  ;;  %v1008_v17 = vadd.f32 1.0, %v4465_v61  ;;  %v1067_v31 = vmul.f32 0.5, %v1003_v12  ;;  %v1010_v15 = vadd.f32 1.0, %v4482_v56  ;;  %v3215_v12 = vld [vmem:[#allocation8 + $0x84] ss:$8 sps:$4 sm:$0xff]  }
 0x1fa   :  { %v3360_v35 = vpop.eup %3359  ;;  %v1132_v27 = vmul.f32 %v1068_v39, %v4313_v28  ;;  %v1069_v1 = vmul.f32 0.5, %v1005_v16  ;;  %v1134_v32 = vmul.f32 %v1070_v42, %v4327_v18  ;;  %v1007_v29 = vadd.f32 1.0, %v4440_v47  ;;  %2408 = vmatprep.subr.bf16.mxu0 %v3215_v12 }
 0x1fb   :  { %v1171_v0 = vpack.c.bf16 %v1129_v43, %v1127_v52  ;;  %v1072_v7 = vmul.f32 0.5, %v1008_v17  ;;  %1510 = vmatmul.mubr.bf16.gmra.mrb[68].mxu1 %v1169_v55  ;;  %v4583_v2 = vmul.f32 %v1067_v31, %v4303_v59  ;;  %v1074_v61 = vmul.f32 0.5, %v1010_v15  ;;  %2409 = vmatpush1.bf16.msra.mxu0 %v3213_v45  ;;  %v3221_v15 = vld [vmem:[#allocation8 + $0xa4] ss:$8 sps:$4 sm:$0xff]  }
 0x1fc   :  { %v4586_v48 = vmul.f32 %v1069_v1, %v4319_v54  ;;  %v1009_v28 = vadd.f32 1.0, %v4477_v23  ;;  %1519 = vmatprep.mubr.bf16.mxu1 %v1172_v58  ;;  %v1174_v46 = vpack.c.bf16 %v1134_v32, %v1132_v27  ;;  %v1071_v53 = vmul.f32 0.5, %v1007_v29  ;;  %v3218_v58 = vld [vmem:[#allocation8 + $0x94] ss:$8 sps:$4 sm:$0xff]  }
 0x1fd   :  { %v4590_v56 = vmul.f32 %v1072_v7, %v4369_v4  ;;  %v1012_v18 = vadd.f32 1.0, %v4507_v5  ;;  %v4596_v59 = vmul.f32 %v1074_v61, %v4381_v62  ;;  %v1014_v54 = vadd.f32 1.0, %v4525_v19  ;;  %2410 = vmatprep.subr.bf16.mxu0 %v3218_v58 }
 0x1fe   :  { %v1173_v47 = vpack.c.bf16 %v4586_v48, %v4583_v2  ;;  %v1073_v13 = vmul.f32 0.5, %v1009_v28  ;;  %v3362_v36 = vpop.eup %3361  ;;  %v4600_v23 = vmul.f32 %v1071_v53, %v4342_v49  ;;  %v1011_v4 = vadd.f32 1.0, %v4488_v60  ;;  %v3219_v28 = vld [vmem:[#allocation8 + $0xa0] ss:$8 sps:$4 sm:$0xff]   ;;  %v3233_v48 = vld [vmem:[#allocation8 + $0xe4] ss:$8 sps:$4 sm:$0xff]  }
 0x1ff   :  { %v1076_v51 = vmul.f32 0.5, %v1012_v18  ;;  %v1013_v37 = vadd.f32 1.0, %v4517_v44  ;;  %v3364_v55 = vpop.eup %3363  ;;  %v1176_v5 = vpack.c.bf16 %v4596_v59, %v4590_v56  ;;  %v1078_v62 = vmul.f32 0.5, %v1014_v54  ;;  %v3224_v56 = vld [vmem:[#allocation8 + $0xb4] ss:$8 sps:$4 sm:$0xff]  }
 0x200   :  { %v1137_v50 = vmul.f32 %v1073_v13, %v4373_v14  ;;  %v1016_v22 = vadd.f32 1.0, %v4548_v34  ;;  %v1075_v38 = vmul.f32 0.5, %v1011_v4  ;;  %v1018_v49 = vadd.f32 1.0, %v4561_v21  ;;  %v3227_v18 = vld [vmem:[#allocation8 + $0xc4] ss:$8 sps:$4 sm:$0xff]  }
 0x201   :  { %v1140_v19 = vmul.f32 %v1076_v51, %v4411_v3  ;;  %v1077_v41 = vmul.f32 0.5, %v1013_v37  ;;  %v1142_v44 = vmul.f32 %v1078_v62, %v4428_v24  ;;  %v1015_v39 = vadd.f32 1.0, %v4538_v11  ;;  %v3230_v59 = vld [vmem:[#allocation8 + $0xd4] ss:$8 sps:$4 sm:$0xff]   ;;  %v3231_v2 = vld [vmem:[#allocation8 + $0xe0] ss:$8 sps:$4 sm:$0xff]  }
 0x202   :  { %v1175_v60 = vpack.c.bf16 %v1137_v50, %v4600_v23  ;;  %v1080_v52 = vmul.f32 0.5, %v1016_v22  ;;  %v1139_v14 = vmul.f32 %v1075_v38, %v4395_v25  ;;  %v1082_v34 = vmul.f32 0.5, %v1018_v49  ;;  %v3216_v25 = vld [vmem:[#allocation8 + $0x90] ss:$8 sps:$4 sm:$0xff]   ;;  %v1215_v54 = vld [vmem:[%s5654_s4] sm:$0x3] }
 0x203   :  { %v1141_v16 = vmul.f32 %v1077_v41, %v4424_v20  ;;  %v1017_v3 = vadd.f32 1.0, %v4558_v57  ;;  %1520 = vmatmul.mubr.bf16.gmra.mrb[72].mxu1 %v1171_v0  ;;  %v1178_v40 = vpack.c.bf16 %v1142_v44, %v1140_v19  ;;  %v1079_v43 = vmul.f32 0.5, %v1015_v39  ;;  %2411 = vmatpush1.bf16.msra.mxu0 %v3216_v25  ;;  %v3234_v13 = vld [vmem:[#allocation8 + $0xf0] ss:$8 sps:$4 sm:$0xff]   ;;  %v5762_v51 = vld [vmem:[#allocation16_spill] sm:$0xff] }
 0x204   :  { %v1144_v21 = vmul.f32 %v1080_v52, %v4460_v9  ;;  %v1020_v42 = vadd.f32 1.0, %v3360_v35  ;;  %1529 = vmatprep.mubr.bf16.mxu1 %v1174_v46  ;;  %v1146_v11 = vmul.f32 %v1082_v34, %v4474_v26  ;;  %v1022_v27 = vadd.f32 1.0, %v3364_v55  ;;  %2412 = vmatprep.subr.bf16.mxu0 %v3221_v15 }
 0x205   :  { %v1177_v24 = vpack.c.bf16 %v1141_v16, %v1139_v14  ;;  %v1081_v17 = vmul.f32 0.5, %v1017_v3  ;;  %v1143_v20 = vmul.f32 %v1079_v43, %v4446_v63  ;;  %v1019_v57 = vadd.f32 1.0, %v4569_v6  ;;  %v5760_v63 = vld [vmem:[#allocation23_spill] sm:$0xff] }
 0x206   :  { %v1084_v31 = vmul.f32 0.5, %v1020_v42  ;;  %v1021_v1 = vadd.f32 1.0, %v3362_v36  ;;  %v1180_v9 = vpack.c.bf16 %v1146_v11, %v1144_v21  ;;  %v1086_v0 = vmul.f32 0.5, %v1022_v27  ;;  %v5761_v36 = vld [vmem:[#allocation15_spill] sm:$0xff] }
 0x207   :  { %v1145_v35 = vmul.f32 %v1081_v17, %v4470_v30  ;;  %v1083_v7 = vmul.f32 0.5, %v1019_v57  ;;  %2413 = vmatpush1.bf16.msra.mxu0 %v3219_v28  ;;  %v4632_v23 = vrot.slane %v1215_v54, %v5761_v36  ;;  %v4635_v4 = vrot.slane %v1215_v54, %v5762_v51 }
 0x208   :  { %v1148_v32 = vmul.f32 %v1084_v31, %v4505_v33  ;;  %v1085_v26 = vmul.f32 0.5, %v1021_v1  ;;  %v1150_v61 = vmul.f32 %v1086_v0, %v4530_v10  ;;  %v3222_v33 = vld [vmem:[#allocation8 + $0xb0] ss:$8 sps:$4 sm:$0xff]   ;;  %2414 = vmatprep.subr.bf16.mxu0 %v3224_v56  ;;  %v3225_v10 = vld [vmem:[#allocation8 + $0xc0] ss:$8 sps:$4 sm:$0xff]  }
 0x209   :  { %v1179_v29 = vpack.c.bf16 %v1145_v35, %v1143_v20  ;;  %v1147_v46 = vmul.f32 %v1083_v7, %v5760_v63 }
 0x20a   :  { %v1149_v6 = vmul.f32 %v1085_v26, %v4523_v8  ;;  %v1182_v53 = vpack.c.bf16 %v1150_v61, %v1148_v32  ;;  %v3228_v8 = vld [vmem:[#allocation8 + $0xd0] ss:$8 sps:$4 sm:$0xff]  }
 0x20b   :  { %1530 = vmatmul.mubr.bf16.gmra.mrb[76].mxu1 %v1173_v47  ;;  %2415 = vmatpush1.bf16.msra.mxu0 %v3222_v33  ;;  %v3236_v47 = vld [vmem:[#allocation8 + $0xf4] ss:$8 sps:$4 sm:$0xff]  }
 0x20c   :  { %v1181_v30 = vpack.c.bf16 %v1149_v6, %v1147_v46  ;;  %1539 = vmatprep.mubr.bf16.mxu1 %v1176_v5  ;;  %2416 = vmatprep.subr.bf16.mxu0 %v3227_v18 }
 0x20f   :  { %2417 = vmatpush1.bf16.msra.mxu0 %v3225_v10 }
 0x210   :  { %2418 = vmatprep.subr.bf16.mxu0 %v3230_v59 }
 0x213   :  { %1540 = vmatmul.mubr.bf16.gmra.mrb[80].mxu1 %v1175_v60  ;;  %2419 = vmatpush1.bf16.msra.mxu0 %v3228_v8 }
 0x214   :  { %1549 = vmatprep.mubr.bf16.mxu1 %v1178_v40  ;;  %2420 = vmatprep.subr.bf16.mxu0 %v3233_v48 }
 0x217   :  { %2421 = vmatpush1.bf16.msra.mxu0 %v3231_v2 }
 0x218   :  { %2422 = vmatprep.subr.bf16.mxu0 %v3236_v47 }
 0x21b   :  { %1550 = vmatmul.mubr.bf16.gmra.mrb[84].mxu1 %v1177_v24  ;;  %2423 = vmatpush1.bf16.msra.mxu0 %v3234_v13 }
 0x21c   :  { %1559 = vmatprep.mubr.bf16.mxu1 %v1180_v9 }
 0x223   :  { %1560 = vmatmul.mubr.bf16.gmra.mrb[88].mxu1 %v1179_v29 }
 0x224   :  { %1569 = vmatprep.mubr.bf16.mxu1 %v1182_v53 }
 0x22b   :  { %1570 = vmatmul.mubr.bf16.gmra.mrb[92].mxu1 %v1181_v30 }
 0x261   :  { %v1421_v37 = vpop.f32.mrb[32].mxu1 }
 0x262   :  { %v4638_v55 = vadd.f32 %v1421_v37, %v4632_v23  ;;  %v1423_v5 = vpop.f32.mrb[33].mxu1 }
 0x263   :  { %v4641_v50 = vadd.f32 %v1423_v5, %v4635_v4  ;;  %v1425_v62 = vpop.f32.mrb[34].mxu1 }
 0x264   :  { %v1580_v22 = vmul.f32 %v4638_v55, %v4638_v55  ;;  %v4646_v19 = vadd.f32 %v1425_v62, %v4632_v23  ;;  %v1427_v38 = vpop.f32.mrb[35].mxu1 }
 0x265   :  { %v1581_v41 = vmul.f32 %v4641_v50, %v4641_v50  ;;  %v4651_v49 = vadd.f32 %v1427_v38, %v4635_v4 }
 0x266   :  { %v1644_v45 = vmul.f32 %v1580_v22, %v4638_v55  ;;  %v1582_v60 = vmul.f32 %v4646_v19, %v4646_v19 }
 0x267   :  { %v1645_v44 = vmul.f32 %v1581_v41, %v4641_v50  ;;  %v1583_v52 = vmul.f32 %v4651_v49, %v4651_v49 }
 0x268   :  { %v1708_v39 = vmul.f32 0.044715, %v1644_v45  ;;  %v1646_v12 = vmul.f32 %v1582_v60, %v4646_v19 }
 0x269   :  { %v1709_v14 = vmul.f32 0.044715, %v1645_v44  ;;  %v1647_v16 = vmul.f32 %v1583_v52, %v4651_v49 }
 0x26a   :  { %v1772_v34 = vadd.f32 %v1708_v39, %v4638_v55  ;;  %v1710_v3 = vmul.f32 0.044715, %v1646_v12 }
 0x26b   :  { %v1773_v58 = vadd.f32 %v1709_v14, %v4641_v50  ;;  %v1711_v40 = vmul.f32 0.044715, %v1647_v16 }
 0x26c   :  { %v1836_v21 = vmul.f32 0.7978846, %v1772_v34  ;;  %v1774_v43 = vadd.f32 %v1710_v3, %v4646_v19 }
 0x26d   :  { %v1837_v42 = vmul.f32 0.7978846, %v1773_v58  ;;  %v1775_v24 = vadd.f32 %v1711_v40, %v4651_v49 }
 0x26e   :  { %3365 = vtanh.f32 %v1836_v21  ;;  %v1838_v11 = vmul.f32 0.7978846, %v1774_v43 }
 0x26f   :  { %3367 = vtanh.f32 %v1837_v42  ;;  %v1839_v17 = vmul.f32 0.7978846, %v1775_v24 }
 0x270   :  { %3369 = vtanh.f32 %v1838_v11  ;;  %v1431_v27 = vpop.f32.mrb[36].mxu1 }
 0x271   :  { %3371 = vtanh.f32 %v1839_v17  ;;  %v4666_v25 = vadd.f32 %v1431_v27, %v4632_v23  ;;  %v1433_v20 = vpop.f32.mrb[37].mxu1 }
 0x272   :  { %v4669_v31 = vadd.f32 %v1433_v20, %v4635_v4  ;;  %v1435_v57 = vpop.f32.mrb[38].mxu1 }
 0x273   :  { %v1584_v1 = vmul.f32 %v4666_v25, %v4666_v25  ;;  %v4674_v15 = vadd.f32 %v1435_v57, %v4632_v23  ;;  %v1437_v9 = vpop.f32.mrb[39].mxu1 }
 0x274   :  { %v1585_v35 = vmul.f32 %v4669_v31, %v4669_v31  ;;  %v4679_v0 = vadd.f32 %v1437_v9, %v4635_v4 }
 0x275   :  { %v1648_v32 = vmul.f32 %v1584_v1, %v4666_v25  ;;  %v1586_v7 = vmul.f32 %v4674_v15, %v4674_v15 }
 0x276   :  { %v1649_v26 = vmul.f32 %v1585_v35, %v4669_v31  ;;  %v1587_v29 = vmul.f32 %v4679_v0, %v4679_v0 }
 0x277   :  { %v1712_v28 = vmul.f32 0.044715, %v1648_v32  ;;  %v1650_v63 = vmul.f32 %v1586_v7, %v4674_v15 }
 0x278   :  { %v3366_v61 = vpop.eup %3365  ;;  %v1713_v56 = vmul.f32 0.044715, %v1649_v26  ;;  %v1651_v53 = vmul.f32 %v1587_v29, %v4679_v0 }
 0x279   :  { %v3368_v46 = vpop.eup %3367  ;;  %v1964_v6 = vadd.f32 1.0, %v3366_v61  ;;  %v1776_v33 = vadd.f32 %v1712_v28, %v4666_v25  ;;  %v1714_v10 = vmul.f32 0.044715, %v1650_v63 }
 0x27a   :  { %v3370_v30 = vpop.eup %3369  ;;  %v1965_v18 = vadd.f32 1.0, %v3368_v46  ;;  %v1777_v48 = vadd.f32 %v1713_v56, %v4669_v31  ;;  %v1715_v47 = vmul.f32 0.044715, %v1651_v53 }
 0x27b   :  { %v3372_v59 = vpop.eup %3371  ;;  %v2028_v8 = vmul.f32 0.5, %v1964_v6  ;;  %v1966_v2 = vadd.f32 1.0, %v3370_v30  ;;  %v1840_v13 = vmul.f32 0.7978846, %v1776_v33  ;;  %v1778_v54 = vadd.f32 %v1714_v10, %v4674_v15 }
 0x27c   :  { %v1967_v37 = vadd.f32 1.0, %v3372_v59  ;;  %v2029_v5 = vmul.f32 0.5, %v1965_v18  ;;  %v1841_v22 = vmul.f32 0.7978846, %v1777_v48  ;;  %v1779_v38 = vadd.f32 %v1715_v47, %v4679_v0 }
 0x27d   :  { %v2030_v62 = vmul.f32 0.5, %v1966_v2  ;;  %3373 = vtanh.f32 %v1840_v13  ;;  %v1842_v41 = vmul.f32 0.7978846, %v1778_v54  ;;  %v2092_v60 = vmul.f32 %v2028_v8, %v4638_v55 }
 0x27e   :  { %v2031_v45 = vmul.f32 0.5, %v1967_v37  ;;  %3375 = vtanh.f32 %v1841_v22  ;;  %v1843_v52 = vmul.f32 0.7978846, %v1779_v38  ;;  %v2093_v39 = vmul.f32 %v2029_v5, %v4641_v50 }
 0x27f   :  { %v2094_v44 = vmul.f32 %v2030_v62, %v4646_v19  ;;  %3377 = vtanh.f32 %v1842_v41 }
 0x280   :  { %v2095_v12 = vmul.f32 %v2031_v45, %v4651_v49  ;;  %3379 = vtanh.f32 %v1843_v52 }
 0x281   :  { %v2156_v14 = vpack.c.bf16 %v2094_v44, %v2092_v60 }
 0x282   :  { %v2157_v16 = vpack.c.bf16 %v2095_v12, %v2093_v39 }
 0x283   :  { %v1441_v34 = vpop.f32.mrb[40].mxu1 }
 0x284   :  { %2424 = vmatprep.mubr.bf16.mxu0 %v2157_v16  ;;  %v4698_v3 = vadd.f32 %v1441_v34, %v4632_v23  ;;  %v1443_v58 = vpop.f32.mrb[41].mxu1 }
 0x285   :  { %2425 = vmatmul.mubr.bf16.vlgmr.msra.gmra.mrb[32].mxu0 %v2156_v14  ;;  %v4701_v55 = vadd.f32 %v1443_v58, %v4635_v4  ;;  %v1445_v19 = vpop.f32.mrb[42].mxu1 }
 0x286   :  { %v1588_v40 = vmul.f32 %v4698_v3, %v4698_v3  ;;  %v4706_v50 = vadd.f32 %v1445_v19, %v4632_v23  ;;  %v1447_v49 = vpop.f32.mrb[43].mxu1 }
 0x287   :  { %v3374_v21 = vpop.eup %3373  ;;  %v1589_v43 = vmul.f32 %v4701_v55, %v4701_v55  ;;  %v4711_v42 = vadd.f32 %v1447_v49, %v4635_v4 }
 0x288   :  { %v3376_v24 = vpop.eup %3375  ;;  %v1652_v11 = vmul.f32 %v1588_v40, %v4698_v3  ;;  %v1590_v17 = vmul.f32 %v4706_v50, %v4706_v50  ;;  %v1968_v27 = vadd.f32 1.0, %v3374_v21 }
 0x289   :  { %v3378_v20 = vpop.eup %3377  ;;  %v1653_v57 = vmul.f32 %v1589_v43, %v4701_v55  ;;  %v1591_v1 = vmul.f32 %v4711_v42, %v4711_v42  ;;  %v1969_v9 = vadd.f32 1.0, %v3376_v24 }
 0x28a   :  { %v3380_v35 = vpop.eup %3379  ;;  %v1716_v32 = vmul.f32 0.044715, %v1652_v11  ;;  %v1654_v7 = vmul.f32 %v1590_v17, %v4706_v50  ;;  %v1970_v26 = vadd.f32 1.0, %v3378_v20  ;;  %v2032_v29 = vmul.f32 0.5, %v1968_v27 }
 0x28b   :  { %v1717_v61 = vmul.f32 0.044715, %v1653_v57  ;;  %v1655_v28 = vmul.f32 %v1591_v1, %v4711_v42  ;;  %v1971_v63 = vadd.f32 1.0, %v3380_v35  ;;  %v2033_v46 = vmul.f32 0.5, %v1969_v9 }
 0x28c   :  { %v1780_v6 = vadd.f32 %v1716_v32, %v4698_v3  ;;  %v1718_v56 = vmul.f32 0.044715, %v1654_v7  ;;  %v2034_v53 = vmul.f32 0.5, %v1970_v26  ;;  %v2096_v8 = vmul.f32 %v2032_v29, %v4666_v25 }
 0x28d   :  { %v1781_v30 = vadd.f32 %v1717_v61, %v4701_v55  ;;  %v1719_v33 = vmul.f32 0.044715, %v1655_v28  ;;  %v2035_v10 = vmul.f32 0.5, %v1971_v63  ;;  %v2097_v13 = vmul.f32 %v2033_v46, %v4669_v31 }
 0x28e   :  { %v1844_v18 = vmul.f32 0.7978846, %v1780_v6  ;;  %v1782_v59 = vadd.f32 %v1718_v56, %v4706_v50  ;;  %v2098_v2 = vmul.f32 %v2034_v53, %v4674_v15 }
 0x28f   :  { %v1845_v48 = vmul.f32 0.7978846, %v1781_v30  ;;  %v1783_v47 = vadd.f32 %v1719_v33, %v4711_v42  ;;  %v2099_v54 = vmul.f32 %v2035_v10, %v4679_v0 }
 0x290   :  { %3381 = vtanh.f32 %v1844_v18  ;;  %v1846_v37 = vmul.f32 0.7978846, %v1782_v59  ;;  %v2158_v5 = vpack.c.bf16 %v2098_v2, %v2096_v8 }
 0x291   :  { %3383 = vtanh.f32 %v1845_v48  ;;  %v1847_v62 = vmul.f32 0.7978846, %v1783_v47  ;;  %v2159_v22 = vpack.c.bf16 %v2099_v54, %v2097_v13 }
 0x292   :  { %3385 = vtanh.f32 %v1846_v37 }
 0x293   :  { %3387 = vtanh.f32 %v1847_v62  ;;  %2434 = vmatprep.mubr.bf16.mxu0 %v2159_v22 }
 0x294   :  { %2435 = vmatmul.mubr.bf16.gmra.mrb[36].mxu0 %v2158_v5 }
 0x295   :  { %v1451_v38 = vpop.f32.mrb[44].mxu1 }
 0x296   :  { %v4730_v25 = vadd.f32 %v1451_v38, %v4632_v23  ;;  %v1453_v15 = vpop.f32.mrb[45].mxu1 }
 0x297   :  { %v4733_v41 = vadd.f32 %v1453_v15, %v4635_v4  ;;  %v1455_v31 = vpop.f32.mrb[46].mxu1 }
 0x298   :  { %v1592_v0 = vmul.f32 %v4730_v25, %v4730_v25  ;;  %v4738_v45 = vadd.f32 %v1455_v31, %v4632_v23  ;;  %v1457_v60 = vpop.f32.mrb[47].mxu1 }
 0x299   :  { %v1593_v44 = vmul.f32 %v4733_v41, %v4733_v41  ;;  %v4743_v52 = vadd.f32 %v1457_v60, %v4635_v4 }
 0x29a   :  { %v1656_v39 = vmul.f32 %v1592_v0, %v4730_v25  ;;  %v1594_v12 = vmul.f32 %v4738_v45, %v4738_v45  ;;  %v3382_v14 = vpop.eup %3381 }
 0x29b   :  { %v1657_v16 = vmul.f32 %v1593_v44, %v4733_v41  ;;  %v1595_v34 = vmul.f32 %v4743_v52, %v4743_v52  ;;  %v3384_v58 = vpop.eup %3383  ;;  %v1972_v49 = vadd.f32 1.0, %v3382_v14 }
 0x29c   :  { %v1720_v19 = vmul.f32 0.044715, %v1656_v39  ;;  %v1658_v40 = vmul.f32 %v1594_v12, %v4738_v45  ;;  %v3386_v21 = vpop.eup %3385  ;;  %v1973_v11 = vadd.f32 1.0, %v3384_v58 }
 0x29d   :  { %v1721_v43 = vmul.f32 0.044715, %v1657_v16  ;;  %v1659_v24 = vmul.f32 %v1595_v34, %v4743_v52  ;;  %v3388_v17 = vpop.eup %3387  ;;  %v1974_v57 = vadd.f32 1.0, %v3386_v21  ;;  %v2036_v1 = vmul.f32 0.5, %v1972_v49 }
 0x29e   :  { %v1784_v27 = vadd.f32 %v1720_v19, %v4730_v25  ;;  %v1722_v20 = vmul.f32 0.044715, %v1658_v40  ;;  %v1461_v32 = vpop.f32.mrb[48].mxu1  ;;  %v1975_v7 = vadd.f32 1.0, %v3388_v17  ;;  %v2037_v26 = vmul.f32 0.5, %v1973_v11 }
 0x29f   :  { %v1785_v9 = vadd.f32 %v1721_v43, %v4733_v41  ;;  %v1723_v35 = vmul.f32 0.044715, %v1659_v24  ;;  %v4757_v28 = vadd.f32 %v1461_v32, %v4632_v23  ;;  %v1463_v63 = vpop.f32.mrb[49].mxu1  ;;  %v2038_v46 = vmul.f32 0.5, %v1974_v57 }
 0x2a0   :  { %v1848_v29 = vmul.f32 0.7978846, %v1784_v27  ;;  %v1786_v61 = vadd.f32 %v1722_v20, %v4738_v45  ;;  %v4761_v53 = vadd.f32 %v1463_v63, %v4635_v4  ;;  %v1465_v30 = vpop.f32.mrb[50].mxu1  ;;  %v2039_v33 = vmul.f32 0.5, %v1975_v7 }
 0x2a1   :  { %v1849_v6 = vmul.f32 0.7978846, %v1785_v9  ;;  %v1787_v56 = vadd.f32 %v1723_v35, %v4743_v52  ;;  %v1596_v18 = vmul.f32 %v4757_v28, %v4757_v28  ;;  %v4766_v59 = vadd.f32 %v1465_v30, %v4632_v23  ;;  %v1467_v8 = vpop.f32.mrb[51].mxu1 }
 0x2a2   :  { %3389 = vtanh.f32 %v1848_v29  ;;  %v1850_v10 = vmul.f32 0.7978846, %v1786_v61  ;;  %v1597_v48 = vmul.f32 %v4761_v53, %v4761_v53  ;;  %v4771_v47 = vadd.f32 %v1467_v8, %v4635_v4 }
 0x2a3   :  { %3391 = vtanh.f32 %v1849_v6  ;;  %v1851_v2 = vmul.f32 0.7978846, %v1787_v56  ;;  %v1660_v13 = vmul.f32 %v1596_v18, %v4757_v28  ;;  %v1598_v54 = vmul.f32 %v4766_v59, %v4766_v59 }
 0x2a4   :  { %3393 = vtanh.f32 %v1850_v10  ;;  %v2101_v37 = vmul.f32 %v2037_v26, %v4701_v55  ;;  %v1661_v5 = vmul.f32 %v1597_v48, %v4761_v53  ;;  %v1599_v62 = vmul.f32 %v4771_v47, %v4771_v47 }
 0x2a5   :  { %3395 = vtanh.f32 %v1851_v2  ;;  %v2103_v22 = vmul.f32 %v2039_v33, %v4711_v42  ;;  %v1724_v38 = vmul.f32 0.044715, %v1660_v13  ;;  %v1662_v15 = vmul.f32 %v1598_v54, %v4766_v59 }
 0x2a6   :  { %v2100_v31 = vmul.f32 %v2036_v1, %v4698_v3  ;;  %v2102_v0 = vmul.f32 %v2038_v46, %v4706_v50  ;;  %v1725_v60 = vmul.f32 0.044715, %v1661_v5  ;;  %v1663_v44 = vmul.f32 %v1599_v62, %v4771_v47 }
 0x2a7   :  { %v2161_v39 = vpack.c.bf16 %v2103_v22, %v2101_v37  ;;  %v1788_v55 = vadd.f32 %v1724_v38, %v4757_v28  ;;  %v1726_v12 = vmul.f32 0.044715, %v1662_v15 }
 0x2a8   :  { %v2160_v14 = vpack.c.bf16 %v2102_v0, %v2100_v31  ;;  %v1789_v16 = vadd.f32 %v1725_v60, %v4761_v53  ;;  %v1727_v34 = vmul.f32 0.044715, %v1663_v44  ;;  %v1471_v58 = vpop.f32.mrb[52].mxu1 }
 0x2a9   :  { %2444 = vmatprep.mubr.bf16.mxu0 %v2161_v39  ;;  %v1852_v42 = vmul.f32 0.7978846, %v1788_v55  ;;  %v1790_v19 = vadd.f32 %v1726_v12, %v4766_v59  ;;  %v4789_v3 = vadd.f32 %v1471_v58, %v4632_v23  ;;  %v1473_v50 = vpop.f32.mrb[53].mxu1 }
 0x2aa   :  { %2445 = vmatmul.mubr.bf16.gmra.mrb[40].mxu0 %v2160_v14  ;;  %v1853_v40 = vmul.f32 0.7978846, %v1789_v16  ;;  %v1791_v49 = vadd.f32 %v1727_v34, %v4771_v47  ;;  %v4793_v21 = vadd.f32 %v1473_v50, %v4635_v4  ;;  %v1475_v43 = vpop.f32.mrb[54].mxu1 }
 0x2ab   :  { %3397 = vtanh.f32 %v1852_v42  ;;  %v1854_v11 = vmul.f32 0.7978846, %v1790_v19  ;;  %v1600_v17 = vmul.f32 %v4789_v3, %v4789_v3  ;;  %v4798_v27 = vadd.f32 %v1475_v43, %v4632_v23  ;;  %v1477_v20 = vpop.f32.mrb[55].mxu1 }
 0x2ac   :  { %v3390_v24 = vpop.eup %3389  ;;  %3399 = vtanh.f32 %v1853_v40  ;;  %v1855_v1 = vmul.f32 0.7978846, %v1791_v49  ;;  %v1601_v9 = vmul.f32 %v4793_v21, %v4793_v21  ;;  %v4803_v35 = vadd.f32 %v1477_v20, %v4635_v4 }
 0x2ad   :  { %v3392_v57 = vpop.eup %3391  ;;  %3401 = vtanh.f32 %v1854_v11  ;;  %v1664_v7 = vmul.f32 %v1600_v17, %v4789_v3  ;;  %v1602_v26 = vmul.f32 %v4798_v27, %v4798_v27  ;;  %v1976_v6 = vadd.f32 1.0, %v3390_v24 }
 0x2ae   :  { %v3394_v32 = vpop.eup %3393  ;;  %v1977_v29 = vadd.f32 1.0, %v3392_v57  ;;  %3403 = vtanh.f32 %v1855_v1  ;;  %v1665_v63 = vmul.f32 %v1601_v9, %v4793_v21  ;;  %v1603_v46 = vmul.f32 %v4803_v35, %v4803_v35 }
 0x2af   :  { %v3396_v61 = vpop.eup %3395  ;;  %v1728_v56 = vmul.f32 0.044715, %v1664_v7  ;;  %v1666_v30 = vmul.f32 %v1602_v26, %v4798_v27  ;;  %v1978_v2 = vadd.f32 1.0, %v3394_v32  ;;  %v2040_v48 = vmul.f32 0.5, %v1976_v6 }
 0x2b0   :  { %v1979_v33 = vadd.f32 1.0, %v3396_v61  ;;  %v2041_v10 = vmul.f32 0.5, %v1977_v29  ;;  %v1729_v18 = vmul.f32 0.044715, %v1665_v63  ;;  %v1667_v8 = vmul.f32 %v1603_v46, %v4803_v35 }
 0x2b1   :  { %v1792_v13 = vadd.f32 %v1728_v56, %v4789_v3  ;;  %v1730_v54 = vmul.f32 0.044715, %v1666_v30  ;;  %v2042_v38 = vmul.f32 0.5, %v1978_v2  ;;  %v2104_v44 = vmul.f32 %v2040_v48, %v4730_v25 }
 0x2b2   :  { %v2043_v37 = vmul.f32 0.5, %v1979_v33  ;;  %v1793_v5 = vadd.f32 %v1729_v18, %v4793_v21  ;;  %v1731_v62 = vmul.f32 0.044715, %v1667_v8  ;;  %v2105_v22 = vmul.f32 %v2041_v10, %v4733_v41 }
 0x2b3   :  { %v1856_v15 = vmul.f32 0.7978846, %v1792_v13  ;;  %v1794_v31 = vadd.f32 %v1730_v54, %v4798_v27  ;;  %v1481_v0 = vpop.f32.mrb[56].mxu1  ;;  %v2106_v16 = vmul.f32 %v2042_v38, %v4738_v45 }
 0x2b4   :  { %v2107_v60 = vmul.f32 %v2043_v37, %v4743_v52  ;;  %v1857_v39 = vmul.f32 0.7978846, %v1793_v5  ;;  %v1795_v55 = vadd.f32 %v1731_v62, %v4803_v35  ;;  %v4821_v12 = vadd.f32 %v1481_v0, %v4632_v23  ;;  %v1483_v14 = vpop.f32.mrb[57].mxu1 }
 0x2b5   :  { %v3398_v34 = vpop.eup %3397  ;;  %3405 = vtanh.f32 %v1856_v15  ;;  %v1858_v41 = vmul.f32 0.7978846, %v1794_v31  ;;  %v4825_v58 = vadd.f32 %v1483_v14, %v4635_v4  ;;  %v1485_v42 = vpop.f32.mrb[58].mxu1  ;;  %v2162_v11 = vpack.c.bf16 %v2106_v16, %v2104_v44 }
 0x2b6   :  { %v2163_v19 = vpack.c.bf16 %v2107_v60, %v2105_v22  ;;  %v3400_v52 = vpop.eup %3399  ;;  %3407 = vtanh.f32 %v1857_v39  ;;  %v1859_v25 = vmul.f32 0.7978846, %v1795_v55  ;;  %v1604_v50 = vmul.f32 %v4821_v12, %v4821_v12  ;;  %v1487_v49 = vpop.f32.mrb[59].mxu1 }
 0x2b7   :  { %v4830_v40 = vadd.f32 %v1485_v42, %v4632_v23  ;;  %v3402_v43 = vpop.eup %3401  ;;  %3409 = vtanh.f32 %v1858_v41  ;;  %v1605_v45 = vmul.f32 %v4825_v58, %v4825_v58  ;;  %v4835_v24 = vadd.f32 %v1487_v49, %v4635_v4 }
 0x2b8   :  { %2454 = vmatprep.mubr.bf16.mxu0 %v2163_v19  ;;  %v3404_v17 = vpop.eup %3403  ;;  %3411 = vtanh.f32 %v1859_v25  ;;  %v1668_v20 = vmul.f32 %v1604_v50, %v4821_v12  ;;  %v1981_v1 = vadd.f32 1.0, %v3400_v52  ;;  %v1980_v26 = vadd.f32 1.0, %v3398_v34 }
 0x2b9   :  { %v1606_v57 = vmul.f32 %v4830_v40, %v4830_v40  ;;  %v1669_v9 = vmul.f32 %v1605_v45, %v4825_v58  ;;  %v1607_v32 = vmul.f32 %v4835_v24, %v4835_v24  ;;  %2455 = vmatmul.mubr.bf16.gmra.mrb[44].mxu0 %v2162_v11  ;;  %v1983_v7 = vadd.f32 1.0, %v3404_v17 }
 0x2ba   :  { %v1732_v29 = vmul.f32 0.044715, %v1668_v20  ;;  %v2045_v63 = vmul.f32 0.5, %v1981_v1  ;;  %v1982_v46 = vadd.f32 1.0, %v3402_v43  ;;  %v2044_v33 = vmul.f32 0.5, %v1980_v26 }
 0x2bb   :  { %v1670_v61 = vmul.f32 %v1606_v57, %v4830_v40  ;;  %v1733_v6 = vmul.f32 0.044715, %v1669_v9  ;;  %v1671_v56 = vmul.f32 %v1607_v32, %v4835_v24  ;;  %v2047_v30 = vmul.f32 0.5, %v1983_v7 }
 0x2bc   :  { %v1796_v10 = vadd.f32 %v1732_v29, %v4821_v12  ;;  %v2109_v8 = vmul.f32 %v2045_v63, %v4761_v53  ;;  %v2046_v2 = vmul.f32 0.5, %v1982_v46  ;;  %v2108_v5 = vmul.f32 %v2044_v33, %v4757_v28 }
 0x2bd   :  { %v1734_v18 = vmul.f32 0.044715, %v1670_v61  ;;  %v1797_v48 = vadd.f32 %v1733_v6, %v4825_v58  ;;  %v1735_v13 = vmul.f32 0.044715, %v1671_v56  ;;  %v2111_v37 = vmul.f32 %v2047_v30, %v4771_v47 }
 0x2be   :  { %v1491_v54 = vpop.f32.mrb[60].mxu1  ;;  %v1860_v62 = vmul.f32 0.7978846, %v1796_v10  ;;  %v2110_v31 = vmul.f32 %v2046_v2, %v4766_v59 }
 0x2bf   :  { %v1798_v22 = vadd.f32 %v1734_v18, %v4830_v40  ;;  %v4852_v38 = vadd.f32 %v1491_v54, %v4632_v23  ;;  %v1493_v15 = vpop.f32.mrb[61].mxu1  ;;  %v3406_v0 = vpop.eup %3405  ;;  %v1861_v53 = vmul.f32 0.7978846, %v1797_v48  ;;  %v1799_v60 = vadd.f32 %v1735_v13, %v4835_v24 }
 0x2c0   :  { %v4857_v44 = vadd.f32 %v1493_v15, %v4635_v4  ;;  %v1495_v39 = vpop.f32.mrb[62].mxu1  ;;  %v2165_v47 = vpack.c.bf16 %v2111_v37, %v2109_v8  ;;  %v3408_v55 = vpop.eup %3407  ;;  %3413 = vtanh.f32 %v1860_v62  ;;  %v2164_v49 = vpack.c.bf16 %v2110_v31, %v2108_v5 }
 0x2c1   :  { %v1862_v28 = vmul.f32 0.7978846, %v1798_v22  ;;  %v1608_v14 = vmul.f32 %v4852_v38, %v4852_v38  ;;  %v4862_v16 = vadd.f32 %v1495_v39, %v4632_v23  ;;  %v1497_v34 = vpop.f32.mrb[63].mxu1  ;;  %v3410_v59 = vpop.eup %3409  ;;  %3415 = vtanh.f32 %v1861_v53 }
 0x2c2   :  { %v1863_v41 = vmul.f32 0.7978846, %v1799_v60  ;;  %v1609_v42 = vmul.f32 %v4857_v44, %v4857_v44  ;;  %v4867_v19 = vadd.f32 %v1497_v34, %v4635_v4  ;;  %2464 = vmatprep.mubr.bf16.mxu0 %v2165_v47  ;;  %v3412_v52 = vpop.eup %3411  ;;  %v1985_v11 = vadd.f32 1.0, %v3408_v55 }
 0x2c3   :  { %3417 = vtanh.f32 %v1862_v28  ;;  %v1672_v25 = vmul.f32 %v1608_v14, %v4852_v38  ;;  %v1610_v50 = vmul.f32 %v4862_v16, %v4862_v16  ;;  %2465 = vmatmul.mubr.bf16.gmra.mrb[48].mxu0 %v2164_v49  ;;  %v1987_v57 = vadd.f32 1.0, %v3412_v52 }
 0x2c4   :  { %3419 = vtanh.f32 %v1863_v41  ;;  %v1673_v43 = vmul.f32 %v1609_v42, %v4857_v44  ;;  %v1611_v45 = vmul.f32 %v4867_v19, %v4867_v19  ;;  %v1984_v1 = vadd.f32 1.0, %v3406_v0 }
 0x2c5   :  { %v1736_v17 = vmul.f32 0.044715, %v1672_v25  ;;  %v1674_v20 = vmul.f32 %v1610_v50, %v4862_v16  ;;  %v2049_v7 = vmul.f32 0.5, %v1985_v11  ;;  %v1986_v26 = vadd.f32 1.0, %v3410_v59 }
 0x2c6   :  { %v1737_v9 = vmul.f32 0.044715, %v1673_v43  ;;  %v1675_v32 = vmul.f32 %v1611_v45, %v4867_v19  ;;  %v1501_v63 = vpop.f32.mrb[64].mxu1  ;;  %v2051_v46 = vmul.f32 0.5, %v1987_v57  ;;  %v2048_v6 = vmul.f32 0.5, %v1984_v1 }
 0x2c7   :  { %v1800_v29 = vadd.f32 %v1736_v17, %v4852_v38  ;;  %v1738_v61 = vmul.f32 0.044715, %v1674_v20  ;;  %v4880_v33 = vadd.f32 %v1501_v63, %v4632_v23  ;;  %v1503_v10 = vpop.f32.mrb[65].mxu1  ;;  %v2113_v18 = vmul.f32 %v2049_v7, %v4793_v21 }
 0x2c8   :  { %v1801_v56 = vadd.f32 %v1737_v9, %v4857_v44  ;;  %v1739_v30 = vmul.f32 0.044715, %v1675_v32  ;;  %v4885_v48 = vadd.f32 %v1503_v10, %v4635_v4  ;;  %v1505_v13 = vpop.f32.mrb[66].mxu1  ;;  %v2115_v54 = vmul.f32 %v2051_v46, %v4803_v35 }
 0x2c9   :  { %v1864_v8 = vmul.f32 0.7978846, %v1800_v29  ;;  %v1802_v2 = vadd.f32 %v1738_v61, %v4862_v16  ;;  %v1612_v62 = vmul.f32 %v4880_v33, %v4880_v33  ;;  %v4892_v22 = vadd.f32 %v1505_v13, %v4632_v23  ;;  %v1507_v15 = vpop.f32.mrb[67].mxu1 }
 0x2ca   :  { %v1865_v37 = vmul.f32 0.7978846, %v1801_v56  ;;  %v1803_v5 = vadd.f32 %v1739_v30, %v4867_v19  ;;  %v4894_v21 = vpop.eup %3413  ;;  %v1613_v0 = vmul.f32 %v4885_v48, %v4885_v48  ;;  %v4899_v53 = vadd.f32 %v1507_v15, %v4635_v4 }
 0x2cb   :  { %3421 = vtanh.f32 %v1864_v8  ;;  %v1866_v31 = vmul.f32 0.7978846, %v1802_v2  ;;  %v3416_v35 = vpop.eup %3415  ;;  %v1676_v39 = vmul.f32 %v1612_v62, %v4880_v33  ;;  %v1614_v47 = vmul.f32 %v4892_v22, %v4892_v22 }
 0x2cc   :  { %3423 = vtanh.f32 %v1865_v37  ;;  %v1867_v60 = vmul.f32 0.7978846, %v1803_v5  ;;  %v1677_v28 = vmul.f32 %v1613_v0, %v4885_v48  ;;  %v1615_v14 = vmul.f32 %v4899_v53, %v4899_v53 }
 0x2cd   :  { %v4904_v55 = vpop.eup %3417  ;;  %3425 = vtanh.f32 %v1866_v31  ;;  %v2167_v34 = vpack.c.bf16 %v2115_v54, %v2113_v18  ;;  %v1740_v41 = vmul.f32 0.044715, %v1676_v39  ;;  %v1678_v42 = vmul.f32 %v1614_v47, %v4892_v22 }
 0x2ce   :  { %v3420_v59 = vpop.eup %3419  ;;  %3427 = vtanh.f32 %v1867_v60  ;;  %v2050_v52 = vmul.f32 0.5, %v1986_v26  ;;  %v1741_v25 = vmul.f32 0.044715, %v1677_v28  ;;  %v1679_v50 = vmul.f32 %v1615_v14, %v4899_v53  ;;  %v1511_v49 = vpop.f32.mrb[68].mxu1 }
 0x2cf   :  { %2474 = vmatprep.mubr.bf16.mxu0 %v2167_v34  ;;  %v2112_v43 = vmul.f32 %v2048_v6, %v4789_v3  ;;  %v1989_v45 = vadd.f32 1.0, %v3416_v35  ;;  %v1804_v11 = vadd.f32 %v1740_v41, %v4880_v33  ;;  %v1742_v17 = vmul.f32 0.044715, %v1678_v42  ;;  %v1513_v57 = vpop.f32.mrb[69].mxu1 }
 0x2d0   :  { %v4914_v20 = vadd.f32 %v1511_v49, %v4632_v23  ;;  %v2114_v1 = vmul.f32 %v2050_v52, %v4798_v27  ;;  %v1805_v9 = vadd.f32 %v1741_v25, %v4885_v48  ;;  %v1743_v32 = vmul.f32 0.044715, %v1679_v50  ;;  %v1515_v26 = vpop.f32.mrb[70].mxu1 }
 0x2d1   :  { %v4919_v7 = vadd.f32 %v1513_v57, %v4635_v4  ;;  %v1991_v29 = vadd.f32 1.0, %v3420_v59  ;;  %v1868_v61 = vmul.f32 0.7978846, %v1804_v11  ;;  %v1806_v3 = vadd.f32 %v1742_v17, %v4892_v22  ;;  %v1517_v6 = vpop.f32.mrb[71].mxu1 }
 0x2d2   :  { %v1616_v63 = vmul.f32 %v4914_v20, %v4914_v20  ;;  %v4925_v46 = vadd.f32 %v1515_v26, %v4632_v23  ;;  %v1869_v56 = vmul.f32 0.7978846, %v1805_v9  ;;  %v1807_v27 = vadd.f32 %v1743_v32, %v4899_v53 }
 0x2d3   :  { %v1617_v30 = vmul.f32 %v4919_v7, %v4919_v7  ;;  %v4931_v10 = vadd.f32 %v1517_v6, %v4635_v4  ;;  %3429 = vtanh.f32 %v1868_v61  ;;  %v1870_v18 = vmul.f32 0.7978846, %v1806_v3 }
 0x2d4   :  { %v1680_v8 = vmul.f32 %v1616_v63, %v4914_v20  ;;  %v1618_v2 = vmul.f32 %v4925_v46, %v4925_v46  ;;  %3431 = vtanh.f32 %v1869_v56  ;;  %v1871_v54 = vmul.f32 0.7978846, %v1807_v27 }
 0x2d5   :  { %v4936_v13 = vpop.eup %3421  ;;  %v1681_v37 = vmul.f32 %v1617_v30, %v4919_v7  ;;  %v1619_v5 = vmul.f32 %v4931_v10, %v4931_v10  ;;  %3433 = vtanh.f32 %v1870_v18  ;;  %v2166_v0 = vpack.c.bf16 %v2114_v1, %v2112_v43 }
 0x2d6   :  { %v4941_v62 = vpop.eup %3423  ;;  %v1744_v15 = vmul.f32 0.044715, %v1680_v8  ;;  %v1682_v31 = vmul.f32 %v1618_v2, %v4925_v46  ;;  %3435 = vtanh.f32 %v1871_v54  ;;  %v1521_v47 = vpop.f32.mrb[72].mxu1  ;;  %v2053_v28 = vmul.f32 0.5, %v1989_v45 }
 0x2d7   :  { %v4944_v35 = vpop.eup %3425  ;;  %v1745_v60 = vmul.f32 0.044715, %v1681_v37  ;;  %v1683_v39 = vmul.f32 %v1619_v5, %v4931_v10  ;;  %2475 = vmatmul.mubr.bf16.gmra.mrb[52].mxu0 %v2166_v0  ;;  %v4951_v41 = vadd.f32 %v1521_v47, %v4632_v23  ;;  %v1523_v42 = vpop.f32.mrb[73].mxu1  ;;  %v2055_v52 = vmul.f32 0.5, %v1991_v29 }
 0x2d8   :  { %v4947_v14 = vpop.eup %3427  ;;  %v1808_v34 = vadd.f32 %v1744_v15, %v4914_v20  ;;  %v1746_v59 = vmul.f32 0.044715, %v1682_v31  ;;  %v4955_v49 = vadd.f32 %v1523_v42, %v4635_v4  ;;  %v1525_v43 = vpop.f32.mrb[74].mxu1  ;;  %v2117_v45 = vmul.f32 %v2053_v28, %v4825_v58 }
 0x2d9   :  { %v1809_v25 = vadd.f32 %v1745_v60, %v4919_v7  ;;  %v1747_v50 = vmul.f32 0.044715, %v1683_v39  ;;  %v1620_v57 = vmul.f32 %v4951_v41, %v4951_v41  ;;  %v4962_v1 = vadd.f32 %v1525_v43, %v4632_v23  ;;  %v1527_v9 = vpop.f32.mrb[75].mxu1 }
 0x2da   :  { %v1872_v11 = vmul.f32 0.7978846, %v1808_v34  ;;  %v1810_v17 = vadd.f32 %v1746_v59, %v4925_v46  ;;  %v1621_v29 = vmul.f32 %v4955_v49, %v4955_v49  ;;  %v4968_v61 = vadd.f32 %v1527_v9, %v4635_v4 }
 0x2db   :  { %v1873_v32 = vmul.f32 0.7978846, %v1809_v25  ;;  %v1811_v26 = vadd.f32 %v1747_v50, %v4931_v10  ;;  %v1684_v3 = vmul.f32 %v1620_v57, %v4951_v41  ;;  %v1622_v63 = vmul.f32 %v4962_v1, %v4962_v1 }
 0x2dc   :  { %3437 = vtanh.f32 %v1872_v11  ;;  %v1874_v58 = vmul.f32 0.7978846, %v1810_v17  ;;  %v1685_v56 = vmul.f32 %v1621_v29, %v4955_v49  ;;  %v1623_v27 = vmul.f32 %v4968_v61, %v4968_v61 }
 0x2dd   :  { %3439 = vtanh.f32 %v1873_v32  ;;  %v1875_v6 = vmul.f32 0.7978846, %v1811_v26  ;;  %v4976_v30 = vpop.eup %3429  ;;  %v1748_v18 = vmul.f32 0.044715, %v1684_v3  ;;  %v1686_v8 = vmul.f32 %v1622_v63, %v4962_v1 }
 0x2de   :  { %3441 = vtanh.f32 %v1874_v58  ;;  %v2119_v2 = vmul.f32 %v2055_v52, %v4835_v24  ;;  %v4980_v54 = vpop.eup %3431  ;;  %v1749_v37 = vmul.f32 0.044715, %v1685_v56  ;;  %v1687_v5 = vmul.f32 %v1623_v27, %v4968_v61  ;;  %v1531_v31 = vpop.f32.mrb[76].mxu1 }
 0x2df   :  { %3443 = vtanh.f32 %v1875_v6  ;;  %v1988_v15 = vadd.f32 1.0, %v4894_v21  ;;  %v4984_v0 = vpop.eup %3433  ;;  %v1812_v60 = vadd.f32 %v1748_v18, %v4951_v41  ;;  %v1750_v39 = vmul.f32 0.044715, %v1686_v8  ;;  %v1533_v34 = vpop.f32.mrb[77].mxu1 }
 0x2e0   :  { %v2169_v47 = vpack.c.bf16 %v2119_v2, %v2117_v45  ;;  %v1990_v28 = vadd.f32 1.0, %v4904_v55  ;;  %v4988_v59 = vpop.eup %3435  ;;  %v1813_v24 = vadd.f32 %v1749_v37, %v4955_v49  ;;  %v1751_v42 = vmul.f32 0.044715, %v1687_v5  ;;  %v1535_v21 = vpop.f32.mrb[78].mxu1 }
 0x2e1   :  { %v2052_v52 = vmul.f32 0.5, %v1988_v15  ;;  %v4992_v25 = vadd.f32 %v1531_v31, %v4632_v23  ;;  %v1876_v50 = vmul.f32 0.7978846, %v1812_v60  ;;  %v1814_v43 = vadd.f32 %v1750_v39, %v4962_v1  ;;  %v1537_v55 = vpop.f32.mrb[79].mxu1 }
 0x2e2   :  { %2484 = vmatprep.mubr.bf16.mxu0 %v2169_v47  ;;  %v2054_v11 = vmul.f32 0.5, %v1990_v28  ;;  %v4996_v45 = vadd.f32 %v1533_v34, %v4635_v4  ;;  %v1877_v17 = vmul.f32 0.7978846, %v1813_v24  ;;  %v1815_v57 = vadd.f32 %v1751_v42, %v4968_v61 }
 0x2e3   :  { %v2116_v9 = vmul.f32 %v2052_v52, %v4821_v12  ;;  %v1624_v32 = vmul.f32 %v4992_v25, %v4992_v25  ;;  %3445 = vtanh.f32 %v1876_v50  ;;  %v1878_v26 = vmul.f32 0.7978846, %v1814_v43 }
 0x2e4   :  { %v2118_v29 = vmul.f32 %v2054_v11, %v4830_v40  ;;  %v1625_v58 = vmul.f32 %v4996_v45, %v4996_v45  ;;  %3447 = vtanh.f32 %v1877_v17  ;;  %v1879_v3 = vmul.f32 0.7978846, %v1815_v57 }
 0x2e5   :  { %v1688_v63 = vmul.f32 %v1624_v32, %v4992_v25  ;;  %v5007_v6 = vadd.f32 %v1535_v21, %v4632_v23  ;;  %3449 = vtanh.f32 %v1878_v26  ;;  %v5013_v18 = vadd.f32 %v1537_v55, %v4635_v4 }
 0x2e6   :  { %v5009_v56 = vpop.eup %3437  ;;  %v2168_v12 = vpack.c.bf16 %v2118_v29, %v2116_v9  ;;  %v1689_v27 = vmul.f32 %v1625_v58, %v4996_v45  ;;  %3451 = vtanh.f32 %v1879_v3  ;;  %v1993_v37 = vadd.f32 1.0, %v4941_v62  ;;  %v1541_v5 = vpop.f32.mrb[80].mxu1 }
 0x2e7   :  { %v5015_v40 = vpop.eup %3439  ;;  %v1752_v8 = vmul.f32 0.044715, %v1688_v63  ;;  %v1626_v2 = vmul.f32 %v5007_v6, %v5007_v6  ;;  %v1627_v60 = vmul.f32 %v5013_v18, %v5013_v18  ;;  %v1995_v39 = vadd.f32 1.0, %v4947_v14  ;;  %v1543_v28 = vpop.f32.mrb[81].mxu1 }
 0x2e8   :  { %v5020_v15 = vpop.eup %3441  ;;  %2485 = vmatmul.mubr.bf16.gmra.mrb[56].mxu0 %v2168_v12  ;;  %v1753_v31 = vmul.f32 0.044715, %v1689_v27  ;;  %v1992_v47 = vadd.f32 1.0, %v4936_v13  ;;  %v2057_v62 = vmul.f32 0.5, %v1993_v37  ;;  %v1994_v52 = vadd.f32 1.0, %v4944_v35  ;;  %v1545_v21 = vpop.f32.mrb[82].mxu1 }
 0x2e9   :  { %v5026_v34 = vpop.eup %3443  ;;  %v1816_v24 = vadd.f32 %v1752_v8, %v4992_v25  ;;  %v1690_v42 = vmul.f32 %v1626_v2, %v5007_v6  ;;  %v1691_v43 = vmul.f32 %v1627_v60, %v5013_v18  ;;  %v2059_v11 = vmul.f32 0.5, %v1995_v39  ;;  %v1547_v14 = vpop.f32.mrb[83].mxu1 }
 0x2ea   :  { %v1817_v50 = vadd.f32 %v1753_v31, %v4996_v45  ;;  %v2056_v55 = vmul.f32 0.5, %v1992_v47  ;;  %v2121_v57 = vmul.f32 %v2057_v62, %v4857_v44  ;;  %v2058_v9 = vmul.f32 0.5, %v1994_v52 }
 0x2eb   :  { %v1880_v17 = vmul.f32 0.7978846, %v1816_v24  ;;  %v1754_v13 = vmul.f32 0.044715, %v1690_v42  ;;  %v1755_v26 = vmul.f32 0.044715, %v1691_v43  ;;  %v2123_v29 = vmul.f32 %v2059_v11, %v4867_v19 }
 0x2ec   :  { %v1881_v32 = vmul.f32 0.7978846, %v1817_v50  ;;  %v2120_v58 = vmul.f32 %v2056_v55, %v4852_v38  ;;  %v2122_v3 = vmul.f32 %v2058_v9, %v4862_v16  ;;  %v5039_v63 = vadd.f32 %v1541_v5, %v4632_v23 }
 0x2ed   :  { %3453 = vtanh.f32 %v1880_v17  ;;  %v1818_v35 = vadd.f32 %v1754_v13, %v5007_v6  ;;  %v5041_v12 = vpop.eup %3445  ;;  %v1819_v44 = vadd.f32 %v1755_v26, %v5013_v18  ;;  %v2171_v27 = vpack.c.bf16 %v2123_v29, %v2121_v57 }
 0x2ee   :  { %3455 = vtanh.f32 %v1881_v32  ;;  %v5045_v8 = vadd.f32 %v1543_v28, %v4635_v4  ;;  %v5047_v19 = vpop.eup %3447  ;;  %v2170_v2 = vpack.c.bf16 %v2122_v3, %v2120_v58  ;;  %v1628_v37 = vmul.f32 %v5039_v63, %v5039_v63  ;;  %v1551_v5 = vpop.f32.mrb[84].mxu1 }
 0x2ef   :  { %v1882_v38 = vmul.f32 0.7978846, %v1818_v35  ;;  %v5052_v16 = vadd.f32 %v1545_v21, %v4632_v23  ;;  %v5054_v31 = vpop.eup %3449  ;;  %v1883_v60 = vmul.f32 0.7978846, %v1819_v44  ;;  %2494 = vmatprep.mubr.bf16.mxu0 %v2171_v27  ;;  %v5059_v47 = vadd.f32 %v1547_v14, %v4635_v4  ;;  %v1553_v24 = vpop.f32.mrb[85].mxu1 }
 0x2f0   :  { %v1629_v39 = vmul.f32 %v5045_v8, %v5045_v8  ;;  %v1997_v28 = vadd.f32 1.0, %v4980_v54  ;;  %v5062_v42 = vpop.eup %3451  ;;  %2495 = vmatmul.mubr.bf16.gmra.mrb[60].mxu0 %v2170_v2  ;;  %v1692_v62 = vmul.f32 %v1628_v37, %v5039_v63  ;;  %v1999_v21 = vadd.f32 1.0, %v4988_v59  ;;  %v1555_v50 = vpop.f32.mrb[86].mxu1 }
 0x2f1   :  { %3457 = vtanh.f32 %v1882_v38  ;;  %v1630_v52 = vmul.f32 %v5052_v16, %v5052_v16  ;;  %v1631_v11 = vmul.f32 %v5059_v47, %v5059_v47  ;;  %v1557_v55 = vpop.f32.mrb[87].mxu1  ;;  %v1996_v57 = vadd.f32 1.0, %v4976_v30 }
 0x2f2   :  { %3459 = vtanh.f32 %v1883_v60  ;;  %v1693_v43 = vmul.f32 %v1629_v39, %v5045_v8  ;;  %v2061_v54 = vmul.f32 0.5, %v1997_v28  ;;  %v1756_v14 = vmul.f32 0.044715, %v1692_v62 }
 0x2f3   :  { %v1694_v17 = vmul.f32 %v1630_v52, %v5052_v16  ;;  %v2063_v13 = vmul.f32 0.5, %v1999_v21  ;;  %v1695_v32 = vmul.f32 %v1631_v11, %v5059_v47  ;;  %v1998_v26 = vadd.f32 1.0, %v4984_v0 }
 0x2f4   :  { %v1757_v9 = vmul.f32 0.044715, %v1693_v43  ;;  %v2125_v59 = vmul.f32 %v2061_v54, %v4885_v48  ;;  %v1820_v29 = vadd.f32 %v1756_v14, %v5039_v63  ;;  %v2060_v3 = vmul.f32 0.5, %v1996_v57 }
 0x2f5   :  { %v1758_v58 = vmul.f32 0.044715, %v1694_v17  ;;  %v2127_v35 = vmul.f32 %v2063_v13, %v4899_v53  ;;  %v1759_v27 = vmul.f32 0.044715, %v1695_v32  ;;  %v2062_v38 = vmul.f32 0.5, %v1998_v26 }
 0x2f6   :  { %v1821_v44 = vadd.f32 %v1757_v9, %v5045_v8  ;;  %v5080_v2 = vadd.f32 %v1551_v5, %v4632_v23  ;;  %v1884_v37 = vmul.f32 0.7978846, %v1820_v29  ;;  %v2124_v0 = vmul.f32 %v2060_v3, %v4880_v33  ;;  %v1561_v39 = vpop.f32.mrb[88].mxu1 }
 0x2f7   :  { %v5082_v30 = vpop.eup %3453  ;;  %v1822_v48 = vadd.f32 %v1758_v58, %v5052_v16  ;;  %v2173_v60 = vpack.c.bf16 %v2127_v35, %v2125_v59  ;;  %v1823_v62 = vadd.f32 %v1759_v27, %v5059_v47  ;;  %v2126_v52 = vmul.f32 %v2062_v38, %v4892_v22  ;;  %v1563_v21 = vpop.f32.mrb[89].mxu1 }
 0x2f8   :  { %v5086_v28 = vpop.eup %3455  ;;  %v1885_v53 = vmul.f32 0.7978846, %v1821_v44  ;;  %v1632_v5 = vmul.f32 %v5080_v2, %v5080_v2  ;;  %3461 = vtanh.f32 %v1884_v37  ;;  %v5093_v11 = vadd.f32 %v1553_v24, %v4635_v4  ;;  %v1565_v54 = vpop.f32.mrb[90].mxu1 }
 0x2f9   :  { %v1886_v43 = vmul.f32 0.7978846, %v1822_v48  ;;  %2504 = vmatprep.mubr.bf16.mxu0 %v2173_v60  ;;  %v5096_v33 = vadd.f32 %v1555_v50, %v4632_v23  ;;  %v1887_v14 = vmul.f32 0.7978846, %v1823_v62  ;;  %v2172_v17 = vpack.c.bf16 %v2126_v52, %v2124_v0  ;;  %v1567_v22 = vpop.f32.mrb[91].mxu1 }
 0x2fa   :  { %3463 = vtanh.f32 %v1885_v53  ;;  %v1696_v13 = vmul.f32 %v1632_v5, %v5080_v2  ;;  %v1633_v9 = vmul.f32 %v5093_v11, %v5093_v11  ;;  %v5106_v32 = vadd.f32 %v1557_v55, %v4635_v4 }
 0x2fb   :  { %v5099_v57 = vpop.eup %3457  ;;  %3465 = vtanh.f32 %v1886_v43  ;;  %v1634_v24 = vmul.f32 %v5096_v33, %v5096_v33  ;;  %2505 = vmatmul.mubr.bf16.gmra.mrb[64].mxu0 %v2172_v17  ;;  %v2001_v26 = vadd.f32 1.0, %v5015_v40  ;;  %v2003_v29 = vadd.f32 1.0, %v5026_v34 }
 0x2fc   :  { %v5108_v50 = vpop.eup %3459  ;;  %3467 = vtanh.f32 %v1887_v14  ;;  %v1760_v59 = vmul.f32 0.044715, %v1696_v13  ;;  %v1697_v58 = vmul.f32 %v1633_v9, %v5093_v11  ;;  %v1635_v3 = vmul.f32 %v5106_v32, %v5106_v32 }
 0x2fd   :  { %v1698_v35 = vmul.f32 %v1634_v24, %v5096_v33  ;;  %v2000_v44 = vadd.f32 1.0, %v5009_v56  ;;  %v2065_v27 = vmul.f32 0.5, %v2001_v26  ;;  %v2067_v38 = vmul.f32 0.5, %v2003_v29 }
 0x2fe   :  { %v1824_v55 = vadd.f32 %v1760_v59, %v5080_v2  ;;  %v2002_v37 = vadd.f32 1.0, %v5020_v15  ;;  %v1761_v48 = vmul.f32 0.044715, %v1697_v58  ;;  %v1699_v40 = vmul.f32 %v1635_v3, %v5106_v32  ;;  %v1571_v0 = vpop.f32.mrb[92].mxu1 }
 0x2ff   :  { %v1762_v60 = vmul.f32 0.044715, %v1698_v35  ;;  %v2064_v34 = vmul.f32 0.5, %v2000_v44  ;;  %v2129_v62 = vmul.f32 %v2065_v27, %v4919_v7  ;;  %v2131_v52 = vmul.f32 %v2067_v38, %v4931_v10  ;;  %v5122_v43 = vpop.f32.mrb[93].mxu1 }
 0x300   :  { %v1888_v53 = vmul.f32 0.7978846, %v1824_v55  ;;  %v2066_v5 = vmul.f32 0.5, %v2002_v37  ;;  %v1825_v56 = vadd.f32 %v1761_v48, %v5093_v11  ;;  %v1763_v17 = vmul.f32 0.044715, %v1699_v40  ;;  %v5127_v13 = vpop.f32.mrb[94].mxu1 }
 0x301   :  { %v1826_v14 = vadd.f32 %v1762_v60, %v5096_v33  ;;  %v2128_v15 = vmul.f32 %v2064_v34, %v4914_v20  ;;  %v2175_v9 = vpack.c.bf16 %v2131_v52, %v2129_v62  ;;  %v5131_v7 = vadd.f32 %v1561_v39, %v4632_v23  ;;  %v5133_v10 = vpop.f32.mrb[95].mxu1 }
 0x302   :  { %3469 = vtanh.f32 %v1888_v53  ;;  %v2130_v24 = vmul.f32 %v2066_v5, %v4925_v46  ;;  %v5135_v59 = vpop.eup %3461  ;;  %v1889_v26 = vmul.f32 0.7978846, %v1825_v56  ;;  %v1827_v58 = vadd.f32 %v1763_v17, %v5106_v32 }
 0x303   :  { %v1890_v29 = vmul.f32 0.7978846, %v1826_v14  ;;  %v5139_v35 = vadd.f32 %v1563_v21, %v4635_v4  ;;  %2514 = vmatprep.mubr.bf16.mxu0 %v2175_v9  ;;  %v1636_v46 = vmul.f32 %v5131_v7, %v5131_v7  ;;  %v5146_v39 = vadd.f32 %v1565_v54, %v4632_v23 }
 0x304   :  { %v5141_v20 = vpop.eup %3463  ;;  %v2174_v3 = vpack.c.bf16 %v2130_v24, %v2128_v15  ;;  %v5149_v44 = vadd.f32 %v1567_v22, %v4635_v4  ;;  %3471 = vtanh.f32 %v1889_v26  ;;  %v1891_v27 = vmul.f32 0.7978846, %v1827_v58 }
 0x305   :  { %v5151_v55 = vpop.eup %3465  ;;  %v1637_v21 = vmul.f32 %v5139_v35, %v5139_v35  ;;  %v2005_v38 = vadd.f32 1.0, %v5047_v19  ;;  %3473 = vtanh.f32 %v1890_v29  ;;  %v1700_v48 = vmul.f32 %v1636_v46, %v5131_v7 }
 0x306   :  { %v5156_v37 = vpop.eup %3467  ;;  %2515 = vmatmul.mubr.bf16.gmra.mrb[68].mxu0 %v2174_v3  ;;  %v1638_v54 = vmul.f32 %v5146_v39, %v5146_v39  ;;  %v1639_v22 = vmul.f32 %v5149_v44, %v5149_v44  ;;  %3475 = vtanh.f32 %v1891_v27  ;;  %v2007_v40 = vadd.f32 1.0, %v5062_v42 }
 0x307   :  { %v1701_v60 = vmul.f32 %v1637_v21, %v5139_v35  ;;  %v2069_v34 = vmul.f32 0.5, %v2005_v38  ;;  %v1764_v53 = vmul.f32 0.044715, %v1700_v48  ;;  %v2004_v52 = vadd.f32 1.0, %v5041_v12 }
 0x308   :  { %v1702_v19 = vmul.f32 %v1638_v54, %v5146_v39  ;;  %v1703_v62 = vmul.f32 %v1639_v22, %v5149_v44  ;;  %v2071_v56 = vmul.f32 0.5, %v2007_v40  ;;  %v2006_v17 = vadd.f32 1.0, %v5054_v31 }
 0x309   :  { %v1765_v5 = vmul.f32 0.044715, %v1701_v60  ;;  %v2133_v14 = vmul.f32 %v2069_v34, %v4955_v49  ;;  %v1828_v15 = vadd.f32 %v1764_v53, %v5131_v7  ;;  %v2068_v26 = vmul.f32 0.5, %v2004_v52 }
 0x30a   :  { %v1766_v9 = vmul.f32 0.044715, %v1702_v19  ;;  %v1767_v24 = vmul.f32 0.044715, %v1703_v62  ;;  %v2135_v29 = vmul.f32 %v2071_v56, %v4968_v61  ;;  %v2070_v58 = vmul.f32 0.5, %v2006_v17 }
 0x30b   :  { %v1829_v42 = vadd.f32 %v1765_v5, %v5139_v35  ;;  %v5174_v3 = vadd.f32 %v1571_v0, %v4632_v23  ;;  %v1892_v46 = vmul.f32 0.7978846, %v1828_v15  ;;  %v2132_v27 = vmul.f32 %v2068_v26, %v4951_v41 }
 0x30c   :  { %v5176_v12 = vpop.eup %3469  ;;  %v1830_v49 = vadd.f32 %v1766_v9, %v5146_v39  ;;  %v1831_v31 = vadd.f32 %v1767_v24, %v5149_v44  ;;  %v2177_v38 = vpack.c.bf16 %v2135_v29, %v2133_v14  ;;  %v2134_v48 = vmul.f32 %v2070_v58, %v4962_v1 }
 0x30d   :  { %v1893_v21 = vmul.f32 0.7978846, %v1829_v42  ;;  %v1640_v61 = vmul.f32 %v5174_v3, %v5174_v3  ;;  %3477 = vtanh.f32 %v1892_v46  ;;  %v5186_v22 = vadd.f32 %v5122_v43, %v4635_v4 }
 0x30e   :  { %v1894_v54 = vmul.f32 0.7978846, %v1830_v49  ;;  %v1895_v0 = vmul.f32 0.7978846, %v1831_v31  ;;  %v3472_v60 = vpop.eup %3471  ;;  %2524 = vmatprep.mubr.bf16.mxu0 %v2177_v38  ;;  %v2176_v40 = vpack.c.bf16 %v2134_v48, %v2132_v27  ;;  %v5191_v34 = vadd.f32 %v5127_v13, %v4632_v23 }
 0x30f   :  { %3479 = vtanh.f32 %v1893_v21  ;;  %v1704_v41 = vmul.f32 %v1640_v61, %v5174_v3  ;;  %v5193_v1 = vpop.eup %3473  ;;  %v1641_v53 = vmul.f32 %v5186_v22, %v5186_v22  ;;  %v5199_v43 = vadd.f32 %v5133_v10, %v4635_v4 }
 0x310   :  { %3481 = vtanh.f32 %v1894_v54  ;;  %v2009_v19 = vadd.f32 1.0, %v5086_v28  ;;  %v3476_v62 = vpop.eup %3475  ;;  %2525 = vmatmul.mubr.bf16.gmra.mrb[72].mxu0 %v2176_v40  ;;  %v1642_v23 = vmul.f32 %v5191_v34, %v5191_v34  ;;  %v2011_v13 = vadd.f32 1.0, %v5108_v50 }
 0x311   :  { %3483 = vtanh.f32 %v1895_v0  ;;  %v1768_v52 = vmul.f32 0.044715, %v1704_v41  ;;  %v1705_v5 = vmul.f32 %v1641_v53, %v5186_v22  ;;  %v1643_v56 = vmul.f32 %v5199_v43, %v5199_v43 }
 0x312   :  { %v2073_v14 = vmul.f32 0.5, %v2009_v19  ;;  %v2008_v4 = vadd.f32 1.0, %v5082_v30  ;;  %v1706_v28 = vmul.f32 %v1642_v23, %v5191_v34  ;;  %v2075_v17 = vmul.f32 0.5, %v2011_v13 }
 0x313   :  { %v1832_v10 = vadd.f32 %v1768_v52, %v5174_v3  ;;  %v2010_v15 = vadd.f32 1.0, %v5099_v57  ;;  %v1769_v9 = vmul.f32 0.044715, %v1705_v5  ;;  %v1707_v24 = vmul.f32 %v1643_v56, %v5199_v43 }
 0x314   :  { %v2137_v50 = vmul.f32 %v2073_v14, %v4996_v45  ;;  %v2072_v26 = vmul.f32 0.5, %v2008_v4  ;;  %v1770_v29 = vmul.f32 0.044715, %v1706_v28  ;;  %v2139_v58 = vmul.f32 %v2075_v17, %v5013_v18 }
 0x315   :  { %v1896_v42 = vmul.f32 0.7978846, %v1832_v10  ;;  %v2074_v46 = vmul.f32 0.5, %v2010_v15  ;;  %v1833_v30 = vadd.f32 %v1769_v9, %v5186_v22  ;;  %v1771_v49 = vmul.f32 0.044715, %v1707_v24 }
 0x316   :  { %v2136_v31 = vmul.f32 %v2072_v26, %v4992_v25  ;;  %v2013_v27 = vadd.f32 1.0, %v5141_v20  ;;  %v1834_v57 = vadd.f32 %v1770_v29, %v5191_v34  ;;  %v2179_v21 = vpack.c.bf16 %v2139_v58, %v2137_v50 }
 0x317   :  { %3485 = vtanh.f32 %v1896_v42  ;;  %v2138_v38 = vmul.f32 %v2074_v46, %v5007_v6  ;;  %v3478_v45 = vpop.eup %3477  ;;  %v1897_v48 = vmul.f32 0.7978846, %v1833_v30  ;;  %v1835_v61 = vadd.f32 %v1771_v49, %v5199_v43 }
 0x318   :  { %v2015_v18 = vadd.f32 1.0, %v5156_v37  ;;  %v2077_v54 = vmul.f32 0.5, %v2013_v27  ;;  %v1898_v40 = vmul.f32 0.7978846, %v1834_v57  ;;  %2534 = vmatprep.mubr.bf16.mxu0 %v2179_v21  ;;  %v2012_v25 = vadd.f32 1.0, %v5135_v59 }
 0x319   :  { %v3480_v0 = vpop.eup %3479  ;;  %v2178_v41 = vpack.c.bf16 %v2138_v38, %v2136_v31  ;;  %v2014_v20 = vadd.f32 1.0, %v5151_v55  ;;  %3487 = vtanh.f32 %v1897_v48  ;;  %v1899_v19 = vmul.f32 0.7978846, %v1835_v61 }
 0x31a   :  { %v3482_v53 = vpop.eup %3481  ;;  %v2079_v52 = vmul.f32 0.5, %v2015_v18  ;;  %v2141_v6 = vmul.f32 %v2077_v54, %v5045_v8  ;;  %3489 = vtanh.f32 %v1898_v40  ;;  %v2076_v13 = vmul.f32 0.5, %v2012_v25 }
 0x31b   :  { %v3484_v23 = vpop.eup %3483  ;;  %2535 = vmatmul.mubr.bf16.gmra.mrb[76].mxu0 %v2178_v41  ;;  %v2078_v37 = vmul.f32 0.5, %v2014_v20  ;;  %v2017_v5 = vadd.f32 1.0, %v3472_v60  ;;  %3491 = vtanh.f32 %v1899_v19  ;;  %v2019_v14 = vadd.f32 1.0, %v3476_v62 }
 0x31c   :  { %v2143_v56 = vmul.f32 %v2079_v52, %v5059_v47  ;;  %v2016_v59 = vadd.f32 1.0, %v5176_v12  ;;  %v2140_v55 = vmul.f32 %v2076_v13, %v5039_v63  ;;  %v2018_v28 = vadd.f32 1.0, %v5193_v1 }
 0x31d   :  { %v2142_v4 = vmul.f32 %v2078_v37, %v5052_v16  ;;  %v2081_v10 = vmul.f32 0.5, %v2017_v5  ;;  %v2083_v17 = vmul.f32 0.5, %v2019_v14  ;;  %v2021_v9 = vadd.f32 1.0, %v3480_v0 }
 0x31e   :  { %v2181_v8 = vpack.c.bf16 %v2143_v56, %v2141_v6  ;;  %v2080_v15 = vmul.f32 0.5, %v2016_v59  ;;  %v2082_v50 = vmul.f32 0.5, %v2018_v28  ;;  %v2023_v60 = vadd.f32 1.0, %v3484_v23 }
 0x31f   :  { %v2180_v24 = vpack.c.bf16 %v2142_v4, %v2140_v55  ;;  %v2145_v47 = vmul.f32 %v2081_v10, %v5093_v11  ;;  %v2147_v62 = vmul.f32 %v2083_v17, %v5106_v32  ;;  %v2085_v12 = vmul.f32 0.5, %v2021_v9 }
 0x320   :  { %2544 = vmatprep.mubr.bf16.mxu0 %v2181_v8  ;;  %v2020_v26 = vadd.f32 1.0, %v3478_v45  ;;  %v2144_v16 = vmul.f32 %v2080_v15, %v5080_v2  ;;  %v2146_v42 = vmul.f32 %v2082_v50, %v5096_v33  ;;  %v2087_v1 = vmul.f32 0.5, %v2023_v60 }
 0x321   :  { %v3486_v63 = vpop.eup %3485  ;;  %v2022_v29 = vadd.f32 1.0, %v3482_v53  ;;  %v2183_v58 = vpack.c.bf16 %v2147_v62, %v2145_v47  ;;  %v2149_v31 = vmul.f32 %v2085_v12, %v5139_v35  ;;  %v2220_v53 = vld [vmem:[%s5656_s6] sm:$0x3]  ;;  %s3683_s6 = smov [#allocation10]  }
 0x322   :  { %v2084_v46 = vmul.f32 0.5, %v2020_v26  ;;  %v2024_v30 = vadd.f32 1.0, %v3486_v63  ;;  %v2182_v49 = vpack.c.bf16 %v2146_v42, %v2144_v16  ;;  %v2151_v11 = vmul.f32 %v2087_v1, %v5149_v44  ;;  %s2942_s8 = sshll.u32 %s3683_s6, 4  ;;  %s2943_s8 = int_to_ptr.vmem [resolvable:$true] %s2942_s8 }
 0x323   :  { %2545 = vmatmul.mubr.bf16.gmra.mrb[80].mxu0 %v2180_v24  ;;  %v2086_v27 = vmul.f32 0.5, %v2022_v29  ;;  %v3488_v32 = vpop.eup %3487  ;;  %v5246_v19 = vrot.slane %v2220_v53, %v5761_v36  ;;  %s3645_s9 = scalar_lea.vmem %s2943_s8, 8192  ;;  %p3650_p5 = scmp.lt.s32.totalorder %s2943_s8, %s2943_s8 }
 0x324   :  { %2554 = vmatprep.mubr.bf16.mxu0 %v2183_v58  ;;  %v3490_v57 = vpop.eup %3489  ;;  %v2185_v21 = vpack.c.bf16 %v2151_v11, %v2149_v31  ;;  %v2148_v2 = vmul.f32 %v2084_v46, %v5131_v7  ;;  %v2025_v38 = vadd.f32 1.0, %v3488_v32  ;;  %v2088_v61 = vmul.f32 0.5, %v2024_v30  ;;  %p3646_p4 = scmp.ne.s32.totalorder %s2943_s8, %s3645_s9  ;;  %p3651_p6 = scmp.lt.s32.totalorder %s3645_s9, %s3645_s9 }
 0x325   :  { %v2150_v33 = vmul.f32 %v2086_v27, %v5146_v39  ;;  %v3492_v45 = vpop.eup %3491  ;;  %v2026_v48 = vadd.f32 1.0, %v3490_v57 }
 0x326   :  { %v2027_v54 = vadd.f32 1.0, %v3492_v45  ;;  %v2089_v0 = vmul.f32 0.5, %v2025_v38  ;;  %v2152_v44 = vmul.f32 %v2088_v61, %v5174_v3  ;;  %v5249_v3 = vrot.slane %v2220_v53, %v5762_v51  ;;  %p3652_p7 = por %p3651_p6, %p3650_p5 }
 0x327   :  { %v2184_v18 = vpack.c.bf16 %v2150_v33, %v2148_v2  ;;  %v2090_v40 = vmul.f32 0.5, %v2026_v48 }
 0x328   :  { %v2091_v35 = vmul.f32 0.5, %v2027_v54  ;;  %v2153_v25 = vmul.f32 %v2089_v0, %v5186_v22  ;;  %p3653_p8 = pnand %p3652_p7, %p3646_p4 }
 0x329   :  { %v2154_v41 = vmul.f32 %v2090_v40, %v5191_v34 }
 0x32a   :  { %v2155_v7 = vmul.f32 %v2091_v35, %v5199_v43 }
 0x32b   :  { %2555 = vmatmul.mubr.bf16.gmra.mrb[84].mxu0 %v2182_v49  ;;  %v2186_v39 = vpack.c.bf16 %v2154_v41, %v2152_v44 }
 0x32c   :  { %2564 = vmatprep.mubr.bf16.mxu0 %v2185_v21  ;;  %v2187_v20 = vpack.c.bf16 %v2155_v7, %v2153_v25 }
 0x333   :  { %2565 = vmatmul.mubr.bf16.gmra.mrb[88].mxu0 %v2184_v18 }
 0x334   :  { %2574 = vmatprep.mubr.bf16.mxu0 %v2187_v20 }
 0x33b   :  { %2575 = vmatmul.mubr.bf16.gmra.mrb[92].mxu0 %v2186_v39 }
 0x358   :  { %v2426_v34 = vpop.f32.mrb[32].mxu0 }
 0x359   :  { %v5252_v22 = vadd.f32 %v2426_v34, %v5246_v19  ;;  %v2428_v43 = vpop.f32.mrb[33].mxu0 }
 0x35a   :  { %v5255_v52 = vadd.f32 %v2428_v43, %v5249_v3  ;;  %v2430_v6 = vpop.f32.mrb[34].mxu0 }
 0x35b   :  { %v5258_v23 = vadd.f32 %v2430_v6, %v5246_v19  ;;  %v2432_v13 = vpop.f32.mrb[35].mxu0  ;;  %v2585_v36 = vmul.f32 %v5252_v22, %v5252_v22 }
 0x35c   :  { %v5263_v37 = vadd.f32 %v2432_v13, %v5249_v3  ;;  %v2586_v51 = vmul.f32 %v5255_v52, %v5255_v52 }
 0x35d   :  { %v2587_v5 = vmul.f32 %v5258_v23, %v5258_v23 }
 0x35e   :  { %v2588_v56 = vmul.f32 %v5263_v37, %v5263_v37  ;;  %v2649_v14 = vadd.f32 %v2586_v51, %v2585_v36 }
 0x360   :  { %2650 = vadd.xlane.f32.xlu0 %v2649_v14  ;;  %v2652_v59 = vadd.f32 %v2588_v56, %v2587_v5 }
 0x364   :  { %2653 = vadd.xlane.f32.xlu0 %v2652_v59 }
 0x367   :  { %v2436_v55 = vpop.f32.mrb[36].mxu0 }
 0x368   :  { %v5272_v4 = vadd.f32 %v2436_v55, %v5246_v19  ;;  %v2438_v10 = vpop.f32.mrb[37].mxu0 }
 0x369   :  { %v5275_v28 = vadd.f32 %v2438_v10, %v5249_v3  ;;  %v2440_v8 = vpop.f32.mrb[38].mxu0 }
 0x36a   :  { %v5278_v17 = vadd.f32 %v2440_v8, %v5246_v19  ;;  %v2442_v15 = vpop.f32.mrb[39].mxu0  ;;  %v2589_v9 = vmul.f32 %v5272_v4, %v5272_v4 }
 0x36b   :  { %v5283_v24 = vadd.f32 %v2442_v15, %v5249_v3  ;;  %v2590_v50 = vmul.f32 %v5275_v28, %v5275_v28 }
 0x36c   :  { %v2591_v60 = vmul.f32 %v5278_v17, %v5278_v17 }
 0x36d   :  { %v2592_v47 = vmul.f32 %v5283_v24, %v5283_v24  ;;  %v2655_v62 = vadd.f32 %v2590_v50, %v2589_v9 }
 0x36f   :  { %2656 = vadd.xlane.f32.xlu1 %v2655_v62  ;;  %v2658_v12 = vadd.f32 %v2592_v47, %v2591_v60 }
 0x373   :  { %2659 = vadd.xlane.f32.xlu1 %v2658_v12 }
 0x37d   :  { %v2446_v26 = vpop.f32.mrb[40].mxu0 }
 0x37e   :  { %v5292_v63 = vadd.f32 %v2446_v26, %v5246_v19  ;;  %v2448_v16 = vpop.f32.mrb[41].mxu0 }
 0x37f   :  { %v5295_v42 = vadd.f32 %v2448_v16, %v5249_v3  ;;  %v2450_v1 = vpop.f32.mrb[42].mxu0 }
 0x380   :  { %v2593_v29 = vmul.f32 %v5292_v63, %v5292_v63  ;;  %v5300_v58 = vadd.f32 %v2450_v1, %v5246_v19  ;;  %v2452_v46 = vpop.f32.mrb[43].mxu0 }
 0x381   :  { %v2594_v30 = vmul.f32 %v5295_v42, %v5295_v42  ;;  %v5305_v49 = vadd.f32 %v2452_v46, %v5249_v3 }
 0x382   :  { %v2595_v31 = vmul.f32 %v5300_v58, %v5300_v58 }
 0x383   :  { %v2596_v11 = vmul.f32 %v5305_v49, %v5305_v49  ;;  %v2661_v27 = vadd.f32 %v2594_v30, %v2593_v29 }
 0x385   :  { %2662 = vadd.xlane.f32.xlu0 %v2661_v27  ;;  %v2664_v32 = vadd.f32 %v2596_v11, %v2595_v31 }
 0x387   :  { %2665 = vadd.xlane.f32.xlu1 %v2664_v32 }
 0x38c   :  { %v2456_v57 = vpop.f32.mrb[44].mxu0 }
 0x38d   :  { %v5312_v21 = vadd.f32 %v2456_v57, %v5246_v19  ;;  %v2458_v2 = vpop.f32.mrb[45].mxu0 }
 0x38e   :  { %v5315_v33 = vadd.f32 %v2458_v2, %v5249_v3  ;;  %v2460_v38 = vpop.f32.mrb[46].mxu0 }
 0x38f   :  { %v2597_v45 = vmul.f32 %v5312_v21, %v5312_v21  ;;  %v5320_v48 = vadd.f32 %v2460_v38, %v5246_v19  ;;  %v2462_v61 = vpop.f32.mrb[47].mxu0 }
 0x390   :  { %v2598_v18 = vmul.f32 %v5315_v33, %v5315_v33  ;;  %v5325_v54 = vadd.f32 %v2462_v61, %v5249_v3 }
 0x391   :  { %v2599_v0 = vmul.f32 %v5320_v48, %v5320_v48 }
 0x392   :  { %v2600_v40 = vmul.f32 %v5325_v54, %v5325_v54  ;;  %v2667_v35 = vadd.f32 %v2598_v18, %v2597_v45 }
 0x394   :  { %2668 = vadd.xlane.f32.xlu0 %v2667_v35  ;;  %v2670_v44 = vadd.f32 %v2600_v40, %v2599_v0 }
 0x396   :  { %2671 = vadd.xlane.f32.xlu1 %v2670_v44  ;;  %v2466_v41 = vpop.f32.mrb[48].mxu0 }
 0x397   :  { %v5332_v25 = vadd.f32 %v2466_v41, %v5246_v19  ;;  %v2468_v7 = vpop.f32.mrb[49].mxu0 }
 0x398   :  { %v5335_v39 = vadd.f32 %v2468_v7, %v5249_v3  ;;  %v2470_v20 = vpop.f32.mrb[50].mxu0 }
 0x399   :  { %v2601_v53 = vmul.f32 %v5332_v25, %v5332_v25  ;;  %v5340_v34 = vadd.f32 %v2470_v20, %v5246_v19  ;;  %v2472_v43 = vpop.f32.mrb[51].mxu0 }
 0x39a   :  { %v2602_v6 = vmul.f32 %v5335_v39, %v5335_v39  ;;  %v5345_v13 = vadd.f32 %v2472_v43, %v5249_v3 }
 0x39b   :  { %v2603_v36 = vmul.f32 %v5340_v34, %v5340_v34 }
 0x39c   :  { %v2604_v51 = vmul.f32 %v5345_v13, %v5345_v13  ;;  %v2673_v5 = vadd.f32 %v2602_v6, %v2601_v53 }
 0x39e   :  { %2674 = vadd.xlane.f32.xlu0 %v2673_v5  ;;  %v2676_v56 = vadd.f32 %v2604_v51, %v2603_v36 }
 0x3a0   :  { %2677 = vadd.xlane.f32.xlu1 %v2676_v56 }
 0x3aa   :  { %v2476_v14 = vpop.f32.mrb[52].mxu0 }
 0x3ab   :  { %v5352_v59 = vadd.f32 %v2476_v14, %v5246_v19  ;;  %v2478_v55 = vpop.f32.mrb[53].mxu0 }
 0x3ac   :  { %v5355_v10 = vadd.f32 %v2478_v55, %v5249_v3  ;;  %v2480_v8 = vpop.f32.mrb[54].mxu0 }
 0x3ad   :  { %v2605_v15 = vmul.f32 %v5352_v59, %v5352_v59  ;;  %v5360_v9 = vadd.f32 %v2480_v8, %v5246_v19  ;;  %v2482_v50 = vpop.f32.mrb[55].mxu0 }
 0x3ae   :  { %v2606_v60 = vmul.f32 %v5355_v10, %v5355_v10  ;;  %v5365_v47 = vadd.f32 %v2482_v50, %v5249_v3 }
 0x3af   :  { %v2607_v62 = vmul.f32 %v5360_v9, %v5360_v9 }
 0x3b0   :  { %v2608_v12 = vmul.f32 %v5365_v47, %v5365_v47  ;;  %v2679_v26 = vadd.f32 %v2606_v60, %v2605_v15 }
 0x3b2   :  { %2680 = vadd.xlane.f32.xlu0 %v2679_v26  ;;  %v2682_v16 = vadd.f32 %v2608_v12, %v2607_v62 }
 0x3b4   :  { %2683 = vadd.xlane.f32.xlu1 %v2682_v16 }
 0x3bb   :  { %v2486_v1 = vpop.f32.mrb[56].mxu0 }
 0x3bc   :  { %v5372_v29 = vadd.f32 %v2486_v1, %v5246_v19  ;;  %v2488_v46 = vpop.f32.mrb[57].mxu0 }
 0x3bd   :  { %v5375_v30 = vadd.f32 %v2488_v46, %v5249_v3  ;;  %v2490_v31 = vpop.f32.mrb[58].mxu0 }
 0x3be   :  { %v2609_v11 = vmul.f32 %v5372_v29, %v5372_v29  ;;  %v5380_v27 = vadd.f32 %v2490_v31, %v5246_v19  ;;  %v2492_v32 = vpop.f32.mrb[59].mxu0 }
 0x3bf   :  { %v2610_v57 = vmul.f32 %v5375_v30, %v5375_v30  ;;  %v5385_v2 = vadd.f32 %v2492_v32, %v5249_v3 }
 0x3c0   :  { %v2611_v38 = vmul.f32 %v5380_v27, %v5380_v27 }
 0x3c1   :  { %v2612_v45 = vmul.f32 %v5385_v2, %v5385_v2  ;;  %v2685_v61 = vadd.f32 %v2610_v57, %v2609_v11 }
 0x3c3   :  { %2686 = vadd.xlane.f32.xlu0 %v2685_v61  ;;  %v2688_v18 = vadd.f32 %v2612_v45, %v2611_v38  ;;  %v2496_v0 = vpop.f32.mrb[60].mxu0 }
 0x3c4   :  { %v5392_v40 = vadd.f32 %v2496_v0, %v5246_v19  ;;  %v2498_v35 = vpop.f32.mrb[61].mxu0 }
 0x3c5   :  { %2689 = vadd.xlane.f32.xlu1 %v2688_v18  ;;  %v5395_v44 = vadd.f32 %v2498_v35, %v5249_v3  ;;  %v2500_v41 = vpop.f32.mrb[62].mxu0 }
 0x3c6   :  { %v2613_v7 = vmul.f32 %v5392_v40, %v5392_v40  ;;  %v5400_v20 = vadd.f32 %v2500_v41, %v5246_v19  ;;  %v2502_v53 = vpop.f32.mrb[63].mxu0 }
 0x3c7   :  { %v2614_v43 = vmul.f32 %v5395_v44, %v5395_v44  ;;  %v5405_v6 = vadd.f32 %v2502_v53, %v5249_v3 }
 0x3c8   :  { %v2615_v36 = vmul.f32 %v5400_v20, %v5400_v20 }
 0x3c9   :  { %v2616_v51 = vmul.f32 %v5405_v6, %v5405_v6  ;;  %v2691_v5 = vadd.f32 %v2614_v43, %v2613_v7 }
 0x3cb   :  { %2692 = vadd.xlane.f32.xlu0 %v2691_v5  ;;  %v2694_v56 = vadd.f32 %v2616_v51, %v2615_v36 }
 0x3cd   :  { %2695 = vadd.xlane.f32.xlu1 %v2694_v56 }
 0x3ce   :  { %v2506_v14 = vpop.f32.mrb[64].mxu0 }
 0x3cf   :  { %v5412_v55 = vadd.f32 %v2506_v14, %v5246_v19  ;;  %v2508_v8 = vpop.f32.mrb[65].mxu0 }
 0x3d0   :  { %v5415_v15 = vadd.f32 %v2508_v8, %v5249_v3  ;;  %v2510_v50 = vpop.f32.mrb[66].mxu0 }
 0x3d1   :  { %v2617_v60 = vmul.f32 %v5412_v55, %v5412_v55  ;;  %v5420_v62 = vadd.f32 %v2510_v50, %v5246_v19  ;;  %v2512_v12 = vpop.f32.mrb[67].mxu0 }
 0x3d2   :  { %v2618_v26 = vmul.f32 %v5415_v15, %v5415_v15  ;;  %v5425_v16 = vadd.f32 %v2512_v12, %v5249_v3 }
 0x3d3   :  { %v2619_v1 = vmul.f32 %v5420_v62, %v5420_v62 }
 0x3d4   :  { %v2620_v46 = vmul.f32 %v5425_v16, %v5425_v16  ;;  %v2697_v31 = vadd.f32 %v2618_v26, %v2617_v60 }
 0x3d6   :  { %2698 = vadd.xlane.f32.xlu0 %v2697_v31  ;;  %v2700_v11 = vadd.f32 %v2620_v46, %v2619_v1 }
 0x3d8   :  { %2701 = vadd.xlane.f32.xlu1 %v2700_v11 }
 0x3d9   :  { %v2516_v32 = vpop.f32.mrb[68].mxu0 }
 0x3da   :  { %v5432_v57 = vadd.f32 %v2516_v32, %v5246_v19  ;;  %v2518_v38 = vpop.f32.mrb[69].mxu0 }
 0x3db   :  { %v5435_v45 = vadd.f32 %v2518_v38, %v5249_v3  ;;  %v2520_v61 = vpop.f32.mrb[70].mxu0 }
 0x3dc   :  { %v2621_v18 = vmul.f32 %v5432_v57, %v5432_v57  ;;  %v5440_v0 = vadd.f32 %v2520_v61, %v5246_v19  ;;  %v2522_v35 = vpop.f32.mrb[71].mxu0 }
 0x3dd   :  { %v2622_v41 = vmul.f32 %v5435_v45, %v5435_v45  ;;  %v5445_v7 = vadd.f32 %v2522_v35, %v5249_v3 }
 0x3de   :  { %v2623_v53 = vmul.f32 %v5440_v0, %v5440_v0 }
 0x3df   :  { %v2624_v43 = vmul.f32 %v5445_v7, %v5445_v7  ;;  %v2703_v36 = vadd.f32 %v2622_v41, %v2621_v18 }
 0x3e1   :  { %2704 = vadd.xlane.f32.xlu0 %v2703_v36  ;;  %v2706_v51 = vadd.f32 %v2624_v43, %v2623_v53 }
 0x3e3   :  { %2707 = vadd.xlane.f32.xlu1 %v2706_v51  ;;  %v2526_v5 = vpop.f32.mrb[72].mxu0 }
 0x3e4   :  { %v5452_v56 = vadd.f32 %v2526_v5, %v5246_v19  ;;  %v2528_v14 = vpop.f32.mrb[73].mxu0 }
 0x3e5   :  { %v5455_v8 = vadd.f32 %v2528_v14, %v5249_v3  ;;  %v2530_v50 = vpop.f32.mrb[74].mxu0 }
 0x3e6   :  { %v2625_v60 = vmul.f32 %v5452_v56, %v5452_v56  ;;  %v5460_v12 = vadd.f32 %v2530_v50, %v5246_v19  ;;  %v2532_v26 = vpop.f32.mrb[75].mxu0 }
 0x3e7   :  { %v2626_v1 = vmul.f32 %v5455_v8, %v5455_v8  ;;  %v5465_v46 = vadd.f32 %v2532_v26, %v5249_v3 }
 0x3e8   :  { %v2627_v31 = vmul.f32 %v5460_v12, %v5460_v12 }
 0x3e9   :  { %v2628_v11 = vmul.f32 %v5465_v46, %v5465_v46  ;;  %v2709_v32 = vadd.f32 %v2626_v1, %v2625_v60 }
 0x3eb   :  { %2710 = vadd.xlane.f32.xlu0 %v2709_v32  ;;  %v2712_v38 = vadd.f32 %v2628_v11, %v2627_v31 }
 0x3ed   :  { %v2651_v61 = vpop.xlane.xlu0 %2650  ;;  %2713 = vadd.xlane.f32.xlu1 %v2712_v38 }
 0x3ee   :  { %v2536_v18 = vpop.f32.mrb[76].mxu0  ;;  %v2745_v35 = vmax.f32 %v2651_v61, 1e-24 }
 0x3ef   :  { %v5472_v41 = vadd.f32 %v2536_v18, %v5246_v19  ;;  %v2538_v53 = vpop.f32.mrb[77].mxu0 }
 0x3f0   :  { %v5475_v43 = vadd.f32 %v2538_v53, %v5249_v3  ;;  %v2540_v36 = vpop.f32.mrb[78].mxu0  ;;  %3493 = vrsqrt.f32 %v2745_v35 }
 0x3f1   :  { %v2629_v51 = vmul.f32 %v5472_v41, %v5472_v41  ;;  %v5480_v5 = vadd.f32 %v2540_v36, %v5246_v19  ;;  %v2542_v14 = vpop.f32.mrb[79].mxu0  ;;  %v2654_v50 = vpop.xlane.xlu0 %2653 }
 0x3f2   :  { %v2630_v60 = vmul.f32 %v5475_v43, %v5475_v43  ;;  %v5485_v26 = vadd.f32 %v2542_v14, %v5249_v3  ;;  %v2746_v1 = vmax.f32 %v2654_v50, 1e-24 }
 0x3f3   :  { %5763 = vst [vmem:[#allocation24_spill] sm:$0xff] %v5480_v5  ;;  %v2631_v31 = vmul.f32 %v5480_v5, %v5480_v5 }
 0x3f4   :  { %5764 = vst [vmem:[#allocation25_spill] sm:$0xff] %v5485_v26  ;;  %v2632_v11 = vmul.f32 %v5485_v26, %v5485_v26  ;;  %v2715_v32 = vadd.f32 %v2630_v60, %v2629_v51  ;;  %3495 = vrsqrt.f32 %v2746_v1 }
 0x3f6   :  { %v2546_v38 = vpop.f32.mrb[80].mxu0  ;;  %2716 = vadd.xlane.f32.xlu0 %v2715_v32  ;;  %v2718_v61 = vadd.f32 %v2632_v11, %v2631_v31 }
 0x3f7   :  { %v5492_v18 = vadd.f32 %v2546_v38, %v5246_v19  ;;  %v2548_v35 = vpop.f32.mrb[81].mxu0 }
 0x3f8   :  { %v5495_v53 = vadd.f32 %v2548_v35, %v5249_v3  ;;  %v2550_v36 = vpop.f32.mrb[82].mxu0  ;;  %2719 = vadd.xlane.f32.xlu1 %v2718_v61 }
 0x3f9   :  { %5765 = vst [vmem:[#allocation26_spill] sm:$0xff] %v5492_v18  ;;  %v2633_v14 = vmul.f32 %v5492_v18, %v5492_v18  ;;  %v5500_v50 = vadd.f32 %v2550_v36, %v5246_v19  ;;  %v2552_v51 = vpop.f32.mrb[83].mxu0 }
 0x3fa   :  { %5766 = vst [vmem:[#allocation27_spill] sm:$0xff] %v5495_v53  ;;  %v3494_v60 = vpop.eup %3493  ;;  %v2634_v1 = vmul.f32 %v5495_v53, %v5495_v53  ;;  %v5505_v31 = vadd.f32 %v2552_v51, %v5249_v3 }
 0x3fb   :  { %5767 = vst [vmem:[#allocation28_spill] sm:$0xff] %v5500_v50  ;;  %v2635_v11 = vmul.f32 %v5500_v50, %v5500_v50  ;;  %v2809_v32 = vmul.f32 %v3494_v60, %v5252_v22  ;;  %v2810_v38 = vmul.f32 %v3494_v60, %v5255_v52 }
 0x3fc   :  { %v2636_v61 = vmul.f32 %v5505_v31, %v5505_v31  ;;  %v2721_v35 = vadd.f32 %v2634_v1, %v2633_v14  ;;  %v2657_v36 = vpop.xlane.xlu1 %2656 }
 0x3fd   :  { %2873 = vst [vmem:[#allocation10] sm:$0xff] %v2809_v32  ;;  %2874 = vst [vmem:[#allocation10 + $0x8] sm:$0xff] %v2810_v38  ;;  %v2747_v51 = vmax.f32 %v2657_v36, 1e-24 }
 0x3fe   :  { %v3496_v18 = vpop.eup %3495  ;;  %v2556_v26 = vpop.f32.mrb[84].mxu0  ;;  %2722 = vadd.xlane.f32.xlu0 %v2721_v35  ;;  %v2724_v53 = vadd.f32 %v2636_v61, %v2635_v11 }
 0x3ff   :  { %v5514_v5 = vadd.f32 %v2556_v26, %v5246_v19  ;;  %v2558_v50 = vpop.f32.mrb[85].mxu0  ;;  %v2811_v22 = vmul.f32 %v3496_v18, %v5258_v23  ;;  %v2812_v52 = vmul.f32 %v3496_v18, %v5263_v37  ;;  %3497 = vrsqrt.f32 %v2747_v51 }
 0x400   :  { %v5519_v60 = vadd.f32 %v2558_v50, %v5249_v3  ;;  %v2560_v14 = vpop.f32.mrb[86].mxu0  ;;  %2725 = vadd.xlane.f32.xlu1 %v2724_v53  ;;  %v2660_v26 = vpop.xlane.xlu1 %2659 }
 0x401   :  { %v2637_v1 = vmul.f32 %v5514_v5, %v5514_v5  ;;  %v5524_v11 = vadd.f32 %v2560_v14, %v5246_v19  ;;  %v2562_v32 = vpop.f32.mrb[87].mxu0  ;;  %2875 = vst [vmem:[#allocation10 + $0x10] sm:$0xff] %v2811_v22  ;;  %2876 = vst [vmem:[#allocation10 + $0x18] sm:$0xff] %v2812_v52  ;;  %v2748_v18 = vmax.f32 %v2660_v26, 1e-24 }
 0x402   :  { %v2638_v23 = vmul.f32 %v5519_v60, %v5519_v60  ;;  %v5529_v37 = vadd.f32 %v2562_v32, %v5249_v3 }
 0x403   :  { %v2639_v53 = vmul.f32 %v5524_v11, %v5524_v11  ;;  %3499 = vrsqrt.f32 %v2748_v18 }
 0x404   :  { %v2640_v50 = vmul.f32 %v5529_v37, %v5529_v37  ;;  %v2727_v38 = vadd.f32 %v2638_v23, %v2637_v1 }
 0x406   :  { %v2566_v61 = vpop.f32.mrb[88].mxu0  ;;  %2728 = vadd.xlane.f32.xlu0 %v2727_v38  ;;  %v2730_v35 = vadd.f32 %v2640_v50, %v2639_v53 }
 0x407   :  { %v5536_v36 = vadd.f32 %v2566_v61, %v5246_v19  ;;  %v2568_v51 = vpop.f32.mrb[89].mxu0 }
 0x408   :  { %v5539_v22 = vadd.f32 %v2568_v51, %v5249_v3  ;;  %v2570_v52 = vpop.f32.mrb[90].mxu0  ;;  %2731 = vadd.xlane.f32.xlu1 %v2730_v35 }
 0x409   :  { %5768 = vst [vmem:[#allocation29_spill] sm:$0xff] %v5536_v36  ;;  %v2641_v14 = vmul.f32 %v5536_v36, %v5536_v36  ;;  %v5544_v32 = vadd.f32 %v2570_v52, %v5246_v19  ;;  %v2572_v1 = vpop.f32.mrb[91].mxu0  ;;  %v3498_v26 = vpop.eup %3497 }
 0x40a   :  { %5769 = vst [vmem:[#allocation30_spill] sm:$0xff] %v5539_v22  ;;  %v2642_v23 = vmul.f32 %v5539_v22, %v5539_v22  ;;  %v5549_v18 = vadd.f32 %v2572_v1, %v5249_v3  ;;  %v2813_v50 = vmul.f32 %v3498_v26, %v5272_v4  ;;  %v2814_v38 = vmul.f32 %v3498_v26, %v5275_v28 }
 0x40b   :  { %5770 = vst [vmem:[#allocation33_spill] sm:$0xff] %v5544_v32  ;;  %v2643_v53 = vmul.f32 %v5544_v32, %v5544_v32 }
 0x40c   :  { %v2644_v61 = vmul.f32 %v5549_v18, %v5549_v18  ;;  %v2733_v35 = vadd.f32 %v2642_v23, %v2641_v14  ;;  %2877 = vst [vmem:[#allocation10 + $0x20] sm:$0xff] %v2813_v50  ;;  %2878 = vst [vmem:[#allocation10 + $0x28] sm:$0xff] %v2814_v38 }
 0x40d   :  { %v3500_v51 = vpop.eup %3499 }
 0x40e   :  { %v2576_v52 = vpop.f32.mrb[92].mxu0  ;;  %2734 = vadd.xlane.f32.xlu0 %v2733_v35  ;;  %v2736_v22 = vadd.f32 %v2644_v61, %v2643_v53  ;;  %v2815_v32 = vmul.f32 %v3500_v51, %v5278_v17  ;;  %v2816_v4 = vmul.f32 %v3500_v51, %v5283_v24 }
 0x40f   :  { %v5558_v1 = vadd.f32 %v2576_v52, %v5246_v19  ;;  %v2578_v36 = vpop.f32.mrb[93].mxu0 }
 0x410   :  { %v5563_v28 = vadd.f32 %v2578_v36, %v5249_v3  ;;  %v2580_v26 = vpop.f32.mrb[94].mxu0  ;;  %2737 = vadd.xlane.f32.xlu1 %v2736_v22  ;;  %2879 = vst [vmem:[#allocation10 + $0x30] sm:$0xff] %v2815_v32  ;;  %2880 = vst [vmem:[#allocation10 + $0x38] sm:$0xff] %v2816_v4 }
 0x411   :  { %v2645_v14 = vmul.f32 %v5558_v1, %v5558_v1  ;;  %v5568_v23 = vadd.f32 %v2580_v26, %v5246_v19  ;;  %v2582_v53 = vpop.f32.mrb[95].mxu0 }
 0x412   :  { %v2646_v50 = vmul.f32 %v5563_v28, %v5563_v28  ;;  %v5573_v17 = vadd.f32 %v2582_v53, %v5249_v3  ;;  %v2663_v24 = vpop.xlane.xlu0 %2662 }
 0x413   :  { %v2647_v36 = vmul.f32 %v5568_v23, %v5568_v23  ;;  %v2749_v22 = vmax.f32 %v2663_v24, 1e-24 }
 0x414   :  { %v2648_v38 = vmul.f32 %v5573_v17, %v5573_v17  ;;  %v2739_v61 = vadd.f32 %v2646_v50, %v2645_v14  ;;  %v2666_v19 = vpop.xlane.xlu1 %2665 }
 0x415   :  { %3501 = vrsqrt.f32 %v2749_v22  ;;  %v2750_v35 = vmax.f32 %v2666_v19, 1e-24 }
 0x416   :  { %2740 = vadd.xlane.f32.xlu0 %v2739_v61  ;;  %v2742_v32 = vadd.f32 %v2648_v38, %v2647_v36 }
 0x417   :  { %3503 = vrsqrt.f32 %v2750_v35 }
 0x418   :  { %2743 = vadd.xlane.f32.xlu1 %v2742_v32 }
 0x41f   :  { %v3502_v51 = vpop.eup %3501 }
 0x420   :  { %v2817_v3 = vmul.f32 %v3502_v51, %v5292_v63  ;;  %v2818_v52 = vmul.f32 %v3502_v51, %v5295_v42 }
 0x421   :  { %v3504_v4 = vpop.eup %3503  ;;  %v2669_v14 = vpop.xlane.xlu0 %2668 }
 0x422   :  { %2881 = vst [vmem:[#allocation10 + $0x40] sm:$0xff] %v2817_v3  ;;  %2882 = vst [vmem:[#allocation10 + $0x48] sm:$0xff] %v2818_v52  ;;  %v2819_v26 = vmul.f32 %v3504_v4, %v5300_v58  ;;  %v2820_v53 = vmul.f32 %v3504_v4, %v5305_v49  ;;  %v2751_v50 = vmax.f32 %v2669_v14, 1e-24 }
 0x423   :  { %v2672_v24 = vpop.xlane.xlu1 %2671 }
 0x424   :  { %2883 = vst [vmem:[#allocation10 + $0x50] sm:$0xff] %v2819_v26  ;;  %2884 = vst [vmem:[#allocation10 + $0x58] sm:$0xff] %v2820_v53  ;;  %3505 = vrsqrt.f32 %v2751_v50  ;;  %v2752_v36 = vmax.f32 %v2672_v24, 1e-24 }
 0x426   :  { %3507 = vrsqrt.f32 %v2752_v36 }
 0x42b   :  { %v2675_v22 = vpop.xlane.xlu0 %2674 }
 0x42c   :  { %v2753_v38 = vmax.f32 %v2675_v22, 1e-24 }
 0x42d   :  { %v2678_v61 = vpop.xlane.xlu1 %2677 }
 0x42e   :  { %v3506_v63 = vpop.eup %3505  ;;  %3509 = vrsqrt.f32 %v2753_v38  ;;  %v2754_v58 = vmax.f32 %v2678_v61, 1e-24 }
 0x42f   :  { %v2821_v42 = vmul.f32 %v3506_v63, %v5312_v21  ;;  %v2822_v19 = vmul.f32 %v3506_v63, %v5315_v33 }
 0x430   :  { %v3508_v35 = vpop.eup %3507  ;;  %3511 = vrsqrt.f32 %v2754_v58 }
 0x431   :  { %2885 = vst [vmem:[#allocation10 + $0x60] sm:$0xff] %v2821_v42  ;;  %2886 = vst [vmem:[#allocation10 + $0x68] sm:$0xff] %v2822_v19  ;;  %v2823_v49 = vmul.f32 %v3508_v35, %v5320_v48  ;;  %v2824_v32 = vmul.f32 %v3508_v35, %v5325_v54 }
 0x433   :  { %2887 = vst [vmem:[#allocation10 + $0x70] sm:$0xff] %v2823_v49  ;;  %2888 = vst [vmem:[#allocation10 + $0x78] sm:$0xff] %v2824_v32 }
 0x438   :  { %v3510_v51 = vpop.eup %3509 }
 0x439   :  { %v2825_v3 = vmul.f32 %v3510_v51, %v5332_v25  ;;  %v2826_v52 = vmul.f32 %v3510_v51, %v5335_v39 }
 0x43a   :  { %v3512_v21 = vpop.eup %3511 }
 0x43b   :  { %2889 = vst [vmem:[#allocation10 + $0x80] sm:$0xff] %v2825_v3  ;;  %2890 = vst [vmem:[#allocation10 + $0x88] sm:$0xff] %v2826_v52  ;;  %v2827_v33 = vmul.f32 %v3512_v21, %v5340_v34  ;;  %v2828_v4 = vmul.f32 %v3512_v21, %v5345_v13 }
 0x43d   :  { %2891 = vst [vmem:[#allocation10 + $0x90] sm:$0xff] %v2827_v33  ;;  %2892 = vst [vmem:[#allocation10 + $0x98] sm:$0xff] %v2828_v4 }
 0x43f   :  { %v2681_v48 = vpop.xlane.xlu0 %2680 }
 0x440   :  { %v2755_v26 = vmax.f32 %v2681_v48, 1e-24 }
 0x441   :  { %v2684_v54 = vpop.xlane.xlu1 %2683 }
 0x442   :  { %3513 = vrsqrt.f32 %v2755_v26  ;;  %v2756_v53 = vmax.f32 %v2684_v54, 1e-24 }
 0x444   :  { %3515 = vrsqrt.f32 %v2756_v53 }
 0x44c   :  { %v3514_v14 = vpop.eup %3513 }
 0x44d   :  { %v2829_v25 = vmul.f32 %v3514_v14, %v5352_v59  ;;  %v2830_v39 = vmul.f32 %v3514_v14, %v5355_v10 }
 0x44e   :  { %v3516_v50 = vpop.eup %3515 }
 0x44f   :  { %2893 = vst [vmem:[#allocation10 + $0xa0] sm:$0xff] %v2829_v25  ;;  %2894 = vst [vmem:[#allocation10 + $0xa8] sm:$0xff] %v2830_v39  ;;  %v2831_v34 = vmul.f32 %v3516_v50, %v5360_v9  ;;  %v2832_v13 = vmul.f32 %v3516_v50, %v5365_v47 }
 0x450   :  { %v2687_v24 = vpop.xlane.xlu0 %2686 }
 0x451   :  { %v2757_v36 = vmax.f32 %v2687_v24, 1e-24  ;;  %2895 = vst [vmem:[#allocation10 + $0xb0] sm:$0xff] %v2831_v34  ;;  %2896 = vst [vmem:[#allocation10 + $0xb8] sm:$0xff] %v2832_v13 }
 0x452   :  { %v2690_v22 = vpop.xlane.xlu1 %2689 }
 0x453   :  { %3517 = vrsqrt.f32 %v2757_v36  ;;  %v2758_v38 = vmax.f32 %v2690_v22, 1e-24 }
 0x455   :  { %3519 = vrsqrt.f32 %v2758_v38 }
 0x458   :  { %v2693_v63 = vpop.xlane.xlu0 %2692 }
 0x459   :  { %v2759_v61 = vmax.f32 %v2693_v63, 1e-24 }
 0x45a   :  { %v2696_v59 = vpop.xlane.xlu1 %2695 }
 0x45b   :  { %3521 = vrsqrt.f32 %v2759_v61  ;;  %v2760_v10 = vmax.f32 %v2696_v59, 1e-24 }
 0x45d   :  { %v3518_v42 = vpop.eup %3517  ;;  %3523 = vrsqrt.f32 %v2760_v10 }
 0x45e   :  { %v2833_v19 = vmul.f32 %v3518_v42, %v5372_v29  ;;  %v2834_v9 = vmul.f32 %v3518_v42, %v5375_v30 }
 0x45f   :  { %v3520_v47 = vpop.eup %3519 }
 0x460   :  { %2897 = vst [vmem:[#allocation10 + $0xc0] sm:$0xff] %v2833_v19  ;;  %2898 = vst [vmem:[#allocation10 + $0xc8] sm:$0xff] %v2834_v9  ;;  %v2835_v58 = vmul.f32 %v3520_v47, %v5380_v27  ;;  %v2836_v35 = vmul.f32 %v3520_v47, %v5385_v2 }
 0x462   :  { %2899 = vst [vmem:[#allocation10 + $0xd0] sm:$0xff] %v2835_v58  ;;  %2900 = vst [vmem:[#allocation10 + $0xd8] sm:$0xff] %v2836_v35  ;;  %v5771_v58 = vld [vmem:[#allocation24_spill] sm:$0xff]  ;;  %v5772_v35 = vld [vmem:[#allocation25_spill] sm:$0xff] }
 0x463   :  { %v2699_v49 = vpop.xlane.xlu0 %2698 }
 0x464   :  { %v2761_v32 = vmax.f32 %v2699_v49, 1e-24 }
 0x465   :  { %v3522_v51 = vpop.eup %3521  ;;  %v2702_v3 = vpop.xlane.xlu1 %2701 }
 0x466   :  { %v2837_v52 = vmul.f32 %v3522_v51, %v5392_v40  ;;  %v2838_v29 = vmul.f32 %v3522_v51, %v5395_v44  ;;  %3525 = vrsqrt.f32 %v2761_v32  ;;  %v2762_v30 = vmax.f32 %v2702_v3, 1e-24 }
 0x467   :  { %v3524_v21 = vpop.eup %3523 }
 0x468   :  { %2901 = vst [vmem:[#allocation10 + $0xe0] sm:$0xff] %v2837_v52  ;;  %2902 = vst [vmem:[#allocation10 + $0xe8] sm:$0xff] %v2838_v29  ;;  %v2839_v33 = vmul.f32 %v3524_v21, %v5400_v20  ;;  %v2840_v27 = vmul.f32 %v3524_v21, %v5405_v6  ;;  %3527 = vrsqrt.f32 %v2762_v30  ;;  %v5773_v29 = vld [vmem:[#allocation26_spill] sm:$0xff]  ;;  %v5774_v30 = vld [vmem:[#allocation27_spill] sm:$0xff] }
 0x46a   :  { %2903 = vst [vmem:[#allocation10 + $0xf0] sm:$0xff] %v2839_v33  ;;  %2904 = vst [vmem:[#allocation10 + $0xf8] sm:$0xff] %v2840_v27  ;;  %v5775_v33 = vld [vmem:[#allocation28_spill] sm:$0xff] }
 0x46e   :  { %v2705_v2 = vpop.xlane.xlu0 %2704 }
 0x46f   :  { %v2763_v4 = vmax.f32 %v2705_v2, 1e-24 }
 0x470   :  { %v2708_v48 = vpop.xlane.xlu1 %2707  ;;  %v3526_v26 = vpop.eup %3525 }
 0x471   :  { %3529 = vrsqrt.f32 %v2763_v4  ;;  %v2764_v40 = vmax.f32 %v2708_v48, 1e-24  ;;  %v2841_v44 = vmul.f32 %v3526_v26, %v5412_v55  ;;  %v2842_v54 = vmul.f32 %v3526_v26, %v5415_v15 }
 0x472   :  { %v3528_v53 = vpop.eup %3527 }
 0x473   :  { %3531 = vrsqrt.f32 %v2764_v40  ;;  %2905 = vst [vmem:[#allocation10 + $0x100] sm:$0xff] %v2841_v44  ;;  %2906 = vst [vmem:[#allocation10 + $0x108] sm:$0xff] %v2842_v54  ;;  %v2843_v20 = vmul.f32 %v3528_v53, %v5420_v62  ;;  %v2844_v6 = vmul.f32 %v3528_v53, %v5425_v16 }
 0x475   :  { %2907 = vst [vmem:[#allocation10 + $0x110] sm:$0xff] %v2843_v20  ;;  %2908 = vst [vmem:[#allocation10 + $0x118] sm:$0xff] %v2844_v6 }
 0x478   :  { %v2711_v14 = vpop.xlane.xlu0 %2710 }
 0x479   :  { %v2765_v25 = vmax.f32 %v2711_v14, 1e-24 }
 0x47a   :  { %v2714_v50 = vpop.xlane.xlu1 %2713 }
 0x47b   :  { %v3530_v39 = vpop.eup %3529  ;;  %3533 = vrsqrt.f32 %v2765_v25  ;;  %v2766_v15 = vmax.f32 %v2714_v50, 1e-24 }
 0x47c   :  { %v2845_v34 = vmul.f32 %v3530_v39, %v5432_v57  ;;  %v2846_v55 = vmul.f32 %v3530_v39, %v5435_v45 }
 0x47d   :  { %v3532_v13 = vpop.eup %3531  ;;  %3535 = vrsqrt.f32 %v2766_v15  ;;  %v5777_v15 = vld [vmem:[#allocation30_spill] sm:$0xff] }
 0x47e   :  { %2909 = vst [vmem:[#allocation10 + $0x120] sm:$0xff] %v2845_v34  ;;  %2910 = vst [vmem:[#allocation10 + $0x128] sm:$0xff] %v2846_v55  ;;  %v2847_v24 = vmul.f32 %v3532_v13, %v5440_v0  ;;  %v2848_v62 = vmul.f32 %v3532_v13, %v5445_v7  ;;  %v5776_v55 = vld [vmem:[#allocation29_spill] sm:$0xff] }
 0x480   :  { %2911 = vst [vmem:[#allocation10 + $0x130] sm:$0xff] %v2847_v24  ;;  %2912 = vst [vmem:[#allocation10 + $0x138] sm:$0xff] %v2848_v62  ;;  %v5778_v24 = vld [vmem:[#allocation33_spill] sm:$0xff] }
 0x483   :  { %v2717_v16 = vpop.xlane.xlu0 %2716 }
 0x484   :  { %v2767_v36 = vmax.f32 %v2717_v16, 1e-24 }
 0x485   :  { %v2720_v22 = vpop.xlane.xlu1 %2719  ;;  %v3534_v38 = vpop.eup %3533 }
 0x486   :  { %3537 = vrsqrt.f32 %v2767_v36  ;;  %v2768_v57 = vmax.f32 %v2720_v22, 1e-24  ;;  %v2849_v45 = vmul.f32 %v3534_v38, %v5452_v56  ;;  %v2850_v63 = vmul.f32 %v3534_v38, %v5455_v8 }
 0x487   :  { %v3536_v61 = vpop.eup %3535 }
 0x488   :  { %3539 = vrsqrt.f32 %v2768_v57  ;;  %2913 = vst [vmem:[#allocation10 + $0x140] sm:$0xff] %v2849_v45  ;;  %2914 = vst [vmem:[#allocation10 + $0x148] sm:$0xff] %v2850_v63  ;;  %v2851_v0 = vmul.f32 %v3536_v61, %v5460_v12  ;;  %v2852_v7 = vmul.f32 %v3536_v61, %v5465_v46 }
 0x48a   :  { %2915 = vst [vmem:[#allocation10 + $0x150] sm:$0xff] %v2851_v0  ;;  %2916 = vst [vmem:[#allocation10 + $0x158] sm:$0xff] %v2852_v7 }
 0x48b   :  { %v2723_v59 = vpop.xlane.xlu0 %2722 }
 0x48c   :  { %v2769_v10 = vmax.f32 %v2723_v59, 1e-24 }
 0x48d   :  { %v2726_v42 = vpop.xlane.xlu1 %2725 }
 0x48e   :  { %3541 = vrsqrt.f32 %v2769_v10  ;;  %v2770_v19 = vmax.f32 %v2726_v42, 1e-24 }
 0x490   :  { %v3538_v9 = vpop.eup %3537  ;;  %3543 = vrsqrt.f32 %v2770_v19 }
 0x491   :  { %v2853_v56 = vmul.f32 %v3538_v9, %v5472_v41  ;;  %v2854_v8 = vmul.f32 %v3538_v9, %v5475_v43 }
 0x492   :  { %v3540_v47 = vpop.eup %3539 }
 0x493   :  { %2917 = vst [vmem:[#allocation10 + $0x160] sm:$0xff] %v2853_v56  ;;  %2918 = vst [vmem:[#allocation10 + $0x168] sm:$0xff] %v2854_v8  ;;  %v2855_v12 = vmul.f32 %v3540_v47, %v5771_v58  ;;  %v2856_v46 = vmul.f32 %v3540_v47, %v5772_v35  ;;  %v2729_v49 = vpop.xlane.xlu0 %2728 }
 0x494   :  { %v2771_v32 = vmax.f32 %v2729_v49, 1e-24 }
 0x495   :  { %2919 = vst [vmem:[#allocation10 + $0x170] sm:$0xff] %v2855_v12  ;;  %2920 = vst [vmem:[#allocation10 + $0x178] sm:$0xff] %v2856_v46  ;;  %v2732_v51 = vpop.xlane.xlu1 %2731 }
 0x496   :  { %3545 = vrsqrt.f32 %v2771_v32  ;;  %v2772_v3 = vmax.f32 %v2732_v51, 1e-24 }
 0x498   :  { %v3542_v52 = vpop.eup %3541  ;;  %3547 = vrsqrt.f32 %v2772_v3 }
 0x499   :  { %v2857_v41 = vmul.f32 %v3542_v52, %v5773_v29  ;;  %v2858_v43 = vmul.f32 %v3542_v52, %v5774_v30 }
 0x49a   :  { %v3544_v21 = vpop.eup %3543 }
 0x49b   :  { %2921 = vst [vmem:[#allocation10 + $0x180] sm:$0xff] %v2857_v41  ;;  %2922 = vst [vmem:[#allocation10 + $0x188] sm:$0xff] %v2858_v43  ;;  %v2859_v27 = vmul.f32 %v3544_v21, %v5775_v33  ;;  %v2860_v2 = vmul.f32 %v3544_v21, %v5505_v31  ;;  %v2735_v4 = vpop.xlane.xlu0 %2734 }
 0x49c   :  { %v2773_v48 = vmax.f32 %v2735_v4, 1e-24 }
 0x49d   :  { %2923 = vst [vmem:[#allocation10 + $0x190] sm:$0xff] %v2859_v27  ;;  %2924 = vst [vmem:[#allocation10 + $0x198] sm:$0xff] %v2860_v2  ;;  %v2738_v26 = vpop.xlane.xlu1 %2737 }
 0x49e   :  { %3549 = vrsqrt.f32 %v2773_v48  ;;  %v2774_v40 = vmax.f32 %v2738_v26, 1e-24 }
 0x4a0   :  { %v3546_v44 = vpop.eup %3545  ;;  %3551 = vrsqrt.f32 %v2774_v40 }
 0x4a1   :  { %v2861_v54 = vmul.f32 %v3546_v44, %v5514_v5  ;;  %v2862_v53 = vmul.f32 %v3546_v44, %v5519_v60 }
 0x4a2   :  { %v3548_v20 = vpop.eup %3547 }
 0x4a3   :  { %2925 = vst [vmem:[#allocation10 + $0x1a0] sm:$0xff] %v2861_v54  ;;  %2926 = vst [vmem:[#allocation10 + $0x1a8] sm:$0xff] %v2862_v53  ;;  %v2863_v6 = vmul.f32 %v3548_v20, %v5524_v11  ;;  %v2864_v31 = vmul.f32 %v3548_v20, %v5529_v37  ;;  %v2741_v14 = vpop.xlane.xlu0 %2740 }
 0x4a4   :  { %v2775_v25 = vmax.f32 %v2741_v14, 1e-24 }
 0x4a5   :  { %2927 = vst [vmem:[#allocation10 + $0x1b0] sm:$0xff] %v2863_v6  ;;  %2928 = vst [vmem:[#allocation10 + $0x1b8] sm:$0xff] %v2864_v31  ;;  %v2744_v39 = vpop.xlane.xlu1 %2743 }
 0x4a6   :  { %3553 = vrsqrt.f32 %v2775_v25  ;;  %v2776_v50 = vmax.f32 %v2744_v39, 1e-24 }
 0x4a8   :  { %v3550_v34 = vpop.eup %3549  ;;  %3555 = vrsqrt.f32 %v2776_v50 }
 0x4a9   :  { %v2865_v5 = vmul.f32 %v3550_v34, %v5776_v55  ;;  %v2866_v60 = vmul.f32 %v3550_v34, %v5777_v15 }
 0x4aa   :  { %v3552_v13 = vpop.eup %3551 }
 0x4ab   :  { %2929 = vst [vmem:[#allocation10 + $0x1c0] sm:$0xff] %v2865_v5  ;;  %2930 = vst [vmem:[#allocation10 + $0x1c8] sm:$0xff] %v2866_v60  ;;  %v2867_v11 = vmul.f32 %v3552_v13, %v5778_v24  ;;  %v2868_v37 = vmul.f32 %v3552_v13, %v5549_v18 }
 0x4ad   :  { %2931 = vst [vmem:[#allocation10 + $0x1d0] sm:$0xff] %v2867_v11  ;;  %2932 = vst [vmem:[#allocation10 + $0x1d8] sm:$0xff] %v2868_v37 }
 0x4b0   :  { %v3554_v62 = vpop.eup %3553 }
 0x4b1   :  { %v2869_v16 = vmul.f32 %v3554_v62, %v5558_v1  ;;  %v2870_v36 = vmul.f32 %v3554_v62, %v5563_v28 }
 0x4b2   :  { %v3556_v22 = vpop.eup %3555 }
 0x4b3   :  { %2933 = vst [vmem:[#allocation10 + $0x1e0] sm:$0xff] %v2869_v16  ;;  %2934 = vst [vmem:[#allocation10 + $0x1e8] sm:$0xff] %v2870_v36  ;;  %v2871_v38 = vmul.f32 %v3556_v22, %v5568_v23  ;;  %v2872_v57 = vmul.f32 %v3556_v22, %v5573_v17 }
 0x4b5   :  { %2935 = vst [vmem:[#allocation10 + $0x1f0] sm:$0xff] %v2871_v38  ;;  %2936 = vst [vmem:[#allocation10 + $0x1f8] sm:$0xff] %v2872_v57 }
 0x4b6   :  { %3656 = shalt.err (!%p3653_p8)
}
 0x4b7   :  { %s3657_s14 = scalar_lea.hbm %s5657_s7, 8192 }
 0x4b8   :  { %p3658_p9 = scmp.ne.s32.totalorder %s5657_s7, %s3657_s14  ;;  %p3661_p10 = scmp.lt.u32.totalorder %s3657_s14, %s5657_s7 }
 0x4ba   :  { %p3663_p11 = pnand %p3661_p10, %p3658_p9 }
 0x4bc   :  { %3666 = shalt.err (!%p3663_p11)
}
 0x4bd   :  { %2948 = dma.vmem_to_hbm [thread:$0]  %s2943_s8, 8192, %s5657_s7, [#allocation4], %s3679_s1, %s3679_s1, %s3680_s25  }
 0x4be   :  { %3673 = dma.done.wait [#allocation4], 8192  }
 0x4bf   :  { %3674 = vsyncadd [#allocation4], 4294959104 }
 0x4c0   :  { %2952 = vsyncpa [#allocation3], 1 }
 0x4c1   :  { %2953 = vsyncpa [#allocation6], 1 }
 0x4c2   :  { %2954 = vsyncpa [#allocation9], 1 }
 0x4c3   :  { %2955 = vsyncpa [#allocation4], 1 }

</bundles_post_ra>
